<compile_context>
chip_gen: v7x
topology: tpu7x:2x2x1
jax: 0.10.0
libtpu: 0.0.40
codegen_flags: <defaults>
</compile_context>

<pallas_src>
import jax
import jax.numpy as jnp
import numpy as np
from jax import lax
from jax.experimental import pallas as pl
from jax.experimental.pallas import tpu as pltpu

_EPS = 1e-5


def _softplus(x):
    # PyTorch Softplus(beta=1, threshold=20)
    return jnp.where(x > 20.0, x, jnp.log1p(jnp.exp(jnp.minimum(x, 20.0))))


def _silu(x):
    # sigmoid(x) = 0.5 * (tanh(0.5 x) + 1): one EUP transcendental per element.
    return x * (0.5 * jnp.tanh(0.5 * x) + 0.5)


def _bn_train(x, gamma, beta):
    """BatchNorm1d, training mode (biased batch variance), two-pass stats.

    Two-pass (x - mean)^2 form matches the reference and avoids the
    cancellation issues of the s2/n - mean^2 form; gamma/beta are folded into
    a single per-lane scale plus shift.
    """
    inv_n = 1.0 / x.shape[0]
    mean = jnp.sum(x, axis=0, keepdims=True) * inv_n
    xc = x - mean
    var = jnp.sum(xc * xc, axis=0, keepdims=True) * inv_n
    scale = gamma * lax.rsqrt(var + _EPS)
    return xc * scale + beta


def convfunc_cgcnn_edgemlp_kernel(
    src_ref, dst_ref,              # VMEM int32 [E, 1]
    node_ref,                      # VMEM f32 [N, F]
    edge_ref,                      # VMEM f32 [E, Fe]
    w_em_ref,                      # VMEM f32 [Fe, F]      edgemlp weight
    w_br_ref,                      # VMEM f32 [3, F, 2F]   fused mlp|screen weight (row-split)
    p_ref,                         # VMEM f32 [8, 2F]      packed biases / BN affine params
    out_ref,                       # VMEM f32 [N, F]
):
    N, F = node_ref.shape
    E = edge_ref.shape[0]

    p = p_ref[...]                                           # [8, 2F]
    b_br, g_br, be_br = p[0:1, :], p[1:2, :], p[2:3, :]      # fused branch params
    b_em, g_em, be_em = p[3:4, 0:F], p[4:5, 0:F], p[5:6, 0:F]
    g_nd, be_nd = p[6:7, 0:F], p[7:8, 0:F]

    # ---- 1) one-hot incidence masks (VPU compares, no serial loops) --------
    node_ids = lax.broadcasted_iota(jnp.int32, (E, N), 1)    # [E, N]
    g_src = (node_ids == src_ref[...]).astype(jnp.float32)   # [E, N]
    g_dst = (node_ids == dst_ref[...]).astype(jnp.float32)   # [E, N]

    # ---- 2) edgemlp: Linear -> BN -> SiLU (dropout p=0 is identity) --------
    z_em = jnp.dot(edge_ref[...], w_em_ref[...],
                   preferred_element_type=jnp.float32) + b_em
    hm = _silu(_bn_train(z_em, g_em, be_em))                  # [E, F]

    # ---- 3) fused mlp|screen linear on concat(h_src, h_dst, hm) ------------
    # onehot_src @ (node @ W0) == node[src] @ W0, so precompute the per-node
    # projections once ([N, 2F]) and contract the one-hot masks on the MXU.
    # The single [E, 2F] result holds the mlp branch in lanes [0, F) and the
    # screen branch in [F, 2F).
    a_src = jnp.dot(node_ref[...], w_br_ref[0], preferred_element_type=jnp.float32)
    a_dst = jnp.dot(node_ref[...], w_br_ref[1], preferred_element_type=jnp.float32)
    z = (jnp.dot(g_src, a_src, preferred_element_type=jnp.float32)
         + jnp.dot(g_dst, a_dst, preferred_element_type=jnp.float32)
         + jnp.dot(hm, w_br_ref[2], preferred_element_type=jnp.float32)
         + b_br)                                              # [E, 2F]
    zn = _bn_train(z, g_br, be_br)     # per-lane BN == two independent branch BNs
    h_upd = _silu(zn[:, 0:F]) * _softplus(zn[:, F:2 * F])     # [E, F]

    # ---- 4) scatter-sum h_upd onto destination nodes (MXU segment-sum) -----
    # agg[n, f] = sum_e g_dst[e, n] * h_upd[e, f]
    agg = lax.dot_general(g_dst, h_upd,
                          dimension_numbers=(((0,), (0,)), ((), ())),
                          preferred_element_type=jnp.float32)  # [N, F]

    # ---- 5) node BN + residual + Softplus -----------------------------------
    out_ref[...] = _softplus(_bn_train(agg, g_nd, be_nd) + node_ref[...])


def _vmem_budget_bytes(N, E, F, Fe):
    """Rough resident-VMEM estimate with headroom; safe cap for v5e/v6e/v7x."""
    f32 = 4
    resident = (
        2 * N * F * f32          # node feats + output
        + E * Fe * f32           # edge feats
        + Fe * F * f32           # w_em
        + 3 * F * 2 * F * f32    # w_br
        + 8 * 2 * F * f32        # packed params
        + 2 * E * f32            # src / dst
        + 2 * E * N * f32        # one-hot masks
        + 3 * E * F * f32        # hm, h_upd, edge temps
        + 2 * E * 2 * F * f32    # z, zn
        + 2 * N * 2 * F * f32    # a_src, a_dst
        + 2 * N * F * f32        # agg, BN temp
    )
    # 2x headroom for compiler temporaries; clamp to <= 60 MiB so the limit is
    # valid on v7x (64 MiB physical VMEM) as well as v5e/v6e (128 MiB).
    return int(min(max(2 * resident, 16 * 1024 * 1024), 60 * 1024 * 1024))


def conv_func_cgcnn_edgemlp(node_feats, edge_feats, src, dst, params):
    N, F = node_feats.shape
    E, Fe = edge_feats.shape
    F2 = 2 * F

    # Fuse the mlp / screen linears into one [3F, 2F] weight and pre-split its
    # rows (src / dst / hm blocks) into a stacked [3, F, 2F] array.
    w_br = jnp.concatenate([params["w_mlp"], params["w_scr"]], axis=1)  # [3F, 2F]
    w_br = w_br.reshape(3, F, F2)

    # Pack all per-feature vectors into a single [8, 2F] array (one DMA).
    def pad_to_2f(v):
        return jnp.concatenate([v, jnp.zeros((1, F), v.dtype)], axis=1)

    p = jnp.concatenate(
        [
            jnp.concatenate([params["b_mlp"], params["b_scr"]], axis=1),
            jnp.concatenate([params["g_mlp"], params["g_scr"]], axis=1),
            jnp.concatenate([params["be_mlp"], params["be_scr"]], axis=1),
            pad_to_2f(params["b_em"]),
            pad_to_2f(params["g_em"]),
            pad_to_2f(params["be_em"]),
            pad_to_2f(params["g_node"]),
            pad_to_2f(params["be_node"]),
        ],
        axis=0,
    )                                                                   # [8, 2F]

    vmem = pl.BlockSpec(memory_space=pltpu.MemorySpace.VMEM)

    return pl.pallas_call(
        convfunc_cgcnn_edgemlp_kernel,
        out_shape=jax.ShapeDtypeStruct((N, F), jnp.float32),
        in_specs=[vmem, vmem, vmem, vmem, vmem, vmem, vmem],
        out_specs=vmem,
        compiler_params=pltpu.CompilerParams(
            vmem_limit_bytes=_vmem_budget_bytes(N, E, F, Fe),
        ),
    )(
        src.astype(jnp.int32).reshape(E, 1),
        dst.astype(jnp.int32).reshape(E, 1),
        node_feats, edge_feats, params["w_em"], w_br, p,
    )


def conv_func_cgcnn_edgemlp_reference(node_feats, edge_feats, src, dst, params):
    # Plain-JAX mirror of the PyTorch forward (training-mode BatchNorm).
    def bn(x, g, b):
        mean = jnp.mean(x, axis=0, keepdims=True)
        var = jnp.mean((x - mean) ** 2, axis=0, keepdims=True)
        return (x - mean) / jnp.sqrt(var + _EPS) * g + b

    def silu(x):
        return x * jax.nn.sigmoid(x)

    hm = silu(bn(edge_feats @ params["w_em"] + params["b_em"],
                 params["g_em"], params["be_em"]))
    hc = jnp.concatenate([node_feats[src], node_feats[dst], hm], axis=1)
    h_mlp = silu(bn(hc @ params["w_mlp"] + params["b_mlp"],
                    params["g_mlp"], params["be_mlp"]))
    h_scr = _softplus(bn(hc @ params["w_scr"] + params["b_scr"],
                         params["g_scr"], params["be_scr"]))
    h_upd = h_mlp * h_scr
    agg = jnp.zeros_like(node_feats).at[dst].add(h_upd)
    return _softplus(bn(agg, params["g_node"], params["be_node"]) + node_feats)


if __name__ == "__main__":
    # Lane-dense problem: F_node = 128 and N = 128 keep every activation, the
    # one-hot masks, the matmul outputs and the output store full 128-/256-lane
    # tiles (no masked vst.msk).
    N, E = 128, 512
    F_node, F_edge = 128, 32
    F_in = 3 * F_node

    key = jax.random.PRNGKey(0)
    keys = jax.random.split(key, 16)

    node_feats = jax.random.normal(keys[0], (N, F_node), dtype=jnp.float32)
    edge_feats = jax.random.normal(keys[1], (E, F_edge), dtype=jnp.float32)
    src = jax.random.randint(keys[2], (E,), 0, N, dtype=jnp.int32)
    dst = jax.random.randint(keys[3], (E,), 0, N, dtype=jnp.int32)

    def vec(k, scale=0.1):
        return scale * jax.random.normal(k, (1, F_node), dtype=jnp.float32)

    params = {
        # edgemlp: Linear(F_edge -> F_node) + BN affine   (SiLU)
        "w_em": 0.1 * jax.random.normal(keys[4], (F_edge, F_node), dtype=jnp.float32),
        "b_em": vec(keys[5]),
        "g_em": 1.0 + vec(keys[6]),
        "be_em": vec(keys[7]),
        # mlp branch: Linear(3F -> F) + BN affine         (SiLU)
        "w_mlp": 0.1 * jax.random.normal(keys[8], (F_in, F_node), dtype=jnp.float32),
        "b_mlp": vec(keys[9]),
        "g_mlp": 1.0 + vec(keys[10]),
        "be_mlp": vec(keys[11]),
        # screen branch: Linear(3F -> F) + BN affine      (Softplus)
        "w_scr": 0.1 * jax.random.normal(keys[12], (F_in, F_node), dtype=jnp.float32),
        "b_scr": vec(keys[13]),
        "g_scr": 1.0 + vec(keys[14]),
        "be_scr": vec(keys[15]),
        # node BatchNorm affine
        "g_node": jnp.full((1, F_node), 1.05, dtype=jnp.float32),
        "be_node": jnp.full((1, F_node), -0.02, dtype=jnp.float32),
    }

    out = conv_func_cgcnn_edgemlp(node_feats, edge_feats, src, dst, params)
    out = jax.block_until_ready(out)

    ref = conv_func_cgcnn_edgemlp_reference(node_feats, edge_feats, src, dst, params)
    np.testing.assert_allclose(np.asarray(out), np.asarray(ref), rtol=3e-4, atol=3e-4)

    print("KERNEL_OK")
</pallas_src>

<mosaic_0001>
module attributes {stable_mosaic.version = 11 : i64} {
  func.func @convfunc_cgcnn_edgemlp_kernel(%arg0: memref<512x1xi32, #tpu.memory_space<vmem>>, %arg1: memref<512x1xi32, #tpu.memory_space<vmem>>, %arg2: memref<128x128xf32, #tpu.memory_space<vmem>>, %arg3: memref<512x32xf32, #tpu.memory_space<vmem>>, %arg4: memref<32x128xf32, #tpu.memory_space<vmem>>, %arg5: memref<3x128x256xf32, #tpu.memory_space<vmem>>, %arg6: memref<8x256xf32, #tpu.memory_space<vmem>>, %arg7: memref<128x128xf32, #tpu.memory_space<vmem>>) attributes {dimension_semantics = [], scalar_prefetch = 0 : i64, scratch_operands = 0 : i64, tpu.core_type = #tpu.core_type<tc>} {
    %c0 = arith.constant 0 : index
    %c0_0 = arith.constant 0 : index
    %0 = vector.load %arg6[%c0, %c0_0] : memref<8x256xf32, #tpu.memory_space<vmem>>, vector<8x256xf32>
    %1 = vector.extract_strided_slice %0 {offsets = [0, 0], sizes = [1, 256], strides = [1, 1]} : vector<8x256xf32> to vector<1x256xf32>
    %2 = vector.extract_strided_slice %0 {offsets = [1, 0], sizes = [1, 256], strides = [1, 1]} : vector<8x256xf32> to vector<1x256xf32>
    %3 = vector.extract_strided_slice %0 {offsets = [2, 0], sizes = [1, 256], strides = [1, 1]} : vector<8x256xf32> to vector<1x256xf32>
    %4 = vector.extract_strided_slice %0 {offsets = [3, 0], sizes = [1, 128], strides = [1, 1]} : vector<8x256xf32> to vector<1x128xf32>
    %5 = vector.extract_strided_slice %0 {offsets = [4, 0], sizes = [1, 128], strides = [1, 1]} : vector<8x256xf32> to vector<1x128xf32>
    %6 = vector.extract_strided_slice %0 {offsets = [5, 0], sizes = [1, 128], strides = [1, 1]} : vector<8x256xf32> to vector<1x128xf32>
    %7 = vector.extract_strided_slice %0 {offsets = [6, 0], sizes = [1, 128], strides = [1, 1]} : vector<8x256xf32> to vector<1x128xf32>
    %8 = vector.extract_strided_slice %0 {offsets = [7, 0], sizes = [1, 128], strides = [1, 1]} : vector<8x256xf32> to vector<1x128xf32>
    %9 = tpu.iota {dimensions = array<i32: 1>} : vector<512x128xi32>
    %c0_1 = arith.constant 0 : index
    %c0_2 = arith.constant 0 : index
    %10 = vector.load %arg0[%c0_1, %c0_2] : memref<512x1xi32, #tpu.memory_space<vmem>>, vector<512x1xi32>
    %11 = vector.broadcast %10 : vector<512x1xi32> to vector<512x128xi32>
    %12 = arith.cmpi eq, %9, %11 : vector<512x128xi32>
    %13 = arith.extui %12 : vector<512x128xi1> to vector<512x128xi32>
    %14 = arith.sitofp %13 : vector<512x128xi32> to vector<512x128xf32>
    %c0_3 = arith.constant 0 : index
    %c0_4 = arith.constant 0 : index
    %15 = vector.load %arg1[%c0_3, %c0_4] : memref<512x1xi32, #tpu.memory_space<vmem>>, vector<512x1xi32>
    %16 = vector.broadcast %15 : vector<512x1xi32> to vector<512x128xi32>
    %17 = arith.cmpi eq, %9, %16 : vector<512x128xi32>
    %18 = arith.extui %17 : vector<512x128xi1> to vector<512x128xi32>
    %19 = arith.sitofp %18 : vector<512x128xi32> to vector<512x128xf32>
    %c0_5 = arith.constant 0 : index
    %c0_6 = arith.constant 0 : index
    %20 = vector.load %arg3[%c0_5, %c0_6] : memref<512x32xf32, #tpu.memory_space<vmem>>, vector<512x32xf32>
    %c0_7 = arith.constant 0 : index
    %c0_8 = arith.constant 0 : index
    %21 = vector.load %arg4[%c0_7, %c0_8] : memref<32x128xf32, #tpu.memory_space<vmem>>, vector<32x128xf32>
    %cst = arith.constant dense<0.000000e+00> : vector<512x128xf32>
    %22 = tpu.matmul %20, %21, %cst {dimension_numbers = #tpu.dot_dimension_numbers<[1], [0], [0], [1], [0, 0, 1, 1], [], []>} : vector<512x32xf32>, vector<32x128xf32>, vector<512x128xf32> -> vector<512x128xf32>
    %23 = vector.broadcast %4 : vector<1x128xf32> to vector<512x128xf32>
    %24 = arith.addf %22, %23 : vector<512x128xf32>
    %cst_9 = arith.constant dense<0.000000e+00> : vector<128xf32>
    %25 = vector.multi_reduction <add>, %24, %cst_9 [0] : vector<512x128xf32> to vector<128xf32>
    %26 = vector.shape_cast %25 : vector<128xf32> to vector<1x128xf32>
    %cst_10 = arith.constant 0.001953125 : f32
    %27 = vector.broadcast %cst_10 : f32 to vector<1x128xf32>
    %28 = arith.mulf %26, %27 : vector<1x128xf32>
    %29 = vector.broadcast %28 : vector<1x128xf32> to vector<512x128xf32>
    %30 = arith.subf %24, %29 : vector<512x128xf32>
    %31 = arith.mulf %30, %30 : vector<512x128xf32>
    %cst_11 = arith.constant dense<0.000000e+00> : vector<128xf32>
    %32 = vector.multi_reduction <add>, %31, %cst_11 [0] : vector<512x128xf32> to vector<128xf32>
    %33 = vector.shape_cast %32 : vector<128xf32> to vector<1x128xf32>
    %cst_12 = arith.constant 0.001953125 : f32
    %34 = vector.broadcast %cst_12 : f32 to vector<1x128xf32>
    %35 = arith.mulf %33, %34 : vector<1x128xf32>
    %cst_13 = arith.constant 9.99999974E-6 : f32
    %36 = vector.broadcast %cst_13 : f32 to vector<1x128xf32>
    %37 = arith.addf %35, %36 : vector<1x128xf32>
    %38 = math.rsqrt %37 : vector<1x128xf32>
    %39 = arith.mulf %5, %38 : vector<1x128xf32>
    %40 = vector.broadcast %39 : vector<1x128xf32> to vector<512x128xf32>
    %41 = arith.mulf %30, %40 : vector<512x128xf32>
    %42 = vector.broadcast %6 : vector<1x128xf32> to vector<512x128xf32>
    %43 = arith.addf %41, %42 : vector<512x128xf32>
    %cst_14 = arith.constant 5.000000e-01 : f32
    %44 = vector.broadcast %cst_14 : f32 to vector<512x128xf32>
    %45 = arith.mulf %44, %43 : vector<512x128xf32>
    %46 = math.tanh %45 : vector<512x128xf32>
    %cst_15 = arith.constant 5.000000e-01 : f32
    %47 = vector.broadcast %cst_15 : f32 to vector<512x128xf32>
    %48 = arith.mulf %47, %46 : vector<512x128xf32>
    %cst_16 = arith.constant 5.000000e-01 : f32
    %49 = vector.broadcast %cst_16 : f32 to vector<512x128xf32>
    %50 = arith.addf %48, %49 : vector<512x128xf32>
    %51 = arith.mulf %43, %50 : vector<512x128xf32>
    %c0_17 = arith.constant 0 : index
    %c0_18 = arith.constant 0 : index
    %52 = vector.load %arg2[%c0_17, %c0_18] : memref<128x128xf32, #tpu.memory_space<vmem>>, vector<128x128xf32>
    %c0_19 = arith.constant 0 : index
    %c0_20 = arith.constant 0 : index
    %c0_21 = arith.constant 0 : index
    %53 = vector.load %arg5[%c0_19, %c0_20, %c0_21] : memref<3x128x256xf32, #tpu.memory_space<vmem>>, vector<1x128x256xf32>
    %54 = vector.shape_cast %53 : vector<1x128x256xf32> to vector<128x256xf32>
    %cst_22 = arith.constant dense<0.000000e+00> : vector<128x256xf32>
    %55 = tpu.matmul %52, %54, %cst_22 {dimension_numbers = #tpu.dot_dimension_numbers<[1], [0], [0], [1], [0, 0, 1, 1], [], []>} : vector<128x128xf32>, vector<128x256xf32>, vector<128x256xf32> -> vector<128x256xf32>
    %c0_23 = arith.constant 0 : index
    %c0_24 = arith.constant 0 : index
    %56 = vector.load %arg2[%c0_23, %c0_24] : memref<128x128xf32, #tpu.memory_space<vmem>>, vector<128x128xf32>
    %c1 = arith.constant 1 : index
    %c0_25 = arith.constant 0 : index
    %c0_26 = arith.constant 0 : index
    %57 = vector.load %arg5[%c1, %c0_25, %c0_26] : memref<3x128x256xf32, #tpu.memory_space<vmem>>, vector<1x128x256xf32>
    %58 = vector.shape_cast %57 : vector<1x128x256xf32> to vector<128x256xf32>
    %cst_27 = arith.constant dense<0.000000e+00> : vector<128x256xf32>
    %59 = tpu.matmul %56, %58, %cst_27 {dimension_numbers = #tpu.dot_dimension_numbers<[1], [0], [0], [1], [0, 0, 1, 1], [], []>} : vector<128x128xf32>, vector<128x256xf32>, vector<128x256xf32> -> vector<128x256xf32>
    %cst_28 = arith.constant dense<0.000000e+00> : vector<512x256xf32>
    %60 = tpu.matmul %14, %55, %cst_28 {dimension_numbers = #tpu.dot_dimension_numbers<[1], [0], [0], [1], [0, 0, 1, 1], [], []>} : vector<512x128xf32>, vector<128x256xf32>, vector<512x256xf32> -> vector<512x256xf32>
    %cst_29 = arith.constant dense<0.000000e+00> : vector<512x256xf32>
    %61 = tpu.matmul %19, %59, %cst_29 {dimension_numbers = #tpu.dot_dimension_numbers<[1], [0], [0], [1], [0, 0, 1, 1], [], []>} : vector<512x128xf32>, vector<128x256xf32>, vector<512x256xf32> -> vector<512x256xf32>
    %62 = arith.addf %60, %61 : vector<512x256xf32>
    %c2 = arith.constant 2 : index
    %c0_30 = arith.constant 0 : index
    %c0_31 = arith.constant 0 : index
    %63 = vector.load %arg5[%c2, %c0_30, %c0_31] : memref<3x128x256xf32, #tpu.memory_space<vmem>>, vector<1x128x256xf32>
    %64 = vector.shape_cast %63 : vector<1x128x256xf32> to vector<128x256xf32>
    %cst_32 = arith.constant dense<0.000000e+00> : vector<512x256xf32>
    %65 = tpu.matmul %51, %64, %cst_32 {dimension_numbers = #tpu.dot_dimension_numbers<[1], [0], [0], [1], [0, 0, 1, 1], [], []>} : vector<512x128xf32>, vector<128x256xf32>, vector<512x256xf32> -> vector<512x256xf32>
    %66 = arith.addf %62, %65 : vector<512x256xf32>
    %67 = vector.broadcast %1 : vector<1x256xf32> to vector<512x256xf32>
    %68 = arith.addf %66, %67 : vector<512x256xf32>
    %cst_33 = arith.constant dense<0.000000e+00> : vector<256xf32>
    %69 = vector.multi_reduction <add>, %68, %cst_33 [0] : vector<512x256xf32> to vector<256xf32>
    %70 = vector.shape_cast %69 : vector<256xf32> to vector<1x256xf32>
    %cst_34 = arith.constant 0.001953125 : f32
    %71 = vector.broadcast %cst_34 : f32 to vector<1x256xf32>
    %72 = arith.mulf %70, %71 : vector<1x256xf32>
    %73 = vector.broadcast %72 : vector<1x256xf32> to vector<512x256xf32>
    %74 = arith.subf %68, %73 : vector<512x256xf32>
    %75 = arith.mulf %74, %74 : vector<512x256xf32>
    %cst_35 = arith.constant dense<0.000000e+00> : vector<256xf32>
    %76 = vector.multi_reduction <add>, %75, %cst_35 [0] : vector<512x256xf32> to vector<256xf32>
    %77 = vector.shape_cast %76 : vector<256xf32> to vector<1x256xf32>
    %cst_36 = arith.constant 0.001953125 : f32
    %78 = vector.broadcast %cst_36 : f32 to vector<1x256xf32>
    %79 = arith.mulf %77, %78 : vector<1x256xf32>
    %cst_37 = arith.constant 9.99999974E-6 : f32
    %80 = vector.broadcast %cst_37 : f32 to vector<1x256xf32>
    %81 = arith.addf %79, %80 : vector<1x256xf32>
    %82 = math.rsqrt %81 : vector<1x256xf32>
    %83 = arith.mulf %2, %82 : vector<1x256xf32>
    %84 = vector.broadcast %83 : vector<1x256xf32> to vector<512x256xf32>
    %85 = arith.mulf %74, %84 : vector<512x256xf32>
    %86 = vector.broadcast %3 : vector<1x256xf32> to vector<512x256xf32>
    %87 = arith.addf %85, %86 : vector<512x256xf32>
    %88 = vector.extract_strided_slice %87 {offsets = [0, 0], sizes = [512, 128], strides = [1, 1]} : vector<512x256xf32> to vector<512x128xf32>
    %cst_38 = arith.constant 5.000000e-01 : f32
    %89 = vector.broadcast %cst_38 : f32 to vector<512x128xf32>
    %90 = arith.mulf %89, %88 : vector<512x128xf32>
    %91 = math.tanh %90 : vector<512x128xf32>
    %cst_39 = arith.constant 5.000000e-01 : f32
    %92 = vector.broadcast %cst_39 : f32 to vector<512x128xf32>
    %93 = arith.mulf %92, %91 : vector<512x128xf32>
    %cst_40 = arith.constant 5.000000e-01 : f32
    %94 = vector.broadcast %cst_40 : f32 to vector<512x128xf32>
    %95 = arith.addf %93, %94 : vector<512x128xf32>
    %96 = arith.mulf %88, %95 : vector<512x128xf32>
    %97 = vector.extract_strided_slice %87 {offsets = [0, 128], sizes = [512, 128], strides = [1, 1]} : vector<512x256xf32> to vector<512x128xf32>
    %cst_41 = arith.constant 2.000000e+01 : f32
    %98 = vector.broadcast %cst_41 : f32 to vector<512x128xf32>
    %99 = arith.cmpf ogt, %97, %98 : vector<512x128xf32>
    %cst_42 = arith.constant 2.000000e+01 : f32
    %100 = vector.broadcast %cst_42 : f32 to vector<512x128xf32>
    %101 = arith.minimumf %97, %100 : vector<512x128xf32>
    %102 = math.exp %101 : vector<512x128xf32>
    %103 = math.log1p %102 : vector<512x128xf32>
    %104 = arith.select %99, %97, %103 : vector<512x128xi1>, vector<512x128xf32>
    %105 = arith.mulf %96, %104 : vector<512x128xf32>
    %cst_43 = arith.constant dense<0.000000e+00> : vector<128x128xf32>
    %106 = tpu.matmul %19, %105, %cst_43 {dimension_numbers = #tpu.dot_dimension_numbers<[0], [0], [1], [1], [0, 1, 1, 1], [], []>} : vector<512x128xf32>, vector<512x128xf32>, vector<128x128xf32> -> vector<128x128xf32>
    %cst_44 = arith.constant dense<0.000000e+00> : vector<128xf32>
    %107 = vector.multi_reduction <add>, %106, %cst_44 [0] : vector<128x128xf32> to vector<128xf32>
    %108 = vector.shape_cast %107 : vector<128xf32> to vector<1x128xf32>
    %cst_45 = arith.constant 7.812500e-03 : f32
    %109 = vector.broadcast %cst_45 : f32 to vector<1x128xf32>
    %110 = arith.mulf %108, %109 : vector<1x128xf32>
    %111 = vector.broadcast %110 : vector<1x128xf32> to vector<128x128xf32>
    %112 = arith.subf %106, %111 : vector<128x128xf32>
    %113 = arith.mulf %112, %112 : vector<128x128xf32>
    %cst_46 = arith.constant dense<0.000000e+00> : vector<128xf32>
    %114 = vector.multi_reduction <add>, %113, %cst_46 [0] : vector<128x128xf32> to vector<128xf32>
    %115 = vector.shape_cast %114 : vector<128xf32> to vector<1x128xf32>
    %cst_47 = arith.constant 7.812500e-03 : f32
    %116 = vector.broadcast %cst_47 : f32 to vector<1x128xf32>
    %117 = arith.mulf %115, %116 : vector<1x128xf32>
    %cst_48 = arith.constant 9.99999974E-6 : f32
    %118 = vector.broadcast %cst_48 : f32 to vector<1x128xf32>
    %119 = arith.addf %117, %118 : vector<1x128xf32>
    %120 = math.rsqrt %119 : vector<1x128xf32>
    %121 = arith.mulf %7, %120 : vector<1x128xf32>
    %122 = vector.broadcast %121 : vector<1x128xf32> to vector<128x128xf32>
    %123 = arith.mulf %112, %122 : vector<128x128xf32>
    %124 = vector.broadcast %8 : vector<1x128xf32> to vector<128x128xf32>
    %125 = arith.addf %123, %124 : vector<128x128xf32>
    %c0_49 = arith.constant 0 : index
    %c0_50 = arith.constant 0 : index
    %126 = vector.load %arg2[%c0_49, %c0_50] : memref<128x128xf32, #tpu.memory_space<vmem>>, vector<128x128xf32>
    %127 = arith.addf %125, %126 : vector<128x128xf32>
    %cst_51 = arith.constant 2.000000e+01 : f32
    %128 = vector.broadcast %cst_51 : f32 to vector<128x128xf32>
    %129 = arith.cmpf ogt, %127, %128 : vector<128x128xf32>
    %cst_52 = arith.constant 2.000000e+01 : f32
    %130 = vector.broadcast %cst_52 : f32 to vector<128x128xf32>
    %131 = arith.minimumf %127, %130 : vector<128x128xf32>
    %132 = math.exp %131 : vector<128x128xf32>
    %133 = math.log1p %132 : vector<128x128xf32>
    %134 = arith.select %129, %127, %133 : vector<128x128xi1>, vector<128x128xf32>
    %c0_53 = arith.constant 0 : index
    %c0_54 = arith.constant 0 : index
    %135 = vector.load %arg7[%c0_53, %c0_54] : memref<128x128xf32, #tpu.memory_space<vmem>>, vector<128x128xf32>
    tpu.vector_store %arg7[%c0_53, %c0_54], %134 {strides = array<i32>} : memref<128x128xf32, #tpu.memory_space<vmem>>, vector<128x128xf32>,
    return
  }
}

</mosaic_0001>

<bundles_post_ra>
// kernel: tpu_custom_call.1
= control target key start
LH: loop header
LB: loop body
LE: loop exit
PB: predicated region body
PF: predicated region fallthrough
CT: control target
= control target key end

     0   :  { %vm999_vm0 = vcmask 261120   ;;  %v9323_v3 = vmov 0   ;;  %s18240_s0 = inlined_call_operand.vmem [shape: s32[512,1], index: 0, kind: input, shape index: {}]   ;;  %s18241_s1 = inlined_call_operand.vmem [shape: s32[512,1], index: 1, kind: input, shape index: {}]   ;;  %s18242_s2 = inlined_call_operand.vmem [shape: f32[128,128], index: 2, kind: input, shape index: {}]   ;;  %s18243_s3 = inlined_call_operand.vmem [shape: f32[512,32], index: 3, kind: input, shape index: {}]   ;;  %s18244_s4 = inlined_call_operand.vmem [shape: f32[32,128], index: 4, kind: input, shape index: {}]   ;;  %s18245_s5 = inlined_call_operand.vmem [shape: f32[3,128,256], index: 5, kind: input, shape index: {}]   ;;  %s18246_s6 = inlined_call_operand.vmem [shape: f32[8,256], index: 6, kind: input, shape index: {}]   ;;  %s18247_s7 = inlined_call_operand.hbm [shape: f32[128,128], index: 7, kind: output, shape index: {}]  }
   0x1   :  { %v33_v0 = vld [vmem:[%s18240_s0 + $0x10] sm:$0xff]  ;;  %v31_v1 = vld [vmem:[%s18240_s0] sm:$0xff]  ;;  %8469 = vset.pattern.permute.xlu1 %v9323_v3  ;;  %8468 = vset.pattern.permute.xlu0 %v9323_v3  ;;  %v992_v4 = vld [vmem:[%s18244_s4 + $0x8] sm:$0xff] }
   0x2   :  { %v991_v2 = vld [vmem:[%s18244_s4] sm:$0xff]  ;;  %102 = vperm.xlu1 %8469, %v33_v0   ;;  %96 = vperm.xlu0 %8468, %v31_v1   ;;  %v993_v6 = vld [vmem:[%s18244_s4 + $0x10] sm:$0xff]  ;;  %v994_v7 = vld [vmem:[%s18244_s4 + $0x18] sm:$0xff] }
   0x3   :  { %v7970_v5 = vpack.c.bf16 %v992_v4, %v991_v2  ;;  %v927_v8 = vld [vmem:[%s18243_s3] sm:$0xff]  ;;  %v34_v9 = vld [vmem:[%s18240_s0 + $0x18] sm:$0xff]  ;;  %v32_v10 = vld [vmem:[%s18240_s0 + $0x8] sm:$0xff]  ;;  %v7974_v11 = vpack.c.bf16 %v994_v7, %v993_v6 }
   0x4   :  { %7874 = vmatprep.mubr.msk.f32.mxu0 %vm999_vm0, %v927_v8  ;;  %v959_v12 = vld [vmem:[%s18243_s3 + $0x100] sm:$0xff]  ;;  %v36_v13 = vld [vmem:[%s18240_s0 + $0x28] sm:$0xff]  ;;  %v929_v17 = vld [vmem:[%s18243_s3 + $0x10] sm:$0xff] }
   0x5   :  { %7971 = vmatprep.subr.bf16.mxu0 %v7970_v5  ;;  %8202 = vmatprep.subr.bf16.mxu1 %v7970_v5  ;;  %v35_v14 = vld [vmem:[%s18240_s0 + $0x20] sm:$0xff]  ;;  %v928_v15 = vld [vmem:[%s18243_s3 + $0x8] sm:$0xff]  ;;  %v961_v18 = vld [vmem:[%s18243_s3 + $0x110] sm:$0xff] }
   0x6   :  { %7973 = vmatpush3.bf16.msra.mxu0 %v7970_v5  ;;  %8204 = vmatpush3.bf16.msra.mxu1 %v7970_v5  ;;  %v960_v16 = vld [vmem:[%s18243_s3 + $0x108] sm:$0xff]  ;;  %v38_v19 = vld [vmem:[%s18240_s0 + $0x38] sm:$0xff]  ;;  %v37_v20 = vld [vmem:[%s18240_s0 + $0x30] sm:$0xff] }
   0x7   :  { %105 = vperm.xlu1 %8469, %v34_v9   ;;  %99 = vperm.xlu0 %8468, %v32_v10   ;;  %v930_v21 = vld [vmem:[%s18243_s3 + $0x18] sm:$0xff]  ;;  %v931_v23 = vld [vmem:[%s18243_s3 + $0x20] sm:$0xff]  ;;  %v40_v25 = vld [vmem:[%s18240_s0 + $0x48] sm:$0xff] }
   0x8   :  { %7975 = vmatprep.subr.bf16.mxu0 %v7974_v11  ;;  %8203 = vmatprep.subr.bf16.mxu1 %v7974_v11  ;;  %v962_v22 = vld [vmem:[%s18243_s3 + $0x118] sm:$0xff]  ;;  %v963_v24 = vld [vmem:[%s18243_s3 + $0x120] sm:$0xff]  ;;  %v932_v27 = vld [vmem:[%s18243_s3 + $0x28] sm:$0xff] }
   0x9   :  { %7922 = vmatprep.mubr.msk.f32.mxu1 %vm999_vm0, %v959_v12  ;;  %v39_v26 = vld [vmem:[%s18240_s0 + $0x40] sm:$0xff]  ;;  %v964_v28 = vld [vmem:[%s18243_s3 + $0x128] sm:$0xff]  ;;  %v933_v29 = vld [vmem:[%s18243_s3 + $0x30] sm:$0xff] }
   0xa   :  { %7977 = vmatpush3.bf16.msra.mxu0 %v7974_v11  ;;  %8205 = vmatpush3.bf16.msra.mxu1 %v7974_v11  ;;  %v965_v30 = vld [vmem:[%s18243_s3 + $0x130] sm:$0xff]  ;;  %v42_v31 = vld [vmem:[%s18240_s0 + $0x58] sm:$0xff]  ;;  %v2321_v33 = vld [vmem:[%s18245_s5 + $0x8] sm:$0xff] }
   0xb   :  { %111 = vperm.xlu1 %8469, %v36_v13   ;;  %108 = vperm.xlu0 %8468, %v35_v14   ;;  %v41_v32 = vld [vmem:[%s18240_s0 + $0x50] sm:$0xff]  ;;  %v934_v34 = vld [vmem:[%s18243_s3 + $0x38] sm:$0xff]  ;;  %v935_v37 = vld [vmem:[%s18243_s3 + $0x40] sm:$0xff] }
   0xc   :  { %v966_v35 = vld [vmem:[%s18243_s3 + $0x138] sm:$0xff]  ;;  %v967_v38 = vld [vmem:[%s18243_s3 + $0x140] sm:$0xff]  ;;  %v44_v39 = vld [vmem:[%s18240_s0 + $0x68] sm:$0xff] }
   0xd   :  { %7875 = vmatmul.mubr.msk.f32.vlgmr.msra.gmra.mrb[0].mxu0 %vm999_vm0, %v928_v15  ;;  %7923 = vmatmul.mubr.msk.f32.vlgmr.msra.gmra.mrb[0].mxu1 %vm999_vm0, %v960_v16  ;;  %v2323_v36 = vld [vmem:[%s18245_s5 + $0x18] sm:$0xff]  ;;  %v43_v40 = vld [vmem:[%s18240_s0 + $0x60] sm:$0xff]  ;;  %v2322_v43 = vld [vmem:[%s18245_s5 + $0x10] sm:$0xff] }
   0xe   :  { %7877 = vmatprep.mubr.msk.f32.mxu0 %vm999_vm0, %v929_v17  ;;  %7925 = vmatprep.mubr.msk.f32.mxu1 %vm999_vm0, %v961_v18  ;;  %v7978_v41 = vpack.c.bf16 %v2323_v36, %v2321_v33  ;;  %v2320_v42 = vld [vmem:[%s18245_s5] sm:$0xff]  ;;  %v936_v44 = vld [vmem:[%s18243_s3 + $0x48] sm:$0xff]  ;;  %v937_v46 = vld [vmem:[%s18243_s3 + $0x50] sm:$0xff] }
   0xf   :  { %117 = vperm.xlu1 %8469, %v38_v19   ;;  %114 = vperm.xlu0 %8468, %v37_v20   ;;  %v968_v45 = vld [vmem:[%s18243_s3 + $0x148] sm:$0xff]  ;;  %v969_v47 = vld [vmem:[%s18243_s3 + $0x150] sm:$0xff]  ;;  %v46_v48 = vld [vmem:[%s18240_s0 + $0x78] sm:$0xff]  ;;  %v7980_v50 = vpack.c.bf16 %v2322_v43, %v2320_v42 }
  0x10   :  { %v45_v49 = vld [vmem:[%s18240_s0 + $0x70] sm:$0xff]  ;;  %7979 = vmatprep.subr.bf16.mxu1 %v7978_v41  ;;  %v2325_v51 = vld [vmem:[%s18245_s5 + $0x28] sm:$0xff]  ;;  %v2327_v52 = vld [vmem:[%s18245_s5 + $0x38] sm:$0xff] }
  0x11   :  { %7878 = vmatmul.mubr.msk.f32.gmra.mrb[2].mxu0 %vm999_vm0, %v930_v21  ;;  %7926 = vmatmul.mubr.msk.f32.gmra.mrb[2].mxu1 %vm999_vm0, %v962_v22  ;;  %v938_v53 = vld [vmem:[%s18243_s3 + $0x58] sm:$0xff]  ;;  %v939_v55 = vld [vmem:[%s18243_s3 + $0x60] sm:$0xff]  ;;  %v48_v57 = vld [vmem:[%s18240_s0 + $0x88] sm:$0xff]  ;;  %v7982_v59 = vpack.c.bf16 %v2327_v52, %v2325_v51 }
  0x12   :  { %7880 = vmatprep.mubr.msk.f32.mxu0 %vm999_vm0, %v931_v23  ;;  %7928 = vmatprep.mubr.msk.f32.mxu1 %vm999_vm0, %v963_v24  ;;  %v970_v54 = vld [vmem:[%s18243_s3 + $0x158] sm:$0xff]  ;;  %v971_v56 = vld [vmem:[%s18243_s3 + $0x160] sm:$0xff]  ;;  %v2326_v61 = vld [vmem:[%s18245_s5 + $0x30] sm:$0xff] }
  0x13   :  { %123 = vperm.xlu1 %8469, %v40_v25   ;;  %120 = vperm.xlu0 %8468, %v39_v26   ;;  %v47_v58 = vld [vmem:[%s18240_s0 + $0x80] sm:$0xff]  ;;  %v940_v62 = vld [vmem:[%s18243_s3 + $0x68] sm:$0xff]  ;;  %v941_v0 = vld [vmem:[%s18243_s3 + $0x70] sm:$0xff] }
  0x14   :  { %7981 = vmatpush1.bf16.msra.mxu1 %v7980_v50  ;;  %v2324_v60 = vld [vmem:[%s18245_s5 + $0x20] sm:$0xff]  ;;  %v972_v63 = vld [vmem:[%s18243_s3 + $0x168] sm:$0xff]  ;;  %v973_v1 = vld [vmem:[%s18243_s3 + $0x170] sm:$0xff] }
  0x15   :  { %7881 = vmatmul.mubr.msk.f32.gmra.mrb[4].mxu0 %vm999_vm0, %v932_v27  ;;  %7929 = vmatmul.mubr.msk.f32.gmra.mrb[4].mxu1 %vm999_vm0, %v964_v28  ;;  %v50_v2 = vld [vmem:[%s18240_s0 + $0x98] sm:$0xff]  ;;  %v49_v3 = vld [vmem:[%s18240_s0 + $0x90] sm:$0xff]  ;;  %v7984_v4 = vpack.c.bf16 %v2326_v61, %v2324_v60  ;;  %v2329_v5 = vld [vmem:[%s18245_s5 + $0x48] sm:$0xff] }
  0x16   :  { %7883 = vmatprep.mubr.msk.f32.mxu0 %vm999_vm0, %v933_v29  ;;  %7931 = vmatprep.mubr.msk.f32.mxu1 %vm999_vm0, %v965_v30  ;;  %v2331_v6 = vld [vmem:[%s18245_s5 + $0x58] sm:$0xff]  ;;  %v943_v9 = vld [vmem:[%s18243_s3 + $0x80] sm:$0xff]  ;;  %v52_v11 = vld [vmem:[%s18240_s0 + $0xa8] sm:$0xff] }
  0x17   :  { %129 = vperm.xlu1 %8469, %v42_v31   ;;  %126 = vperm.xlu0 %8468, %v41_v32   ;;  %v942_v7 = vld [vmem:[%s18243_s3 + $0x78] sm:$0xff]  ;;  %v975_v10 = vld [vmem:[%s18243_s3 + $0x180] sm:$0xff]  ;;  %v7986_v13 = vpack.c.bf16 %v2331_v6, %v2329_v5  ;;  %v2330_v15 = vld [vmem:[%s18245_s5 + $0x50] sm:$0xff] }
  0x18   :  { %7983 = vmatprep.subr.bf16.mxu1 %v7982_v59  ;;  %v974_v8 = vld [vmem:[%s18243_s3 + $0x178] sm:$0xff]  ;;  %v51_v12 = vld [vmem:[%s18240_s0 + $0xa0] sm:$0xff]  ;;  %v944_v16 = vld [vmem:[%s18243_s3 + $0x88] sm:$0xff] }
  0x19   :  { %7884 = vmatmul.mubr.msk.f32.gmra.mrb[6].mxu0 %vm999_vm0, %v934_v34  ;;  %7932 = vmatmul.mubr.msk.f32.gmra.mrb[6].mxu1 %vm999_vm0, %v966_v35  ;;  %v2328_v14 = vld [vmem:[%s18245_s5 + $0x40] sm:$0xff]  ;;  %v976_v17 = vld [vmem:[%s18243_s3 + $0x188] sm:$0xff]  ;;  %v945_v18 = vld [vmem:[%s18243_s3 + $0x90] sm:$0xff] }
  0x1a   :  { %7886 = vmatprep.mubr.msk.f32.mxu0 %vm999_vm0, %v935_v37  ;;  %7934 = vmatprep.mubr.msk.f32.mxu1 %vm999_vm0, %v967_v38  ;;  %v977_v19 = vld [vmem:[%s18243_s3 + $0x190] sm:$0xff]  ;;  %v54_v20 = vld [vmem:[%s18240_s0 + $0xb8] sm:$0xff]  ;;  %v7988_v22 = vpack.c.bf16 %v2330_v15, %v2328_v14  ;;  %v2333_v23 = vld [vmem:[%s18245_s5 + $0x68] sm:$0xff] }
  0x1b   :  { %135 = vperm.xlu1 %8469, %v44_v39   ;;  %132 = vperm.xlu0 %8468, %v43_v40   ;;  %v53_v21 = vld [vmem:[%s18240_s0 + $0xb0] sm:$0xff]  ;;  %v2335_v24 = vld [vmem:[%s18245_s5 + $0x78] sm:$0xff]  ;;  %v947_v27 = vld [vmem:[%s18243_s3 + $0xa0] sm:$0xff] }
  0x1c   :  { %7985 = vmatpush1.bf16.msra.mxu1 %v7984_v4  ;;  %v946_v25 = vld [vmem:[%s18243_s3 + $0x98] sm:$0xff]  ;;  %v979_v28 = vld [vmem:[%s18243_s3 + $0x1a0] sm:$0xff]  ;;  %v56_v29 = vld [vmem:[%s18240_s0 + $0xc8] sm:$0xff]  ;;  %v7990_v31 = vpack.c.bf16 %v2335_v24, %v2333_v23 }
  0x1d   :  { %7887 = vmatmul.mubr.msk.f32.gmra.mrb[8].mxu0 %vm999_vm0, %v936_v44  ;;  %7935 = vmatmul.mubr.msk.f32.gmra.mrb[8].mxu1 %vm999_vm0, %v968_v45  ;;  %v978_v26 = vld [vmem:[%s18243_s3 + $0x198] sm:$0xff]  ;;  %v55_v30 = vld [vmem:[%s18240_s0 + $0xc0] sm:$0xff]  ;;  %v2334_v33 = vld [vmem:[%s18245_s5 + $0x70] sm:$0xff] }
  0x1e   :  { %7889 = vmatprep.mubr.msk.f32.mxu0 %vm999_vm0, %v937_v46  ;;  %7937 = vmatprep.mubr.msk.f32.mxu1 %vm999_vm0, %v969_v47  ;;  %v2332_v32 = vld [vmem:[%s18245_s5 + $0x60] sm:$0xff]  ;;  %v948_v34 = vld [vmem:[%s18243_s3 + $0xa8] sm:$0xff]  ;;  %v949_v36 = vld [vmem:[%s18243_s3 + $0xb0] sm:$0xff] }
  0x1f   :  { %141 = vperm.xlu1 %8469, %v46_v48   ;;  %138 = vperm.xlu0 %8468, %v45_v49   ;;  %v980_v35 = vld [vmem:[%s18243_s3 + $0x1a8] sm:$0xff]  ;;  %v981_v37 = vld [vmem:[%s18243_s3 + $0x1b0] sm:$0xff]  ;;  %v58_v38 = vld [vmem:[%s18240_s0 + $0xd8] sm:$0xff]  ;;  %v7992_v40 = vpack.c.bf16 %v2334_v33, %v2332_v32 }
  0x20   :  { %7987 = vmatprep.subr.bf16.mxu1 %v7986_v13  ;;  %v57_v39 = vld [vmem:[%s18240_s0 + $0xd0] sm:$0xff]  ;;  %v2337_v41 = vld [vmem:[%s18245_s5 + $0x88] sm:$0xff]  ;;  %v2339_v42 = vld [vmem:[%s18245_s5 + $0x98] sm:$0xff] }
  0x21   :  { %7890 = vmatmul.mubr.msk.f32.gmra.mrb[10].mxu0 %vm999_vm0, %v938_v53  ;;  %7938 = vmatmul.mubr.msk.f32.gmra.mrb[10].mxu1 %vm999_vm0, %v970_v54  ;;  %v950_v43 = vld [vmem:[%s18243_s3 + $0xb8] sm:$0xff]  ;;  %v951_v45 = vld [vmem:[%s18243_s3 + $0xc0] sm:$0xff]  ;;  %v2338_v48 = vld [vmem:[%s18245_s5 + $0x90] sm:$0xff]  ;;  %v7994_v51 = vpack.c.bf16 %v2339_v42, %v2337_v41 }
  0x22   :  { %7892 = vmatprep.mubr.msk.f32.mxu0 %vm999_vm0, %v939_v55  ;;  %7940 = vmatprep.mubr.msk.f32.mxu1 %vm999_vm0, %v971_v56  ;;  %v982_v44 = vld [vmem:[%s18243_s3 + $0x1b8] sm:$0xff]  ;;  %v983_v46 = vld [vmem:[%s18243_s3 + $0x1c0] sm:$0xff]  ;;  %v60_v49 = vld [vmem:[%s18240_s0 + $0xe8] sm:$0xff] }
  0x23   :  { %147 = vperm.xlu1 %8469, %v48_v57   ;;  %144 = vperm.xlu0 %8468, %v47_v58   ;;  %v2336_v47 = vld [vmem:[%s18245_s5 + $0x80] sm:$0xff]  ;;  %v2341_v52 = vld [vmem:[%s18245_s5 + $0xa8] sm:$0xff]  ;;  %v2343_v53 = vld [vmem:[%s18245_s5 + $0xb8] sm:$0xff] }
  0x24   :  { %7989 = vmatpush1.bf16.msra.mxu1 %v7988_v22  ;;  %v59_v50 = vld [vmem:[%s18240_s0 + $0xe0] sm:$0xff]  ;;  %v952_v54 = vld [vmem:[%s18243_s3 + $0xc8] sm:$0xff]  ;;  %v7996_v56 = vpack.c.bf16 %v2338_v48, %v2336_v47  ;;  %v953_v57 = vld [vmem:[%s18243_s3 + $0xd0] sm:$0xff] }
  0x25   :  { %7893 = vmatmul.mubr.msk.f32.gmra.mrb[12].mxu0 %vm999_vm0, %v940_v62  ;;  %7941 = vmatmul.mubr.msk.f32.gmra.mrb[12].mxu1 %vm999_vm0, %v972_v63  ;;  %v984_v55 = vld [vmem:[%s18243_s3 + $0x1c8] sm:$0xff]  ;;  %v2340_v58 = vld [vmem:[%s18245_s5 + $0xa0] sm:$0xff]  ;;  %v2342_v59 = vld [vmem:[%s18245_s5 + $0xb0] sm:$0xff]  ;;  %v7998_v62 = vpack.c.bf16 %v2343_v53, %v2341_v52 }
  0x26   :  { %7895 = vmatprep.mubr.msk.f32.mxu0 %vm999_vm0, %v941_v0  ;;  %7943 = vmatprep.mubr.msk.f32.mxu1 %vm999_vm0, %v973_v1  ;;  %v985_v60 = vld [vmem:[%s18243_s3 + $0x1d0] sm:$0xff]  ;;  %v62_v61 = vld [vmem:[%s18240_s0 + $0xf8] sm:$0xff]  ;;  %v2345_v0 = vld [vmem:[%s18245_s5 + $0xc8] sm:$0xff]  ;;  %v8000_v4 = vpack.c.bf16 %v2342_v59, %v2340_v58 }
  0x27   :  { %153 = vperm.xlu1 %8469, %v50_v2   ;;  %150 = vperm.xlu0 %8468, %v49_v3   ;;  %v61_v63 = vld [vmem:[%s18240_s0 + $0xf0] sm:$0xff]  ;;  %v2347_v1 = vld [vmem:[%s18245_s5 + $0xd8] sm:$0xff]  ;;  %v955_v5 = vld [vmem:[%s18243_s3 + $0xe0] sm:$0xff] }
  0x28   :  { %7991 = vmatprep.subr.bf16.mxu1 %v7990_v31  ;;  %v954_v2 = vld [vmem:[%s18243_s3 + $0xd8] sm:$0xff]  ;;  %v2344_v6 = vld [vmem:[%s18245_s5 + $0xc0] sm:$0xff]  ;;  %v956_v14 = vld [vmem:[%s18243_s3 + $0xe8] sm:$0xff] }
  0x29   :  { %7896 = vmatmul.mubr.msk.f32.gmra.mrb[14].mxu0 %vm999_vm0, %v942_v7  ;;  %7944 = vmatmul.mubr.msk.f32.gmra.mrb[14].mxu1 %vm999_vm0, %v974_v8  ;;  %v986_v3 = vld [vmem:[%s18243_s3 + $0x1d8] sm:$0xff]  ;;  %v2346_v7 = vld [vmem:[%s18245_s5 + $0xd0] sm:$0xff]  ;;  %v987_v8 = vld [vmem:[%s18243_s3 + $0x1e0] sm:$0xff] }
  0x2a   :  { %7898 = vmatprep.mubr.msk.f32.mxu0 %vm999_vm0, %v943_v9  ;;  %7946 = vmatprep.mubr.msk.f32.mxu1 %vm999_vm0, %v975_v10  ;;  %v64_v9 = vld [vmem:[%s18240_s0 + $0x108] sm:$0xff]  ;;  %v8002_v10 = vpack.c.bf16 %v2347_v1, %v2345_v0  ;;  %v2351_v13 = vld [vmem:[%s18245_s5 + $0xf8] sm:$0xff]  ;;  %v7448_v31 = vld [vmem:[%s18245_s5 + $0x110] sm:$0xff] }
  0x2b   :  { %159 = vperm.xlu1 %8469, %v52_v11   ;;  %156 = vperm.xlu0 %8468, %v51_v12   ;;  %v63_v11 = vld [vmem:[%s18240_s0 + $0x100] sm:$0xff]  ;;  %v2349_v12 = vld [vmem:[%s18245_s5 + $0xe8] sm:$0xff]  ;;  %v7449_v24 = vld [vmem:[%s18245_s5 + $0x118] sm:$0xff] }
  0x2c   :  { %7993 = vmatpush1.bf16.msra.mxu1 %v7992_v40  ;;  %v988_v15 = vld [vmem:[%s18243_s3 + $0x1e8] sm:$0xff]  ;;  %v8006_v22 = vpack.c.bf16 %v2351_v13, %v2349_v12  ;;  %v7450_v40 = vld [vmem:[%s18245_s5 + $0x120] sm:$0xff]  ;;  %v7452_v41 = vld [vmem:[%s18245_s5 + $0x130] sm:$0xff] }
  0x2d   :  { %7899 = vmatmul.mubr.msk.f32.gmra.mrb[16].mxu0 %vm999_vm0, %v944_v16  ;;  %7947 = vmatmul.mubr.msk.f32.gmra.mrb[16].mxu1 %vm999_vm0, %v976_v17  ;;  %v8004_v16 = vpack.c.bf16 %v2346_v7, %v2344_v6  ;;  %v957_v17 = vld [vmem:[%s18243_s3 + $0xf0] sm:$0xff]  ;;  %v7447_v23 = vld [vmem:[%s18245_s5 + $0x108] sm:$0xff]  ;;  %v70_v42 = vld [vmem:[%s18240_s0 + $0x138] sm:$0xff]  ;;  %v8016_v47 = vpack.c.bf16 %v7452_v41, %v7450_v40 }
  0x2e   :  { %7901 = vmatprep.mubr.msk.f32.mxu0 %vm999_vm0, %v945_v18  ;;  %7949 = vmatprep.mubr.msk.f32.mxu1 %vm999_vm0, %v977_v19  ;;  %v989_v18 = vld [vmem:[%s18243_s3 + $0x1f0] sm:$0xff]  ;;  %v2348_v19 = vld [vmem:[%s18245_s5 + $0xe0] sm:$0xff]  ;;  %v68_v32 = vld [vmem:[%s18240_s0 + $0x128] sm:$0xff] }
  0x2f   :  { %165 = vperm.xlu1 %8469, %v54_v20   ;;  %162 = vperm.xlu0 %8468, %v53_v21   ;;  %v2350_v20 = vld [vmem:[%s18245_s5 + $0xf0] sm:$0xff]  ;;  %v66_v21 = vld [vmem:[%s18240_s0 + $0x118] sm:$0xff]  ;;  %v7451_v33 = vld [vmem:[%s18245_s5 + $0x128] sm:$0xff] }
  0x30   :  { %7995 = vmatprep.subr.bf16.mxu1 %v7994_v51  ;;  %v72_v51 = vld [vmem:[%s18240_s0 + $0x148] sm:$0xff]  ;;  %v7461_v53 = vld [vmem:[%s18245_s5 + $0x178] sm:$0xff]  ;;  %v7458_v58 = vld [vmem:[%s18245_s5 + $0x160] sm:$0xff] }
  0x31   :  { %7902 = vmatmul.mubr.msk.f32.gmra.mrb[18].mxu0 %vm999_vm0, %v946_v25  ;;  %7950 = vmatmul.mubr.msk.f32.gmra.mrb[18].mxu1 %vm999_vm0, %v978_v26  ;;  %v65_v25 = vld [vmem:[%s18240_s0 + $0x110] sm:$0xff]  ;;  %v958_v26 = vld [vmem:[%s18243_s3 + $0xf8] sm:$0xff]  ;;  %v7459_v52 = vld [vmem:[%s18245_s5 + $0x168] sm:$0xff] }
  0x32   :  { %7904 = vmatprep.mubr.msk.f32.mxu0 %vm999_vm0, %v947_v27  ;;  %7952 = vmatprep.mubr.msk.f32.mxu1 %vm999_vm0, %v979_v28  ;;  %v990_v27 = vld [vmem:[%s18243_s3 + $0x1f8] sm:$0xff]  ;;  %v8008_v28 = vpack.c.bf16 %v2350_v20, %v2348_v19  ;;  %v7460_v59 = vld [vmem:[%s18245_s5 + $0x170] sm:$0xff] }
  0x33   :  { %171 = vperm.xlu1 %8469, %v56_v29   ;;  %168 = vperm.xlu0 %8468, %v55_v30   ;;  %v8010_v29 = vpack.c.bf16 %v7449_v24, %v7447_v23  ;;  %v7446_v30 = vld [vmem:[%s18245_s5 + $0x100] sm:$0xff] }
  0x34   :  { %7997 = vmatpush1.bf16.msra.mxu1 %v7996_v56 }
  0x35   :  { %7905 = vmatmul.mubr.msk.f32.gmra.mrb[20].mxu0 %vm999_vm0, %v948_v34  ;;  %7953 = vmatmul.mubr.msk.f32.gmra.mrb[20].mxu1 %vm999_vm0, %v980_v35  ;;  %v7453_v34 = vld [vmem:[%s18245_s5 + $0x138] sm:$0xff]  ;;  %v67_v35 = vld [vmem:[%s18240_s0 + $0x120] sm:$0xff] }
  0x36   :  { %7907 = vmatprep.mubr.msk.f32.mxu0 %vm999_vm0, %v949_v36  ;;  %7955 = vmatprep.mubr.msk.f32.mxu1 %vm999_vm0, %v981_v37  ;;  %v18248_v36 = vmov 0.0   ;;  %v9869_v37 = vld [vmem:[%s18242_s2] sm:$0xff] }
  0x37   :  { %177 = vperm.xlu1 %8469, %v58_v38   ;;  %174 = vperm.xlu0 %8468, %v57_v39   ;;  %v8012_v38 = vpack.c.bf16 %v7448_v31, %v7446_v30  ;;  %v8014_v39 = vpack.c.bf16 %v7453_v34, %v7451_v33 }
  0x38   :  { %7999 = vmatprep.subr.bf16.mxu1 %v7998_v62  ;;  %v7465_v62 = vld [vmem:[%s18245_s5 + $0x198] sm:$0xff] }
  0x39   :  { %7908 = vmatmul.mubr.msk.f32.gmra.mrb[22].mxu0 %vm999_vm0, %v950_v43  ;;  %7956 = vmatmul.mubr.msk.f32.gmra.mrb[22].mxu1 %vm999_vm0, %v982_v44  ;;  %v7455_v43 = vld [vmem:[%s18245_s5 + $0x148] sm:$0xff]  ;;  %v7457_v44 = vld [vmem:[%s18245_s5 + $0x158] sm:$0xff] }
  0x3a   :  { %7910 = vmatprep.mubr.msk.f32.mxu0 %vm999_vm0, %v951_v45  ;;  %7958 = vmatprep.mubr.msk.f32.mxu1 %vm999_vm0, %v983_v46  ;;  %v69_v45 = vld [vmem:[%s18240_s0 + $0x130] sm:$0xff]  ;;  %v9895_v46 = vld [vmem:[%s18242_s2 + $0x8] sm:$0xff]  ;;  %v8018_v48 = vpack.c.bf16 %v7457_v44, %v7455_v43 }
  0x3b   :  { %183 = vperm.xlu1 %8469, %v60_v49   ;;  %180 = vperm.xlu0 %8468, %v59_v50   ;;  %v7454_v49 = vld [vmem:[%s18245_s5 + $0x140] sm:$0xff]  ;;  %v7456_v50 = vld [vmem:[%s18245_s5 + $0x150] sm:$0xff] }
  0x3c   :  { %8001 = vmatpush1.bf16.msra.mxu1 %v8000_v4  ;;  %v8020_v56 = vpack.c.bf16 %v7456_v50, %v7454_v49 }
  0x3d   :  { %7911 = vmatmul.mubr.msk.f32.gmra.mrb[24].mxu0 %vm999_vm0, %v952_v54  ;;  %7959 = vmatmul.mubr.msk.f32.gmra.mrb[24].mxu1 %vm999_vm0, %v984_v55  ;;  %v71_v54 = vld [vmem:[%s18240_s0 + $0x140] sm:$0xff]  ;;  %v9920_v55 = vld [vmem:[%s18242_s2 + $0x10] sm:$0xff] }
  0x3e   :  { %7913 = vmatprep.mubr.msk.f32.mxu0 %vm999_vm0, %v953_v57  ;;  %7961 = vmatprep.mubr.msk.f32.mxu1 %vm999_vm0, %v985_v60  ;;  %v8022_v57 = vpack.c.bf16 %v7461_v53, %v7459_v52  ;;  %v74_v60 = vld [vmem:[%s18240_s0 + $0x158] sm:$0xff] }
  0x3f   :  { %189 = vperm.xlu1 %8469, %v62_v61   ;;  %186 = vperm.xlu0 %8468, %v61_v63   ;;  %v7463_v61 = vld [vmem:[%s18245_s5 + $0x188] sm:$0xff]  ;;  %v73_v63 = vld [vmem:[%s18240_s0 + $0x150] sm:$0xff] }
  0x40   :  { %8003 = vmatprep.subr.bf16.mxu1 %v8002_v10 }
  0x41   :  { %7914 = vmatmul.mubr.msk.f32.gmra.mrb[26].mxu0 %vm999_vm0, %v954_v2  ;;  %7962 = vmatmul.mubr.msk.f32.gmra.mrb[26].mxu1 %vm999_vm0, %v986_v3 }
  0x42   :  { %7916 = vmatprep.mubr.msk.f32.mxu0 %vm999_vm0, %v955_v5  ;;  %7964 = vmatprep.mubr.msk.f32.mxu1 %vm999_vm0, %v987_v8 }
  0x43   :  { %195 = vperm.xlu1 %8469, %v64_v9   ;;  %192 = vperm.xlu0 %8468, %v63_v11  }
  0x44   :  { %8005 = vmatpush1.bf16.msra.mxu1 %v8004_v16 }
  0x45   :  { %7917 = vmatmul.mubr.msk.f32.gmra.mrb[28].mxu0 %vm999_vm0, %v956_v14  ;;  %7965 = vmatmul.mubr.msk.f32.gmra.mrb[28].mxu1 %vm999_vm0, %v988_v15 }
  0x46   :  { %7919 = vmatprep.mubr.msk.f32.mxu0 %vm999_vm0, %v957_v17  ;;  %7967 = vmatprep.mubr.msk.f32.mxu1 %vm999_vm0, %v989_v18 }
  0x47   :  { %201 = vperm.xlu1 %8469, %v66_v21   ;;  %198 = vperm.xlu0 %8468, %v65_v25  }
  0x48   :  { %8007 = vmatprep.subr.bf16.mxu1 %v8006_v22 }
  0x49   :  { %7920 = vmatmul.mubr.msk.f32.gmra.mrb[30].mxu0 %vm999_vm0, %v958_v26  ;;  %7968 = vmatmul.mubr.msk.f32.gmra.mrb[30].mxu1 %vm999_vm0, %v990_v27 }
  0x4a   :  { %8009 = vmatpush1.bf16.msra.mxu1 %v8008_v28  ;;  %2416 = vmatprep.mubr.f32.mxu1 %v18248_v36 }
  0x4b   :  { %207 = vperm.xlu1 %8469, %v68_v32   ;;  %8011 = vmatprep.subr.bf16.mxu1 %v8010_v29 }
  0x4c   :  { %204 = vperm.xlu0 %8468, %v67_v35   ;;  %3220 = vmatprep.mubr.f32.mxu0 %v18248_v36 }
  0x4d   :  { %2417 = vmatmul.mubr.f32.vlgmr.msra.gmra.mrb[32].mxu1 %v9869_v37 }
  0x4e   :  { %2422 = vmatprep.mubr.f32.mxu1 %v18248_v36  ;;  %8013 = vmatpush1.bf16.msra.mxu1 %v8012_v38 }
  0x4f   :  { %213 = vperm.xlu1 %8469, %v70_v42   ;;  %8015 = vmatprep.subr.bf16.mxu1 %v8014_v39 }
  0x50   :  { %210 = vperm.xlu0 %8468, %v69_v45  }
  0x51   :  { %2423 = vmatmul.mubr.f32.gmra.mrb[34].mxu1 %v9895_v46 }
  0x52   :  { %2428 = vmatprep.mubr.f32.mxu1 %v18248_v36  ;;  %8017 = vmatpush1.bf16.msra.mxu1 %v8016_v47 }
  0x53   :  { %219 = vperm.xlu1 %8469, %v72_v51   ;;  %8019 = vmatprep.subr.bf16.mxu1 %v8018_v48 }
  0x54   :  { %216 = vperm.xlu0 %8468, %v71_v54  }
  0x55   :  { %2429 = vmatmul.mubr.f32.gmra.mrb[36].mxu1 %v9920_v55 }
  0x56   :  { %12 = vsyncpa [#allocation3], 0  ;;  %2434 = vmatprep.mubr.f32.mxu1 %v18248_v36  ;;  %v9945_v0 = vld [vmem:[%s18242_s2 + $0x18] sm:$0xff]  ;;  %8021 = vmatpush1.bf16.msra.mxu1 %v8020_v56  ;;  %v8024_v1 = vpack.c.bf16 %v7460_v59, %v7458_v58  ;;  %v8026_v2 = vpack.c.bf16 %v7465_v62, %v7463_v61  ;;  %v7462_v3 = vld [vmem:[%s18245_s5 + $0x180] sm:$0xff] }
  0x57   :  { %225 = vperm.xlu1 %8469, %v74_v60   ;;  %8023 = vmatprep.subr.bf16.mxu1 %v8022_v57  ;;  %v7464_v4 = vld [vmem:[%s18245_s5 + $0x190] sm:$0xff]  ;;  %v76_v5 = vld [vmem:[%s18240_s0 + $0x168] sm:$0xff]  ;;  %v7469_v7 = vld [vmem:[%s18245_s5 + $0x1b8] sm:$0xff] }
  0x58   :  { %222 = vperm.xlu0 %8468, %v73_v63   ;;  %v7467_v6 = vld [vmem:[%s18245_s5 + $0x1a8] sm:$0xff]  ;;  %v75_v8 = vld [vmem:[%s18240_s0 + $0x160] sm:$0xff]  ;;  %v8028_v10 = vpack.c.bf16 %v7464_v4, %v7462_v3  ;;  %v7468_v13 = vld [vmem:[%s18245_s5 + $0x1b0] sm:$0xff] }
  0x59   :  { %2435 = vmatmul.mubr.f32.gmra.mrb[38].mxu1 %v9945_v0  ;;  %v9970_v9 = vld [vmem:[%s18242_s2 + $0x20] sm:$0xff]  ;;  %v8030_v11 = vpack.c.bf16 %v7469_v7, %v7467_v6  ;;  %v78_v14 = vld [vmem:[%s18240_s0 + $0x178] sm:$0xff]  ;;  %v7471_v15 = vld [vmem:[%s18245_s5 + $0x1c8] sm:$0xff] }
  0x5a   :  { %2440 = vmatprep.mubr.f32.mxu1 %v18248_v36  ;;  %8025 = vmatpush1.bf16.msra.mxu1 %v8024_v1  ;;  %v7466_v12 = vld [vmem:[%s18245_s5 + $0x1a0] sm:$0xff]  ;;  %v7473_v16 = vld [vmem:[%s18245_s5 + $0x1d8] sm:$0xff]  ;;  %v77_v17 = vld [vmem:[%s18240_s0 + $0x170] sm:$0xff] }
  0x5b   :  { %231 = vperm.xlu1 %8469, %v76_v5   ;;  %8027 = vmatprep.subr.bf16.mxu1 %v8026_v2  ;;  %v9995_v18 = vld [vmem:[%s18242_s2 + $0x28] sm:$0xff]  ;;  %v8032_v19 = vpack.c.bf16 %v7468_v13, %v7466_v12  ;;  %v8034_v20 = vpack.c.bf16 %v7473_v16, %v7471_v15  ;;  %v7470_v21 = vld [vmem:[%s18245_s5 + $0x1c0] sm:$0xff]  ;;  %v7472_v22 = vld [vmem:[%s18245_s5 + $0x1d0] sm:$0xff] }
  0x5c   :  { %228 = vperm.xlu0 %8468, %v75_v8   ;;  %v80_v23 = vld [vmem:[%s18240_s0 + $0x188] sm:$0xff]  ;;  %v7477_v25 = vld [vmem:[%s18245_s5 + $0x1f8] sm:$0xff]  ;;  %v79_v26 = vld [vmem:[%s18240_s0 + $0x180] sm:$0xff]  ;;  %v8036_v28 = vpack.c.bf16 %v7472_v22, %v7470_v21 }
  0x5d   :  { %2441 = vmatmul.mubr.f32.gmra.mrb[40].mxu1 %v9970_v9  ;;  %v7475_v24 = vld [vmem:[%s18245_s5 + $0x1e8] sm:$0xff]  ;;  %v10020_v27 = vld [vmem:[%s18242_s2 + $0x30] sm:$0xff]  ;;  %v7474_v30 = vld [vmem:[%s18245_s5 + $0x1e0] sm:$0xff] }
  0x5e   :  { %2446 = vmatprep.mubr.f32.mxu1 %v18248_v36  ;;  %8029 = vmatpush1.bf16.msra.mxu1 %v8028_v10  ;;  %v8038_v29 = vpack.c.bf16 %v7477_v25, %v7475_v24  ;;  %v7476_v31 = vld [vmem:[%s18245_s5 + $0x1f0] sm:$0xff]  ;;  %v82_v32 = vld [vmem:[%s18240_s0 + $0x198] sm:$0xff]  ;;  %v84_v38 = vld [vmem:[%s18240_s0 + $0x1a8] sm:$0xff] }
  0x5f   :  { %237 = vperm.xlu1 %8469, %v78_v14   ;;  %8031 = vmatprep.subr.bf16.mxu1 %v8030_v11  ;;  %v81_v33 = vld [vmem:[%s18240_s0 + $0x190] sm:$0xff]  ;;  %v10039_v34 = vld [vmem:[%s18242_s2 + $0x38] sm:$0xff]  ;;  %v8040_v35 = vpack.c.bf16 %v7476_v31, %v7474_v30  ;;  %v83_v39 = vld [vmem:[%s18240_s0 + $0x1a0] sm:$0xff] }
  0x60   :  { %234 = vperm.xlu0 %8468, %v77_v17   ;;  %v10052_v40 = vld [vmem:[%s18242_s2 + $0x40] sm:$0xff]  ;;  %v86_v41 = vld [vmem:[%s18240_s0 + $0x1b8] sm:$0xff]  ;;  %v85_v42 = vld [vmem:[%s18240_s0 + $0x1b0] sm:$0xff] }
  0x61   :  { %2447 = vmatmul.mubr.f32.gmra.mrb[42].mxu1 %v9995_v18  ;;  %v10065_v43 = vld [vmem:[%s18242_s2 + $0x48] sm:$0xff]  ;;  %v87_v45 = vld [vmem:[%s18240_s0 + $0x1c0] sm:$0xff]  ;;  %v10078_v47 = vld [vmem:[%s18242_s2 + $0x50] sm:$0xff] }
  0x62   :  { %2452 = vmatprep.mubr.f32.mxu1 %v18248_v36  ;;  %8033 = vmatpush1.bf16.msra.mxu1 %v8032_v19  ;;  %v88_v44 = vld [vmem:[%s18240_s0 + $0x1c8] sm:$0xff]  ;;  %v90_v48 = vld [vmem:[%s18240_s0 + $0x1d8] sm:$0xff]  ;;  %v89_v49 = vld [vmem:[%s18240_s0 + $0x1d0] sm:$0xff] }
  0x63   :  { %243 = vperm.xlu1 %8469, %v80_v23   ;;  %8035 = vmatprep.subr.bf16.mxu1 %v8034_v20  ;;  %v10091_v50 = vld [vmem:[%s18242_s2 + $0x58] sm:$0xff]  ;;  %v92_v51 = vld [vmem:[%s18240_s0 + $0x1e8] sm:$0xff]  ;;  %v91_v52 = vld [vmem:[%s18240_s0 + $0x1e0] sm:$0xff] }
  0x64   :  { %240 = vperm.xlu0 %8468, %v79_v26   ;;  %v10104_v53 = vld [vmem:[%s18242_s2 + $0x60] sm:$0xff]  ;;  %v94_v54 = vld [vmem:[%s18240_s0 + $0x1f8] sm:$0xff]  ;;  %v93_v56 = vld [vmem:[%s18240_s0 + $0x1f0] sm:$0xff] }
  0x65   :  { %2453 = vmatmul.mubr.f32.gmra.mrb[44].mxu1 %v10020_v27  ;;  %v10117_v57 = vld [vmem:[%s18242_s2 + $0x68] sm:$0xff]  ;;  %v479_v59 = vld [vmem:[%s18241_s1] sm:$0xff]  ;;  %v10134_v62 = vld [vmem:[%s18242_s2 + $0x70] sm:$0xff] }
  0x66   :  { %2458 = vmatprep.mubr.f32.mxu1 %v18248_v36  ;;  %8037 = vmatpush1.bf16.msra.mxu1 %v8036_v28  ;;  %v480_v58 = vld [vmem:[%s18241_s1 + $0x8] sm:$0xff]  ;;  %v482_v63 = vld [vmem:[%s18241_s1 + $0x18] sm:$0xff]  ;;  %v481_v1 = vld [vmem:[%s18241_s1 + $0x10] sm:$0xff] }
  0x67   :  { %249 = vperm.xlu1 %8469, %v82_v32   ;;  %8039 = vmatprep.subr.bf16.mxu1 %v8038_v29  ;;  %v10151_v4 = vld [vmem:[%s18242_s2 + $0x78] sm:$0xff]  ;;  %v484_v5 = vld [vmem:[%s18241_s1 + $0x28] sm:$0xff]  ;;  %v483_v6 = vld [vmem:[%s18241_s1 + $0x20] sm:$0xff] }
  0x68   :  { %246 = vperm.xlu0 %8468, %v81_v33   ;;  %v486_v10 = vld [vmem:[%s18241_s1 + $0x38] sm:$0xff]  ;;  %v485_v11 = vld [vmem:[%s18241_s1 + $0x30] sm:$0xff]  ;;  %v488_v14 = vld [vmem:[%s18241_s1 + $0x48] sm:$0xff] }
  0x69   :  { %2459 = vmatmul.mubr.f32.gmra.mrb[46].mxu1 %v10039_v34  ;;  %v490_v17 = vld [vmem:[%s18241_s1 + $0x58] sm:$0xff]  ;;  %v492_v21 = vld [vmem:[%s18241_s1 + $0x68] sm:$0xff] }
  0x6a   :  { %2464 = vmatprep.mubr.f32.mxu1 %v18248_v36  ;;  %8041 = vmatpush1.bf16.msra.mxu1 %v8040_v35  ;;  %v494_v24 = vld [vmem:[%s18241_s1 + $0x78] sm:$0xff]  ;;  %v496_v28 = vld [vmem:[%s18241_s1 + $0x88] sm:$0xff] }
  0x6b   :  { %255 = vperm.xlu1 %8469, %v84_v38   ;;  %v498_v31 = vld [vmem:[%s18241_s1 + $0x98] sm:$0xff]  ;;  %v500_v35 = vld [vmem:[%s18241_s1 + $0xa8] sm:$0xff] }
  0x6c   :  { %252 = vperm.xlu0 %8468, %v83_v39  }
  0x6d   :  { %2465 = vmatmul.mubr.f32.gmra.mrb[48].mxu1 %v10052_v40 }
  0x6e   :  { %2470 = vmatprep.mubr.f32.mxu1 %v18248_v36 }
  0x6f   :  { %261 = vperm.xlu1 %8469, %v86_v41   ;;  %v502_v41 = vld [vmem:[%s18241_s1 + $0xb8] sm:$0xff] }
  0x70   :  { %258 = vperm.xlu0 %8468, %v85_v42  }
  0x71   :  { %2471 = vmatmul.mubr.f32.gmra.mrb[50].mxu1 %v10065_v43 }
  0x72   :  { %2476 = vmatprep.mubr.f32.mxu1 %v18248_v36 }
  0x73   :  { %267 = vperm.xlu1 %8469, %v88_v44  }
  0x74   :  { %264 = vperm.xlu0 %8468, %v87_v45   ;;  %v504_v45 = vld [vmem:[%s18241_s1 + $0xc8] sm:$0xff] }
  0x75   :  { %2477 = vmatmul.mubr.f32.gmra.mrb[52].mxu1 %v10078_v47 }
  0x76   :  { %2482 = vmatprep.mubr.f32.mxu1 %v18248_v36 }
  0x77   :  { %273 = vperm.xlu1 %8469, %v90_v48  }
  0x78   :  { %270 = vperm.xlu0 %8468, %v89_v49  }
  0x79   :  { %2483 = vmatmul.mubr.f32.gmra.mrb[54].mxu1 %v10091_v50 }
  0x7a   :  { %2488 = vmatprep.mubr.f32.mxu1 %v18248_v36 }
  0x7b   :  { %279 = vperm.xlu1 %8469, %v92_v51   ;;  %v506_v51 = vld [vmem:[%s18241_s1 + $0xd8] sm:$0xff] }
  0x7c   :  { %276 = vperm.xlu0 %8468, %v91_v52  }
  0x7d   :  { %2489 = vmatmul.mubr.f32.gmra.mrb[56].mxu1 %v10104_v53 }
  0x7e   :  { %2494 = vmatprep.mubr.f32.mxu1 %v18248_v36 }
  0x7f   :  { %285 = vperm.xlu1 %8469, %v94_v54  }
  0x80   :  { %282 = vperm.xlu0 %8468, %v93_v56   ;;  %v508_v56 = vld [vmem:[%s18241_s1 + $0xe8] sm:$0xff] }
  0x81   :  { %2495 = vmatmul.mubr.f32.gmra.mrb[58].mxu1 %v10117_v57  ;;  %v10126_v60 = vpop.permute.xlu1 %102  ;;  %v10128_v61 = vpop.permute.xlu0 %96 }
  0x82   :  { %18824 = vst [vmem:[#allocation5_spill] sm:$0xff] %v10126_v60  ;;  %18825 = vst [vmem:[#allocation6_spill] sm:$0xff] %v10128_v61  ;;  %2500 = vmatprep.mubr.f32.mxu1 %v18248_v36 }
  0x83   :  { %547 = vperm.xlu1 %8469, %v480_v58  }
  0x84   :  { %544 = vperm.xlu0 %8468, %v479_v59  }
  0x85   :  { %2501 = vmatmul.mubr.f32.gmra.mrb[60].mxu1 %v10134_v62 }
  0x86   :  { %v10143_v2 = vpop.permute.xlu1 %105  ;;  %v10145_v3 = vpop.permute.xlu0 %99  ;;  %2506 = vmatprep.mubr.f32.mxu1 %v18248_v36 }
  0x87   :  { %18826 = vst [vmem:[#allocation7_spill] sm:$0xff] %v10143_v2  ;;  %18827 = vst [vmem:[#allocation8_spill] sm:$0xff] %v10145_v3  ;;  %553 = vperm.xlu1 %8469, %v482_v63   ;;  %v510_v63 = vld [vmem:[%s18241_s1 + $0xf8] sm:$0xff] }
  0x88   :  { %550 = vperm.xlu0 %8468, %v481_v1  }
  0x89   :  { %2507 = vmatmul.mubr.f32.gmra.mrb[62].mxu1 %v10151_v4 }
  0x8a   :  { %v10160_v7 = vpop.permute.xlu1 %111  ;;  %v10162_v8 = vpop.permute.xlu0 %108  ;;  %2610 = vmatprep.mubr.f32.mxu1 %v18248_v36 }
  0x8b   :  { %18828 = vst [vmem:[#allocation9_spill] sm:$0xff] %v10160_v7  ;;  %18829 = vst [vmem:[#allocation10_spill] sm:$0xff] %v10162_v8  ;;  %559 = vperm.xlu1 %8469, %v484_v5  }
  0x8c   :  { %556 = vperm.xlu0 %8468, %v483_v6   ;;  %v512_v6 = vld [vmem:[%s18241_s1 + $0x108] sm:$0xff] }
  0x8d   :  { %2611 = vmatmul.mubr.f32.vlgmr.msra.gmra.mrb[64].mxu1 %v9869_v37  ;;  %v487_v37 = vld [vmem:[%s18241_s1 + $0x40] sm:$0xff] }
  0x8e   :  { %v10172_v12 = vpop.permute.xlu1 %117  ;;  %v10174_v13 = vpop.permute.xlu0 %114  ;;  %2616 = vmatprep.mubr.f32.mxu1 %v18248_v36 }
  0x8f   :  { %18830 = vst [vmem:[#allocation11_spill] sm:$0xff] %v10172_v12  ;;  %18831 = vst [vmem:[#allocation12_spill] sm:$0xff] %v10174_v13  ;;  %565 = vperm.xlu1 %8469, %v486_v10  }
  0x90   :  { %562 = vperm.xlu0 %8468, %v485_v11  }
  0x91   :  { %2617 = vmatmul.mubr.f32.gmra.mrb[66].mxu1 %v9895_v46  ;;  %v489_v46 = vld [vmem:[%s18241_s1 + $0x50] sm:$0xff] }
  0x92   :  { %v10184_v15 = vpop.permute.xlu1 %123  ;;  %v10186_v16 = vpop.permute.xlu0 %120  ;;  %2622 = vmatprep.mubr.f32.mxu1 %v18248_v36 }
  0x93   :  { %18832 = vst [vmem:[#allocation13_spill] sm:$0xff] %v10184_v15  ;;  %18833 = vst [vmem:[#allocation14_spill] sm:$0xff] %v10186_v16  ;;  %571 = vperm.xlu1 %8469, %v488_v14   ;;  %v514_v14 = vld [vmem:[%s18241_s1 + $0x118] sm:$0xff] }
  0x94   :  { %568 = vperm.xlu0 %8468, %v487_v37  }
  0x95   :  { %2623 = vmatmul.mubr.f32.gmra.mrb[68].mxu1 %v9920_v55  ;;  %v491_v55 = vld [vmem:[%s18241_s1 + $0x60] sm:$0xff] }
  0x96   :  { %v10196_v19 = vpop.permute.xlu1 %129  ;;  %v10198_v20 = vpop.permute.xlu0 %126  ;;  %2628 = vmatprep.mubr.f32.mxu1 %v18248_v36 }
  0x97   :  { %18834 = vst [vmem:[#allocation15_spill] sm:$0xff] %v10196_v19  ;;  %18835 = vst [vmem:[#allocation16_spill] sm:$0xff] %v10198_v20  ;;  %577 = vperm.xlu1 %8469, %v490_v17  }
  0x98   :  { %574 = vperm.xlu0 %8468, %v489_v46   ;;  %v516_v46 = vld [vmem:[%s18241_s1 + $0x128] sm:$0xff] }
  0x99   :  { %2629 = vmatmul.mubr.f32.gmra.mrb[70].mxu1 %v9945_v0  ;;  %v493_v0 = vld [vmem:[%s18241_s1 + $0x70] sm:$0xff] }
  0x9a   :  { %v10208_v22 = vpop.permute.xlu1 %135  ;;  %v10210_v23 = vpop.permute.xlu0 %132  ;;  %2634 = vmatprep.mubr.f32.mxu1 %v18248_v36 }
  0x9b   :  { %18836 = vst [vmem:[#allocation17_spill] sm:$0xff] %v10208_v22  ;;  %18837 = vst [vmem:[#allocation18_spill] sm:$0xff] %v10210_v23  ;;  %583 = vperm.xlu1 %8469, %v492_v21  }
  0x9c   :  { %580 = vperm.xlu0 %8468, %v491_v55  }
  0x9d   :  { %2635 = vmatmul.mubr.f32.gmra.mrb[72].mxu1 %v9970_v9  ;;  %v495_v9 = vld [vmem:[%s18241_s1 + $0x80] sm:$0xff] }
  0x9e   :  { %v10220_v25 = vpop.permute.xlu1 %141  ;;  %v10222_v26 = vpop.permute.xlu0 %138  ;;  %2640 = vmatprep.mubr.f32.mxu1 %v18248_v36 }
  0x9f   :  { %18838 = vst [vmem:[#allocation19_spill] sm:$0xff] %v10220_v25  ;;  %18839 = vst [vmem:[#allocation20_spill] sm:$0xff] %v10222_v26  ;;  %589 = vperm.xlu1 %8469, %v494_v24   ;;  %v518_v24 = vld [vmem:[%s18241_s1 + $0x138] sm:$0xff] }
  0xa0   :  { %586 = vperm.xlu0 %8468, %v493_v0  }
  0xa1   :  { %2641 = vmatmul.mubr.f32.gmra.mrb[74].mxu1 %v9995_v18  ;;  %v497_v18 = vld [vmem:[%s18241_s1 + $0x90] sm:$0xff] }
  0xa2   :  { %v10232_v29 = vpop.permute.xlu1 %147  ;;  %v10234_v30 = vpop.permute.xlu0 %144  ;;  %2646 = vmatprep.mubr.f32.mxu1 %v18248_v36 }
  0xa3   :  { %18840 = vst [vmem:[#allocation21_spill] sm:$0xff] %v10232_v29  ;;  %18841 = vst [vmem:[#allocation22_spill] sm:$0xff] %v10234_v30  ;;  %595 = vperm.xlu1 %8469, %v496_v28  }
  0xa4   :  { %592 = vperm.xlu0 %8468, %v495_v9   ;;  %v520_v9 = vld [vmem:[%s18241_s1 + $0x148] sm:$0xff] }
  0xa5   :  { %2647 = vmatmul.mubr.f32.gmra.mrb[76].mxu1 %v10020_v27  ;;  %v499_v27 = vld [vmem:[%s18241_s1 + $0xa0] sm:$0xff] }
  0xa6   :  { %v10244_v32 = vpop.permute.xlu1 %153  ;;  %v10246_v33 = vpop.permute.xlu0 %150  ;;  %2652 = vmatprep.mubr.f32.mxu1 %v18248_v36 }
  0xa7   :  { %18842 = vst [vmem:[#allocation23_spill] sm:$0xff] %v10244_v32  ;;  %18843 = vst [vmem:[#allocation24_spill] sm:$0xff] %v10246_v33  ;;  %601 = vperm.xlu1 %8469, %v498_v31   ;;  %v18250_v31 = vlaneseq }
  0xa8   :  { %598 = vperm.xlu0 %8468, %v497_v18   ;;  %v519_v18 = vld [vmem:[%s18241_s1 + $0x140] sm:$0xff] }
  0xa9   :  { %2653 = vmatmul.mubr.f32.gmra.mrb[78].mxu1 %v10039_v34  ;;  %v501_v34 = vld [vmem:[%s18241_s1 + $0xb0] sm:$0xff] }
  0xaa   :  { %v10256_v38 = vpop.permute.xlu1 %159  ;;  %v10258_v39 = vpop.permute.xlu0 %156  ;;  %2658 = vmatprep.mubr.f32.mxu1 %v18248_v36 }
  0xab   :  { %18844 = vst [vmem:[#allocation25_spill] sm:$0xff] %v10256_v38  ;;  %18845 = vst [vmem:[#allocation26_spill] sm:$0xff] %v10258_v39  ;;  %607 = vperm.xlu1 %8469, %v500_v35  }
  0xac   :  { %604 = vperm.xlu0 %8468, %v499_v27  }
  0xad   :  { %2659 = vmatmul.mubr.f32.gmra.mrb[80].mxu1 %v10052_v40  ;;  %v503_v40 = vld [vmem:[%s18241_s1 + $0xc0] sm:$0xff] }
  0xae   :  { %v10268_v42 = vpop.permute.xlu1 %165  ;;  %v10270_v44 = vpop.permute.xlu0 %162  ;;  %2664 = vmatprep.mubr.f32.mxu1 %v18248_v36 }
  0xaf   :  { %18846 = vst [vmem:[#allocation27_spill] sm:$0xff] %v10268_v42  ;;  %18847 = vst [vmem:[#allocation28_spill] sm:$0xff] %v10270_v44  ;;  %613 = vperm.xlu1 %8469, %v502_v41   ;;  %v522_v41 = vld [vmem:[%s18241_s1 + $0x158] sm:$0xff] }
  0xb0   :  { %610 = vperm.xlu0 %8468, %v501_v34   ;;  %v521_v34 = vld [vmem:[%s18241_s1 + $0x150] sm:$0xff] }
  0xb1   :  { %2665 = vmatmul.mubr.f32.gmra.mrb[82].mxu1 %v10065_v43  ;;  %v505_v43 = vld [vmem:[%s18241_s1 + $0xd0] sm:$0xff] }
  0xb2   :  { %v10280_v48 = vpop.permute.xlu1 %171  ;;  %v10282_v49 = vpop.permute.xlu0 %168  ;;  %2670 = vmatprep.mubr.f32.mxu1 %v18248_v36 }
  0xb3   :  { %18848 = vst [vmem:[#allocation29_spill] sm:$0xff] %v10280_v48  ;;  %18849 = vst [vmem:[#allocation30_spill] sm:$0xff] %v10282_v49  ;;  %619 = vperm.xlu1 %8469, %v504_v45   ;;  %v10384_v45 = vshrl.u32 %v18250_v31, 7 }
  0xb4   :  { %616 = vperm.xlu0 %8468, %v503_v40  }
  0xb5   :  { %2671 = vmatmul.mubr.f32.gmra.mrb[84].mxu1 %v10078_v47  ;;  %v507_v47 = vld [vmem:[%s18241_s1 + $0xe0] sm:$0xff]  ;;  %18866 = vst [vmem:[#allocation47_spill] sm:$0xff] %v10384_v45 }
  0xb6   :  { %v10292_v52 = vpop.permute.xlu1 %177  ;;  %v10294_v54 = vpop.permute.xlu0 %174  ;;  %2676 = vmatprep.mubr.f32.mxu1 %v18248_v36 }
  0xb7   :  { %18850 = vst [vmem:[#allocation31_spill] sm:$0xff] %v10292_v52  ;;  %18851 = vst [vmem:[#allocation32_spill] sm:$0xff] %v10294_v54  ;;  %625 = vperm.xlu1 %8469, %v506_v51  }
  0xb8   :  { %622 = vperm.xlu0 %8468, %v505_v43   ;;  %v524_v43 = vld [vmem:[%s18241_s1 + $0x168] sm:$0xff] }
  0xb9   :  { %2677 = vmatmul.mubr.f32.gmra.mrb[86].mxu1 %v10091_v50  ;;  %v509_v50 = vld [vmem:[%s18241_s1 + $0xf0] sm:$0xff] }
  0xba   :  { %v10304_v58 = vpop.permute.xlu1 %183  ;;  %v10306_v59 = vpop.permute.xlu0 %180  ;;  %2682 = vmatprep.mubr.f32.mxu1 %v18248_v36 }
  0xbb   :  { %18852 = vst [vmem:[#allocation33_spill] sm:$0xff] %v10304_v58  ;;  %18853 = vst [vmem:[#allocation34_spill] sm:$0xff] %v10306_v59  ;;  %631 = vperm.xlu1 %8469, %v508_v56   ;;  %v523_v56 = vld [vmem:[%s18241_s1 + $0x160] sm:$0xff] }
  0xbc   :  { %628 = vperm.xlu0 %8468, %v507_v47   ;;  %v997_v47 = vsub.s32 3, %v10384_v45 }
  0xbd   :  { %2683 = vmatmul.mubr.f32.gmra.mrb[88].mxu1 %v10104_v53  ;;  %v511_v53 = vld [vmem:[%s18241_s1 + $0x100] sm:$0xff] }
  0xbe   :  { %v10316_v1 = vpop.permute.xlu1 %189  ;;  %2688 = vmatprep.mubr.f32.mxu1 %v18248_v36  ;;  %v10319_v5 = vpop.permute.xlu0 %186 }
  0xbf   :  { %18854 = vst [vmem:[#allocation35_spill] sm:$0xff] %v10316_v1  ;;  %18855 = vst [vmem:[#allocation36_spill] sm:$0xff] %v10319_v5  ;;  %637 = vperm.xlu1 %8469, %v510_v63  }
  0xc0   :  { %634 = vperm.xlu0 %8468, %v509_v50   ;;  %v27_v50 = vld [vmem:[%s18246_s6] sm:$0xff] }
  0xc1   :  { %2689 = vmatmul.mubr.f32.gmra.mrb[90].mxu1 %v10117_v57  ;;  %v513_v57 = vld [vmem:[%s18241_s1 + $0x110] sm:$0xff] }
  0xc2   :  { %v10328_v10 = vpop.permute.xlu1 %195  ;;  %2694 = vmatprep.mubr.f32.mxu1 %v18248_v36  ;;  %v10331_v11 = vpop.permute.xlu0 %192 }
  0xc3   :  { %18856 = vst [vmem:[#allocation37_spill] sm:$0xff] %v10328_v10  ;;  %18857 = vst [vmem:[#allocation38_spill] sm:$0xff] %v10331_v11  ;;  %643 = vperm.xlu1 %8469, %v512_v6  }
  0xc4   :  { %640 = vperm.xlu0 %8468, %v511_v53   ;;  %v526_v53 = vld [vmem:[%s18241_s1 + $0x178] sm:$0xff] }
  0xc5   :  { %2695 = vmatmul.mubr.f32.gmra.mrb[92].mxu1 %v10134_v62  ;;  %v515_v62 = vld [vmem:[%s18241_s1 + $0x120] sm:$0xff] }
  0xc6   :  { %v10340_v37 = vpop.permute.xlu1 %201  ;;  %2700 = vmatprep.mubr.f32.mxu1 %v18248_v36  ;;  %v10343_v17 = vpop.permute.xlu0 %198 }
  0xc7   :  { %18858 = vst [vmem:[#allocation39_spill] sm:$0xff] %v10340_v37  ;;  %18859 = vst [vmem:[#allocation40_spill] sm:$0xff] %v10343_v17  ;;  %649 = vperm.xlu1 %8469, %v514_v14   ;;  %v10407_v14 = vrot.slane %v27_v50, %v997_v47 }
  0xc8   :  { %646 = vperm.xlu0 %8468, %v513_v57   ;;  %v525_v57 = vld [vmem:[%s18241_s1 + $0x170] sm:$0xff] }
  0xc9   :  { %2701 = vmatmul.mubr.f32.gmra.mrb[94].mxu1 %v10151_v4  ;;  %v517_v4 = vld [vmem:[%s18241_s1 + $0x130] sm:$0xff] }
  0xca   :  { %v10352_v21 = vpop.permute.xlu1 %207  ;;  %2771 = vmatprep.mubr.f32.mxu1 %v18248_v36 }
  0xcb   :  { %18860 = vst [vmem:[#allocation41_spill] sm:$0xff] %v10352_v21  ;;  %v10355_v55 = vpop.permute.xlu0 %204  ;;  %655 = vperm.xlu1 %8469, %v516_v46  }
  0xcc   :  { %18861 = vst [vmem:[#allocation42_spill] sm:$0xff] %v10355_v55  ;;  %652 = vperm.xlu0 %8468, %v515_v62  }
  0xce   :  { %v10363_v0 = vpop.permute.xlu1 %213 }
  0xcf   :  { %18862 = vst [vmem:[#allocation43_spill] sm:$0xff] %v10363_v0  ;;  %v10365_v28 = vpop.permute.xlu0 %210  ;;  %661 = vperm.xlu1 %8469, %v518_v24  }
  0xd0   :  { %18863 = vst [vmem:[#allocation44_spill] sm:$0xff] %v10365_v28  ;;  %658 = vperm.xlu0 %8468, %v517_v4  }
  0xd2   :  { %v10373_v35 = vpop.permute.xlu1 %219 }
  0xd3   :  { %18864 = vst [vmem:[#allocation45_spill] sm:$0xff] %v10373_v35  ;;  %v10375_v27 = vpop.permute.xlu0 %216  ;;  %667 = vperm.xlu1 %8469, %v520_v9   ;;  %v528_v9 = vld [vmem:[%s18241_s1 + $0x188] sm:$0xff] }
  0xd4   :  { %18865 = vst [vmem:[#allocation46_spill] sm:$0xff] %v10375_v27  ;;  %664 = vperm.xlu0 %8468, %v519_v18  }
  0xd6   :  { %v10386_v40 = vpop.permute.xlu1 %225 }
  0xd7   :  { %18867 = vst [vmem:[#allocation48_spill] sm:$0xff] %v10386_v40  ;;  %v10388_v51 = vpop.permute.xlu0 %222  ;;  %673 = vperm.xlu1 %8469, %v522_v41  }
  0xd8   :  { %18868 = vst [vmem:[#allocation49_spill] sm:$0xff] %v10388_v51  ;;  %670 = vperm.xlu0 %8468, %v521_v34  }
  0xda   :  { %v10397_v63 = vpop.permute.xlu1 %231 }
  0xdb   :  { %18869 = vst [vmem:[#allocation50_spill] sm:$0xff] %v10397_v63  ;;  %v10402_v6 = vpop.permute.xlu0 %228  ;;  %679 = vperm.xlu1 %8469, %v524_v43  }
  0xdc   :  { %18870 = vst [vmem:[#allocation51_spill] sm:$0xff] %v10402_v6  ;;  %676 = vperm.xlu0 %8468, %v523_v56   ;;  %v527_v56 = vld [vmem:[%s18241_s1 + $0x180] sm:$0xff] }
  0xde   :  { %v10412_v46 = vpop.permute.xlu1 %237 }
  0xdf   :  { %18871 = vst [vmem:[#allocation52_spill] sm:$0xff] %v10412_v46  ;;  %v10414_v62 = vpop.permute.xlu0 %234  ;;  %685 = vperm.xlu1 %8469, %v526_v53  }
  0xe0   :  { %18872 = vst [vmem:[#allocation53_spill] sm:$0xff] %v10414_v62  ;;  %v7924_v24 = vpop.f32.mrb[0].mxu1  ;;  %682 = vperm.xlu0 %8468, %v525_v57   ;;  %v7876_v4 = vpop.f32.mrb[0].mxu0 }
  0xe1   :  { %v10420_v18 = vadd.f32 %v7924_v24, %v10407_v14  ;;  %v10422_v41 = vpop.f32.mrb[1].mxu1  ;;  %v10425_v34 = vadd.f32 %v7876_v4, %v10407_v14  ;;  %v1258_v43 = vpop.f32.mrb[1].mxu0  ;;  %v530_v4 = vld [vmem:[%s18241_s1 + $0x198] sm:$0xff] }
  0xe2   :  { %v10431_v47 = vadd.f32 %v1258_v43, %v10407_v14  ;;  %v10433_v50 = vpop.permute.xlu1 %243 }
  0xe3   :  { %18873 = vst [vmem:[#allocation54_spill] sm:$0xff] %v10425_v34  ;;  %18875 = vst [vmem:[#allocation56_spill] sm:$0xff] %v10433_v50  ;;  %v10435_v53 = vpop.permute.xlu0 %240  ;;  %691 = vperm.xlu1 %8469, %v528_v9   ;;  %v529_v50 = vld [vmem:[%s18241_s1 + $0x190] sm:$0xff] }
  0xe4   :  { %18874 = vst [vmem:[#allocation55_spill] sm:$0xff] %v10431_v47  ;;  %18876 = vst [vmem:[#allocation57_spill] sm:$0xff] %v10435_v53  ;;  %v1577_v57 = vadd.f32 %v10425_v34, %v10431_v47  ;;  %v7879_v24 = vpop.f32.mrb[2].mxu0  ;;  %v7927_v36 = vpop.f32.mrb[2].mxu1  ;;  %688 = vperm.xlu0 %8468, %v527_v56  }
  0xe5   :  { %v10443_v31 = vadd.f32 %v7927_v36, %v10407_v14  ;;  %v1268_v43 = vpop.f32.mrb[3].mxu0  ;;  %v1428_v45 = vpop.f32.mrb[3].mxu1  ;;  %v10449_v9 = vadd.f32 %v7879_v24, %v10407_v14  ;;  %v532_v24 = vld [vmem:[%s18241_s1 + $0x1a8] sm:$0xff] }
  0xe6   :  { %v10452_v53 = vadd.f32 %v1268_v43, %v10407_v14  ;;  %v10455_v56 = vadd.f32 %v1428_v45, %v10407_v14  ;;  %v10457_v46 = vpop.permute.xlu1 %249 }
  0xe7   :  { %18877 = vst [vmem:[#allocation58_spill] sm:$0xff] %v10449_v9  ;;  %18879 = vst [vmem:[#allocation60_spill] sm:$0xff] %v10457_v46  ;;  %v10459_v62 = vpop.permute.xlu0 %246  ;;  %697 = vperm.xlu1 %8469, %v530_v4   ;;  %v531_v46 = vld [vmem:[%s18241_s1 + $0x1a0] sm:$0xff] }
  0xe8   :  { %18878 = vst [vmem:[#allocation59_spill] sm:$0xff] %v10452_v53  ;;  %18880 = vst [vmem:[#allocation61_spill] sm:$0xff] %v10459_v62  ;;  %v1578_v36 = vadd.f32 %v1577_v57, %v10452_v53  ;;  %v7882_v63 = vpop.f32.mrb[4].mxu0  ;;  %v7930_v6 = vpop.f32.mrb[4].mxu1  ;;  %694 = vperm.xlu0 %8468, %v529_v50  }
  0xe9   :  { %v10466_v43 = vadd.f32 %v7930_v6, %v10407_v14  ;;  %v1278_v40 = vpop.f32.mrb[5].mxu0  ;;  %v1438_v45 = vpop.f32.mrb[5].mxu1  ;;  %v10472_v4 = vadd.f32 %v7882_v63, %v10407_v14 }
  0xea   :  { %v10475_v57 = vadd.f32 %v1278_v40, %v10407_v14  ;;  %v1579_v50 = vadd.f32 %v1578_v36, %v10449_v9  ;;  %v10479_v62 = vadd.f32 %v1438_v45, %v10407_v14  ;;  %v10481_v51 = vpop.permute.xlu1 %255  ;;  %v534_v40 = vld [vmem:[%s18241_s1 + $0x1b8] sm:$0xff] }
  0xeb   :  { %18881 = vst [vmem:[#allocation62_spill] sm:$0xff] %v10466_v43  ;;  %18882 = vst [vmem:[#allocation63_spill] sm:$0xff] %v10472_v4  ;;  %v10483_v6 = vpop.permute.xlu0 %252  ;;  %703 = vperm.xlu1 %8469, %v532_v24  }
  0xec   :  { %18883 = vst [vmem:[#allocation64_spill] sm:$0xff] %v10475_v57  ;;  %18884 = vst [vmem:[#allocation65_spill] sm:$0xff] %v10479_v62  ;;  %v1580_v35 = vadd.f32 %v1579_v50, %v10475_v57  ;;  %v7885_v27 = vpop.f32.mrb[6].mxu0  ;;  %v7933_v0 = vpop.f32.mrb[6].mxu1  ;;  %700 = vperm.xlu0 %8468, %v531_v46  }
  0xed   :  { %18885 = vst [vmem:[#allocation66_spill] sm:$0xff] %v10481_v51  ;;  %18886 = vst [vmem:[#allocation67_spill] sm:$0xff] %v10483_v6  ;;  %v10490_v63 = vadd.f32 %v7933_v0, %v10407_v14  ;;  %v1288_v36 = vpop.f32.mrb[7].mxu0  ;;  %v1448_v45 = vpop.f32.mrb[7].mxu1  ;;  %v533_v51 = vld [vmem:[%s18241_s1 + $0x1b0] sm:$0xff]  ;;  %v10496_v24 = vadd.f32 %v7885_v27, %v10407_v14  ;;  %v536_v27 = vld [vmem:[%s18241_s1 + $0x1c8] sm:$0xff] }
  0xee   :  { %v10499_v50 = vadd.f32 %v1288_v36, %v10407_v14  ;;  %v1581_v46 = vadd.f32 %v1580_v35, %v10472_v4  ;;  %v10503_v6 = vadd.f32 %v1448_v45, %v10407_v14  ;;  %v10505_v28 = vpop.permute.xlu1 %261 }
  0xef   :  { %18887 = vst [vmem:[#allocation68_spill] sm:$0xff] %v10490_v63  ;;  %18888 = vst [vmem:[#allocation69_spill] sm:$0xff] %v10496_v24  ;;  %v10507_v0 = vpop.permute.xlu0 %258  ;;  %709 = vperm.xlu1 %8469, %v534_v40  }
  0xf0   :  { %18889 = vst [vmem:[#allocation70_spill] sm:$0xff] %v10499_v50  ;;  %18890 = vst [vmem:[#allocation71_spill] sm:$0xff] %v10503_v6  ;;  %v1582_v21 = vadd.f32 %v1581_v46, %v10499_v50  ;;  %v7888_v55 = vpop.f32.mrb[8].mxu0  ;;  %v7936_v37 = vpop.f32.mrb[8].mxu1  ;;  %706 = vperm.xlu0 %8468, %v533_v51  }
  0xf1   :  { %18891 = vst [vmem:[#allocation72_spill] sm:$0xff] %v10505_v28  ;;  %18892 = vst [vmem:[#allocation73_spill] sm:$0xff] %v10507_v0  ;;  %v10514_v36 = vadd.f32 %v7936_v37, %v10407_v14  ;;  %v1298_v35 = vpop.f32.mrb[9].mxu0  ;;  %v1458_v45 = vpop.f32.mrb[9].mxu1  ;;  %v535_v28 = vld [vmem:[%s18241_s1 + $0x1c0] sm:$0xff]  ;;  %v10520_v40 = vadd.f32 %v7888_v55, %v10407_v14  ;;  %v538_v55 = vld [vmem:[%s18241_s1 + $0x1d8] sm:$0xff] }
  0xf2   :  { %v10523_v46 = vadd.f32 %v1298_v35, %v10407_v14  ;;  %v1583_v51 = vadd.f32 %v1582_v21, %v10496_v24  ;;  %v10527_v0 = vadd.f32 %v1458_v45, %v10407_v14  ;;  %v10529_v17 = vpop.permute.xlu1 %267 }
  0xf3   :  { %18893 = vst [vmem:[#allocation74_spill] sm:$0xff] %v10514_v36  ;;  %18894 = vst [vmem:[#allocation75_spill] sm:$0xff] %v10520_v40  ;;  %v10531_v37 = vpop.permute.xlu0 %264  ;;  %715 = vperm.xlu1 %8469, %v536_v27  }
  0xf4   :  { %18895 = vst [vmem:[#allocation76_spill] sm:$0xff] %v10523_v46  ;;  %18896 = vst [vmem:[#allocation77_spill] sm:$0xff] %v10527_v0  ;;  %v1584_v10 = vadd.f32 %v1583_v51, %v10523_v46  ;;  %v7891_v11 = vpop.f32.mrb[10].mxu0  ;;  %v7939_v1 = vpop.f32.mrb[10].mxu1  ;;  %712 = vperm.xlu0 %8468, %v535_v28  }
  0xf5   :  { %18897 = vst [vmem:[#allocation78_spill] sm:$0xff] %v10529_v17  ;;  %18898 = vst [vmem:[#allocation79_spill] sm:$0xff] %v10531_v37  ;;  %v10538_v35 = vadd.f32 %v7939_v1, %v10407_v14  ;;  %v1308_v21 = vpop.f32.mrb[11].mxu0  ;;  %v1468_v45 = vpop.f32.mrb[11].mxu1  ;;  %v537_v17 = vld [vmem:[%s18241_s1 + $0x1d0] sm:$0xff]  ;;  %v10544_v27 = vadd.f32 %v7891_v11, %v10407_v14  ;;  %v540_v11 = vld [vmem:[%s18241_s1 + $0x1e8] sm:$0xff] }
  0xf6   :  { %v10547_v51 = vadd.f32 %v1308_v21, %v10407_v14  ;;  %v1585_v28 = vadd.f32 %v1584_v10, %v10520_v40  ;;  %v10551_v37 = vadd.f32 %v1468_v45, %v10407_v14  ;;  %v10553_v5 = vpop.permute.xlu1 %273 }
  0xf7   :  { %18899 = vst [vmem:[#allocation80_spill] sm:$0xff] %v10538_v35  ;;  %18900 = vst [vmem:[#allocation81_spill] sm:$0xff] %v10544_v27  ;;  %v10555_v1 = vpop.permute.xlu0 %270  ;;  %721 = vperm.xlu1 %8469, %v538_v55  }
  0xf8   :  { %18901 = vst [vmem:[#allocation82_spill] sm:$0xff] %v10547_v51  ;;  %18902 = vst [vmem:[#allocation83_spill] sm:$0xff] %v10551_v37  ;;  %v1586_v58 = vadd.f32 %v1585_v28, %v10547_v51  ;;  %v7894_v59 = vpop.f32.mrb[12].mxu0  ;;  %v7942_v52 = vpop.f32.mrb[12].mxu1  ;;  %718 = vperm.xlu0 %8468, %v537_v17  }
  0xf9   :  { %18903 = vst [vmem:[#allocation84_spill] sm:$0xff] %v10553_v5  ;;  %18904 = vst [vmem:[#allocation85_spill] sm:$0xff] %v10555_v1  ;;  %v10562_v21 = vadd.f32 %v7942_v52, %v10407_v14  ;;  %v1318_v10 = vpop.f32.mrb[13].mxu0  ;;  %v1478_v45 = vpop.f32.mrb[13].mxu1  ;;  %v539_v5 = vld [vmem:[%s18241_s1 + $0x1e0] sm:$0xff]  ;;  %v10568_v55 = vadd.f32 %v7894_v59, %v10407_v14  ;;  %v542_v59 = vld [vmem:[%s18241_s1 + $0x1f8] sm:$0xff] }
  0xfa   :  { %v10571_v28 = vadd.f32 %v1318_v10, %v10407_v14  ;;  %v1587_v17 = vadd.f32 %v1586_v58, %v10544_v27  ;;  %v10575_v1 = vadd.f32 %v1478_v45, %v10407_v14  ;;  %v10577_v54 = vpop.permute.xlu1 %279 }
  0xfb   :  { %18905 = vst [vmem:[#allocation86_spill] sm:$0xff] %v10568_v55  ;;  %18908 = vst [vmem:[#allocation89_spill] sm:$0xff] %v10577_v54  ;;  %v10579_v52 = vpop.permute.xlu0 %276  ;;  %727 = vperm.xlu1 %8469, %v540_v11   ;;  %v541_v54 = vld [vmem:[%s18241_s1 + $0x1f0] sm:$0xff] }
  0xfc   :  { %18906 = vst [vmem:[#allocation87_spill] sm:$0xff] %v10571_v28  ;;  %18907 = vst [vmem:[#allocation88_spill] sm:$0xff] %v10575_v1  ;;  %v1588_v48 = vadd.f32 %v1587_v17, %v10571_v28  ;;  %v7897_v49 = vpop.f32.mrb[14].mxu0  ;;  %v7945_v42 = vpop.f32.mrb[14].mxu1  ;;  %724 = vperm.xlu0 %8468, %v539_v5  }
  0xfd   :  { %18909 = vst [vmem:[#allocation90_spill] sm:$0xff] %v10579_v52  ;;  %v10586_v10 = vadd.f32 %v7945_v42, %v10407_v14  ;;  %v1328_v58 = vpop.f32.mrb[15].mxu0  ;;  %v1488_v45 = vpop.f32.mrb[15].mxu1  ;;  %v10592_v11 = vadd.f32 %v7897_v49, %v10407_v14 }
  0xfe   :  { %v10595_v17 = vadd.f32 %v1328_v58, %v10407_v14  ;;  %v1589_v5 = vadd.f32 %v1588_v48, %v10568_v55  ;;  %v10599_v52 = vadd.f32 %v1488_v45, %v10407_v14  ;;  %v10601_v44 = vpop.permute.xlu1 %285 }
  0xff   :  { %18910 = vst [vmem:[#allocation91_spill] sm:$0xff] %v10592_v11  ;;  %18912 = vst [vmem:[#allocation93_spill] sm:$0xff] %v10601_v44  ;;  %v10603_v42 = vpop.permute.xlu0 %282  ;;  %733 = vperm.xlu1 %8469, %v542_v59  }
 0x100   :  { %18911 = vst [vmem:[#allocation92_spill] sm:$0xff] %v10595_v17  ;;  %18913 = vst [vmem:[#allocation94_spill] sm:$0xff] %v10603_v42  ;;  %v1590_v38 = vadd.f32 %v1589_v5, %v10595_v17  ;;  %v7900_v39 = vpop.f32.mrb[16].mxu0  ;;  %v7948_v32 = vpop.f32.mrb[16].mxu1  ;;  %730 = vperm.xlu0 %8468, %v541_v54  }
 0x101   :  { %v10607_v49 = vadd.f32 %v7948_v32, %v10407_v14  ;;  %v1338_v58 = vpop.f32.mrb[17].mxu0  ;;  %v1498_v33 = vpop.f32.mrb[17].mxu1  ;;  %v10610_v48 = vadd.f32 %v7900_v39, %v10407_v14 }
 0x102   :  { %v10613_v45 = vadd.f32 %v1338_v58, %v10407_v14  ;;  %v1591_v44 = vadd.f32 %v1590_v38, %v10592_v11  ;;  %v10617_v59 = vadd.f32 %v1498_v33, %v10407_v14  ;;  %v10619_v5 = vpop.permute.xlu1 %547 }
 0x103   :  { %18914 = vst [vmem:[#allocation95_spill] sm:$0xff] %v10610_v48  ;;  %18916 = vst [vmem:[#allocation97_spill] sm:$0xff] %v10619_v5  ;;  %v10621_v42 = vpop.permute.xlu0 %544 }
 0x104   :  { %18915 = vst [vmem:[#allocation96_spill] sm:$0xff] %v10613_v45  ;;  %18917 = vst [vmem:[#allocation98_spill] sm:$0xff] %v10621_v42  ;;  %v1592_v32 = vadd.f32 %v1591_v44, %v10613_v45  ;;  %v7903_v54 = vpop.f32.mrb[18].mxu0  ;;  %v7951_v29 = vpop.f32.mrb[18].mxu1 }
 0x105   :  { %v10625_v17 = vadd.f32 %v7951_v29, %v10407_v14  ;;  %v1348_v39 = vpop.f32.mrb[19].mxu0  ;;  %v1508_v55 = vpop.f32.mrb[19].mxu1  ;;  %v10628_v58 = vadd.f32 %v7903_v54, %v10407_v14 }
 0x106   :  { %v10631_v38 = vadd.f32 %v1348_v39, %v10407_v14  ;;  %v1593_v33 = vadd.f32 %v1592_v32, %v10610_v48  ;;  %v10635_v11 = vadd.f32 %v1508_v55, %v10407_v14  ;;  %v10637_v30 = vpop.permute.xlu1 %553 }
 0x107   :  { %18918 = vst [vmem:[#allocation99_spill] sm:$0xff] %v10628_v58  ;;  %v10639_v44 = vpop.permute.xlu0 %550 }
 0x108   :  { %18919 = vst [vmem:[#allocation100_spill] sm:$0xff] %v10631_v38  ;;  %v1594_v29 = vadd.f32 %v1593_v33, %v10631_v38  ;;  %v7906_v45 = vpop.f32.mrb[20].mxu0  ;;  %v7954_v28 = vpop.f32.mrb[20].mxu1 }
 0x109   :  { %v10643_v27 = vadd.f32 %v7954_v28, %v10407_v14  ;;  %v1358_v54 = vpop.f32.mrb[21].mxu0  ;;  %v1518_v25 = vpop.f32.mrb[21].mxu1  ;;  %v10646_v39 = vadd.f32 %v7906_v45, %v10407_v14 }
 0x10a   :  { %v10649_v32 = vadd.f32 %v1358_v54, %v10407_v14  ;;  %v1595_v55 = vadd.f32 %v1594_v29, %v10628_v58  ;;  %v10653_v48 = vadd.f32 %v1518_v25, %v10407_v14  ;;  %v10655_v51 = vpop.permute.xlu1 %559 }
 0x10b   :  { %18920 = vst [vmem:[#allocation101_spill] sm:$0xff] %v10646_v39  ;;  %v10657_v33 = vpop.permute.xlu0 %556 }
 0x10c   :  { %18921 = vst [vmem:[#allocation102_spill] sm:$0xff] %v10649_v32  ;;  %v1596_v28 = vadd.f32 %v1595_v55, %v10649_v32  ;;  %v7909_v38 = vpop.f32.mrb[22].mxu0  ;;  %v7957_v40 = vpop.f32.mrb[22].mxu1 }
 0x10d   :  { %v10661_v46 = vadd.f32 %v7957_v40, %v10407_v14  ;;  %v1368_v45 = vpop.f32.mrb[23].mxu0  ;;  %v1528_v24 = vpop.f32.mrb[23].mxu1  ;;  %v10664_v54 = vadd.f32 %v7909_v38, %v10407_v14 }
 0x10e   :  { %v10667_v29 = vadd.f32 %v1368_v45, %v10407_v14  ;;  %v1597_v25 = vadd.f32 %v1596_v28, %v10646_v39  ;;  %v10671_v58 = vadd.f32 %v1528_v24, %v10407_v14  ;;  %v10673_v26 = vpop.permute.xlu1 %565 }
 0x10f   :  { %18922 = vst [vmem:[#allocation103_spill] sm:$0xff] %v10664_v54  ;;  %v10675_v55 = vpop.permute.xlu0 %562 }
 0x110   :  { %18923 = vst [vmem:[#allocation104_spill] sm:$0xff] %v10667_v29  ;;  %v1598_v40 = vadd.f32 %v1597_v25, %v10667_v29  ;;  %v7912_v32 = vpop.f32.mrb[24].mxu0  ;;  %v7960_v22 = vpop.f32.mrb[24].mxu1 }
 0x111   :  { %v10679_v50 = vadd.f32 %v7960_v22, %v10407_v14  ;;  %v1378_v38 = vpop.f32.mrb[25].mxu0  ;;  %v1538_v4 = vpop.f32.mrb[25].mxu1  ;;  %v10682_v45 = vadd.f32 %v7912_v32, %v10407_v14 }
 0x112   :  { %v10685_v28 = vadd.f32 %v1378_v38, %v10407_v14  ;;  %v1599_v24 = vadd.f32 %v1598_v40, %v10664_v54  ;;  %v10689_v39 = vadd.f32 %v1538_v4, %v10407_v14  ;;  %v10691_v23 = vpop.permute.xlu1 %571 }
 0x113   :  { %18924 = vst [vmem:[#allocation105_spill] sm:$0xff] %v10682_v45  ;;  %18926 = vst [vmem:[#allocation107_spill] sm:$0xff] %v10691_v23  ;;  %v10693_v25 = vpop.permute.xlu0 %568 }
 0x114   :  { %18925 = vst [vmem:[#allocation106_spill] sm:$0xff] %v10685_v28  ;;  %18927 = vst [vmem:[#allocation108_spill] sm:$0xff] %v10693_v25  ;;  %v1600_v22 = vadd.f32 %v1599_v24, %v10685_v28  ;;  %v7915_v29 = vpop.f32.mrb[26].mxu0  ;;  %v7963_v57 = vpop.f32.mrb[26].mxu1 }
 0x115   :  { %v10697_v9 = vadd.f32 %v7963_v57, %v10407_v14  ;;  %v1388_v32 = vpop.f32.mrb[27].mxu0  ;;  %v1548_v19 = vpop.f32.mrb[27].mxu1  ;;  %v10700_v38 = vadd.f32 %v7915_v29, %v10407_v14 }
 0x116   :  { %v10703_v40 = vadd.f32 %v1388_v32, %v10407_v14  ;;  %v1601_v4 = vadd.f32 %v1600_v22, %v10682_v45  ;;  %v10707_v54 = vadd.f32 %v1548_v19, %v10407_v14  ;;  %v10709_v53 = vpop.permute.xlu1 %577 }
 0x117   :  { %18928 = vst [vmem:[#allocation109_spill] sm:$0xff] %v10700_v38  ;;  %18930 = vst [vmem:[#allocation111_spill] sm:$0xff] %v10709_v53  ;;  %v10711_v24 = vpop.permute.xlu0 %574 }
 0x118   :  { %18929 = vst [vmem:[#allocation110_spill] sm:$0xff] %v10703_v40  ;;  %18931 = vst [vmem:[#allocation112_spill] sm:$0xff] %v10711_v24  ;;  %v1602_v57 = vadd.f32 %v1601_v4, %v10703_v40  ;;  %v7918_v28 = vpop.f32.mrb[28].mxu0  ;;  %v7966_v20 = vpop.f32.mrb[28].mxu1  ;;  %v18936_v40 = vlaneseq }
 0x119   :  { %v10715_v34 = vadd.f32 %v7966_v20, %v10407_v14  ;;  %v1398_v29 = vpop.f32.mrb[29].mxu0  ;;  %v1558_v47 = vpop.f32.mrb[29].mxu1  ;;  %v10718_v32 = vadd.f32 %v7918_v28, %v10407_v14 }
 0x11a   :  { %v10721_v22 = vadd.f32 %v1398_v29, %v10407_v14  ;;  %v1603_v19 = vadd.f32 %v1602_v57, %v10700_v38  ;;  %v10725_v45 = vadd.f32 %v1558_v47, %v10407_v14  ;;  %v10727_v15 = vpop.permute.xlu1 %583  ;;  %v10732_v20 = vand.u32 127, %v18936_v40 }
 0x11b   :  { %18932 = vst [vmem:[#allocation113_spill] sm:$0xff] %v10718_v32  ;;  %18934 = vst [vmem:[#allocation115_spill] sm:$0xff] %v10727_v15  ;;  %v10729_v4 = vpop.permute.xlu0 %580 }
 0x11c   :  { %18933 = vst [vmem:[#allocation114_spill] sm:$0xff] %v10721_v22  ;;  %18935 = vst [vmem:[#allocation116_spill] sm:$0xff] %v10729_v4  ;;  %v1604_v16 = vadd.f32 %v1603_v19, %v10721_v22  ;;  %v7921_v12 = vpop.f32.mrb[30].mxu0  ;;  %v7969_v28 = vpop.f32.mrb[30].mxu1  ;;  %vm735_vm1 = vcmp.eq.s32.totalorder %v10732_v20, %v10621_v42  ;;  %vm736_vm2 = vcmp.eq.s32.totalorder %v10732_v20, %v10619_v5 }
 0x11d   :  { %v10736_v13 = vadd.f32 %v7969_v28, %v10407_v14  ;;  %v1408_v29 = vpop.f32.mrb[31].mxu0  ;;  %v1568_v7 = vpop.f32.mrb[31].mxu1  ;;  %v10739_v57 = vadd.f32 %v7921_v12, %v10407_v14  ;;  %vm737_vm5 = vcmp.eq.s32.totalorder %v10732_v20, %v10639_v44  ;;  %vm738_vm7 = vcmp.eq.s32.totalorder %v10732_v20, %v10637_v30 }
 0x11e   :  { %v10742_v47 = vadd.f32 %v1408_v29, %v10407_v14  ;;  %v1605_v38 = vadd.f32 %v1604_v16, %v10718_v32  ;;  %v10746_v40 = vadd.f32 %v1568_v7, %v10407_v14  ;;  %v10748_v8 = vpop.permute.xlu1 %589  ;;  %v10757_v29 = vadd.f32 %v10422_v41, %v10407_v14 }
 0x11f   :  { %18937 = vst [vmem:[#allocation117_spill] sm:$0xff] %v10736_v13  ;;  %18938 = vst [vmem:[#allocation118_spill] sm:$0xff] %v10739_v57  ;;  %v10750_v19 = vpop.permute.xlu0 %586  ;;  %v18944_v32 = vmov 0.0   ;;  %vm739_vm9 = vcmp.eq.s32.totalorder %v10732_v20, %v10657_v33  ;;  %vm740_vm11 = vcmp.eq.s32.totalorder %v10732_v20, %v10655_v51  ;;  %vm741_vm13 = vcmp.eq.s32.totalorder %v10732_v20, %v10675_v55 }
 0x120   :  { %18939 = vst [vmem:[#allocation119_spill] sm:$0xff] %v10742_v47  ;;  %18940 = vst [vmem:[#allocation120_spill] sm:$0xff] %v10748_v8  ;;  %v1606_v28 = vadd.f32 %v1605_v38, %v10742_v47  ;;  %v2418_v22 = vpop.f32.mrb[32].mxu1  ;;  %v7318_v2 = vsel %vm735_vm1, 1.0, %v18944_v32  ;;  %vm742_vm15 = vcmp.eq.s32.totalorder %v10732_v20, %v10673_v26 }
 0x121   :  { %18941 = vst [vmem:[#allocation121_spill] sm:$0xff] %v10750_v19  ;;  %v2420_v12 = vpop.f32.mrb[33].mxu1  ;;  %18942 = vst [vmem:[#allocation122_spill] sm:$0xff] %v10757_v29 }
 0x122   :  { %v1607_v7 = vadd.f32 %v1606_v28, %v10739_v57  ;;  %v10762_v16 = vpop.permute.xlu1 %595  ;;  %v7319_v28 = vsel %vm736_vm2, 1.0, %v18944_v32 }
 0x123   :  { %18943 = vst [vmem:[#allocation123_spill] sm:$0xff] %v10762_v16  ;;  %vm18318_vm3 = vcmp.eq.s32.totalorder %v10732_v20, %v10762_v16  ;;  %v10770_v38 = vpop.permute.xlu0 %592 }
 0x124   :  { %18945 = vst [vmem:[#allocation124_spill] sm:$0xff] %v10770_v38  ;;  %v1608_v14 = vadd.f32 %v1607_v7, %v10757_v29  ;;  %vm18323_vm4 = vcmp.eq.s32.totalorder %v10732_v20, %v10770_v38  ;;  %v2424_v41 = vpop.f32.mrb[34].mxu1  ;;  %v7335_v57 = vsel %vm18318_vm3, 1.0, %v18944_v32 }
 0x125   :  { %v7334_v47 = vsel %vm18323_vm4, 1.0, %v18944_v32  ;;  %v8076_v7 = vpack.c.bf16 %v2424_v41, %v2418_v22  ;;  %v2426_v29 = vpop.f32.mrb[35].mxu1  ;;  %v8472_v61 = vpack.i.bf16 %v7319_v28, %v7335_v57  ;;  %v7320_v22 = vsel %vm737_vm5, 1.0, %v18944_v32 }
 0x126   :  { %v1609_v42 = vadd.f32 %v1608_v14, %v10420_v18  ;;  %v8470_v60 = vpack.i.bf16 %v7318_v2, %v7334_v47  ;;  %v8074_v5 = vpack.c.bf16 %v2426_v29, %v2420_v12  ;;  %v10790_v3 = vpop.permute.xlu1 %601  ;;  %v7321_v14 = vsel %vm738_vm7, 1.0, %v18944_v32 }
 0x127   :  { %18946 = vst [vmem:[#allocation125_spill] sm:$0xff] %v10790_v3  ;;  %v10792_v13 = vpop.permute.xlu0 %598  ;;  %vm18310_vm8 = vcmp.eq.s32.totalorder %v10732_v20, %v10790_v3 }
 0x128   :  { %18947 = vst [vmem:[#allocation126_spill] sm:$0xff] %v10792_v13  ;;  %v1610_v16 = vadd.f32 %v1609_v42, %v10455_v56  ;;  %vm18315_vm6 = vcmp.eq.s32.totalorder %v10732_v20, %v10792_v13  ;;  %v2430_v38 = vpop.f32.mrb[36].mxu1  ;;  %8075 = vmatprep.subr.bf16.mxu0 %v8074_v5  ;;  %8471 = vxpose.xlu0.b32.start [1/16] %v8470_v60, 128 }
 0x129   :  { %v7336_v2 = vsel %vm18315_vm6, 1.0, %v18944_v32  ;;  %v2432_v47 = vpop.f32.mrb[37].mxu1  ;;  %8077 = vmatpush1.bf16.msra.mxu0 %v8076_v7 }
 0x12a   :  { %v1611_v42 = vadd.f32 %v1610_v16, %v10443_v31  ;;  %v10810_v60 = vpop.permute.xlu1 %607  ;;  %v8474_v12 = vpack.i.bf16 %v7320_v22, %v7336_v2  ;;  %v7337_v16 = vsel %vm18310_vm8, 1.0, %v18944_v32 }
 0x12b   :  { %18948 = vst [vmem:[#allocation127_spill] sm:$0xff] %v10810_v60  ;;  %v10812_v5 = vpop.permute.xlu0 %604  ;;  %v8476_v13 = vpack.i.bf16 %v7321_v14, %v7337_v16  ;;  %vm18302_vm12 = vcmp.eq.s32.totalorder %v10732_v20, %v10810_v60 }
 0x12c   :  { %18949 = vst [vmem:[#allocation128_spill] sm:$0xff] %v10812_v5  ;;  %v1612_v57 = vadd.f32 %v1611_v42, %v10479_v62  ;;  %v2436_v29 = vpop.f32.mrb[38].mxu1  ;;  %8473 = vxpose.xlu0.b32.cont [2/16] %v8472_v61, 128  ;;  %vm18307_vm10 = vcmp.eq.s32.totalorder %v10732_v20, %v10812_v5  ;;  %v18976_v62 = vld [vmem:[#allocation5_spill] sm:$0xff] }
 0x12d   :  { %v8080_v41 = vpack.c.bf16 %v2436_v29, %v2430_v38  ;;  %v2438_v28 = vpop.f32.mrb[39].mxu1  ;;  %v7322_v38 = vsel %vm739_vm9, 1.0, %v18944_v32 }
 0x12e   :  { %v1613_v7 = vadd.f32 %v1612_v57, %v10466_v43  ;;  %v8078_v61 = vpack.c.bf16 %v2438_v28, %v2432_v47  ;;  %v10828_v22 = vpop.permute.xlu1 %613  ;;  %v7338_v47 = vsel %vm18307_vm10, 1.0, %v18944_v32  ;;  %v18973_v43 = vld [vmem:[#allocation8_spill] sm:$0xff] }
 0x12f   :  { %18950 = vst [vmem:[#allocation129_spill] sm:$0xff] %v10828_v22  ;;  %v10830_v2 = vpop.permute.xlu0 %610  ;;  %v8478_v28 = vpack.i.bf16 %v7322_v38, %v7338_v47  ;;  %vm18306_vm0 = vcmp.eq.s32.totalorder %v10732_v20, %v10828_v22 }
 0x130   :  { %18951 = vst [vmem:[#allocation130_spill] sm:$0xff] %v10830_v2  ;;  %v1614_v42 = vadd.f32 %v1613_v7, %v10503_v6  ;;  %v2442_v3 = vpop.f32.mrb[40].mxu1  ;;  %8079 = vmatprep.subr.bf16.mxu0 %v8078_v61  ;;  %8475 = vxpose.xlu0.b32.cont [3/16] %v8474_v12, 128  ;;  %v7339_v61 = vsel %vm18302_vm12, 1.0, %v18944_v32  ;;  %vm18301_vm14 = vcmp.eq.s32.totalorder %v10732_v20, %v10830_v2 }
 0x131   :  { %v2444_v57 = vpop.f32.mrb[41].mxu1  ;;  %8081 = vmatpush1.bf16.msra.mxu0 %v8080_v41  ;;  %v7323_v41 = vsel %vm740_vm11, 1.0, %v18944_v32 }
 0x132   :  { %v1615_v29 = vadd.f32 %v1614_v42, %v10490_v63  ;;  %v10846_v12 = vpop.permute.xlu1 %619  ;;  %v8480_v63 = vpack.i.bf16 %v7323_v41, %v7339_v61 }
 0x133   :  { %18952 = vst [vmem:[#allocation131_spill] sm:$0xff] %v10846_v12  ;;  %v10848_v14 = vpop.permute.xlu0 %616  ;;  %vm18314_vm10 = vcmp.eq.s32.totalorder %v10732_v20, %v10846_v12 }
 0x134   :  { %18953 = vst [vmem:[#allocation132_spill] sm:$0xff] %v10848_v14  ;;  %v1616_v16 = vadd.f32 %v1615_v29, %v10527_v0  ;;  %v2448_v7 = vpop.f32.mrb[42].mxu1  ;;  %8477 = vxpose.xlu0.b32.cont [4/16] %v8476_v13, 128  ;;  %vm18309_vm12 = vcmp.eq.s32.totalorder %v10732_v20, %v10848_v14 }
 0x135   :  { %v8084_v42 = vpack.c.bf16 %v2448_v7, %v2442_v3  ;;  %v2450_v5 = vpop.f32.mrb[43].mxu1  ;;  %v7324_v3 = vsel %vm741_vm13, 1.0, %v18944_v32 }
 0x136   :  { %v1617_v29 = vadd.f32 %v1616_v16, %v10514_v36  ;;  %v8082_v13 = vpack.c.bf16 %v2450_v5, %v2444_v57  ;;  %v10864_v38 = vpop.permute.xlu1 %625  ;;  %v7340_v5 = vsel %vm18301_vm14, 1.0, %v18944_v32  ;;  %vm743_vm14 = vcmp.eq.s32.totalorder %v10732_v20, %v10693_v25 }
 0x137   :  { %18954 = vst [vmem:[#allocation133_spill] sm:$0xff] %v10864_v38  ;;  %v10866_v47 = vpop.permute.xlu0 %622  ;;  %v8482_v61 = vpack.i.bf16 %v7324_v3, %v7340_v5  ;;  %vm18322_vm6 = vcmp.eq.s32.totalorder %v10732_v20, %v10864_v38 }
 0x138   :  { %18955 = vst [vmem:[#allocation134_spill] sm:$0xff] %v10866_v47  ;;  %v1618_v0 = vadd.f32 %v1617_v29, %v10551_v37  ;;  %v2454_v60 = vpop.f32.mrb[44].mxu1  ;;  %8083 = vmatprep.subr.bf16.mxu0 %v8082_v13  ;;  %8479 = vxpose.xlu0.b32.cont [5/16] %v8478_v28, 128  ;;  %vm18317_vm8 = vcmp.eq.s32.totalorder %v10732_v20, %v10866_v47 }
 0x139   :  { %v2456_v57 = vpop.f32.mrb[45].mxu1  ;;  %8085 = vmatpush1.bf16.msra.mxu0 %v8084_v42  ;;  %v7325_v42 = vsel %vm742_vm15, 1.0, %v18944_v32 }
 0x13a   :  { %v1619_v16 = vadd.f32 %v1618_v0, %v10538_v35  ;;  %v10882_v28 = vpop.permute.xlu1 %631  ;;  %v7341_v0 = vsel %vm18306_vm0, 1.0, %v18944_v32  ;;  %vm18396_vm0 = vcmp.eq.s32.totalorder %v10732_v20, %v10691_v23 }
 0x13b   :  { %18956 = vst [vmem:[#allocation135_spill] sm:$0xff] %v10882_v28  ;;  %v10884_v7 = vpop.permute.xlu0 %628  ;;  %v8484_v35 = vpack.i.bf16 %v7325_v42, %v7341_v0  ;;  %vm18330_vm4 = vcmp.eq.s32.totalorder %v10732_v20, %v10882_v28 }
 0x13c   :  { %18957 = vst [vmem:[#allocation136_spill] sm:$0xff] %v10884_v7  ;;  %v1620_v41 = vadd.f32 %v1619_v16, %v10575_v1  ;;  %v2460_v29 = vpop.f32.mrb[46].mxu1  ;;  %8481 = vxpose.xlu0.b32.cont [6/16] %v8480_v63, 128  ;;  %vm18326_vm3 = vcmp.eq.s32.totalorder %v10732_v20, %v10884_v7 }
 0x13d   :  { %v8088_v13 = vpack.c.bf16 %v2460_v29, %v2454_v60  ;;  %v2462_v2 = vpop.f32.mrb[47].mxu1  ;;  %v7326_v60 = vsel %vm743_vm14, 1.0, %v18944_v32 }
 0x13e   :  { %v1621_v16 = vadd.f32 %v1620_v41, %v10562_v21  ;;  %v8086_v63 = vpack.c.bf16 %v2462_v2, %v2456_v57  ;;  %v10900_v3 = vpop.permute.xlu1 %637  ;;  %v7342_v2 = vsel %vm18309_vm12, 1.0, %v18944_v32  ;;  %vm18395_vm12 = vcmp.eq.s32.totalorder %v10732_v20, %v10711_v24 }
 0x13f   :  { %18958 = vst [vmem:[#allocation137_spill] sm:$0xff] %v10900_v3  ;;  %v10902_v5 = vpop.permute.xlu0 %634  ;;  %v8486_v0 = vpack.i.bf16 %v7326_v60, %v7342_v2 }
 0x140   :  { %18959 = vst [vmem:[#allocation138_spill] sm:$0xff] %v10902_v5  ;;  %v1622_v1 = vadd.f32 %v1621_v16, %v10599_v52  ;;  %v2466_v22 = vpop.f32.mrb[48].mxu1  ;;  %8087 = vmatprep.subr.bf16.mxu0 %v8086_v63  ;;  %8483 = vxpose.xlu0.b32.cont [7/16] %v8482_v61, 128 }
 0x141   :  { %v2468_v57 = vpop.f32.mrb[49].mxu1  ;;  %8089 = vmatpush1.bf16.msra.mxu0 %v8088_v13  ;;  %v7327_v13 = vsel %vm18396_vm0, 1.0, %v18944_v32 }
 0x142   :  { %v1623_v41 = vadd.f32 %v1622_v1, %v10586_v10  ;;  %v10918_v61 = vpop.permute.xlu1 %643  ;;  %v7343_v1 = vsel %vm18314_vm10, 1.0, %v18944_v32  ;;  %vm18341_vm10 = vcmp.eq.s32.totalorder %v10732_v20, %v10709_v53 }
 0x143   :  { %18960 = vst [vmem:[#allocation139_spill] sm:$0xff] %v10918_v61  ;;  %v10920_v29 = vpop.permute.xlu0 %640  ;;  %v8488_v36 = vpack.i.bf16 %v7327_v13, %v7343_v1 }
 0x144   :  { %18961 = vst [vmem:[#allocation140_spill] sm:$0xff] %v10920_v29  ;;  %v1624_v42 = vadd.f32 %v1623_v41, %v10617_v59  ;;  %v2472_v16 = vpop.f32.mrb[50].mxu1  ;;  %8485 = vxpose.xlu0.b32.cont [8/16] %v8484_v35, 128 }
 0x145   :  { %v8092_v63 = vpack.c.bf16 %v2472_v16, %v2466_v22  ;;  %v2474_v14 = vpop.f32.mrb[51].mxu1  ;;  %v7328_v22 = vsel %vm18395_vm12, 1.0, %v18944_v32 }
 0x146   :  { %v1625_v41 = vadd.f32 %v1624_v42, %v10607_v49  ;;  %v8090_v35 = vpack.c.bf16 %v2474_v14, %v2468_v57  ;;  %v10936_v60 = vpop.permute.xlu1 %649  ;;  %v7344_v14 = vsel %vm18317_vm8, 1.0, %v18944_v32  ;;  %vm18327_vm8 = vcmp.eq.s32.totalorder %v10732_v20, %v10729_v4 }
 0x147   :  { %18962 = vst [vmem:[#allocation141_spill] sm:$0xff] %v10936_v60  ;;  %v10938_v2 = vpop.permute.xlu0 %646  ;;  %v8490_v1 = vpack.i.bf16 %v7328_v22, %v7344_v14 }
 0x148   :  { %18963 = vst [vmem:[#allocation142_spill] sm:$0xff] %v10938_v2  ;;  %v1626_v37 = vadd.f32 %v1625_v41, %v10635_v11  ;;  %v2478_v12 = vpop.f32.mrb[52].mxu1  ;;  %8091 = vmatprep.subr.bf16.mxu0 %v8090_v35  ;;  %8487 = vxpose.xlu0.b32.cont [9/16] %v8486_v0, 128 }
 0x149   :  { %v2480_v57 = vpop.f32.mrb[53].mxu1  ;;  %8093 = vmatpush1.bf16.msra.mxu0 %v8092_v63  ;;  %v7329_v63 = vsel %vm18341_vm10, 1.0, %v18944_v32 }
 0x14a   :  { %v1627_v42 = vadd.f32 %v1626_v37, %v10625_v17  ;;  %v10954_v0 = vpop.permute.xlu1 %655  ;;  %v7345_v37 = vsel %vm18322_vm6, 1.0, %v18944_v32  ;;  %vm18331_vm6 = vcmp.eq.s32.totalorder %v10732_v20, %v10727_v15 }
 0x14b   :  { %18964 = vst [vmem:[#allocation143_spill] sm:$0xff] %v10954_v0  ;;  %v10956_v16 = vpop.permute.xlu0 %652  ;;  %v8492_v24 = vpack.i.bf16 %v7329_v63, %v7345_v37 }
 0x14c   :  { %18965 = vst [vmem:[#allocation144_spill] sm:$0xff] %v10956_v16  ;;  %v1628_v13 = vadd.f32 %v1627_v42, %v10653_v48  ;;  %v2484_v41 = vpop.f32.mrb[54].mxu1  ;;  %8489 = vxpose.xlu0.b32.cont [10/16] %v8488_v36, 128 }
 0x14d   :  { %v8096_v35 = vpack.c.bf16 %v2484_v41, %v2478_v12  ;;  %v2486_v47 = vpop.f32.mrb[55].mxu1  ;;  %v7330_v12 = vsel %vm18327_vm8, 1.0, %v18944_v32  ;;  %vm18336_vm8 = vcmp.eq.s32.totalorder %v10732_v20, %v10902_v5 }
 0x14e   :  { %v1629_v42 = vadd.f32 %v1628_v13, %v10643_v27  ;;  %v8094_v36 = vpack.c.bf16 %v2486_v47, %v2480_v57  ;;  %v10972_v22 = vpop.permute.xlu1 %661  ;;  %v7346_v47 = vsel %vm18326_vm3, 1.0, %v18944_v32  ;;  %vm18340_vm3 = vcmp.eq.s32.totalorder %v10732_v20, %v10750_v19 }
 0x14f   :  { %18966 = vst [vmem:[#allocation145_spill] sm:$0xff] %v10972_v22  ;;  %v10974_v14 = vpop.permute.xlu0 %658  ;;  %v8494_v37 = vpack.i.bf16 %v7330_v12, %v7346_v47 }
 0x150   :  { %18967 = vst [vmem:[#allocation146_spill] sm:$0xff] %v10974_v14  ;;  %v1630_v53 = vadd.f32 %v1629_v42, %v10671_v58  ;;  %v2490_v38 = vpop.f32.mrb[56].mxu1  ;;  %8095 = vmatprep.subr.bf16.mxu0 %v8094_v36  ;;  %8491 = vxpose.xlu0.b32.cont [11/16] %v8490_v1, 128 }
 0x151   :  { %v2492_v57 = vpop.f32.mrb[57].mxu1  ;;  %8097 = vmatpush1.bf16.msra.mxu0 %v8096_v35  ;;  %v7331_v35 = vsel %vm18331_vm6, 1.0, %v18944_v32  ;;  %vm18338_vm6 = vcmp.eq.s32.totalorder %v10732_v20, %v10900_v3  ;;  %v18969_v3 = vld [vmem:[#allocation6_spill] sm:$0xff] }
 0x152   :  { %v1631_v13 = vadd.f32 %v1630_v53, %v10661_v46  ;;  %v10990_v1 = vpop.permute.xlu1 %667  ;;  %v7347_v53 = vsel %vm18330_vm4, 1.0, %v18944_v32  ;;  %vm18339_vm4 = vcmp.eq.s32.totalorder %v10732_v20, %v10748_v8 }
 0x153   :  { %v10992_v41 = vpop.permute.xlu0 %664  ;;  %v8496_v15 = vpack.i.bf16 %v7331_v35, %v7347_v53  ;;  %vm776_vm12 = vcmp.eq.s32.totalorder %v10732_v20, %v10990_v1 }
 0x154   :  { %18968 = vst [vmem:[#allocation147_spill] sm:$0xff] %v10992_v41  ;;  %v1632_v63 = vadd.f32 %v1631_v13, %v10689_v39  ;;  %v2496_v42 = vpop.f32.mrb[58].mxu1  ;;  %8493 = vxpose.xlu0.b32.cont [12/16] %v8492_v24, 128 }
 0x155   :  { %v8100_v36 = vpack.c.bf16 %v2496_v42, %v2490_v38  ;;  %v2498_v7 = vpop.f32.mrb[59].mxu1  ;;  %v7332_v38 = vsel %vm18340_vm3, 1.0, %v18944_v32 }
 0x156   :  { %v1633_v4 = vadd.f32 %v1632_v63, %v10679_v50  ;;  %v8098_v24 = vpack.c.bf16 %v2498_v7, %v2492_v57  ;;  %v11008_v12 = vpop.permute.xlu1 %673  ;;  %v7348_v7 = vsel %vm18336_vm8, 1.0, %v18944_v32  ;;  %vm18355_vm8 = vcmp.eq.s32.totalorder %v10732_v20, %v10920_v29 }
 0x157   :  { %v11010_v47 = vpop.permute.xlu0 %670  ;;  %v8498_v35 = vpack.i.bf16 %v7332_v38, %v7348_v7 }
 0x158   :  { %v1634_v13 = vadd.f32 %v1633_v4, %v10707_v54  ;;  %v2502_v28 = vpop.f32.mrb[60].mxu1  ;;  %8099 = vmatprep.subr.bf16.mxu0 %v8098_v24  ;;  %8495 = vxpose.xlu0.b32.cont [13/16] %v8494_v37, 128  ;;  %v7349_v24 = vsel %vm18338_vm6, 1.0, %v18944_v32  ;;  %vm287_vm6 = vcmp.eq.s32.totalorder %v10732_v20, %v18969_v3 }
 0x159   :  { %v2504_v57 = vpop.f32.mrb[61].mxu1  ;;  %8101 = vmatpush1.bf16.msra.mxu0 %v8100_v36  ;;  %v7333_v36 = vsel %vm18339_vm4, 1.0, %v18944_v32  ;;  %vm18354_vm4 = vcmp.eq.s32.totalorder %v10732_v20, %v10918_v61 }
 0x15a   :  { %v1635_v63 = vadd.f32 %v1634_v13, %v10697_v9  ;;  %v11026_v4 = vpop.permute.xlu1 %679  ;;  %v8500_v7 = vpack.i.bf16 %v7333_v36, %v7349_v24  ;;  %v7351_v36 = vsel %vm18354_vm4, 1.0, %v18944_v32  ;;  %vm18359_vm4 = vcmp.eq.s32.totalorder %v10732_v20, %v10938_v2 }
 0x15b   :  { %v11028_v37 = vpop.permute.xlu0 %676 }
 0x15c   :  { %v1636_v42 = vadd.f32 %v1635_v63, %v10725_v45  ;;  %v2508_v53 = vpop.f32.mrb[62].mxu1  ;;  %8497 = vxpose.xlu0.b32.cont [14/16] %v8496_v15, 128 }
 0x15d   :  { %v8104_v13 = vpack.c.bf16 %v2508_v53, %v2502_v28  ;;  %v2510_v5 = vpop.f32.mrb[63].mxu1 }
 0x15e   :  { %v1637_v19 = vadd.f32 %v1636_v42, %v10715_v34  ;;  %v8102_v23 = vpack.c.bf16 %v2510_v5, %v2504_v57  ;;  %v11040_v6 = vpop.permute.xlu1 %685  ;;  %v18970_v42 = vld [vmem:[#allocation117_spill] sm:$0xff] }
 0x15f   :  { %v11042_v38 = vpop.permute.xlu0 %682 }
 0x160   :  { %v1638_v15 = vadd.f32 %v1637_v19, %v10746_v40  ;;  %8103 = vmatprep.subr.bf16.mxu0 %v8102_v23  ;;  %8499 = vxpose.xlu0.b32.cont [15/16] %v8498_v35, 128  ;;  %v2612_v63 = vpop.f32.mrb[64].mxu1  ;;  %v7350_v19 = vsel %vm18355_vm8, 1.0, %v18944_v32  ;;  %v18342_v35 = vmov 1.0  }
 0x161   :  { %8105 = vmatpush1.bf16.msra.mxu0 %v8104_v13  ;;  %v2614_v28 = vpop.f32.mrb[65].mxu1 }
 0x162   :  { %v1639_v5 = vadd.f32 %v1638_v15, %v18970_v42  ;;  %v11052_v57 = vpop.permute.xlu1 %691 }
 0x163   :  { %18971 = vst [vmem:[#allocation6_spill] sm:$0xff] %v11052_v57  ;;  %vm18349_vm3 = vcmp.eq.s32.totalorder %v10732_v20, %v11052_v57  ;;  %v11060_v23 = vpop.permute.xlu0 %688  ;;  %v18975_v57 = vmov 1.0  }
 0x164   :  { %18972 = vst [vmem:[#allocation117_spill] sm:$0xff] %v11060_v23  ;;  %v1640_v3 = vrot.slane %v1639_v5, 4  ;;  %vm18353_vm10 = vcmp.eq.s32.totalorder %v10732_v20, %v11060_v23  ;;  %7542 = vmatmul.mubr.msk.f32.vlgmr.msra.gmra.mrb[32].mxu0 %vm287_vm6, %v18342_v35  ;;  %8501 = vxpose.xlu0.b32.end [16/16] %v8500_v7, 128  ;;  %v2618_v53 = vpop.f32.mrb[66].mxu1  ;;  %v7367_v24 = vsel %vm18349_vm3, 1.0, %v18944_v32  ;;  %vm288_vm6 = vcmp.eq.s32.totalorder %v10732_v20, %v18973_v43 }
 0x165   :  { %v7366_v13 = vsel %vm18353_vm10, 1.0, %v18944_v32  ;;  %3226 = vmatprep.mubr.f32.mxu0 %v18944_v32  ;;  %v8044_v15 = vpack.c.bf16 %v2618_v53, %v2612_v63  ;;  %v2620_v7 = vpop.f32.mrb[67].mxu1  ;;  %v8584_v25 = vpack.i.bf16 %v7351_v36, %v7367_v24  ;;  %vm289_vm10 = vcmp.eq.s32.totalorder %v10732_v20, %v18976_v62 }
 0x166   :  { %v1641_v35 = vadd.f32 %v1640_v3, %v1639_v5  ;;  %v8582_v29 = vpack.i.bf16 %v7350_v19, %v7366_v13  ;;  %v8042_v8 = vpack.c.bf16 %v2620_v7, %v2614_v28  ;;  %v11090_v43 = vpop.permute.xlu1 %697  ;;  %v7352_v5 = vsel %vm18359_vm4, 1.0, %v18944_v32  ;;  %v18979_v13 = vld [vmem:[#allocation7_spill] sm:$0xff] }
 0x167   :  { %v11080_v61 = vpop.permute.xlu0 %694  ;;  %18977 = vst [vmem:[#allocation5_spill] sm:$0xff] %v11090_v43  ;;  %vm18358_vm8 = vcmp.eq.s32.totalorder %v10732_v20, %v11090_v43 }
 0x168   :  { %18974 = vst [vmem:[#allocation8_spill] sm:$0xff] %v11080_v61  ;;  %vm18356_vm3 = vcmp.eq.s32.totalorder %v10732_v20, %v11080_v61  ;;  %8583 = vxpose.xlu1.b32.start [1/16] %v8582_v29, 128  ;;  %7543 = vmatmul.mubr.msk.f32.gmra.mrb[34].mxu0 %vm288_vm6, %v18975_v57  ;;  %v2624_v23 = vpop.f32.mrb[68].mxu1  ;;  %v1642_v63 = vrot.slane %v1641_v35, 2  ;;  %vm18357_vm6 = vcmp.eq.s32.totalorder %v10732_v20, %v10936_v60 }
 0x169   :  { %3232 = vmatprep.mubr.f32.mxu0 %v18944_v32  ;;  %v2626_v28 = vpop.f32.mrb[69].mxu1  ;;  %8043 = vmatprep.subr.bf16.mxu1 %v8042_v8  ;;  %v7368_v29 = vsel %vm18356_vm3, 1.0, %v18944_v32  ;;  %vm290_vm3 = vcmp.eq.s32.totalorder %v10732_v20, %v18979_v13 }
 0x16a   :  { %8045 = vmatpush1.bf16.msra.mxu1 %v8044_v15  ;;  %v1643_v62 = vadd.f32 %v1642_v63, %v1641_v35  ;;  %v8586_v36 = vpack.i.bf16 %v7352_v5, %v7368_v29  ;;  %v7369_v35 = vsel %vm18358_vm8, 1.0, %v18944_v32  ;;  %v11123_v7 = vpop.permute.xlu1 %703  ;;  %vm18372_vm8 = vcmp.eq.s32.totalorder %v10732_v20, %v10954_v0  ;;  %v19008_v0 = vld [vmem:[#allocation54_spill] sm:$0xff] }
 0x16b   :  { %v11105_v19 = vpop.permute.xlu0 %700  ;;  %18980 = vst [vmem:[#allocation7_spill] sm:$0xff] %v11123_v7  ;;  %vm18362_vm4 = vcmp.eq.s32.totalorder %v10732_v20, %v11123_v7  ;;  %v7355_v13 = vsel %vm18372_vm8, 1.0, %v18944_v32  ;;  %v18984_v7 = vld [vmem:[#allocation11_spill] sm:$0xff] }
 0x16c   :  { %8585 = vxpose.xlu1.b32.cont [2/16] %v8584_v25, 128  ;;  %7544 = vmatmul.mubr.msk.f32.gmra.mrb[36].mxu0 %vm289_vm10, %v18975_v57  ;;  %v2630_v8 = vpop.f32.mrb[70].mxu1  ;;  %18978 = vst [vmem:[#allocation148_spill] sm:$0xff] %v11105_v19  ;;  %v7353_v25 = vsel %vm18357_vm6, 1.0, %v18944_v32  ;;  %vm18360_vm10 = vcmp.eq.s32.totalorder %v10732_v20, %v11105_v19  ;;  %v1644_v15 = vrot.slane %v1643_v62, 1  ;;  %vm18376_vm6 = vcmp.eq.s32.totalorder %v10732_v20, %v10956_v16 }
 0x16d   :  { %3238 = vmatprep.mubr.f32.mxu0 %v18944_v32  ;;  %v8048_v3 = vpack.c.bf16 %v2630_v8, %v2624_v23  ;;  %v2632_v53 = vpop.f32.mrb[71].mxu1  ;;  %v7370_v29 = vsel %vm18360_vm10, 1.0, %v18944_v32  ;;  %v18981_v8 = vld [vmem:[#allocation10_spill] sm:$0xff] }
 0x16e   :  { %v8046_v24 = vpack.c.bf16 %v2632_v53, %v2626_v28  ;;  %v8588_v28 = vpack.i.bf16 %v7353_v25, %v7369_v35  ;;  %v1645_v53 = vadd.f32 %v1644_v15, %v1643_v62  ;;  %v7371_v62 = vsel %vm18362_vm4, 1.0, %v18944_v32  ;;  %v18982_v25 = vld [vmem:[#allocation9_spill] sm:$0xff]  ;;  %v11289_v60 = vpop.permute.xlu1 %709 }
 0x16f   :  { %vm292_vm10 = vcmp.eq.s32.totalorder %v10732_v20, %v18982_v25  ;;  %vm294_vm4 = vcmp.eq.s32.totalorder %v10732_v20, %v18984_v7  ;;  %v11275_v19 = vpop.permute.xlu0 %706  ;;  %19010 = vst [vmem:[#allocation54_spill] sm:$0xff] %v11289_v60  ;;  %vm18388_vm8 = vcmp.eq.s32.totalorder %v10732_v20, %v11289_v60 }
 0x170   :  { %8587 = vxpose.xlu1.b32.cont [3/16] %v8586_v36, 128  ;;  %7545 = vmatmul.mubr.msk.f32.gmra.mrb[38].mxu0 %vm290_vm3, %v18975_v57  ;;  %v11121_v23 = vpop.f32.mrb[72].mxu1  ;;  %vm291_vm3 = vcmp.eq.s32.totalorder %v10732_v20, %v18981_v8  ;;  %v11162_v15 = vmul.f32 0.001953125, %v1645_v53  ;;  %v18983_v8 = vld [vmem:[#allocation12_spill] sm:$0xff] }
 0x171   :  { %3244 = vmatprep.mubr.f32.mxu0 %v18944_v32  ;;  %v11126_v63 = vpop.f32.mrb[73].mxu1  ;;  %8047 = vmatprep.subr.bf16.mxu1 %v8046_v24 }
 0x172   :  { %8049 = vmatpush1.bf16.msra.mxu1 %v8048_v3  ;;  %v7354_v3 = vsel %vm18376_vm6, 1.0, %v18944_v32  ;;  %v11176_v53 = vsub.f32 %v10562_v21, %v11162_v15  ;;  %v11191_v25 = vsub.f32 %v10617_v59, %v11162_v15  ;;  %v11195_v21 = vsub.f32 %v10607_v49, %v11162_v15 }
 0x173   :  { %v8590_v24 = vpack.i.bf16 %v7354_v3, %v7370_v29  ;;  %v8592_v29 = vpack.i.bf16 %v7355_v13, %v7371_v62  ;;  %v11184_v13 = vsub.f32 %v10586_v10, %v11162_v15  ;;  %v11203_v10 = vsub.f32 %v10625_v17, %v11162_v15 }
 0x174   :  { %8589 = vxpose.xlu1.b32.cont [4/16] %v8588_v28, 128  ;;  %v11140_v5 = vpop.f32.mrb[74].mxu1  ;;  %7546 = vmatmul.mubr.msk.f32.gmra.mrb[40].mxu0 %vm291_vm3, %v18975_v57  ;;  %vm293_vm3 = vcmp.eq.s32.totalorder %v10732_v20, %v18983_v8  ;;  %18987 = vst [vmem:[#allocation12_spill] sm:$0xff] %v11191_v25  ;;  %18988 = vst [vmem:[#allocation11_spill] sm:$0xff] %v11195_v21  ;;  %v11212_v59 = vsub.f32 %v10643_v27, %v11162_v15 }
 0x175   :  { %v11147_v36 = vpop.f32.mrb[75].mxu1  ;;  %3250 = vmatprep.mubr.f32.mxu0 %v18944_v32  ;;  %18986 = vst [vmem:[#allocation9_spill] sm:$0xff] %v11184_v13  ;;  %18990 = vst [vmem:[#allocation150_spill] sm:$0xff] %v11203_v10  ;;  %v11216_v49 = vsub.f32 %v10671_v58, %v11162_v15  ;;  %v11224_v17 = vsub.f32 %v10689_v39, %v11162_v15  ;;  %v11232_v27 = vsub.f32 %v10707_v54, %v11162_v15 }
 0x176   :  { %18992 = vst [vmem:[#allocation152_spill] sm:$0xff] %v11212_v59  ;;  %v11236_v58 = vsub.f32 %v10697_v9, %v11162_v15  ;;  %v11246_v39 = vsub.f32 %v10715_v34, %v11162_v15  ;;  %v11254_v54 = vsub.f32 %v18970_v42, %v11162_v15  ;;  %v19004_v42 = vld [vmem:[#allocation13_spill] sm:$0xff]  ;;  %v11286_v16 = vsub.f32 %v19008_v0, %v11162_v15  ;;  %v19012_v0 = vld [vmem:[#allocation59_spill] sm:$0xff] }
 0x177   :  { %18993 = vst [vmem:[#allocation153_spill] sm:$0xff] %v11216_v49  ;;  %18995 = vst [vmem:[#allocation155_spill] sm:$0xff] %v11224_v17  ;;  %vm18392_vm6 = vcmp.eq.s32.totalorder %v10732_v20, %v10972_v22  ;;  %v19024_v59 = vld [vmem:[#allocation17_spill] sm:$0xff] }
 0x178   :  { %8591 = vxpose.xlu1.b32.cont [5/16] %v8590_v24, 128  ;;  %v11160_v35 = vpop.f32.mrb[76].mxu1  ;;  %7547 = vmatmul.mubr.msk.f32.gmra.mrb[42].mxu0 %vm292_vm10, %v18975_v57  ;;  %v11180_v24 = vsub.f32 %v10599_v52, %v11162_v15  ;;  %v11199_v52 = vsub.f32 %v10635_v11, %v11162_v15  ;;  %v11220_v11 = vsub.f32 %v10661_v46, %v11162_v15  ;;  %v7357_v60 = vsel %vm18392_vm6, 1.0, %v18944_v32 }
 0x179   :  { %v11165_v28 = vpop.f32.mrb[77].mxu1  ;;  %3256 = vmatprep.mubr.f32.mxu0 %v18944_v32  ;;  %18997 = vst [vmem:[#allocation157_spill] sm:$0xff] %v11232_v27  ;;  %18998 = vst [vmem:[#allocation158_spill] sm:$0xff] %v11236_v58  ;;  %v11242_v46 = vsub.f32 %v10725_v45, %v11162_v15  ;;  %v19003_v45 = vld [vmem:[#allocation14_spill] sm:$0xff]  ;;  %v19018_v27 = vld [vmem:[#allocation64_spill] sm:$0xff]  ;;  %vm300_vm6 = vcmp.eq.s32.totalorder %v10732_v20, %v19024_v59 }
 0x17a   :  { %18985 = vst [vmem:[#allocation10_spill] sm:$0xff] %v11180_v24  ;;  %18989 = vst [vmem:[#allocation149_spill] sm:$0xff] %v11199_v52  ;;  %vm295_vm10 = vcmp.eq.s32.totalorder %v10732_v20, %v19003_v45  ;;  %v19006_v45 = vld [vmem:[#allocation55_spill] sm:$0xff] }
 0x17b   :  { %18994 = vst [vmem:[#allocation154_spill] sm:$0xff] %v11220_v11  ;;  %18999 = vst [vmem:[#allocation159_spill] sm:$0xff] %v11242_v46  ;;  %v11282_v61 = vsub.f32 %v19006_v45, %v11162_v15  ;;  %v19014_v46 = vld [vmem:[#allocation15_spill] sm:$0xff] }
 0x17c   :  { %8593 = vxpose.xlu1.b32.cont [6/16] %v8592_v29, 128  ;;  %v11170_v3 = vpop.f32.mrb[78].mxu1  ;;  %7548 = vmatmul.mubr.msk.f32.gmra.mrb[44].mxu0 %vm293_vm3, %v18975_v57  ;;  %v11208_v29 = vsub.f32 %v10653_v48, %v11162_v15  ;;  %v11228_v48 = vsub.f32 %v10679_v50, %v11162_v15  ;;  %19000 = vst [vmem:[#allocation160_spill] sm:$0xff] %v11246_v39  ;;  %19002 = vst [vmem:[#allocation162_spill] sm:$0xff] %v11254_v54 }
 0x17d   :  { %v11187_v62 = vpop.f32.mrb[79].mxu1  ;;  %3262 = vmatprep.mubr.f32.mxu0 %v18944_v32  ;;  %v11250_v50 = vsub.f32 %v10746_v40, %v11162_v15  ;;  %vm296_vm3 = vcmp.eq.s32.totalorder %v10732_v20, %v19004_v42  ;;  %19005 = vst [vmem:[#allocation14_spill] sm:$0xff] %v11275_v19  ;;  %19007 = vst [vmem:[#allocation13_spill] sm:$0xff] %v11282_v61  ;;  %v19011_v42 = vld [vmem:[#allocation16_spill] sm:$0xff]  ;;  %v11304_v54 = vsub.f32 %v19012_v0, %v11162_v15  ;;  %v19015_v0 = vld [vmem:[#allocation58_spill] sm:$0xff] }
 0x17e   :  { %18991 = vst [vmem:[#allocation151_spill] sm:$0xff] %v11208_v29  ;;  %18996 = vst [vmem:[#allocation156_spill] sm:$0xff] %v11228_v48  ;;  %v11321_v58 = vsub.f32 %v19015_v0, %v11162_v15  ;;  %v11342_v48 = vsub.f32 %v19018_v27, %v11162_v15  ;;  %v11355_v27 = vpop.permute.xlu1 %715  ;;  %v19025_v29 = vld [vmem:[#allocation20_spill] sm:$0xff] }
 0x17f   :  { %19001 = vst [vmem:[#allocation161_spill] sm:$0xff] %v11250_v50  ;;  %19009 = vst [vmem:[#allocation55_spill] sm:$0xff] %v11286_v16  ;;  %v1711_v50 = vmul.f32 %v11282_v61, %v11282_v61  ;;  %v1713_v17 = vmul.f32 %v11304_v54, %v11304_v54  ;;  %vm18406_vm0 = vcmp.eq.s32.totalorder %v10732_v20, %v11355_v27 }
 0x180   :  { %v11238_v8 = vpop.f32.mrb[80].mxu1  ;;  %7549 = vmatmul.mubr.msk.f32.gmra.mrb[46].mxu0 %vm294_vm4, %v18975_v57  ;;  %vm297_vm4 = vcmp.eq.s32.totalorder %v10732_v20, %v19011_v42  ;;  %19013 = vst [vmem:[#allocation16_spill] sm:$0xff] %v11304_v54  ;;  %v1712_v42 = vmul.f32 %v11286_v16, %v11286_v16  ;;  %19016 = vst [vmem:[#allocation59_spill] sm:$0xff] %v11321_v58  ;;  %v11325_v16 = vpop.permute.xlu0 %712 }
 0x181   :  { %v11260_v9 = vpop.f32.mrb[81].mxu1  ;;  %3268 = vmatprep.mubr.f32.mxu0 %v18944_v32  ;;  %19017 = vst [vmem:[#allocation15_spill] sm:$0xff] %v11325_v16  ;;  %19019 = vst [vmem:[#allocation58_spill] sm:$0xff] %v11342_v48 }
 0x182   :  { %v1775_v11 = vadd.f32 %v1712_v42, %v1711_v50  ;;  %v19023_v50 = vld [vmem:[#allocation70_spill] sm:$0xff]  ;;  %v1714_v42 = vmul.f32 %v11321_v58, %v11321_v58  ;;  %v19027_v58 = vld [vmem:[#allocation76_spill] sm:$0xff] }
 0x183   :  { %v11395_v10 = vsub.f32 %v19027_v58, %v11162_v15  ;;  %v8052_v58 = vpack.c.bf16 %v11140_v5, %v11121_v23 }
 0x184   :  { %v11265_v34 = vpop.f32.mrb[82].mxu1  ;;  %7550 = vmatmul.mubr.msk.f32.gmra.mrb[48].mxu0 %vm295_vm10, %v18975_v57  ;;  %vm18386_vm10 = vcmp.eq.s32.totalorder %v10732_v20, %v11275_v19  ;;  %v1776_v22 = vadd.f32 %v1775_v11, %v1713_v17  ;;  %v1715_v11 = vmul.f32 %v11342_v48, %v11342_v48  ;;  %v11417_v25 = vpop.permute.xlu0 %718 }
 0x185   :  { %v11268_v40 = vpop.f32.mrb[83].mxu1  ;;  %3274 = vmatprep.mubr.f32.mxu0 %v18944_v32  ;;  %v7372_v39 = vsel %vm18386_vm10, 1.0, %v18944_v32 }
 0x188   :  { %v11273_v7 = vpop.f32.mrb[84].mxu1  ;;  %7551 = vmatmul.mubr.msk.f32.gmra.mrb[50].mxu0 %vm296_vm3, %v18975_v57  ;;  %vm18394_vm3 = vcmp.eq.s32.totalorder %v10732_v20, %v10974_v14  ;;  %v19020_v14 = vld [vmem:[#allocation18_spill] sm:$0xff] }
 0x189   :  { %v11278_v43 = vpop.f32.mrb[85].mxu1  ;;  %3280 = vmatprep.mubr.f32.mxu0 %v18944_v32  ;;  %v7356_v19 = vsel %vm18394_vm3, 1.0, %v18944_v32  ;;  %vm299_vm10 = vcmp.eq.s32.totalorder %v10732_v20, %v19020_v14  ;;  %v11365_v14 = vsub.f32 %v19023_v50, %v11162_v15  ;;  %vm301_vm3 = vcmp.eq.s32.totalorder %v10732_v20, %v19025_v29 }
 0x18a   :  { %v8594_v49 = vpack.i.bf16 %v7356_v19, %v7372_v39  ;;  %v19021_v19 = vld [vmem:[#allocation63_spill] sm:$0xff] }
 0x18b   :  { %v11361_v39 = vsub.f32 %v19021_v19, %v11162_v15 }
 0x18c   :  { %v11295_v2 = vpop.f32.mrb[86].mxu1  ;;  %7552 = vmatmul.mubr.msk.f32.gmra.mrb[52].mxu0 %vm297_vm4, %v18975_v57  ;;  %vm298_vm4 = vcmp.eq.s32.totalorder %v10732_v20, %v19014_v46  ;;  %v7373_v46 = vsel %vm18388_vm8, 1.0, %v18944_v32  ;;  %vm18407_vm8 = vcmp.eq.s32.totalorder %v10732_v20, %v11325_v16  ;;  %8595 = vxpose.xlu1.b32.cont [7/16] %v8594_v49, 128  ;;  %v1777_v49 = vadd.f32 %v1776_v22, %v1714_v42  ;;  %v19028_v22 = vld [vmem:[#allocation75_spill] sm:$0xff] }
 0x18d   :  { %v11300_v45 = vpop.f32.mrb[87].mxu1  ;;  %3286 = vmatprep.mubr.f32.mxu0 %v18944_v32  ;;  %19022 = vst [vmem:[#allocation64_spill] sm:$0xff] %v11361_v39  ;;  %v8596_v19 = vpack.i.bf16 %v7357_v60, %v7373_v46  ;;  %v7374_v17 = vsel %vm18407_vm8, 1.0, %v18944_v32  ;;  %v19026_v60 = vld [vmem:[#allocation69_spill] sm:$0xff]  ;;  %v11399_v42 = vsub.f32 %v19028_v22, %v11162_v15  ;;  %v1716_v48 = vmul.f32 %v11361_v39, %v11361_v39 }
 0x18e   :  { %v11391_v46 = vsub.f32 %v19026_v60, %v11162_v15  ;;  %v1717_v60 = vmul.f32 %v11365_v14, %v11365_v14  ;;  %v1778_v52 = vadd.f32 %v1777_v49, %v1715_v11  ;;  %v7375_v22 = vsel %vm18406_vm0, 1.0, %v18944_v32 }
 0x18f   :  { %v8050_v39 = vpack.c.bf16 %v11147_v36, %v11126_v63  ;;  %v8056_v11 = vpack.c.bf16 %v11170_v3, %v11160_v35  ;;  %v8058_v63 = vpack.c.bf16 %v11268_v40, %v11260_v9  ;;  %v8064_v36 = vpack.c.bf16 %v11295_v2, %v11273_v7  ;;  %v11460_v9 = vpop.permute.xlu1 %721 }
 0x190   :  { %v11327_v61 = vpop.f32.mrb[88].mxu1  ;;  %7553 = vmatmul.mubr.msk.f32.gmra.mrb[54].mxu0 %vm298_vm4, %v18975_v57  ;;  %vm775_vm4 = vcmp.eq.s32.totalorder %v10732_v20, %v10992_v41  ;;  %8597 = vxpose.xlu1.b32.cont [8/16] %v8596_v19, 128  ;;  %v1779_v5 = vadd.f32 %v1778_v52, %v1716_v48  ;;  %v8054_v19 = vpack.c.bf16 %v11187_v62, %v11165_v28  ;;  %v19029_v48 = vld [vmem:[#allocation82_spill] sm:$0xff] }
 0x191   :  { %v11338_v0 = vpop.f32.mrb[89].mxu1  ;;  %3292 = vmatprep.mubr.f32.mxu0 %v18944_v32  ;;  %v7358_v16 = vsel %vm775_vm4, 1.0, %v18944_v32  ;;  %8051 = vmatprep.subr.bf16.mxu1 %v8050_v39  ;;  %v8062_v35 = vpack.c.bf16 %v11300_v45, %v11278_v43  ;;  %v1718_v62 = vmul.f32 %v11391_v46, %v11391_v46  ;;  %v11452_v43 = vsub.f32 %v19029_v48, %v11162_v15 }
 0x192   :  { %v8598_v41 = vpack.i.bf16 %v7358_v16, %v7374_v17  ;;  %v8060_v16 = vpack.c.bf16 %v11265_v34, %v11238_v8  ;;  %v1780_v52 = vadd.f32 %v1779_v5, %v1717_v60  ;;  %8053 = vmatpush1.bf16.msra.mxu1 %v8052_v58  ;;  %v7359_v8 = vsel %vm776_vm12, 1.0, %v18944_v32  ;;  %v19030_v17 = vld [vmem:[#allocation19_spill] sm:$0xff]  ;;  %v19031_v60 = vld [vmem:[#allocation81_spill] sm:$0xff] }
 0x193   :  { %8055 = vmatprep.subr.bf16.mxu1 %v8054_v19  ;;  %v1719_v40 = vmul.f32 %v11395_v10, %v11395_v10  ;;  %v8600_v39 = vpack.i.bf16 %v7359_v8, %v7375_v22  ;;  %vm302_vm0 = vcmp.eq.s32.totalorder %v10732_v20, %v19030_v17  ;;  %v11479_v58 = vsub.f32 %v19031_v60, %v11162_v15 }
 0x194   :  { %v11369_v54 = vpop.f32.mrb[90].mxu1  ;;  %7554 = vmatmul.mubr.msk.f32.gmra.mrb[56].mxu0 %vm299_vm10, %v18975_v57  ;;  %8599 = vxpose.xlu1.b32.cont [9/16] %v8598_v41, 128  ;;  %vm18409_vm10 = vcmp.eq.s32.totalorder %v10732_v20, %v11010_v47  ;;  %v1781_v45 = vadd.f32 %v1780_v52, %v1718_v62  ;;  %v1720_v22 = vmul.f32 %v11399_v42, %v11399_v42  ;;  %v11495_v62 = vpop.permute.xlu0 %724  ;;  %v19032_v52 = vld [vmem:[#allocation87_spill] sm:$0xff] }
 0x195   :  { %v11378_v50 = vpop.f32.mrb[91].mxu1  ;;  %3298 = vmatprep.mubr.f32.mxu0 %v18944_v32  ;;  %v8068_v3 = vpack.c.bf16 %v11369_v54, %v11327_v61  ;;  %vm18411_vm8 = vcmp.eq.s32.totalorder %v10732_v20, %v11008_v12  ;;  %v7360_v19 = vsel %vm18409_vm10, 1.0, %v18944_v32  ;;  %v11500_v48 = vsub.f32 %v19032_v52, %v11162_v15 }
 0x196   :  { %v8066_v28 = vpack.c.bf16 %v11378_v50, %v11338_v0  ;;  %v1782_v5 = vadd.f32 %v1781_v45, %v1719_v40  ;;  %8057 = vmatpush1.bf16.msra.mxu1 %v8056_v11  ;;  %v1721_v11 = vmul.f32 %v11452_v43, %v11452_v43  ;;  %v19033_v45 = vld [vmem:[#allocation22_spill] sm:$0xff]  ;;  %v1722_v60 = vmul.f32 %v11479_v58, %v11479_v58 }
 0x197   :  { %8059 = vmatprep.subr.bf16.mxu1 %v8058_v63  ;;  %vm18415_vm10 = vcmp.eq.s32.totalorder %v10732_v20, %v11028_v37 }
 0x198   :  { %v11411_v21 = vpop.f32.mrb[92].mxu1  ;;  %7555 = vmatmul.mubr.msk.f32.gmra.mrb[58].mxu0 %vm300_vm6, %v18975_v57  ;;  %vm18408_vm6 = vcmp.eq.s32.totalorder %v10732_v20, %v11417_v25  ;;  %8601 = vxpose.xlu1.b32.cont [10/16] %v8600_v39, 128  ;;  %v1783_v8 = vadd.f32 %v1782_v5, %v1720_v22  ;;  %v19034_v39 = vld [vmem:[#allocation86_spill] sm:$0xff]  ;;  %v11525_v22 = vpop.permute.xlu1 %727  ;;  %v19035_v5 = vld [vmem:[#allocation92_spill] sm:$0xff] }
 0x199   :  { %v11427_v23 = vpop.f32.mrb[93].mxu1  ;;  %3304 = vmatprep.mubr.f32.mxu0 %v18944_v32  ;;  %v7376_v29 = vsel %vm18408_vm6, 1.0, %v18944_v32  ;;  %vm303_vm6 = vcmp.eq.s32.totalorder %v10732_v20, %v19033_v45  ;;  %v11509_v17 = vsub.f32 %v19034_v39, %v11162_v15  ;;  %v19037_v45 = vld [vmem:[#allocation91_spill] sm:$0xff] }
 0x19a   :  { %v8602_v40 = vpack.i.bf16 %v7360_v19, %v7376_v29  ;;  %v1784_v52 = vadd.f32 %v1783_v8, %v1721_v11  ;;  %8061 = vmatpush1.bf16.msra.mxu1 %v8060_v16  ;;  %v7361_v29 = vsel %vm18411_vm8, 1.0, %v18944_v32  ;;  %v11530_v19 = vsub.f32 %v19035_v5, %v11162_v15 }
 0x19b   :  { %8063 = vmatprep.subr.bf16.mxu1 %v8062_v35  ;;  %v1723_v16 = vmul.f32 %v11500_v48, %v11500_v48  ;;  %v11539_v39 = vsub.f32 %v19037_v45, %v11162_v15  ;;  %v1724_v5 = vmul.f32 %v11509_v17, %v11509_v17  ;;  %vm18414_vm8 = vcmp.eq.s32.totalorder %v10732_v20, %v11026_v4  ;;  %v19041_v45 = vld [vmem:[#allocation100_spill] sm:$0xff] }
 0x19c   :  { %v11448_v59 = vpop.f32.mrb[94].mxu1  ;;  %7556 = vmatmul.mubr.msk.f32.gmra.mrb[60].mxu0 %vm301_vm3, %v18975_v57  ;;  %vm18410_vm3 = vcmp.eq.s32.totalorder %v10732_v20, %v11460_v9  ;;  %8603 = vxpose.xlu1.b32.cont [11/16] %v8602_v40, 128  ;;  %v1785_v11 = vadd.f32 %v1784_v52, %v1722_v60  ;;  %v19036_v40 = vld [vmem:[#allocation21_spill] sm:$0xff]  ;;  %v11558_v60 = vpop.permute.xlu0 %730  ;;  %v19038_v52 = vld [vmem:[#allocation96_spill] sm:$0xff]  ;;  %v1725_v7 = vmul.f32 %v11530_v19, %v11530_v19 }
 0x19d   :  { %v11468_v34 = vpop.f32.mrb[95].mxu1  ;;  %3310 = vmatprep.mubr.f32.mxu0 %v18944_v32  ;;  %v7377_v63 = vsel %vm18410_vm3, 1.0, %v18944_v32  ;;  %vm304_vm3 = vcmp.eq.s32.totalorder %v10732_v20, %v19036_v40  ;;  %v11566_v2 = vsub.f32 %v19038_v52, %v11162_v15  ;;  %v11594_v40 = vpop.permute.xlu1 %733  ;;  %v11602_v61 = vsub.f32 %v19041_v45, %v11162_v15 }
 0x19e   :  { %v8070_v49 = vpack.c.bf16 %v11468_v34, %v11427_v23  ;;  %v8604_v8 = vpack.i.bf16 %v7361_v29, %v7377_v63  ;;  %v1786_v41 = vadd.f32 %v1785_v11, %v1723_v16  ;;  %8065 = vmatpush1.bf16.msra.mxu1 %v8064_v36  ;;  %v7362_v63 = vsel %vm18415_vm10, 1.0, %v18944_v32  ;;  %v19039_v16 = vld [vmem:[#allocation24_spill] sm:$0xff]  ;;  %v19040_v11 = vld [vmem:[#allocation95_spill] sm:$0xff] }
 0x19f   :  { %8067 = vmatprep.subr.bf16.mxu1 %v8066_v28  ;;  %v11575_v0 = vsub.f32 %v19040_v11, %v11162_v15  ;;  %v1726_v28 = vmul.f32 %v11539_v39, %v11539_v39  ;;  %v1727_v54 = vmul.f32 %v11566_v2, %v11566_v2  ;;  %vm782_vm10 = vcmp.eq.s32.totalorder %v10732_v20, %v11040_v6  ;;  %v19213_v6 = vld [vmem:[#allocation117_spill] sm:$0xff] }
 0x1a0   :  { %7557 = vmatmul.mubr.msk.f32.gmra.mrb[62].mxu0 %vm302_vm0, %v18975_v57  ;;  %vm18412_vm0 = vcmp.eq.s32.totalorder %v10732_v20, %v11495_v62  ;;  %8605 = vxpose.xlu1.b32.cont [12/16] %v8604_v8, 128  ;;  %v1787_v36 = vadd.f32 %v1786_v41, %v1724_v5  ;;  %v7363_v41 = vsel %vm18414_vm8, 1.0, %v18944_v32  ;;  %v19042_v5 = vld [vmem:[#allocation23_spill] sm:$0xff]  ;;  %v1729_v11 = vmul.f32 %v11602_v61, %v11602_v61 }
 0x1a1   :  { %3316 = vmatprep.mubr.f32.mxu0 %v18944_v32  ;;  %v7378_v35 = vsel %vm18412_vm0, 1.0, %v18944_v32  ;;  %vm305_vm0 = vcmp.eq.s32.totalorder %v10732_v20, %v19039_v16  ;;  %vm306_vm8 = vcmp.eq.s32.totalorder %v10732_v20, %v19042_v5  ;;  %v19049_v5 = vld [vmem:[#allocation104_spill] sm:$0xff] }
 0x1a2   :  { %v8606_v29 = vpack.i.bf16 %v7362_v63, %v7378_v35  ;;  %v1788_v8 = vadd.f32 %v1787_v36, %v1725_v7  ;;  %8069 = vmatpush1.bf16.msra.mxu1 %v8068_v3  ;;  %v19043_v63 = vld [vmem:[#allocation99_spill] sm:$0xff]  ;;  %v19044_v7 = vpack.c.bf16 %v11448_v59, %v11411_v21  ;;  %v19046_v59 = vld [vmem:[#allocation26_spill] sm:$0xff] }
 0x1a3   :  { %8071 = vmatprep.subr.bf16.mxu1 %v8070_v49  ;;  %v11611_v23 = vsub.f32 %v19043_v63, %v11162_v15  ;;  %v1728_v49 = vmul.f32 %v11575_v0, %v11575_v0  ;;  %v11662_v63 = vsub.f32 %v19049_v5, %v11162_v15 }
 0x1a4   :  { %7558 = vmatmul.mubr.msk.f32.gmra.mrb[64].mxu0 %vm303_vm6, %v18975_v57  ;;  %vm18413_vm6 = vcmp.eq.s32.totalorder %v10732_v20, %v11525_v22  ;;  %8607 = vxpose.xlu1.b32.cont [13/16] %v8606_v29, 128  ;;  %v1789_v3 = vadd.f32 %v1788_v8, %v1726_v28  ;;  %v19045_v29 = vld [vmem:[#allocation102_spill] sm:$0xff] }
 0x1a5   :  { %3322 = vmatprep.mubr.f32.mxu0 %v18944_v32  ;;  %v7379_v50 = vsel %vm18413_vm6, 1.0, %v18944_v32  ;;  %vm781_vm6 = vcmp.eq.s32.totalorder %v10732_v20, %v11042_v38  ;;  %v11633_v16 = vsub.f32 %v19045_v29, %v11162_v15  ;;  %v19052_v29 = vld [vmem:[#allocation103_spill] sm:$0xff]  ;;  %v1733_v8 = vmul.f32 %v11662_v63, %v11662_v63 }
 0x1a6   :  { %v8608_v35 = vpack.i.bf16 %v7363_v41, %v7379_v50  ;;  %v1790_v52 = vadd.f32 %v1789_v3, %v1727_v54  ;;  %8073 = vmatpush1.bf16.msra.mxu1 %v19044_v7  ;;  %v7364_v36 = vsel %vm781_vm6, 1.0, %v18944_v32  ;;  %v19048_v41 = vld [vmem:[#allocation101_spill] sm:$0xff]  ;;  %v1730_v54 = vmul.f32 %v11611_v23, %v11611_v23 }
 0x1a7   :  { %v11650_v45 = vsub.f32 %v19048_v41, %v11162_v15  ;;  %v19050_v7 = vld [vmem:[#allocation25_spill] sm:$0xff] }
 0x1a8   :  { %7559 = vmatmul.mubr.msk.f32.gmra.mrb[66].mxu0 %vm304_vm3, %v18975_v57  ;;  %vm18416_vm3 = vcmp.eq.s32.totalorder %v10732_v20, %v11558_v60  ;;  %8609 = vxpose.xlu1.b32.cont [14/16] %v8608_v35, 128  ;;  %v1791_v50 = vadd.f32 %v1790_v52, %v1728_v49  ;;  %v7365_v35 = vsel %vm782_vm10, 1.0, %v18944_v32 }
 0x1a9   :  { %3328 = vmatprep.mubr.f32.mxu0 %v18944_v32  ;;  %v7380_v34 = vsel %vm18416_vm3, 1.0, %v18944_v32  ;;  %vm307_vm3 = vcmp.eq.s32.totalorder %v10732_v20, %v19046_v59  ;;  %7478 = vmatmul.mubr.msk.f32.vlgmr.msra.gmra.mrb[96].mxu1 %vm735_vm1, %v18975_v57  ;;  %vm308_vm1 = vcmp.eq.s32.totalorder %v10732_v20, %v19050_v7  ;;  %v19053_v59 = vld [vmem:[#allocation106_spill] sm:$0xff] }
 0x1aa   :  { %v8610_v21 = vpack.i.bf16 %v7364_v36, %v7380_v34  ;;  %v1792_v3 = vadd.f32 %v1791_v50, %v1729_v11  ;;  %2777 = vmatprep.mubr.f32.mxu1 %v18944_v32  ;;  %v1731_v34 = vmul.f32 %v11633_v16, %v11633_v16  ;;  %v11675_v11 = vsub.f32 %v19052_v29, %v11162_v15  ;;  %v19057_v36 = vld [vmem:[#allocation27_spill] sm:$0xff]  ;;  %v19058_v29 = vld [vmem:[#allocation109_spill] sm:$0xff] }
 0x1ab   :  { %v1732_v50 = vmul.f32 %v11650_v45, %v11650_v45 }
 0x1ac   :  { %7560 = vmatmul.mubr.msk.f32.gmra.mrb[68].mxu0 %vm305_vm0, %v18975_v57  ;;  %vm798_vm0 = vcmp.eq.s32.totalorder %v10732_v20, %v11594_v40  ;;  %8611 = vxpose.xlu1.b32.cont [15/16] %v8610_v21, 128  ;;  %v1793_v49 = vadd.f32 %v1792_v3, %v1730_v54  ;;  %v19054_v54 = vld [vmem:[#allocation28_spill] sm:$0xff]  ;;  %v19055_v3 = vld [vmem:[#allocation105_spill] sm:$0xff]  ;;  %v1734_v5 = vmul.f32 %v11675_v11, %v11675_v11 }
 0x1ad   :  { %3334 = vmatprep.mubr.f32.mxu0 %v18944_v32  ;;  %v7381_v28 = vsel %vm798_vm0, 1.0, %v18944_v32  ;;  %7479 = vmatmul.mubr.msk.f32.gmra.mrb[98].mxu1 %vm736_vm2, %v18975_v57  ;;  %vm309_vm2 = vcmp.eq.s32.totalorder %v10732_v20, %v19054_v54 }
 0x1ae   :  { %v8612_v52 = vpack.i.bf16 %v7365_v35, %v7381_v28  ;;  %v1794_v21 = vadd.f32 %v1793_v49, %v1731_v34  ;;  %2783 = vmatprep.mubr.f32.mxu1 %v18944_v32  ;;  %v11683_v28 = vsub.f32 %v19053_v59, %v11162_v15  ;;  %v11696_v35 = vsub.f32 %v19055_v3, %v11162_v15  ;;  %v19056_v49 = vld [vmem:[#allocation110_spill] sm:$0xff] }
 0x1af   :  { %v19060_v3 = vld [vmem:[#allocation30_spill] sm:$0xff] }
 0x1b0   :  { %7561 = vmatmul.mubr.msk.f32.gmra.mrb[70].mxu0 %vm306_vm8, %v18975_v57  ;;  %8613 = vxpose.xlu1.b32.end [16/16] %v8612_v52, 128  ;;  %v1795_v41 = vadd.f32 %v1794_v21, %v1732_v50  ;;  %v11704_v52 = vsub.f32 %v19056_v49, %v11162_v15  ;;  %v1735_v44 = vmul.f32 %v11683_v28, %v11683_v28 }
 0x1b1   :  { %3340 = vmatprep.mubr.f32.mxu0 %v18944_v32  ;;  %7480 = vmatmul.mubr.msk.f32.gmra.mrb[100].mxu1 %vm737_vm5, %v18975_v57  ;;  %vm310_vm5 = vcmp.eq.s32.totalorder %v10732_v20, %v19057_v36  ;;  %v11717_v50 = vsub.f32 %v19058_v29, %v11162_v15  ;;  %v1736_v21 = vmul.f32 %v11696_v35, %v11696_v35 }
 0x1b2   :  { %v1796_v34 = vadd.f32 %v1795_v41, %v1733_v8  ;;  %2789 = vmatprep.mubr.f32.mxu1 %v18944_v32  ;;  %v19059_v8 = vld [vmem:[#allocation114_spill] sm:$0xff]  ;;  %v1737_v30 = vmul.f32 %v11704_v52, %v11704_v52 }
 0x1b3   :  { %v11725_v41 = vsub.f32 %v19059_v8, %v11162_v15  ;;  %v1738_v49 = vmul.f32 %v11717_v50, %v11717_v50 }
 0x1b4   :  { %7562 = vmatmul.mubr.msk.f32.gmra.mrb[72].mxu0 %vm307_vm3, %v18975_v57  ;;  %v1797_v7 = vadd.f32 %v1796_v34, %v1734_v5  ;;  %v19061_v5 = vld [vmem:[#allocation113_spill] sm:$0xff] }
 0x1b5   :  { %3346 = vmatprep.mubr.f32.mxu0 %v18944_v32  ;;  %7481 = vmatmul.mubr.msk.f32.gmra.mrb[102].mxu1 %vm738_vm7, %v18975_v57  ;;  %vm311_vm7 = vcmp.eq.s32.totalorder %v10732_v20, %v19060_v3  ;;  %v11738_v34 = vsub.f32 %v19061_v5, %v11162_v15  ;;  %v1739_v33 = vmul.f32 %v11725_v41, %v11725_v41  ;;  %v19065_v3 = vld [vmem:[#allocation122_spill] sm:$0xff] }
 0x1b6   :  { %v1798_v59 = vadd.f32 %v1797_v7, %v1735_v44  ;;  %2795 = vmatprep.mubr.f32.mxu1 %v18944_v32  ;;  %v19062_v7 = vld [vmem:[#allocation119_spill] sm:$0xff]  ;;  %v11767_v5 = vsub.f32 %v19065_v3, %v11162_v15  ;;  %v19072_v3 = vld [vmem:[#allocation65_spill] sm:$0xff] }
 0x1b7   :  { %v11746_v36 = vsub.f32 %v19062_v7, %v11162_v15  ;;  %v11780_v7 = vsub.f32 %v10420_v18, %v11162_v15  ;;  %v19070_v18 = vld [vmem:[#allocation31_spill] sm:$0xff] }
 0x1b8   :  { %7563 = vmatmul.mubr.msk.f32.gmra.mrb[74].mxu0 %vm308_vm1, %v18975_v57  ;;  %v1799_v54 = vadd.f32 %v1798_v59, %v1736_v21  ;;  %v19063_v21 = vld [vmem:[#allocation29_spill] sm:$0xff]  ;;  %v19064_v59 = vld [vmem:[#allocation118_spill] sm:$0xff]  ;;  %19066 = vst [vmem:[#allocation18_spill] sm:$0xff] %v11767_v5  ;;  %v1743_v55 = vmul.f32 %v11767_v5, %v11767_v5 }
 0x1b9   :  { %3352 = vmatprep.mubr.f32.mxu0 %v18944_v32  ;;  %7482 = vmatmul.mubr.msk.f32.gmra.mrb[104].mxu1 %vm739_vm9, %v18975_v57  ;;  %vm312_vm8 = vcmp.eq.s32.totalorder %v10732_v20, %v19063_v21  ;;  %v11759_v8 = vsub.f32 %v19064_v59, %v11162_v15  ;;  %v1741_v51 = vmul.f32 %v11746_v36, %v11746_v36 }
 0x1ba   :  { %v1800_v44 = vadd.f32 %v1799_v54, %v1737_v30  ;;  %2801 = vmatprep.mubr.f32.mxu1 %v18944_v32  ;;  %v1740_v30 = vmul.f32 %v11738_v34, %v11738_v34  ;;  %19068 = vst [vmem:[#allocation63_spill] sm:$0xff] %v11780_v7  ;;  %v11788_v21 = vsub.f32 %v10455_v56, %v11162_v15 }
 0x1bb   :  { %v1744_v56 = vmul.f32 %v11780_v7, %v11780_v7 }
 0x1bc   :  { %7564 = vmatmul.mubr.msk.f32.gmra.mrb[76].mxu0 %vm309_vm2, %v18975_v57  ;;  %v1801_v29 = vadd.f32 %v1800_v44, %v1738_v49  ;;  %v19067_v44 = vld [vmem:[#allocation32_spill] sm:$0xff]  ;;  %19069 = vst [vmem:[#allocation70_spill] sm:$0xff] %v11788_v21  ;;  %v1745_v26 = vmul.f32 %v11788_v21, %v11788_v21  ;;  %v19078_v21 = vld [vmem:[#allocation71_spill] sm:$0xff] }
 0x1bd   :  { %3358 = vmatprep.mubr.f32.mxu0 %v18944_v32  ;;  %7483 = vmatmul.mubr.msk.f32.gmra.mrb[106].mxu1 %vm740_vm11, %v18975_v57  ;;  %vm313_vm9 = vcmp.eq.s32.totalorder %v10732_v20, %v19067_v44  ;;  %vm314_vm11 = vcmp.eq.s32.totalorder %v10732_v20, %v19070_v18  ;;  %v11842_v7 = vsub.f32 %v19078_v21, %v11162_v15  ;;  %v7611_v21 = vld [vmem:[%s18245_s5 + $0x228] sm:$0xff] }
 0x1be   :  { %v1802_v54 = vadd.f32 %v1801_v29, %v1739_v33  ;;  %2807 = vmatprep.mubr.f32.mxu1 %v18944_v32  ;;  %v1742_v33 = vmul.f32 %v11759_v8, %v11759_v8 }
 0x1bf   :  { %19079 = vst [vmem:[#allocation76_spill] sm:$0xff] %v11842_v7 }
 0x1c0   :  { %7565 = vmatmul.mubr.msk.f32.gmra.mrb[78].mxu0 %vm310_vm5, %v18975_v57  ;;  %v1803_v49 = vadd.f32 %v1802_v54, %v1740_v30  ;;  %v11801_v30 = vsub.f32 %v10443_v31, %v11162_v15  ;;  %v19074_v31 = vld [vmem:[#allocation34_spill] sm:$0xff] }
 0x1c1   :  { %3364 = vmatprep.mubr.f32.mxu0 %v18944_v32  ;;  %7484 = vmatmul.mubr.msk.f32.gmra.mrb[108].mxu1 %vm741_vm13, %v18975_v57  ;;  %vm315_vm13 = vcmp.eq.s32.totalorder %v10732_v20, %v19074_v31  ;;  %v7608_v31 = vld [vmem:[%s18245_s5 + $0x210] sm:$0xff] }
 0x1c2   :  { %v1804_v29 = vadd.f32 %v1803_v49, %v1741_v51  ;;  %2813 = vmatprep.mubr.f32.mxu1 %v18944_v32  ;;  %19071 = vst [vmem:[#allocation17_spill] sm:$0xff] %v11801_v30  ;;  %v11809_v51 = vsub.f32 %v19072_v3, %v11162_v15 }
 0x1c4   :  { %7566 = vmatmul.mubr.msk.f32.gmra.mrb[80].mxu0 %vm311_vm7, %v18975_v57  ;;  %v1805_v59 = vadd.f32 %v1804_v29, %v1742_v33  ;;  %19073 = vst [vmem:[#allocation20_spill] sm:$0xff] %v11809_v51  ;;  %v7607_v33 = vld [vmem:[%s18245_s5 + $0x208] sm:$0xff]  ;;  %v7609_v29 = vld [vmem:[%s18245_s5 + $0x218] sm:$0xff] }
 0x1c5   :  { %3370 = vmatprep.mubr.f32.mxu0 %v18944_v32  ;;  %7485 = vmatmul.mubr.msk.f32.gmra.mrb[110].mxu1 %vm742_vm15, %v18975_v57  ;;  %v8106_v3 = vpack.c.bf16 %v7609_v29, %v7607_v33  ;;  %v7613_v33 = vld [vmem:[%s18245_s5 + $0x238] sm:$0xff]  ;;  %v7610_v29 = vld [vmem:[%s18245_s5 + $0x220] sm:$0xff] }
 0x1c6   :  { %v1806_v54 = vadd.f32 %v1805_v59, %v1743_v55  ;;  %2819 = vmatprep.mubr.f32.mxu1 %v18944_v32  ;;  %v7606_v55 = vld [vmem:[%s18245_s5 + $0x200] sm:$0xff]  ;;  %v19076_v59 = vld [vmem:[#allocation62_spill] sm:$0xff] }
 0x1c7   :  { %v11831_v18 = vsub.f32 %v19076_v59, %v11162_v15  ;;  %v8108_v44 = vpack.c.bf16 %v7608_v31, %v7606_v55  ;;  %v1747_v59 = vmul.f32 %v11809_v51, %v11809_v51  ;;  %8107 = vmatprep.subr.bf16.mxu0 %v8106_v3  ;;  %v19083_v55 = vld [vmem:[#allocation68_spill] sm:$0xff]  ;;  %v8110_v31 = vpack.c.bf16 %v7613_v33, %v7611_v21  ;;  %v7615_v21 = vld [vmem:[%s18245_s5 + $0x248] sm:$0xff] }
 0x1c8   :  { %7567 = vmatmul.mubr.msk.f32.gmra.mrb[82].mxu0 %vm312_vm8, %v18975_v57  ;;  %v1807_v49 = vadd.f32 %v1806_v54, %v1744_v56  ;;  %v1746_v56 = vmul.f32 %v11801_v30, %v11801_v30  ;;  %v7617_v33 = vld [vmem:[%s18245_s5 + $0x258] sm:$0xff] }
 0x1c9   :  { %3376 = vmatprep.mubr.f32.mxu0 %v18944_v32  ;;  %7486 = vmatmul.mubr.msk.f32.gmra.mrb[112].mxu1 %vm743_vm14, %v18975_v57  ;;  %19077 = vst [vmem:[#allocation69_spill] sm:$0xff] %v11831_v18 }
 0x1ca   :  { %v1808_v54 = vadd.f32 %v1807_v49, %v1745_v26  ;;  %2825 = vmatprep.mubr.f32.mxu1 %v18944_v32  ;;  %v19080_v26 = vld [vmem:[#allocation33_spill] sm:$0xff]  ;;  %v19081_v49 = vld [vmem:[#allocation107_spill] sm:$0xff]  ;;  %8109 = vmatpush1.bf16.msra.mxu0 %v8108_v44 }
 0x1cb   :  { %vm316_vm14 = vcmp.eq.s32.totalorder %v10732_v20, %v19080_v26  ;;  %vm19082_vm15 = vcmp.eq.s32.totalorder %v10732_v20, %v19081_v49  ;;  %v7612_v44 = vld [vmem:[%s18245_s5 + $0x230] sm:$0xff]  ;;  %v19085_v49 = vld [vmem:[#allocation77_spill] sm:$0xff]  ;;  %8111 = vmatprep.subr.bf16.mxu0 %v8110_v31 }
 0x1cc   :  { %7568 = vmatmul.mubr.msk.f32.gmra.mrb[84].mxu0 %vm313_vm9, %v18975_v57  ;;  %v1809_v5 = vadd.f32 %v1808_v54, %v1746_v56  ;;  %v11864_v56 = vsub.f32 %v19083_v55, %v11162_v15  ;;  %v1748_v54 = vmul.f32 %v11831_v18, %v11831_v18  ;;  %v8112_v26 = vpack.c.bf16 %v7612_v44, %v7610_v29  ;;  %v7614_v29 = vld [vmem:[%s18245_s5 + $0x240] sm:$0xff] }
 0x1cd   :  { %3382 = vmatprep.mubr.f32.mxu0 %v18944_v32  ;;  %7487 = vmatmul.mubr.msk.f32.gmra.mrb[114].mxu1 %vm19082_vm15, %v18975_v57  ;;  %v11875_v51 = vsub.f32 %v19085_v49, %v11162_v15  ;;  %v1749_v55 = vmul.f32 %v11842_v7, %v11842_v7  ;;  %v7616_v49 = vld [vmem:[%s18245_s5 + $0x250] sm:$0xff] }
 0x1ce   :  { %19084 = vst [vmem:[#allocation75_spill] sm:$0xff] %v11864_v56  ;;  %v1810_v3 = vadd.f32 %v1809_v5, %v1747_v59  ;;  %2831 = vmatprep.mubr.f32.mxu1 %v18944_v32  ;;  %v19087_v5 = vld [vmem:[#allocation36_spill] sm:$0xff]  ;;  %8113 = vmatpush1.bf16.msra.mxu0 %v8112_v26  ;;  %v1750_v31 = vmul.f32 %v11864_v56, %v11864_v56 }
 0x1cf   :  { %19086 = vst [vmem:[#allocation82_spill] sm:$0xff] %v11875_v51  ;;  %vm317_vm3 = vcmp.eq.s32.totalorder %v10732_v20, %v19087_v5  ;;  %v19088_v59 = vld [vmem:[#allocation112_spill] sm:$0xff]  ;;  %v8114_v26 = vpack.c.bf16 %v7617_v33, %v7615_v21  ;;  %v8116_v5 = vpack.c.bf16 %v7616_v49, %v7614_v29  ;;  %v7619_v21 = vld [vmem:[%s18245_s5 + $0x268] sm:$0xff]  ;;  %v7618_v29 = vld [vmem:[%s18245_s5 + $0x260] sm:$0xff] }
 0x1d0   :  { %7569 = vmatmul.mubr.msk.f32.gmra.mrb[86].mxu0 %vm314_vm11, %v18975_v57  ;;  %v1811_v30 = vadd.f32 %v1810_v3, %v1748_v54  ;;  %vm19089_vm1 = vcmp.eq.s32.totalorder %v10732_v20, %v19088_v59  ;;  %v19090_v54 = vld [vmem:[#allocation74_spill] sm:$0xff]  ;;  %v19091_v59 = vld [vmem:[#allocation83_spill] sm:$0xff]  ;;  %v7621_v33 = vld [vmem:[%s18245_s5 + $0x278] sm:$0xff] }
 0x1d1   :  { %3388 = vmatprep.mubr.f32.mxu0 %v18944_v32  ;;  %7488 = vmatmul.mubr.msk.f32.gmra.mrb[116].mxu1 %vm19089_vm1, %v18975_v57  ;;  %v11897_v3 = vsub.f32 %v19090_v54, %v11162_v15  ;;  %v11908_v7 = vsub.f32 %v19091_v59, %v11162_v15  ;;  %v1751_v54 = vmul.f32 %v11875_v51, %v11875_v51  ;;  %v7620_v59 = vld [vmem:[%s18245_s5 + $0x270] sm:$0xff] }
 0x1d2   :  { %v1812_v44 = vadd.f32 %v1811_v30, %v1749_v55  ;;  %2837 = vmatprep.mubr.f32.mxu1 %v18944_v32  ;;  %8115 = vmatprep.subr.bf16.mxu0 %v8114_v26  ;;  %v19092_v30 = vld [vmem:[#allocation35_spill] sm:$0xff] }
 0x1d3   :  { %vm318_vm2 = vcmp.eq.s32.totalorder %v10732_v20, %v19092_v30  ;;  %v19093_v55 = vld [vmem:[#allocation111_spill] sm:$0xff]  ;;  %8117 = vmatpush1.bf16.msra.mxu0 %v8116_v5  ;;  %v1752_v26 = vmul.f32 %v11897_v3, %v11897_v3  ;;  %v8118_v5 = vpack.c.bf16 %v7621_v33, %v7619_v21  ;;  %v8120_v30 = vpack.c.bf16 %v7620_v59, %v7618_v29  ;;  %v7622_v21 = vld [vmem:[%s18245_s5 + $0x280] sm:$0xff]  ;;  %v19099_v33 = vld [vmem:[#allocation38_spill] sm:$0xff] }
 0x1d4   :  { %7570 = vmatmul.mubr.msk.f32.gmra.mrb[88].mxu0 %vm315_vm13, %v18975_v57  ;;  %v1813_v18 = vadd.f32 %v1812_v44, %v1750_v31  ;;  %vm19094_vm5 = vcmp.eq.s32.totalorder %v10732_v20, %v19093_v55  ;;  %v19095_v31 = vld [vmem:[#allocation80_spill] sm:$0xff]  ;;  %vm319_vm8 = vcmp.eq.s32.totalorder %v10732_v20, %v19099_v33 }
 0x1d5   :  { %3394 = vmatprep.mubr.f32.mxu0 %v18944_v32  ;;  %7489 = vmatmul.mubr.msk.f32.gmra.mrb[118].mxu1 %vm19094_vm5, %v18975_v57  ;;  %v11930_v44 = vsub.f32 %v19095_v31, %v11162_v15  ;;  %v19096_v55 = vld [vmem:[#allocation88_spill] sm:$0xff]  ;;  %v1753_v31 = vmul.f32 %v11908_v7, %v11908_v7 }
 0x1d6   :  { %v1814_v49 = vadd.f32 %v1813_v18, %v1751_v54  ;;  %2843 = vmatprep.mubr.f32.mxu1 %v18944_v32  ;;  %v11941_v51 = vsub.f32 %v19096_v55, %v11162_v15  ;;  %8119 = vmatprep.subr.bf16.mxu0 %v8118_v5  ;;  %v19097_v18 = vld [vmem:[#allocation116_spill] sm:$0xff]  ;;  %v7623_v54 = vld [vmem:[%s18245_s5 + $0x288] sm:$0xff]  ;;  %v7624_v5 = vld [vmem:[%s18245_s5 + $0x290] sm:$0xff] }
 0x1d7   :  { %vm19098_vm7 = vcmp.eq.s32.totalorder %v10732_v20, %v19097_v18  ;;  %8121 = vmatpush1.bf16.msra.mxu0 %v8120_v30  ;;  %v7625_v15 = vld [vmem:[%s18245_s5 + $0x298] sm:$0xff]  ;;  %v1754_v29 = vmul.f32 %v11930_v44, %v11930_v44  ;;  %v8124_v59 = vpack.c.bf16 %v7624_v5, %v7622_v21  ;;  %v1756_v21 = vmul.f32 %v11176_v53, %v11176_v53 }
 0x1d8   :  { %7571 = vmatmul.mubr.msk.f32.gmra.mrb[90].mxu0 %vm316_vm14, %v18975_v57  ;;  %v1815_v56 = vadd.f32 %v1814_v49, %v1752_v26  ;;  %v8122_v49 = vpack.c.bf16 %v7625_v15, %v7623_v54  ;;  %v1755_v30 = vmul.f32 %v11941_v51, %v11941_v51  ;;  %v7629_v18 = vld [vmem:[%s18245_s5 + $0x2b8] sm:$0xff]  ;;  %v7626_v54 = vld [vmem:[%s18245_s5 + $0x2a0] sm:$0xff]  ;;  %v1757_v5 = vmul.f32 %v11180_v24, %v11180_v24 }
 0x1d9   :  { %3400 = vmatprep.mubr.f32.mxu0 %v18944_v32  ;;  %7490 = vmatmul.mubr.msk.f32.gmra.mrb[120].mxu1 %vm19098_vm7, %v18975_v57  ;;  %v19102_v15 = vld [vmem:[#allocation37_spill] sm:$0xff] }
 0x1da   :  { %v1816_v26 = vadd.f32 %v1815_v56, %v1753_v31  ;;  %2849 = vmatprep.mubr.f32.mxu1 %v18944_v32  ;;  %8123 = vmatprep.subr.bf16.mxu0 %v8122_v49  ;;  %v19100_v56 = vld [vmem:[#allocation115_spill] sm:$0xff]  ;;  %v7627_v31 = vld [vmem:[%s18245_s5 + $0x2a8] sm:$0xff]  ;;  %vm320_vm11 = vcmp.eq.s32.totalorder %v10732_v20, %v19102_v15  ;;  %v19210_v24 = vld [vmem:[#allocation93_spill] sm:$0xff] }
 0x1db   :  { %vm19101_vm9 = vcmp.eq.s32.totalorder %v10732_v20, %v19100_v56  ;;  %8125 = vmatpush1.bf16.msra.mxu0 %v8124_v59  ;;  %v7633_v56 = vld [vmem:[%s18245_s5 + $0x2d8] sm:$0xff] }
 0x1dc   :  { %7572 = vmatmul.mubr.msk.f32.gmra.mrb[92].mxu0 %vm317_vm3, %v18975_v57  ;;  %v1817_v55 = vadd.f32 %v1816_v26, %v1754_v29  ;;  %v8126_v29 = vpack.c.bf16 %v7629_v18, %v7627_v31  ;;  %v7628_v26 = vld [vmem:[%s18245_s5 + $0x2b0] sm:$0xff]  ;;  %v7630_v31 = vld [vmem:[%s18245_s5 + $0x2c0] sm:$0xff]  ;;  %v19105_v18 = vld [vmem:[#allocation40_spill] sm:$0xff] }
 0x1dd   :  { %3406 = vmatprep.mubr.f32.mxu0 %v18944_v32  ;;  %7491 = vmatmul.mubr.msk.f32.gmra.mrb[122].mxu1 %vm19101_vm9, %v18975_v57  ;;  %v8128_v49 = vpack.c.bf16 %v7628_v26, %v7626_v54  ;;  %vm321_vm14 = vcmp.eq.s32.totalorder %v10732_v20, %v19105_v18  ;;  %v1758_v54 = vmul.f32 %v11184_v13, %v11184_v13  ;;  %v19106_v26 = vld [vmem:[#allocation12_spill] sm:$0xff]  ;;  %v19110_v18 = vld [vmem:[#allocation11_spill] sm:$0xff] }
 0x1de   :  { %v1818_v33 = vadd.f32 %v1817_v55, %v1755_v30  ;;  %2855 = vmatprep.mubr.f32.mxu1 %v18944_v32  ;;  %8127 = vmatprep.subr.bf16.mxu0 %v8126_v29  ;;  %v19103_v30 = vld [vmem:[#allocation121_spill] sm:$0xff]  ;;  %v7631_v55 = vld [vmem:[%s18245_s5 + $0x2c8] sm:$0xff] }
 0x1df   :  { %vm19104_vm13 = vcmp.eq.s32.totalorder %v10732_v20, %v19103_v30  ;;  %8129 = vmatpush1.bf16.msra.mxu0 %v8128_v49  ;;  %v1759_v49 = vmul.f32 %v19106_v26, %v19106_v26 }
 0x1e0   :  { %7573 = vmatmul.mubr.msk.f32.gmra.mrb[94].mxu0 %vm318_vm2, %v18975_v57  ;;  %v1819_v59 = vadd.f32 %v1818_v33, %v1756_v21  ;;  %v8130_v21 = vpack.c.bf16 %v7633_v56, %v7631_v55  ;;  %v7632_v33 = vld [vmem:[%s18245_s5 + $0x2d0] sm:$0xff]  ;;  %v7637_v55 = vld [vmem:[%s18245_s5 + $0x2f8] sm:$0xff]  ;;  %v7634_v56 = vld [vmem:[%s18245_s5 + $0x2e0] sm:$0xff] }
 0x1e1   :  { %3412 = vmatprep.mubr.f32.mxu0 %v18944_v32  ;;  %7492 = vmatmul.mubr.msk.f32.gmra.mrb[124].mxu1 %vm19104_vm13, %v18975_v57  ;;  %v8132_v29 = vpack.c.bf16 %v7632_v33, %v7630_v31  ;;  %v19109_v31 = vld [vmem:[#allocation39_spill] sm:$0xff] }
 0x1e2   :  { %v1820_v15 = vadd.f32 %v1819_v59, %v1757_v5  ;;  %2861 = vmatprep.mubr.f32.mxu1 %v18944_v32  ;;  %8131 = vmatprep.subr.bf16.mxu0 %v8130_v21  ;;  %v19107_v5 = vld [vmem:[#allocation120_spill] sm:$0xff]  ;;  %v7635_v59 = vld [vmem:[%s18245_s5 + $0x2e8] sm:$0xff]  ;;  %vm322_vm3 = vcmp.eq.s32.totalorder %v10732_v20, %v19109_v31  ;;  %v7636_v33 = vld [vmem:[%s18245_s5 + $0x2f0] sm:$0xff] }
 0x1e3   :  { %vm19108_vm15 = vcmp.eq.s32.totalorder %v10732_v20, %v19107_v5  ;;  %8133 = vmatpush1.bf16.msra.mxu0 %v8132_v29  ;;  %v8134_v21 = vpack.c.bf16 %v7637_v55, %v7635_v59  ;;  %v8136_v29 = vpack.c.bf16 %v7636_v33, %v7634_v56  ;;  %v19111_v5 = vld [vmem:[#allocation149_spill] sm:$0xff]  ;;  %v19115_v59 = vld [vmem:[#allocation150_spill] sm:$0xff]  ;;  %v19116_v31 = vld [vmem:[#allocation151_spill] sm:$0xff] }
 0x1e4   :  { %7574 = vmatmul.mubr.msk.f32.gmra.mrb[96].mxu0 %vm319_vm8, %v18975_v57  ;;  %v1821_v30 = vadd.f32 %v1820_v15, %v1758_v54  ;;  %v1760_v54 = vmul.f32 %v19110_v18, %v19110_v18  ;;  %v1761_v26 = vmul.f32 %v19111_v5, %v19111_v5  ;;  %v1762_v55 = vmul.f32 %v19115_v59, %v19115_v59  ;;  %v19119_v33 = vld [vmem:[#allocation41_spill] sm:$0xff]  ;;  %v19208_v18 = vld [vmem:[#allocation94_spill] sm:$0xff] }
 0x1e5   :  { %3418 = vmatprep.mubr.f32.mxu0 %v18944_v32  ;;  %7493 = vmatmul.mubr.msk.f32.gmra.mrb[126].mxu1 %vm19108_vm15, %v18975_v57  ;;  %vm324_vm7 = vcmp.eq.s32.totalorder %v10732_v20, %v19119_v33  ;;  %v19125_v33 = vld [vmem:[#allocation154_spill] sm:$0xff] }
 0x1e6   :  { %v1822_v15 = vadd.f32 %v1821_v30, %v1759_v49  ;;  %2867 = vmatprep.mubr.f32.mxu1 %v18944_v32  ;;  %8135 = vmatprep.subr.bf16.mxu0 %v8134_v21  ;;  %v19112_v49 = vld [vmem:[#allocation124_spill] sm:$0xff]  ;;  %v19114_v30 = vld [vmem:[#allocation42_spill] sm:$0xff]  ;;  %v19117_v21 = vld [vmem:[#allocation123_spill] sm:$0xff] }
 0x1e7   :  { %vm19113_vm1 = vcmp.eq.s32.totalorder %v10732_v20, %v19112_v49  ;;  %8137 = vmatpush1.bf16.msra.mxu0 %v8136_v29  ;;  %vm323_vm2 = vcmp.eq.s32.totalorder %v10732_v20, %v19114_v30  ;;  %vm19118_vm5 = vcmp.eq.s32.totalorder %v10732_v20, %v19117_v21  ;;  %v19120_v29 = vld [vmem:[#allocation152_spill] sm:$0xff]  ;;  %v19121_v49 = vld [vmem:[#allocation153_spill] sm:$0xff] }
 0x1e8   :  { %7575 = vmatmul.mubr.msk.f32.gmra.mrb[98].mxu0 %vm320_vm11, %v18975_v57  ;;  %v1823_v13 = vadd.f32 %v1822_v15, %v1760_v54  ;;  %v1763_v54 = vmul.f32 %v19116_v31, %v19116_v31  ;;  %v1765_v30 = vmul.f32 %v19121_v49, %v19121_v49  ;;  %v19124_v21 = vld [vmem:[#allocation44_spill] sm:$0xff]  ;;  %v19126_v49 = vld [vmem:[#allocation155_spill] sm:$0xff] }
 0x1e9   :  { %3424 = vmatprep.mubr.f32.mxu0 %v18944_v32  ;;  %7494 = vmatmul.mubr.msk.f32.gmra.mrb[128].mxu1 %vm19113_vm1, %v18975_v57  ;;  %vm325_vm9 = vcmp.eq.s32.totalorder %v10732_v20, %v19124_v21  ;;  %v19129_v21 = vld [vmem:[#allocation43_spill] sm:$0xff] }
 0x1ea   :  { %v1824_v56 = vadd.f32 %v1823_v13, %v1761_v26  ;;  %2873 = vmatprep.mubr.f32.mxu1 %v18944_v32  ;;  %v1764_v13 = vmul.f32 %v19120_v29, %v19120_v29  ;;  %vm326_vm13 = vcmp.eq.s32.totalorder %v10732_v20, %v19129_v21  ;;  %v19134_v21 = vld [vmem:[#allocation46_spill] sm:$0xff] }
 0x1eb   :  { %vm327_vm15 = vcmp.eq.s32.totalorder %v10732_v20, %v19134_v21  ;;  %v19139_v21 = vld [vmem:[#allocation45_spill] sm:$0xff] }
 0x1ec   :  { %7576 = vmatmul.mubr.msk.f32.gmra.mrb[100].mxu0 %vm321_vm14, %v18975_v57  ;;  %v1825_v15 = vadd.f32 %v1824_v56, %v1762_v55  ;;  %v19122_v56 = vld [vmem:[#allocation126_spill] sm:$0xff]  ;;  %vm328_vm1 = vcmp.eq.s32.totalorder %v10732_v20, %v19139_v21  ;;  %v19144_v21 = vld [vmem:[#allocation49_spill] sm:$0xff] }
 0x1ed   :  { %3430 = vmatprep.mubr.f32.mxu0 %v18944_v32  ;;  %7495 = vmatmul.mubr.msk.f32.gmra.mrb[130].mxu1 %vm19118_vm5, %v18975_v57  ;;  %vm19123_vm8 = vcmp.eq.s32.totalorder %v10732_v20, %v19122_v56  ;;  %v19127_v56 = vld [vmem:[#allocation125_spill] sm:$0xff]  ;;  %vm329_vm5 = vcmp.eq.s32.totalorder %v10732_v20, %v19144_v21  ;;  %v19151_v21 = vld [vmem:[#allocation51_spill] sm:$0xff] }
 0x1ee   :  { %v1826_v26 = vadd.f32 %v1825_v15, %v1763_v54  ;;  %2879 = vmatprep.mubr.f32.mxu1 %v18944_v32  ;;  %v1766_v54 = vmul.f32 %v19125_v33, %v19125_v33  ;;  %vm19128_vm11 = vcmp.eq.s32.totalorder %v10732_v20, %v19127_v56  ;;  %v19130_v33 = vld [vmem:[#allocation156_spill] sm:$0xff] }
 0x1ef   :  { %v19132_v56 = vld [vmem:[#allocation128_spill] sm:$0xff] }
 0x1f0   :  { %7577 = vmatmul.mubr.msk.f32.gmra.mrb[102].mxu0 %vm322_vm3, %v18975_v57  ;;  %v1827_v55 = vadd.f32 %v1826_v26, %v1764_v13  ;;  %v1767_v13 = vmul.f32 %v19126_v49, %v19126_v49  ;;  %v19131_v49 = vld [vmem:[#allocation157_spill] sm:$0xff]  ;;  %vm19133_vm14 = vcmp.eq.s32.totalorder %v10732_v20, %v19132_v56  ;;  %v19137_v56 = vld [vmem:[#allocation127_spill] sm:$0xff] }
 0x1f1   :  { %3436 = vmatprep.mubr.f32.mxu0 %v18944_v32  ;;  %7496 = vmatmul.mubr.msk.f32.gmra.mrb[132].mxu1 %vm19123_vm8, %v18975_v57  ;;  %vm19138_vm3 = vcmp.eq.s32.totalorder %v10732_v20, %v19137_v56  ;;  %v19142_v56 = vld [vmem:[#allocation130_spill] sm:$0xff] }
 0x1f2   :  { %v1828_v15 = vadd.f32 %v1827_v55, %v1765_v30  ;;  %2885 = vmatprep.mubr.f32.mxu1 %v18944_v32  ;;  %v1768_v30 = vmul.f32 %v19130_v33, %v19130_v33  ;;  %v19135_v33 = vld [vmem:[#allocation158_spill] sm:$0xff] }
 0x1f4   :  { %7578 = vmatmul.mubr.msk.f32.gmra.mrb[104].mxu0 %vm323_vm2, %v18975_v57  ;;  %v1829_v26 = vadd.f32 %v1828_v15, %v1766_v54  ;;  %v1769_v54 = vmul.f32 %v19131_v49, %v19131_v49  ;;  %v19136_v49 = vld [vmem:[#allocation159_spill] sm:$0xff]  ;;  %vm19143_vm2 = vcmp.eq.s32.totalorder %v10732_v20, %v19142_v56 }
 0x1f5   :  { %3442 = vmatprep.mubr.f32.mxu0 %v18944_v32  ;;  %7497 = vmatmul.mubr.msk.f32.gmra.mrb[134].mxu1 %vm19128_vm11, %v18975_v57  ;;  %vm331_vm11 = vcmp.eq.s32.totalorder %v10732_v20, %v19151_v21  ;;  %v19160_v21 = vld [vmem:[#allocation52_spill] sm:$0xff] }
 0x1f6   :  { %v1830_v55 = vadd.f32 %v1829_v26, %v1767_v13  ;;  %2891 = vmatprep.mubr.f32.mxu1 %v18944_v32  ;;  %v1770_v13 = vmul.f32 %v19135_v33, %v19135_v33  ;;  %v19140_v33 = vld [vmem:[#allocation160_spill] sm:$0xff] }
 0x1f8   :  { %7579 = vmatmul.mubr.msk.f32.gmra.mrb[106].mxu0 %vm324_vm7, %v18975_v57  ;;  %v1831_v15 = vadd.f32 %v1830_v55, %v1768_v30  ;;  %v1771_v30 = vmul.f32 %v19136_v49, %v19136_v49  ;;  %v19141_v49 = vld [vmem:[#allocation161_spill] sm:$0xff] }
 0x1f9   :  { %3448 = vmatprep.mubr.f32.mxu0 %v18944_v32  ;;  %7498 = vmatmul.mubr.msk.f32.gmra.mrb[136].mxu1 %vm19133_vm14, %v18975_v57 }
 0x1fa   :  { %v1832_v26 = vadd.f32 %v1831_v15, %v1769_v54  ;;  %2897 = vmatprep.mubr.f32.mxu1 %v18944_v32  ;;  %v1772_v54 = vmul.f32 %v19140_v33, %v19140_v33  ;;  %v19145_v33 = vld [vmem:[#allocation162_spill] sm:$0xff] }
 0x1fc   :  { %7580 = vmatmul.mubr.msk.f32.gmra.mrb[108].mxu0 %vm325_vm9, %v18975_v57  ;;  %v1833_v55 = vadd.f32 %v1832_v26, %v1770_v13  ;;  %v1773_v13 = vmul.f32 %v19141_v49, %v19141_v49 }
 0x1fd   :  { %3454 = vmatprep.mubr.f32.mxu0 %v18944_v32  ;;  %7499 = vmatmul.mubr.msk.f32.gmra.mrb[138].mxu1 %vm19138_vm3, %v18975_v57 }
 0x1fe   :  { %v1834_v15 = vadd.f32 %v1833_v55, %v1771_v30  ;;  %2903 = vmatprep.mubr.f32.mxu1 %v18944_v32  ;;  %v1774_v30 = vmul.f32 %v19145_v33, %v19145_v33 }
 0x200   :  { %7581 = vmatmul.mubr.msk.f32.gmra.mrb[110].mxu0 %vm326_vm13, %v18975_v57  ;;  %v1835_v26 = vadd.f32 %v1834_v15, %v1772_v54  ;;  %v19146_v54 = vld [vmem:[#allocation129_spill] sm:$0xff]  ;;  %v19148_v15 = vld [vmem:[#allocation48_spill] sm:$0xff] }
 0x201   :  { %3460 = vmatprep.mubr.f32.mxu0 %v18944_v32  ;;  %7500 = vmatmul.mubr.msk.f32.gmra.mrb[140].mxu1 %vm19143_vm2, %v18975_v57  ;;  %vm19147_vm7 = vcmp.eq.s32.totalorder %v10732_v20, %v19146_v54  ;;  %vm330_vm8 = vcmp.eq.s32.totalorder %v10732_v20, %v19148_v15  ;;  %v19155_v15 = vld [vmem:[#allocation134_spill] sm:$0xff]  ;;  %vm334_vm2 = vcmp.eq.s32.totalorder %v10732_v20, %v19160_v21  ;;  %v19169_v21 = vld [vmem:[#allocation61_spill] sm:$0xff] }
 0x202   :  { %v1836_v55 = vadd.f32 %v1835_v26, %v1773_v13  ;;  %2909 = vmatprep.mubr.f32.mxu1 %v18944_v32  ;;  %v19149_v26 = vld [vmem:[#allocation132_spill] sm:$0xff] }
 0x203   :  { %vm19150_vm9 = vcmp.eq.s32.totalorder %v10732_v20, %v19149_v26 }
 0x204   :  { %7582 = vmatmul.mubr.msk.f32.gmra.mrb[112].mxu0 %vm327_vm15, %v18975_v57  ;;  %v1837_v49 = vadd.f32 %v1836_v55, %v1774_v30  ;;  %v19154_v55 = vld [vmem:[#allocation50_spill] sm:$0xff]  ;;  %vm19156_vm15 = vcmp.eq.s32.totalorder %v10732_v20, %v19155_v15 }
 0x205   :  { %3466 = vmatprep.mubr.f32.mxu0 %v18944_v32  ;;  %7501 = vmatmul.mubr.msk.f32.gmra.mrb[142].mxu1 %vm19147_vm7, %v18975_v57  ;;  %vm332_vm14 = vcmp.eq.s32.totalorder %v10732_v20, %v19154_v55  ;;  %v19163_v55 = vld [vmem:[#allocation57_spill] sm:$0xff] }
 0x206   :  { %v1838_v56 = vrot.slane %v1837_v49, 4  ;;  %2915 = vmatprep.mubr.f32.mxu1 %v18944_v32  ;;  %vm335_vm7 = vcmp.eq.s32.totalorder %v10732_v20, %v19163_v55  ;;  %v19173_v55 = vld [vmem:[#allocation140_spill] sm:$0xff] }
 0x208   :  { %7583 = vmatmul.mubr.msk.f32.gmra.mrb[114].mxu0 %vm328_vm1, %v18975_v57  ;;  %v1839_v13 = vadd.f32 %v1838_v56, %v1837_v49  ;;  %v19152_v49 = vld [vmem:[#allocation131_spill] sm:$0xff]  ;;  %v19157_v56 = vld [vmem:[#allocation53_spill] sm:$0xff] }
 0x209   :  { %3472 = vmatprep.mubr.f32.mxu0 %v18944_v32  ;;  %7502 = vmatmul.mubr.msk.f32.gmra.mrb[144].mxu1 %vm19150_vm9, %v18975_v57  ;;  %vm19153_vm13 = vcmp.eq.s32.totalorder %v10732_v20, %v19152_v49  ;;  %vm333_vm3 = vcmp.eq.s32.totalorder %v10732_v20, %v19157_v56  ;;  %v19161_v49 = vld [vmem:[#allocation136_spill] sm:$0xff] }
 0x20a   :  { %2921 = vmatprep.mubr.f32.mxu1 %v18944_v32  ;;  %v1840_v30 = vrot.slane %v1839_v13, 2  ;;  %v19166_v56 = vld [vmem:[#allocation56_spill] sm:$0xff] }
 0x20b   :  { %vm336_vm9 = vcmp.eq.s32.totalorder %v10732_v20, %v19166_v56  ;;  %v19176_v56 = vld [vmem:[#allocation139_spill] sm:$0xff] }
 0x20c   :  { %7584 = vmatmul.mubr.msk.f32.gmra.mrb[116].mxu0 %vm329_vm5, %v18975_v57  ;;  %v1841_v54 = vadd.f32 %v1840_v30, %v1839_v13  ;;  %v19158_v13 = vld [vmem:[#allocation133_spill] sm:$0xff]  ;;  %vm19162_vm5 = vcmp.eq.s32.totalorder %v10732_v20, %v19161_v49  ;;  %v19172_v49 = vld [vmem:[#allocation60_spill] sm:$0xff] }
 0x20d   :  { %3478 = vmatprep.mubr.f32.mxu0 %v18944_v32  ;;  %7503 = vmatmul.mubr.msk.f32.gmra.mrb[146].mxu1 %vm19153_vm13, %v18975_v57  ;;  %vm19159_vm1 = vcmp.eq.s32.totalorder %v10732_v20, %v19158_v13  ;;  %v19167_v13 = vld [vmem:[#allocation138_spill] sm:$0xff]  ;;  %vm337_vm13 = vcmp.eq.s32.totalorder %v10732_v20, %v19169_v21 }
 0x20e   :  { %2927 = vmatprep.mubr.f32.mxu1 %v18944_v32  ;;  %v1842_v26 = vrot.slane %v1841_v54, 1 }
 0x210   :  { %7585 = vmatmul.mubr.msk.f32.gmra.mrb[118].mxu0 %vm330_vm8, %v18975_v57  ;;  %v1843_v30 = vadd.f32 %v1842_v26, %v1841_v54  ;;  %v19164_v54 = vld [vmem:[#allocation135_spill] sm:$0xff] }
 0x211   :  { %3484 = vmatprep.mubr.f32.mxu0 %v18944_v32  ;;  %7504 = vmatmul.mubr.msk.f32.gmra.mrb[148].mxu1 %vm19156_vm15, %v18975_v57  ;;  %vm19165_vm8 = vcmp.eq.s32.totalorder %v10732_v20, %v19164_v54  ;;  %vm338_vm15 = vcmp.eq.s32.totalorder %v10732_v20, %v19172_v49 }
 0x212   :  { %2933 = vmatprep.mubr.f32.mxu1 %v18944_v32  ;;  %v1844_v15 = vmul.f32 0.001953125, %v1843_v30  ;;  %v19170_v30 = vld [vmem:[#allocation137_spill] sm:$0xff] }
 0x214   :  { %7586 = vmatmul.mubr.msk.f32.gmra.mrb[120].mxu0 %vm331_vm11, %v18975_v57  ;;  %v1845_v26 = vadd.f32 1e-05, %v1844_v15  ;;  %vm19168_vm11 = vcmp.eq.s32.totalorder %v10732_v20, %v19167_v13  ;;  %v19175_v15 = vld [vmem:[#allocation67_spill] sm:$0xff]  ;;  %v9278_v13 = vld [vmem:[%s18246_s6] sm:$0xff] }
 0x215   :  { %3490 = vmatprep.mubr.f32.mxu0 %v18944_v32  ;;  %7505 = vmatmul.mubr.msk.f32.gmra.mrb[150].mxu1 %vm19159_vm1, %v18975_v57  ;;  %vm339_vm1 = vcmp.eq.s32.totalorder %v10732_v20, %v19175_v15  ;;  %v19182_v15 = vld [vmem:[#allocation73_spill] sm:$0xff] }
 0x216   :  { %2939 = vmatprep.mubr.f32.mxu1 %v18944_v32  ;;  %8694 = vrsqrt.f32 %v1845_v26  ;;  %v19178_v26 = vld [vmem:[#allocation66_spill] sm:$0xff] }
 0x218   :  { %7587 = vmatmul.mubr.msk.f32.gmra.mrb[122].mxu0 %vm332_vm14, %v18975_v57  ;;  %vm19171_vm14 = vcmp.eq.s32.totalorder %v10732_v20, %v19170_v30  ;;  %v19179_v30 = vld [vmem:[#allocation47_spill] sm:$0xff] }
 0x219   :  { %3496 = vmatprep.mubr.f32.mxu0 %v18944_v32  ;;  %7506 = vmatmul.mubr.msk.f32.gmra.mrb[152].mxu1 %vm19162_vm5, %v18975_v57  ;;  %vm340_vm5 = vcmp.eq.s32.totalorder %v10732_v20, %v19178_v26  ;;  %v1850_v49 = vsub.s32 4, %v19179_v30  ;;  %v19183_v26 = vld [vmem:[#allocation141_spill] sm:$0xff] }
 0x21a   :  { %2945 = vmatprep.mubr.f32.mxu1 %v18944_v32 }
 0x21c   :  { %7588 = vmatmul.mubr.msk.f32.gmra.mrb[124].mxu0 %vm333_vm3, %v18975_v57  ;;  %vm19174_vm3 = vcmp.eq.s32.totalorder %v10732_v20, %v19173_v55  ;;  %v19180_v55 = vld [vmem:[#allocation142_spill] sm:$0xff] }
 0x21d   :  { %3502 = vmatprep.mubr.f32.mxu0 %v18944_v32  ;;  %7507 = vmatmul.mubr.msk.f32.gmra.mrb[154].mxu1 %vm19165_vm8, %v18975_v57  ;;  %vm341_vm8 = vcmp.eq.s32.totalorder %v10732_v20, %v19182_v15 }
 0x21e   :  { %2951 = vmatprep.mubr.f32.mxu1 %v18944_v32 }
 0x220   :  { %7589 = vmatmul.mubr.msk.f32.gmra.mrb[126].mxu0 %vm334_vm2, %v18975_v57  ;;  %v8695_v54 = vpop.eup %8694  ;;  %vm19177_vm2 = vcmp.eq.s32.totalorder %v10732_v20, %v19176_v56 }
 0x221   :  { %3508 = vmatprep.mubr.f32.mxu0 %v18944_v32  ;;  %7508 = vmatmul.mubr.msk.f32.gmra.mrb[156].mxu1 %vm19168_vm11, %v18975_v57  ;;  %v1847_v21 = vmul.f32 %v9278_v13, %v8695_v54  ;;  %v1918_v54 = vsub.s32 5, %v19179_v30  ;;  %v19187_v30 = vld [vmem:[#allocation144_spill] sm:$0xff] }
 0x222   :  { %2957 = vmatprep.mubr.f32.mxu1 %v18944_v32 }
 0x223   :  { %v12246_v56 = vrot.slane %v1847_v21, %v1850_v49  ;;  %v12258_v15 = vrot.slane %v9278_v13, %v1918_v54  ;;  %v19186_v21 = vld [vmem:[#allocation13_spill] sm:$0xff] }
 0x224   :  { %7590 = vmatmul.mubr.msk.f32.gmra.mrb[128].mxu0 %vm335_vm7, %v18975_v57  ;;  %vm19181_vm7 = vcmp.eq.s32.totalorder %v10732_v20, %v19180_v55  ;;  %v19185_v55 = vld [vmem:[#allocation72_spill] sm:$0xff] }
 0x225   :  { %3514 = vmatprep.mubr.f32.mxu0 %v18944_v32  ;;  %7509 = vmatmul.mubr.msk.f32.gmra.mrb[158].mxu1 %vm19171_vm14, %v18975_v57  ;;  %vm342_vm11 = vcmp.eq.s32.totalorder %v10732_v20, %v19185_v55  ;;  %v1852_v49 = vmul.f32 %v12246_v56, %v19186_v21  ;;  %v19190_v55 = vld [vmem:[#allocation55_spill] sm:$0xff] }
 0x226   :  { %2963 = vmatprep.mubr.f32.mxu1 %v18944_v32  ;;  %v1853_v13 = vmul.f32 %v12246_v56, %v19190_v55  ;;  %v19191_v21 = vld [vmem:[#allocation143_spill] sm:$0xff] }
 0x227   :  { %v12274_v54 = vadd.f32 %v12258_v15, %v1852_v49 }
 0x228   :  { %7591 = vmatmul.mubr.msk.f32.gmra.mrb[130].mxu0 %vm336_vm9, %v18975_v57  ;;  %vm19184_vm9 = vcmp.eq.s32.totalorder %v10732_v20, %v19183_v26  ;;  %v19189_v26 = vld [vmem:[#allocation79_spill] sm:$0xff]  ;;  %v12290_v33 = vadd.f32 %v12258_v15, %v1853_v13 }
 0x229   :  { %3520 = vmatprep.mubr.f32.mxu0 %v18944_v32  ;;  %7510 = vmatmul.mubr.msk.f32.gmra.mrb[160].mxu1 %vm19174_vm3, %v18975_v57  ;;  %vm343_vm14 = vcmp.eq.s32.totalorder %v10732_v20, %v19189_v26  ;;  %v19194_v26 = vld [vmem:[#allocation16_spill] sm:$0xff]  ;;  %v1984_v49 = vmul.f32 0.5, %v12274_v54 }
 0x22a   :  { %2969 = vmatprep.mubr.f32.mxu1 %v18944_v32  ;;  %v1854_v55 = vmul.f32 %v12246_v56, %v19194_v26  ;;  %v19198_v26 = vld [vmem:[#allocation59_spill] sm:$0xff]  ;;  %v1985_v13 = vmul.f32 0.5, %v12290_v33 }
 0x22b   :  { %v1855_v29 = vmul.f32 %v12246_v56, %v19198_v26  ;;  %8696 = vtanh.f32 %v1984_v49  ;;  %v19202_v49 = vld [vmem:[#allocation58_spill] sm:$0xff] }
 0x22c   :  { %7592 = vmatmul.mubr.msk.f32.gmra.mrb[132].mxu0 %vm337_vm13, %v18975_v57  ;;  %vm19188_vm13 = vcmp.eq.s32.totalorder %v10732_v20, %v19187_v30  ;;  %v19193_v30 = vld [vmem:[#allocation78_spill] sm:$0xff]  ;;  %v12305_v31 = vadd.f32 %v12258_v15, %v1854_v55  ;;  %v1856_v26 = vmul.f32 %v12246_v56, %v19202_v49  ;;  %8698 = vtanh.f32 %v1985_v13  ;;  %v19205_v49 = vld [vmem:[#allocation64_spill] sm:$0xff] }
 0x22d   :  { %3526 = vmatprep.mubr.f32.mxu0 %v18944_v32  ;;  %7511 = vmatmul.mubr.msk.f32.gmra.mrb[162].mxu1 %vm19177_vm2, %v18975_v57  ;;  %vm344_vm3 = vcmp.eq.s32.totalorder %v10732_v20, %v19193_v30  ;;  %v19197_v30 = vld [vmem:[#allocation85_spill] sm:$0xff]  ;;  %v12320_v59 = vadd.f32 %v12258_v15, %v1855_v29  ;;  %v1857_v13 = vmul.f32 %v12246_v56, %v19205_v49 }
 0x22e   :  { %2975 = vmatprep.mubr.f32.mxu1 %v18944_v32  ;;  %vm345_vm2 = vcmp.eq.s32.totalorder %v10732_v20, %v19197_v30  ;;  %v19201_v30 = vld [vmem:[#allocation84_spill] sm:$0xff]  ;;  %v1986_v55 = vmul.f32 0.5, %v12305_v31  ;;  %v12335_v5 = vadd.f32 %v12258_v15, %v1856_v26 }
 0x22f   :  { %v1987_v29 = vmul.f32 0.5, %v12320_v59  ;;  %v12350_v49 = vadd.f32 %v12258_v15, %v1857_v13 }
 0x230   :  { %7593 = vmatmul.mubr.msk.f32.gmra.mrb[134].mxu0 %vm338_vm15, %v18975_v57  ;;  %vm19192_vm15 = vcmp.eq.s32.totalorder %v10732_v20, %v19191_v21  ;;  %v19195_v21 = vld [vmem:[#allocation146_spill] sm:$0xff]  ;;  %8700 = vtanh.f32 %v1986_v55  ;;  %v1858_v55 = vmul.f32 %v12246_v56, %v11365_v14  ;;  %v1988_v26 = vmul.f32 0.5, %v12335_v5 }
 0x231   :  { %3532 = vmatprep.mubr.f32.mxu0 %v18944_v32  ;;  %7512 = vmatmul.mubr.msk.f32.gmra.mrb[164].mxu1 %vm19181_vm7, %v18975_v57  ;;  %vm346_vm7 = vcmp.eq.s32.totalorder %v10732_v20, %v19201_v30  ;;  %v19204_v30 = vld [vmem:[#allocation90_spill] sm:$0xff]  ;;  %8702 = vtanh.f32 %v1987_v29  ;;  %v1859_v14 = vmul.f32 %v12246_v56, %v11391_v46  ;;  %v1989_v13 = vmul.f32 0.5, %v12350_v49 }
 0x232   :  { %2981 = vmatprep.mubr.f32.mxu1 %v18944_v32  ;;  %8704 = vtanh.f32 %v1988_v26  ;;  %v12365_v29 = vadd.f32 %v12258_v15, %v1858_v55  ;;  %v1860_v46 = vmul.f32 %v12246_v56, %v11395_v10  ;;  %v1861_v10 = vmul.f32 %v12246_v56, %v11399_v42 }
 0x233   :  { %8706 = vtanh.f32 %v1989_v13  ;;  %v1862_v42 = vmul.f32 %v12246_v56, %v11452_v43  ;;  %v1863_v43 = vmul.f32 %v12246_v56, %v11479_v58  ;;  %v1864_v58 = vmul.f32 %v12246_v56, %v11500_v48 }
 0x234   :  { %7594 = vmatmul.mubr.msk.f32.gmra.mrb[136].mxu0 %vm339_vm1, %v18975_v57  ;;  %vm19196_vm1 = vcmp.eq.s32.totalorder %v10732_v20, %v19195_v21  ;;  %v19199_v21 = vld [vmem:[#allocation145_spill] sm:$0xff]  ;;  %v1990_v55 = vmul.f32 0.5, %v12365_v29  ;;  %v1865_v48 = vmul.f32 %v12246_v56, %v11509_v17  ;;  %v1866_v17 = vmul.f32 %v12246_v56, %v11530_v19 }
 0x235   :  { %3538 = vmatprep.mubr.f32.mxu0 %v18944_v32  ;;  %7513 = vmatmul.mubr.msk.f32.gmra.mrb[166].mxu1 %vm19184_vm9, %v18975_v57  ;;  %vm349_vm9 = vcmp.eq.s32.totalorder %v10732_v20, %v19208_v18  ;;  %v1867_v19 = vmul.f32 %v12246_v56, %v11539_v39  ;;  %v1868_v39 = vmul.f32 %v12246_v56, %v11566_v2 }
 0x236   :  { %2987 = vmatprep.mubr.f32.mxu1 %v18944_v32  ;;  %8708 = vtanh.f32 %v1990_v55  ;;  %v1869_v2 = vmul.f32 %v12246_v56, %v11575_v0 }
 0x238   :  { %7595 = vmatmul.mubr.msk.f32.gmra.mrb[138].mxu0 %vm340_vm5, %v18975_v57  ;;  %vm19200_vm5 = vcmp.eq.s32.totalorder %v10732_v20, %v19199_v21  ;;  %v8697_v21 = vpop.eup %8696 }
 0x239   :  { %3544 = vmatprep.mubr.f32.mxu0 %v18944_v32  ;;  %7514 = vmatmul.mubr.msk.f32.gmra.mrb[168].mxu1 %vm19188_vm13, %v18975_v57  ;;  %v2112_v1 = vmul.f32 0.5, %v8697_v21  ;;  %vm350_vm13 = vcmp.eq.s32.totalorder %v10732_v20, %v19210_v24 }
 0x23a   :  { %2993 = vmatprep.mubr.f32.mxu1 %v18944_v32 }
 0x23c   :  { %7596 = vmatmul.mubr.msk.f32.gmra.mrb[140].mxu0 %vm341_vm8, %v18975_v57  ;;  %vm347_vm8 = vcmp.eq.s32.totalorder %v10732_v20, %v19204_v30  ;;  %v19206_v30 = vld [vmem:[#allocation89_spill] sm:$0xff] }
 0x23d   :  { %3550 = vmatprep.mubr.f32.mxu0 %v18944_v32  ;;  %7515 = vmatmul.mubr.msk.f32.gmra.mrb[170].mxu1 %vm19192_vm15, %v18975_v57  ;;  %vm19212_vm15 = vcmp.eq.s32.totalorder %v10732_v20, %v11026_v4 }
 0x23e   :  { %2999 = vmatprep.mubr.f32.mxu1 %v18944_v32 }
 0x240   :  { %7597 = vmatmul.mubr.msk.f32.gmra.mrb[142].mxu0 %vm342_vm11, %v18975_v57  ;;  %vm19209_vm11 = vcmp.eq.s32.totalorder %v10732_v20, %v11008_v12  ;;  %v12380_v12 = vadd.f32 %v12258_v15, %v1859_v14 }
 0x241   :  { %3556 = vmatprep.mubr.f32.mxu0 %v18944_v32  ;;  %7516 = vmatmul.mubr.msk.f32.gmra.mrb[172].mxu1 %vm19196_vm1, %v18975_v57 }
 0x242   :  { %3005 = vmatprep.mubr.f32.mxu1 %v18944_v32  ;;  %v1991_v14 = vmul.f32 0.5, %v12380_v12 }
 0x244   :  { %7598 = vmatmul.mubr.msk.f32.gmra.mrb[144].mxu0 %vm343_vm14, %v18975_v57  ;;  %vm19211_vm14 = vcmp.eq.s32.totalorder %v10732_v20, %v11028_v37  ;;  %8710 = vtanh.f32 %v1991_v14 }
 0x245   :  { %3562 = vmatprep.mubr.f32.mxu0 %v18944_v32  ;;  %7517 = vmatmul.mubr.msk.f32.gmra.mrb[174].mxu1 %vm19200_vm5, %v18975_v57 }
 0x246   :  { %3011 = vmatprep.mubr.f32.mxu1 %v18944_v32 }
 0x248   :  { %7599 = vmatmul.mubr.msk.f32.gmra.mrb[146].mxu0 %vm344_vm3, %v18975_v57 }
 0x249   :  { %3568 = vmatprep.mubr.f32.mxu0 %v18944_v32  ;;  %7518 = vmatmul.mubr.msk.f32.gmra.mrb[176].mxu1 %vm775_vm4, %v18975_v57  ;;  %vm348_vm4 = vcmp.eq.s32.totalorder %v10732_v20, %v19206_v30  ;;  %v8699_v30 = vpop.eup %8698 }
 0x24a   :  { %3017 = vmatprep.mubr.f32.mxu1 %v18944_v32  ;;  %v2113_v18 = vmul.f32 0.5, %v8699_v30  ;;  %v8701_v21 = vpop.eup %8700 }
 0x24b   :  { %v8703_v30 = vpop.eup %8702 }
 0x24c   :  { %7600 = vmatmul.mubr.msk.f32.gmra.mrb[148].mxu0 %vm345_vm2, %v18975_v57  ;;  %v2177_v24 = vadd.f32 0.5, %v2113_v18  ;;  %v8705_v18 = vpop.eup %8704 }
 0x24d   :  { %3574 = vmatprep.mubr.f32.mxu0 %v18944_v32  ;;  %7519 = vmatmul.mubr.msk.f32.gmra.mrb[178].mxu1 %vm776_vm12, %v18975_v57  ;;  %vm19207_vm12 = vcmp.eq.s32.totalorder %v10732_v20, %v11010_v47  ;;  %v2176_v47 = vadd.f32 0.5, %v2112_v1  ;;  %v2114_v1 = vmul.f32 0.5, %v8701_v21  ;;  %v2116_v55 = vmul.f32 0.5, %v8705_v18 }
 0x24e   :  { %3023 = vmatprep.mubr.f32.mxu1 %v18944_v32  ;;  %v2241_v37 = vmul.f32 %v2177_v24, %v12290_v33 }
 0x24f   :  { %v2240_v26 = vmul.f32 %v2176_v47, %v12274_v54  ;;  %v12393_v54 = vadd.f32 %v12258_v15, %v1860_v46  ;;  %v2178_v13 = vadd.f32 0.5, %v2114_v1  ;;  %v2115_v47 = vmul.f32 0.5, %v8703_v30 }
 0x250   :  { %7601 = vmatmul.mubr.msk.f32.gmra.mrb[150].mxu0 %vm346_vm7, %v18975_v57  ;;  %v12406_v46 = vadd.f32 %v12258_v15, %v1861_v10  ;;  %v12419_v1 = vadd.f32 %v12258_v15, %v1862_v42 }
 0x251   :  { %3580 = vmatprep.mubr.f32.mxu0 %v18944_v32  ;;  %7520 = vmatmul.mubr.msk.f32.gmra.mrb[180].mxu1 %vm19207_vm12, %v18975_v57  ;;  %v1992_v21 = vmul.f32 0.5, %v12393_v54  ;;  %v2242_v4 = vmul.f32 %v2178_v13, %v12305_v31  ;;  %v2179_v33 = vadd.f32 0.5, %v2115_v47  ;;  %v2180_v31 = vadd.f32 0.5, %v2116_v55 }
 0x252   :  { %3029 = vmatprep.mubr.f32.mxu1 %v18944_v32  ;;  %v1993_v24 = vmul.f32 0.5, %v12406_v46  ;;  %v1994_v14 = vmul.f32 0.5, %v12419_v1  ;;  %vm19231_vm12 = vcmp.eq.s32.totalorder %v10732_v20, %v11355_v27 }
 0x253   :  { %8712 = vtanh.f32 %v1992_v21  ;;  %v2243_v38 = vmul.f32 %v2179_v33, %v12320_v59  ;;  %v2244_v59 = vmul.f32 %v2180_v31, %v12335_v5  ;;  %v12445_v21 = vadd.f32 %v12258_v15, %v1864_v58  ;;  %v19215_v5 = vld [vmem:[#allocation6_spill] sm:$0xff] }
 0x254   :  { %7602 = vmatmul.mubr.msk.f32.gmra.mrb[152].mxu0 %vm347_vm8, %v18975_v57  ;;  %8714 = vtanh.f32 %v1993_v24  ;;  %v12458_v24 = vadd.f32 %v12258_v15, %v1865_v48  ;;  %v12484_v48 = vadd.f32 %v12258_v15, %v1867_v19 }
 0x255   :  { %3586 = vmatprep.mubr.f32.mxu0 %v18944_v32  ;;  %7521 = vmatmul.mubr.msk.f32.gmra.mrb[182].mxu1 %vm19209_vm11, %v18975_v57  ;;  %8716 = vtanh.f32 %v1994_v14  ;;  %v12471_v14 = vadd.f32 %v12258_v15, %v1866_v17  ;;  %v12499_v17 = vadd.f32 %v12258_v15, %v1868_v39  ;;  %vm19233_vm11 = vcmp.eq.s32.totalorder %v10732_v20, %v11460_v9 }
 0x256   :  { %3035 = vmatprep.mubr.f32.mxu1 %v18944_v32  ;;  %v1997_v58 = vmul.f32 0.5, %v12458_v24 }
 0x257   :  { %v2000_v19 = vmul.f32 0.5, %v12499_v17 }
 0x258   :  { %7603 = vmatmul.mubr.msk.f32.gmra.mrb[154].mxu0 %vm348_vm4, %v18975_v57 }
 0x259   :  { %3592 = vmatprep.mubr.f32.mxu0 %v18944_v32  ;;  %7522 = vmatmul.mubr.msk.f32.gmra.mrb[184].mxu1 %vm19211_vm14, %v18975_v57  ;;  %vm19235_vm14 = vcmp.eq.s32.totalorder %v10732_v20, %v11525_v22 }
 0x25a   :  { %3041 = vmatprep.mubr.f32.mxu1 %v18944_v32 }
 0x25c   :  { %7604 = vmatmul.mubr.msk.f32.gmra.mrb[156].mxu0 %vm349_vm9, %v18975_v57  ;;  %vm19232_vm9 = vcmp.eq.s32.totalorder %v10732_v20, %v11417_v25 }
 0x25d   :  { %3598 = vmatprep.mubr.f32.mxu0 %v18944_v32  ;;  %7523 = vmatmul.mubr.msk.f32.gmra.mrb[186].mxu1 %vm19212_vm15, %v18975_v57  ;;  %vm19236_vm15 = vcmp.eq.s32.totalorder %v10732_v20, %v11558_v60 }
 0x25e   :  { %3047 = vmatprep.mubr.f32.mxu1 %v18944_v32 }
 0x260   :  { %7605 = vmatmul.mubr.msk.f32.gmra.mrb[158].mxu0 %vm350_vm13, %v18975_v57  ;;  %vm19234_vm13 = vcmp.eq.s32.totalorder %v10732_v20, %v11495_v62 }
 0x261   :  { %3702 = vmatprep.mubr.f32.mxu0 %v18944_v32  ;;  %7524 = vmatmul.mubr.msk.f32.gmra.mrb[188].mxu1 %vm781_vm6, %v18975_v57  ;;  %vm19216_vm6 = vcmp.eq.s32.totalorder %v10732_v20, %v19215_v5 }
 0x262   :  { %3053 = vmatprep.mubr.f32.mxu1 %v18944_v32 }
 0x264   :  { %3703 = vmatmul.mubr.f32.vlgmr.msra.gmra.mrb[32].mxu0 %v2240_v26  ;;  %v8707_v26 = vpop.eup %8706 }
 0x265   :  { %3708 = vmatprep.mubr.f32.mxu0 %v18944_v32  ;;  %7525 = vmatmul.mubr.msk.f32.gmra.mrb[190].mxu1 %vm782_vm10, %v18975_v57  ;;  %v2117_v30 = vmul.f32 0.5, %v8707_v26  ;;  %v8709_v10 = vpop.eup %8708  ;;  %vm19214_vm10 = vcmp.eq.s32.totalorder %v10732_v20, %v19213_v6 }
 0x266   :  { %3059 = vmatprep.mubr.f32.mxu1 %v18944_v32  ;;  %v2118_v47 = vmul.f32 0.5, %v8709_v10  ;;  %v8711_v18 = vpop.eup %8710 }
 0x267   :  { %v2181_v13 = vadd.f32 0.5, %v2117_v30  ;;  %v2119_v55 = vmul.f32 0.5, %v8711_v18  ;;  %v8713_v26 = vpop.eup %8712  ;;  %v1998_v18 = vmul.f32 0.5, %v12471_v14 }
 0x268   :  { %3709 = vmatmul.mubr.f32.gmra.mrb[34].mxu0 %v2241_v37  ;;  %v12432_v37 = vadd.f32 %v12258_v15, %v1863_v43  ;;  %v2182_v33 = vadd.f32 0.5, %v2118_v47  ;;  %v1996_v43 = vmul.f32 0.5, %v12445_v21  ;;  %v2120_v30 = vmul.f32 0.5, %v8713_v26  ;;  %v8715_v10 = vpop.eup %8714 }
 0x269   :  { %3714 = vmatprep.mubr.f32.mxu0 %v18944_v32  ;;  %7526 = vmatmul.mubr.msk.f32.gmra.mrb[192].mxu1 %vm19214_vm10, %v18975_v57  ;;  %v2183_v31 = vadd.f32 0.5, %v2119_v55  ;;  %v8717_v47 = vpop.eup %8716  ;;  %v1999_v26 = vmul.f32 0.5, %v12484_v48 }
 0x26a   :  { %3065 = vmatprep.mubr.f32.mxu1 %v18944_v32  ;;  %v1995_v42 = vmul.f32 0.5, %v12432_v37 }
 0x26b   :  { %v2247_v6 = vmul.f32 %v2183_v31, %v12380_v12  ;;  %v19221_v12 = vld [vmem:[#allocation148_spill] sm:$0xff] }
 0x26c   :  { %3715 = vmatmul.mubr.f32.gmra.mrb[36].mxu0 %v2242_v4  ;;  %v2245_v4 = vmul.f32 %v2181_v13, %v12350_v49  ;;  %8718 = vtanh.f32 %v1995_v42  ;;  %v19217_v49 = vld [vmem:[#allocation8_spill] sm:$0xff]  ;;  %v2121_v13 = vmul.f32 0.5, %v8715_v10  ;;  %vm19222_vm2 = vcmp.eq.s32.totalorder %v10732_v20, %v19221_v12 }
 0x26d   :  { %3720 = vmatprep.mubr.f32.mxu0 %v18944_v32  ;;  %7527 = vmatmul.mubr.msk.f32.gmra.mrb[194].mxu1 %vm19216_vm6, %v18975_v57  ;;  %vm19218_vm3 = vcmp.eq.s32.totalorder %v10732_v20, %v19217_v49  ;;  %8720 = vtanh.f32 %v1996_v43  ;;  %v19223_v43 = vld [vmem:[#allocation7_spill] sm:$0xff] }
 0x26e   :  { %3071 = vmatprep.mubr.f32.mxu1 %v18944_v32  ;;  %8722 = vtanh.f32 %v1997_v58  ;;  %v2185_v5 = vadd.f32 0.5, %v2121_v13  ;;  %vm19224_vm5 = vcmp.eq.s32.totalorder %v10732_v20, %v19223_v43  ;;  %v12516_v58 = vadd.f32 %v12258_v15, %v1869_v2 }
 0x26f   :  { %8724 = vtanh.f32 %v1998_v18  ;;  %v1872_v2 = vmul.f32 %v12246_v56, %v11633_v16 }
 0x270   :  { %3721 = vmatmul.mubr.f32.gmra.mrb[38].mxu0 %v2243_v38  ;;  %v2246_v38 = vmul.f32 %v2182_v33, %v12365_v29  ;;  %v19219_v29 = vld [vmem:[#allocation5_spill] sm:$0xff]  ;;  %v2249_v49 = vmul.f32 %v2185_v5, %v12406_v46  ;;  %8726 = vtanh.f32 %v1999_v26  ;;  %v2001_v18 = vmul.f32 0.5, %v12516_v58 }
 0x271   :  { %3726 = vmatprep.mubr.f32.mxu0 %v18944_v32  ;;  %7528 = vmatmul.mubr.msk.f32.gmra.mrb[196].mxu1 %vm19218_vm3, %v18975_v57  ;;  %vm19220_vm1 = vcmp.eq.s32.totalorder %v10732_v20, %v19219_v29  ;;  %v19225_v29 = vld [vmem:[#allocation14_spill] sm:$0xff]  ;;  %8728 = vtanh.f32 %v2000_v19  ;;  %v1873_v19 = vmul.f32 %v12246_v56, %v11650_v45 }
 0x272   :  { %3077 = vmatprep.mubr.f32.mxu1 %v18944_v32  ;;  %vm19226_vm7 = vcmp.eq.s32.totalorder %v10732_v20, %v19225_v29  ;;  %8730 = vtanh.f32 %v2001_v18  ;;  %v1874_v18 = vmul.f32 %v12246_v56, %v11662_v63 }
 0x273   :  { %v12584_v27 = vadd.f32 %v12258_v15, %v1873_v19 }
 0x274   :  { %3727 = vmatmul.mubr.f32.gmra.mrb[40].mxu0 %v2244_v59  ;;  %v2184_v59 = vadd.f32 0.5, %v2120_v30  ;;  %v1870_v30 = vmul.f32 %v12246_v56, %v11602_v61  ;;  %v12601_v25 = vadd.f32 %v12258_v15, %v1874_v18 }
 0x275   :  { %3732 = vmatprep.mubr.f32.mxu0 %v18944_v32  ;;  %7529 = vmatmul.mubr.msk.f32.gmra.mrb[198].mxu1 %vm19220_vm1, %v18975_v57 }
 0x276   :  { %3083 = vmatprep.mubr.f32.mxu1 %v18944_v32  ;;  %v2248_v42 = vmul.f32 %v2184_v59, %v12393_v54  ;;  %v8719_v33 = vpop.eup %8718  ;;  %v12533_v12 = vadd.f32 %v12258_v15, %v1870_v30 }
 0x277   :  { %v8721_v31 = vpop.eup %8720 }
 0x278   :  { %3733 = vmatmul.mubr.f32.gmra.mrb[42].mxu0 %v2245_v4  ;;  %v2122_v4 = vmul.f32 0.5, %v8717_v47  ;;  %v2124_v59 = vmul.f32 0.5, %v8721_v31  ;;  %v8723_v13 = vpop.eup %8722  ;;  %v1871_v47 = vmul.f32 %v12246_v56, %v11611_v23  ;;  %v2002_v43 = vmul.f32 0.5, %v12533_v12 }
 0x279   :  { %3738 = vmatprep.mubr.f32.mxu0 %v18944_v32  ;;  %7530 = vmatmul.mubr.msk.f32.gmra.mrb[200].mxu1 %vm19222_vm2, %v18975_v57 }
 0x27a   :  { %3089 = vmatprep.mubr.f32.mxu1 %v18944_v32  ;;  %v2186_v0 = vadd.f32 0.5, %v2122_v4  ;;  %v2188_v23 = vadd.f32 0.5, %v2124_v59  ;;  %v2125_v4 = vmul.f32 0.5, %v8723_v13  ;;  %8732 = vtanh.f32 %v2002_v43 }
 0x27c   :  { %3739 = vmatmul.mubr.f32.gmra.mrb[44].mxu0 %v2246_v38  ;;  %v12494_v55 = vpop.f32.mrb[96].mxu1  ;;  %v2123_v38 = vmul.f32 0.5, %v8719_v33  ;;  %v8725_v33 = vpop.eup %8724  ;;  %v2189_v16 = vadd.f32 0.5, %v2125_v4 }
 0x27d   :  { %3744 = vmatprep.mubr.f32.mxu0 %v18944_v32  ;;  %v12501_v54 = vpop.f32.mrb[97].mxu1  ;;  %7531 = vmatmul.mubr.msk.f32.gmra.mrb[202].mxu1 %vm19224_vm5, %v18975_v57  ;;  %v2126_v31 = vmul.f32 0.5, %v8725_v33  ;;  %v8727_v30 = vpop.eup %8726 }
 0x27e   :  { %3095 = vmatprep.mubr.f32.mxu1 %v18944_v32  ;;  %v2187_v61 = vadd.f32 0.5, %v2123_v38  ;;  %v2252_v38 = vmul.f32 %v2188_v23, %v12445_v21  ;;  %v2253_v59 = vmul.f32 %v2189_v16, %v12458_v24  ;;  %v2127_v13 = vmul.f32 0.5, %v8727_v30 }
 0x27f   :  { %v2190_v45 = vadd.f32 0.5, %v2126_v31  ;;  %v1876_v30 = vmul.f32 %v12246_v56, %v11683_v28 }
 0x280   :  { %3745 = vmatmul.mubr.f32.gmra.mrb[46].mxu0 %v2247_v6  ;;  %v12511_v10 = vpop.f32.mrb[98].mxu1  ;;  %v2250_v6 = vmul.f32 %v2186_v0, %v12419_v1  ;;  %v2251_v5 = vmul.f32 %v2187_v61, %v12432_v37  ;;  %v19229_v0 = vld [vmem:[#allocation15_spill] sm:$0xff]  ;;  %v12567_v61 = vadd.f32 %v12258_v15, %v1872_v2  ;;  %v2191_v63 = vadd.f32 0.5, %v2127_v13 }
 0x281   :  { %3750 = vmatprep.mubr.f32.mxu0 %v18944_v32  ;;  %v12518_v46 = vpop.f32.mrb[99].mxu1  ;;  %7532 = vmatmul.mubr.msk.f32.gmra.mrb[204].mxu1 %vm19226_vm7, %v18975_v57  ;;  %vm19230_vm4 = vcmp.eq.s32.totalorder %v10732_v20, %v19229_v0  ;;  %v2254_v23 = vmul.f32 %v2190_v45, %v12471_v14  ;;  %v1875_v2 = vmul.f32 %v12246_v56, %v11675_v11  ;;  %v2005_v0 = vmul.f32 0.5, %v12584_v27 }
 0x282   :  { %3101 = vmatprep.mubr.f32.mxu1 %v18944_v32  ;;  %v12635_v62 = vadd.f32 %v12258_v15, %v1876_v30 }
 0x283   :  { %v12618_v9 = vadd.f32 %v12258_v15, %v1875_v2 }
 0x284   :  { %3751 = vmatmul.mubr.f32.gmra.mrb[48].mxu0 %v2248_v42  ;;  %v12528_v39 = vpop.f32.mrb[100].mxu1  ;;  %v19227_v42 = vld [vmem:[#allocation54_spill] sm:$0xff] }
 0x285   :  { %3756 = vmatprep.mubr.f32.mxu0 %v18944_v32  ;;  %v12535_v1 = vpop.f32.mrb[101].mxu1  ;;  %vm19228_vm8 = vcmp.eq.s32.totalorder %v10732_v20, %v19227_v42 }
 0x286   :  { %7533 = vmatmul.mubr.msk.f32.gmra.mrb[206].mxu1 %vm19228_vm8, %v18975_v57 }
 0x287   :  { %3107 = vmatprep.mubr.f32.mxu1 %v18944_v32 }
 0x288   :  { %3757 = vmatmul.mubr.f32.gmra.mrb[50].mxu0 %v2249_v49  ;;  %v12545_v26 = vpop.f32.mrb[102].mxu1  ;;  %v12550_v49 = vadd.f32 %v12258_v15, %v1871_v47  ;;  %v8729_v47 = vpop.eup %8728 }
 0x289   :  { %3762 = vmatprep.mubr.f32.mxu0 %v18944_v32  ;;  %v12552_v37 = vpop.f32.mrb[103].mxu1  ;;  %v2128_v4 = vmul.f32 0.5, %v8729_v47  ;;  %v8731_v33 = vpop.eup %8730  ;;  %v1877_v47 = vmul.f32 %v12246_v56, %v11696_v35 }
 0x28a   :  { %7534 = vmatmul.mubr.msk.f32.gmra.mrb[208].mxu1 %vm19230_vm4, %v18975_v57  ;;  %v2129_v16 = vmul.f32 0.5, %v8731_v33  ;;  %v8733_v31 = vpop.eup %8732  ;;  %v1878_v33 = vmul.f32 %v12246_v56, %v11704_v52 }
 0x28b   :  { %3113 = vmatprep.mubr.f32.mxu1 %v18944_v32  ;;  %v2192_v11 = vadd.f32 0.5, %v2128_v4  ;;  %v2130_v45 = vmul.f32 0.5, %v8733_v31  ;;  %v12652_v22 = vadd.f32 %v12258_v15, %v1877_v47  ;;  %v1879_v31 = vmul.f32 %v12246_v56, %v11717_v50 }
 0x28c   :  { %3763 = vmatmul.mubr.f32.gmra.mrb[52].mxu0 %v2250_v6  ;;  %v12562_v29 = vpop.f32.mrb[104].mxu1  ;;  %v2003_v6 = vmul.f32 0.5, %v12550_v49  ;;  %v2193_v28 = vadd.f32 0.5, %v2129_v16  ;;  %v12669_v60 = vadd.f32 %v12258_v15, %v1878_v33 }
 0x28d   :  { %3768 = vmatprep.mubr.f32.mxu0 %v18944_v32  ;;  %v12569_v21 = vpop.f32.mrb[105].mxu1  ;;  %v2194_v35 = vadd.f32 0.5, %v2130_v45 }
 0x28e   :  { %7535 = vmatmul.mubr.msk.f32.gmra.mrb[210].mxu1 %vm19231_vm12, %v18975_v57  ;;  %8734 = vtanh.f32 %v2003_v6  ;;  %v2006_v6 = vmul.f32 0.5, %v12601_v25 }
 0x28f   :  { %3119 = vmatprep.mubr.f32.mxu1 %v18944_v32 }
 0x290   :  { %3769 = vmatmul.mubr.f32.gmra.mrb[54].mxu0 %v2251_v5  ;;  %v12579_v42 = vpop.f32.mrb[106].mxu1  ;;  %v2004_v5 = vmul.f32 0.5, %v12567_v61 }
 0x291   :  { %3774 = vmatprep.mubr.f32.mxu0 %v18944_v32  ;;  %v12586_v24 = vpop.f32.mrb[107].mxu1 }
 0x292   :  { %7536 = vmatmul.mubr.msk.f32.gmra.mrb[212].mxu1 %vm19232_vm9, %v18975_v57  ;;  %8736 = vtanh.f32 %v2004_v5  ;;  %v2007_v5 = vmul.f32 0.5, %v12618_v9 }
 0x293   :  { %3125 = vmatprep.mubr.f32.mxu1 %v18944_v32  ;;  %8738 = vtanh.f32 %v2005_v0  ;;  %v2008_v0 = vmul.f32 0.5, %v12635_v62 }
 0x294   :  { %3775 = vmatmul.mubr.f32.gmra.mrb[56].mxu0 %v2252_v38  ;;  %v12596_v43 = vpop.f32.mrb[108].mxu1  ;;  %v2255_v38 = vmul.f32 %v2191_v63, %v12484_v48  ;;  %8740 = vtanh.f32 %v2006_v6  ;;  %v2009_v6 = vmul.f32 0.5, %v12652_v22 }
 0x295   :  { %3780 = vmatprep.mubr.f32.mxu0 %v18944_v32  ;;  %v12603_v14 = vpop.f32.mrb[109].mxu1  ;;  %8742 = vtanh.f32 %v2007_v5  ;;  %v2010_v5 = vmul.f32 0.5, %v12669_v60 }
 0x296   :  { %7537 = vmatmul.mubr.msk.f32.gmra.mrb[214].mxu1 %vm19233_vm11, %v18975_v57  ;;  %8744 = vtanh.f32 %v2008_v0 }
 0x297   :  { %3131 = vmatprep.mubr.f32.mxu1 %v18944_v32  ;;  %8746 = vtanh.f32 %v2009_v6 }
 0x298   :  { %3781 = vmatmul.mubr.f32.gmra.mrb[58].mxu0 %v2253_v59  ;;  %v12613_v19 = vpop.f32.mrb[110].mxu1  ;;  %v2256_v59 = vmul.f32 %v2192_v11, %v12499_v17  ;;  %v8735_v13 = vpop.eup %8734  ;;  %8748 = vtanh.f32 %v2010_v5 }
 0x299   :  { %3786 = vmatprep.mubr.f32.mxu0 %v18944_v32  ;;  %v12620_v48 = vpop.f32.mrb[111].mxu1  ;;  %v2131_v63 = vmul.f32 0.5, %v8735_v13  ;;  %v1880_v13 = vmul.f32 %v12246_v56, %v11725_v41  ;;  %v1881_v41 = vmul.f32 %v12246_v56, %v11738_v34  ;;  %v1882_v34 = vmul.f32 %v12246_v56, %v11746_v36 }
 0x29a   :  { %7538 = vmatmul.mubr.msk.f32.gmra.mrb[216].mxu1 %vm19234_vm13, %v18975_v57  ;;  %v1883_v36 = vmul.f32 %v12246_v56, %v11759_v8 }
 0x29b   :  { %3137 = vmatprep.mubr.f32.mxu1 %v18944_v32  ;;  %v2195_v52 = vadd.f32 0.5, %v2131_v63  ;;  %v12697_v33 = vadd.f32 %v12258_v15, %v1880_v13  ;;  %v12709_v6 = vadd.f32 %v12258_v15, %v1881_v41 }
 0x29c   :  { %3787 = vmatmul.mubr.f32.gmra.mrb[60].mxu0 %v2254_v23  ;;  %v12630_v18 = vpop.f32.mrb[112].mxu1  ;;  %v2257_v23 = vmul.f32 %v2193_v28, %v12516_v58  ;;  %v8737_v4 = vpop.eup %8736 }
 0x29d   :  { %3792 = vmatprep.mubr.f32.mxu0 %v18944_v32  ;;  %v12637_v17 = vpop.f32.mrb[113].mxu1  ;;  %v2132_v11 = vmul.f32 0.5, %v8737_v4  ;;  %v8739_v16 = vpop.eup %8738  ;;  %v2013_v5 = vmul.f32 0.5, %v12709_v6 }
 0x29e   :  { %7539 = vmatmul.mubr.msk.f32.gmra.mrb[218].mxu1 %vm19235_vm14, %v18975_v57  ;;  %v2133_v28 = vmul.f32 0.5, %v8739_v16  ;;  %v8741_v45 = vpop.eup %8740 }
 0x29f   :  { %3143 = vmatprep.mubr.f32.mxu1 %v18944_v32  ;;  %v2196_v50 = vadd.f32 0.5, %v2132_v11 }
 0x2a0   :  { %3793 = vmatmul.mubr.f32.gmra.mrb[62].mxu0 %v2255_v38  ;;  %v12647_v2 = vpop.f32.mrb[114].mxu1  ;;  %v2258_v38 = vmul.f32 %v2194_v35, %v12533_v12  ;;  %v2197_v40 = vadd.f32 0.5, %v2133_v28  ;;  %v8743_v35 = vpop.eup %8742 }
 0x2a1   :  { %3798 = vmatprep.mubr.f32.mxu0 %v18944_v32  ;;  %v12654_v58 = vpop.f32.mrb[115].mxu1  ;;  %v8745_v11 = vpop.eup %8744 }
 0x2a2   :  { %7540 = vmatmul.mubr.msk.f32.gmra.mrb[220].mxu1 %vm19236_vm15, %v18975_v57  ;;  %v2136_v28 = vmul.f32 0.5, %v8745_v11 }
 0x2a3   :  { %3149 = vmatprep.mubr.f32.mxu1 %v18944_v32 }
 0x2a4   :  { %3799 = vmatmul.mubr.f32.gmra.mrb[64].mxu0 %v2256_v59  ;;  %v12664_v30 = vpop.f32.mrb[116].mxu1  ;;  %v2259_v59 = vmul.f32 %v2195_v52, %v12550_v49  ;;  %v2134_v49 = vmul.f32 0.5, %v8741_v45  ;;  %v2135_v52 = vmul.f32 0.5, %v8743_v35  ;;  %v8747_v45 = vpop.eup %8746 }
 0x2a5   :  { %3804 = vmatprep.mubr.f32.mxu0 %v18944_v32  ;;  %v12671_v12 = vpop.f32.mrb[117].mxu1  ;;  %v2137_v35 = vmul.f32 0.5, %v8747_v45  ;;  %v8749_v41 = vpop.eup %8748 }
 0x2a6   :  { %7541 = vmatmul.mubr.msk.f32.gmra.mrb[222].mxu1 %vm798_vm0, %v18975_v57  ;;  %v2260_v57 = vmul.f32 %v2196_v50, %v12567_v61  ;;  %v2261_v61 = vmul.f32 %v2197_v40, %v12584_v27  ;;  %v2199_v50 = vadd.f32 0.5, %v2135_v52  ;;  %v12733_v52 = vadd.f32 %v12258_v15, %v1883_v36 }
 0x2a8   :  { %3805 = vmatmul.mubr.f32.gmra.mrb[66].mxu0 %v2257_v23  ;;  %v12680_v47 = vpop.f32.mrb[118].mxu1  ;;  %v12685_v23 = vadd.f32 %v12258_v15, %v1879_v31  ;;  %v2012_v31 = vmul.f32 0.5, %v12697_v33 }
 0x2a9   :  { %3810 = vmatprep.mubr.f32.mxu0 %v18944_v32  ;;  %v12687_v20 = vpop.f32.mrb[119].mxu1 }
 0x2aa   :  { %v2011_v4 = vmul.f32 0.5, %v12685_v23 }
 0x2ac   :  { %3811 = vmatmul.mubr.f32.gmra.mrb[68].mxu0 %v2258_v38  ;;  %v12692_v63 = vpop.f32.mrb[120].mxu1  ;;  %v2198_v38 = vadd.f32 0.5, %v2134_v49  ;;  %8750 = vtanh.f32 %v2011_v4  ;;  %v2200_v49 = vadd.f32 0.5, %v2136_v28  ;;  %v19237_v4 = vld [vmem:[#allocation18_spill] sm:$0xff] }
 0x2ad   :  { %3816 = vmatprep.mubr.f32.mxu0 %v18944_v32  ;;  %v12699_v0 = vpop.f32.mrb[121].mxu1  ;;  %8752 = vtanh.f32 %v2012_v31  ;;  %v1884_v8 = vmul.f32 %v12246_v56, %v19237_v4  ;;  %v2138_v31 = vmul.f32 0.5, %v8749_v41  ;;  %v19240_v4 = vld [vmem:[#allocation70_spill] sm:$0xff] }
 0x2ae   :  { %v2262_v27 = vmul.f32 %v2198_v38, %v12601_v25  ;;  %v2263_v25 = vmul.f32 %v2199_v50, %v12618_v9  ;;  %8754 = vtanh.f32 %v2013_v5  ;;  %v2264_v9 = vmul.f32 %v2200_v49, %v12635_v62  ;;  %v19238_v50 = vld [vmem:[#allocation63_spill] sm:$0xff] }
 0x2af   :  { %v1885_v28 = vmul.f32 %v12246_v56, %v19238_v50  ;;  %v2015_v5 = vmul.f32 0.5, %v12733_v52  ;;  %v12745_v36 = vadd.f32 %v12258_v15, %v1884_v8  ;;  %v2202_v49 = vadd.f32 0.5, %v2138_v31 }
 0x2b0   :  { %3817 = vmatmul.mubr.f32.gmra.mrb[70].mxu0 %v2259_v59  ;;  %v12704_v16 = vpop.f32.mrb[122].mxu1 }
 0x2b1   :  { %3822 = vmatprep.mubr.f32.mxu0 %v18944_v32  ;;  %v12711_v59 = vpop.f32.mrb[123].mxu1  ;;  %v12757_v8 = vadd.f32 %v12258_v15, %v1885_v28 }
 0x2b4   :  { %3823 = vmatmul.mubr.f32.gmra.mrb[72].mxu0 %v2260_v57  ;;  %v12716_v13 = vpop.f32.mrb[124].mxu1  ;;  %v12721_v57 = vadd.f32 %v12258_v15, %v1882_v34  ;;  %v2201_v34 = vadd.f32 0.5, %v2137_v35 }
 0x2b5   :  { %3828 = vmatprep.mubr.f32.mxu0 %v18944_v32  ;;  %v12723_v40 = vpop.f32.mrb[125].mxu1 }
 0x2b6   :  { %v2014_v38 = vmul.f32 0.5, %v12721_v57  ;;  %v2265_v62 = vmul.f32 %v2201_v34, %v12652_v22  ;;  %v2266_v22 = vmul.f32 %v2202_v49, %v12669_v60 }
 0x2b8   :  { %3829 = vmatmul.mubr.f32.gmra.mrb[74].mxu0 %v2261_v61  ;;  %v12728_v61 = vpop.f32.mrb[126].mxu1  ;;  %8756 = vtanh.f32 %v2014_v38  ;;  %v2016_v38 = vmul.f32 0.5, %v12745_v36 }
 0x2b9   :  { %3834 = vmatprep.mubr.f32.mxu0 %v18944_v32  ;;  %v12735_v11 = vpop.f32.mrb[127].mxu1  ;;  %8758 = vtanh.f32 %v2015_v5  ;;  %v2017_v5 = vmul.f32 0.5, %v12757_v8 }
 0x2ba   :  { %8760 = vtanh.f32 %v2016_v38 }
 0x2bb   :  { %8762 = vtanh.f32 %v2017_v5 }
 0x2bc   :  { %3835 = vmatmul.mubr.f32.gmra.mrb[76].mxu0 %v2262_v27  ;;  %v8751_v27 = vpop.eup %8750  ;;  %v12740_v45 = vpop.f32.mrb[128].mxu1 }
 0x2bd   :  { %3840 = vmatprep.mubr.f32.mxu0 %v18944_v32  ;;  %v2139_v35 = vmul.f32 0.5, %v8751_v27  ;;  %v8753_v41 = vpop.eup %8752 }
 0x2be   :  { %v2140_v31 = vmul.f32 0.5, %v8753_v41  ;;  %v8755_v27 = vpop.eup %8754 }
 0x2bf   :  { %v2203_v34 = vadd.f32 0.5, %v2139_v35  ;;  %v2141_v35 = vmul.f32 0.5, %v8755_v27 }
 0x2c0   :  { %3841 = vmatmul.mubr.f32.gmra.mrb[78].mxu0 %v2263_v25  ;;  %v12747_v25 = vpop.f32.mrb[129].mxu1  ;;  %v2204_v49 = vadd.f32 0.5, %v2140_v31 }
 0x2c1   :  { %3846 = vmatprep.mubr.f32.mxu0 %v18944_v32  ;;  %19239 = vst [vmem:[#allocation19_spill] sm:$0xff] %v12747_v25  ;;  %v12752_v50 = vpop.f32.mrb[130].mxu1  ;;  %v2267_v60 = vmul.f32 %v2203_v34, %v12685_v23  ;;  %v2205_v34 = vadd.f32 0.5, %v2141_v35 }
 0x2c2   :  { %19241 = vst [vmem:[#allocation81_spill] sm:$0xff] %v12752_v50  ;;  %v12759_v25 = vpop.f32.mrb[131].mxu1  ;;  %v8757_v41 = vpop.eup %8756  ;;  %v2268_v23 = vmul.f32 %v2204_v49, %v12697_v33 }
 0x2c3   :  { %19242 = vst [vmem:[#allocation87_spill] sm:$0xff] %v12759_v25  ;;  %v2142_v31 = vmul.f32 0.5, %v8757_v41  ;;  %v8759_v27 = vpop.eup %8758  ;;  %v2269_v33 = vmul.f32 %v2205_v34, %v12709_v6 }
 0x2c4   :  { %3847 = vmatmul.mubr.f32.gmra.mrb[80].mxu0 %v2264_v9  ;;  %v1886_v9 = vmul.f32 %v12246_v56, %v19240_v4  ;;  %v12764_v50 = vpop.f32.mrb[132].mxu1  ;;  %v2143_v35 = vmul.f32 0.5, %v8759_v27  ;;  %v8761_v41 = vpop.eup %8760 }
 0x2c5   :  { %3852 = vmatprep.mubr.f32.mxu0 %v18944_v32  ;;  %19244 = vst [vmem:[#allocation22_spill] sm:$0xff] %v12764_v50  ;;  %v12771_v25 = vpop.f32.mrb[133].mxu1  ;;  %v2206_v49 = vadd.f32 0.5, %v2142_v31  ;;  %v2144_v31 = vmul.f32 0.5, %v8761_v41  ;;  %v8763_v27 = vpop.eup %8762 }
 0x2c6   :  { %v12769_v28 = vadd.f32 %v12258_v15, %v1886_v9  ;;  %19245 = vst [vmem:[#allocation86_spill] sm:$0xff] %v12771_v25  ;;  %v2207_v34 = vadd.f32 0.5, %v2143_v35  ;;  %v2145_v35 = vmul.f32 0.5, %v8763_v27 }
 0x2c7   :  { %v2270_v6 = vmul.f32 %v2206_v49, %v12721_v57  ;;  %v2208_v49 = vadd.f32 0.5, %v2144_v31 }
 0x2c8   :  { %3853 = vmatmul.mubr.f32.gmra.mrb[82].mxu0 %v2265_v62  ;;  %v19243_v62 = vld [vmem:[#allocation17_spill] sm:$0xff]  ;;  %v12776_v50 = vpop.f32.mrb[134].mxu1  ;;  %v2018_v38 = vmul.f32 0.5, %v12769_v28  ;;  %v2271_v57 = vmul.f32 %v2207_v34, %v12733_v52  ;;  %v2209_v34 = vadd.f32 0.5, %v2145_v35 }
 0x2c9   :  { %3858 = vmatprep.mubr.f32.mxu0 %v18944_v32  ;;  %v1887_v4 = vmul.f32 %v12246_v56, %v19243_v62  ;;  %19247 = vst [vmem:[#allocation92_spill] sm:$0xff] %v12776_v50  ;;  %v12783_v25 = vpop.f32.mrb[135].mxu1  ;;  %v2272_v52 = vmul.f32 %v2208_v49, %v12745_v36 }
 0x2ca   :  { %19248 = vst [vmem:[#allocation21_spill] sm:$0xff] %v12783_v25  ;;  %8764 = vtanh.f32 %v2018_v38  ;;  %v2273_v36 = vmul.f32 %v2209_v34, %v12757_v8 }
 0x2cb   :  { %v12781_v9 = vadd.f32 %v12258_v15, %v1887_v4 }
 0x2cc   :  { %3859 = vmatmul.mubr.f32.gmra.mrb[84].mxu0 %v2266_v22  ;;  %v19246_v22 = vld [vmem:[#allocation20_spill] sm:$0xff]  ;;  %v12788_v50 = vpop.f32.mrb[136].mxu1 }
 0x2cd   :  { %3864 = vmatprep.mubr.f32.mxu0 %v18944_v32  ;;  %v1888_v62 = vmul.f32 %v12246_v56, %v19246_v22  ;;  %19250 = vst [vmem:[#allocation91_spill] sm:$0xff] %v12788_v50  ;;  %v2019_v5 = vmul.f32 0.5, %v12781_v9  ;;  %v12795_v25 = vpop.f32.mrb[137].mxu1 }
 0x2ce   :  { %19251 = vst [vmem:[#allocation96_spill] sm:$0xff] %v12795_v25 }
 0x2cf   :  { %v12793_v4 = vadd.f32 %v12258_v15, %v1888_v62  ;;  %8766 = vtanh.f32 %v2019_v5 }
 0x2d0   :  { %3865 = vmatmul.mubr.f32.gmra.mrb[86].mxu0 %v2267_v60  ;;  %v19249_v60 = vld [vmem:[#allocation69_spill] sm:$0xff]  ;;  %v12800_v50 = vpop.f32.mrb[138].mxu1 }
 0x2d1   :  { %3870 = vmatprep.mubr.f32.mxu0 %v18944_v32  ;;  %v1889_v22 = vmul.f32 %v12246_v56, %v19249_v60  ;;  %19253 = vst [vmem:[#allocation24_spill] sm:$0xff] %v12800_v50  ;;  %v2020_v38 = vmul.f32 0.5, %v12793_v4  ;;  %v12807_v25 = vpop.f32.mrb[139].mxu1 }
 0x2d2   :  { %19254 = vst [vmem:[#allocation95_spill] sm:$0xff] %v12807_v25 }
 0x2d3   :  { %v12805_v62 = vadd.f32 %v12258_v15, %v1889_v22  ;;  %8768 = vtanh.f32 %v2020_v38 }
 0x2d4   :  { %3871 = vmatmul.mubr.f32.gmra.mrb[88].mxu0 %v2268_v23  ;;  %v19252_v23 = vld [vmem:[#allocation76_spill] sm:$0xff]  ;;  %v12812_v50 = vpop.f32.mrb[140].mxu1  ;;  %v8765_v41 = vpop.eup %8764 }
 0x2d5   :  { %3876 = vmatprep.mubr.f32.mxu0 %v18944_v32  ;;  %v1890_v60 = vmul.f32 %v12246_v56, %v19252_v23  ;;  %19256 = vst [vmem:[#allocation100_spill] sm:$0xff] %v12812_v50  ;;  %v2021_v5 = vmul.f32 0.5, %v12805_v62  ;;  %v12819_v25 = vpop.f32.mrb[141].mxu1  ;;  %v2146_v31 = vmul.f32 0.5, %v8765_v41 }
 0x2d6   :  { %19257 = vst [vmem:[#allocation23_spill] sm:$0xff] %v12819_v25 }
 0x2d7   :  { %v12817_v22 = vadd.f32 %v12258_v15, %v1890_v60  ;;  %8770 = vtanh.f32 %v2021_v5  ;;  %v2210_v49 = vadd.f32 0.5, %v2146_v31 }
 0x2d8   :  { %3877 = vmatmul.mubr.f32.gmra.mrb[90].mxu0 %v2269_v33  ;;  %v19255_v33 = vld [vmem:[#allocation75_spill] sm:$0xff]  ;;  %v12824_v50 = vpop.f32.mrb[142].mxu1 }
 0x2d9   :  { %3882 = vmatprep.mubr.f32.mxu0 %v18944_v32  ;;  %v1891_v23 = vmul.f32 %v12246_v56, %v19255_v33  ;;  %v2022_v38 = vmul.f32 0.5, %v12817_v22  ;;  %v12831_v25 = vpop.f32.mrb[143].mxu1  ;;  %v8767_v27 = vpop.eup %8766  ;;  %v2274_v8 = vmul.f32 %v2210_v49, %v12769_v28 }
 0x2da   :  { %19259 = vst [vmem:[#allocation99_spill] sm:$0xff] %v12831_v25  ;;  %v2147_v35 = vmul.f32 0.5, %v8767_v27 }
 0x2db   :  { %v12829_v60 = vadd.f32 %v12258_v15, %v1891_v23  ;;  %8772 = vtanh.f32 %v2022_v38 }
 0x2dc   :  { %3883 = vmatmul.mubr.f32.gmra.mrb[92].mxu0 %v2270_v6  ;;  %v19258_v6 = vld [vmem:[#allocation82_spill] sm:$0xff]  ;;  %v2211_v34 = vadd.f32 0.5, %v2147_v35 }
 0x2dd   :  { %3888 = vmatprep.mubr.f32.mxu0 %v18944_v32  ;;  %v1892_v33 = vmul.f32 %v12246_v56, %v19258_v6  ;;  %v12836_v6 = vpop.f32.mrb[144].mxu1  ;;  %v2023_v5 = vmul.f32 0.5, %v12829_v60  ;;  %v8769_v41 = vpop.eup %8768 }
 0x2de   :  { %v12843_v25 = vpop.f32.mrb[145].mxu1  ;;  %v2148_v31 = vmul.f32 0.5, %v8769_v41  ;;  %v2275_v28 = vmul.f32 %v2211_v34, %v12781_v9 }
 0x2df   :  { %v12841_v23 = vadd.f32 %v12258_v15, %v1892_v33  ;;  %19260 = vst [vmem:[#allocation102_spill] sm:$0xff] %v12843_v25  ;;  %8774 = vtanh.f32 %v2023_v5 }
 0x2e0   :  { %3889 = vmatmul.mubr.f32.gmra.mrb[94].mxu0 %v2271_v57  ;;  %v1893_v57 = vmul.f32 %v12246_v56, %v11897_v3  ;;  %v1894_v3 = vmul.f32 %v12246_v56, %v11908_v7  ;;  %v1895_v7 = vmul.f32 %v12246_v56, %v11930_v44  ;;  %v2212_v49 = vadd.f32 0.5, %v2148_v31 }
 0x2e1   :  { %3894 = vmatprep.mubr.f32.mxu0 %v18944_v32  ;;  %v2024_v38 = vmul.f32 0.5, %v12841_v23  ;;  %v8771_v27 = vpop.eup %8770  ;;  %v1896_v44 = vmul.f32 %v12246_v56, %v11941_v51  ;;  %v1897_v51 = vmul.f32 %v12246_v56, %v11176_v53 }
 0x2e2   :  { %v12853_v33 = vadd.f32 %v12258_v15, %v1893_v57  ;;  %v12865_v57 = vadd.f32 %v12258_v15, %v1894_v3  ;;  %v2149_v35 = vmul.f32 0.5, %v8771_v27  ;;  %v12877_v3 = vadd.f32 %v12258_v15, %v1895_v7 }
 0x2e3   :  { %8776 = vtanh.f32 %v2024_v38  ;;  %v2276_v9 = vmul.f32 %v2212_v49, %v12793_v4  ;;  %v12889_v7 = vadd.f32 %v12258_v15, %v1896_v44  ;;  %v12901_v44 = vadd.f32 %v12258_v15, %v1897_v51 }
 0x2e4   :  { %3895 = vmatmul.mubr.f32.gmra.mrb[96].mxu0 %v2272_v52  ;;  %v12848_v52 = vpop.f32.mrb[146].mxu1  ;;  %v2025_v5 = vmul.f32 0.5, %v12853_v33  ;;  %v2026_v38 = vmul.f32 0.5, %v12865_v57  ;;  %v2213_v34 = vadd.f32 0.5, %v2149_v35 }
 0x2e5   :  { %3900 = vmatprep.mubr.f32.mxu0 %v18944_v32  ;;  %v12855_v25 = vpop.f32.mrb[147].mxu1  ;;  %v8773_v41 = vpop.eup %8772 }
 0x2e6   :  { %19261 = vst [vmem:[#allocation26_spill] sm:$0xff] %v12855_v25  ;;  %8778 = vtanh.f32 %v2025_v5  ;;  %v2150_v31 = vmul.f32 0.5, %v8773_v41  ;;  %v2027_v5 = vmul.f32 0.5, %v12877_v3  ;;  %v2277_v4 = vmul.f32 %v2213_v34, %v12805_v62 }
 0x2e7   :  { %8780 = vtanh.f32 %v2026_v38  ;;  %v2028_v38 = vmul.f32 0.5, %v12889_v7 }
 0x2e8   :  { %3901 = vmatmul.mubr.f32.gmra.mrb[98].mxu0 %v2273_v36  ;;  %v12860_v36 = vpop.f32.mrb[148].mxu1  ;;  %v2214_v49 = vadd.f32 0.5, %v2150_v31  ;;  %8782 = vtanh.f32 %v2027_v5  ;;  %v2029_v5 = vmul.f32 0.5, %v12901_v44 }
 0x2e9   :  { %3906 = vmatprep.mubr.f32.mxu0 %v18944_v32  ;;  %19262 = vst [vmem:[#allocation98_spill] sm:$0xff] %v12860_v36  ;;  %v12867_v25 = vpop.f32.mrb[149].mxu1  ;;  %v8775_v27 = vpop.eup %8774  ;;  %8784 = vtanh.f32 %v2028_v38 }
 0x2ea   :  { %19263 = vst [vmem:[#allocation101_spill] sm:$0xff] %v12867_v25  ;;  %v2151_v35 = vmul.f32 0.5, %v8775_v27  ;;  %v2278_v62 = vmul.f32 %v2214_v49, %v12817_v22  ;;  %8786 = vtanh.f32 %v2029_v5 }
 0x2ec   :  { %3907 = vmatmul.mubr.f32.gmra.mrb[100].mxu0 %v2274_v8  ;;  %v12872_v8 = vpop.f32.mrb[150].mxu1  ;;  %v2215_v34 = vadd.f32 0.5, %v2151_v35 }
 0x2ed   :  { %3912 = vmatprep.mubr.f32.mxu0 %v18944_v32  ;;  %19264 = vst [vmem:[#allocation104_spill] sm:$0xff] %v12872_v8  ;;  %v12879_v25 = vpop.f32.mrb[151].mxu1  ;;  %v8777_v41 = vpop.eup %8776  ;;  %v19316_v8 = vld [vmem:[#allocation161_spill] sm:$0xff] }
 0x2ee   :  { %19265 = vst [vmem:[#allocation25_spill] sm:$0xff] %v12879_v25  ;;  %v2152_v31 = vmul.f32 0.5, %v8777_v41  ;;  %v2279_v22 = vmul.f32 %v2215_v34, %v12829_v60 }
 0x2f0   :  { %3913 = vmatmul.mubr.f32.gmra.mrb[102].mxu0 %v2275_v28  ;;  %v12884_v28 = vpop.f32.mrb[152].mxu1  ;;  %v8779_v27 = vpop.eup %8778  ;;  %v2216_v49 = vadd.f32 0.5, %v2152_v31 }
 0x2f1   :  { %3918 = vmatprep.mubr.f32.mxu0 %v18944_v32  ;;  %19266 = vst [vmem:[#allocation97_spill] sm:$0xff] %v12884_v28  ;;  %v12891_v25 = vpop.f32.mrb[153].mxu1  ;;  %v2153_v35 = vmul.f32 0.5, %v8779_v27  ;;  %v8781_v41 = vpop.eup %8780 }
 0x2f2   :  { %19267 = vst [vmem:[#allocation103_spill] sm:$0xff] %v12891_v25  ;;  %v12896_v28 = vpop.f32.mrb[154].mxu1  ;;  %v2280_v60 = vmul.f32 %v2216_v49, %v12841_v23  ;;  %v2154_v31 = vmul.f32 0.5, %v8781_v41  ;;  %v8783_v27 = vpop.eup %8782 }
 0x2f3   :  { %19269 = vst [vmem:[#allocation106_spill] sm:$0xff] %v12896_v28  ;;  %v12903_v25 = vpop.f32.mrb[155].mxu1  ;;  %v2217_v34 = vadd.f32 0.5, %v2153_v35  ;;  %v2155_v35 = vmul.f32 0.5, %v8783_v27  ;;  %v8785_v41 = vpop.eup %8784 }
 0x2f4   :  { %3919 = vmatmul.mubr.f32.gmra.mrb[104].mxu0 %v2276_v9  ;;  %v19268_v9 = vld [vmem:[#allocation10_spill] sm:$0xff]  ;;  %19270 = vst [vmem:[#allocation28_spill] sm:$0xff] %v12903_v25  ;;  %v12908_v28 = vpop.f32.mrb[156].mxu1  ;;  %v2218_v49 = vadd.f32 0.5, %v2154_v31  ;;  %v2156_v31 = vmul.f32 0.5, %v8785_v41  ;;  %v8787_v27 = vpop.eup %8786 }
 0x2f5   :  { %3924 = vmatprep.mubr.f32.mxu0 %v18944_v32  ;;  %v1898_v53 = vmul.f32 %v12246_v56, %v19268_v9  ;;  %19272 = vst [vmem:[#allocation105_spill] sm:$0xff] %v12908_v28  ;;  %v12915_v25 = vpop.f32.mrb[157].mxu1  ;;  %v2281_v23 = vmul.f32 %v2217_v34, %v12853_v33  ;;  %v2219_v34 = vadd.f32 0.5, %v2155_v35  ;;  %v2157_v35 = vmul.f32 0.5, %v8787_v27 }
 0x2f6   :  { %19273 = vst [vmem:[#allocation110_spill] sm:$0xff] %v12915_v25  ;;  %v2282_v33 = vmul.f32 %v2218_v49, %v12865_v57  ;;  %v2220_v49 = vadd.f32 0.5, %v2156_v31 }
 0x2f7   :  { %v12913_v51 = vadd.f32 %v12258_v15, %v1898_v53  ;;  %v2283_v57 = vmul.f32 %v2219_v34, %v12877_v3  ;;  %v2221_v34 = vadd.f32 0.5, %v2157_v35 }
 0x2f8   :  { %3925 = vmatmul.mubr.f32.gmra.mrb[106].mxu0 %v2277_v4  ;;  %v19271_v4 = vld [vmem:[#allocation9_spill] sm:$0xff]  ;;  %v12920_v28 = vpop.f32.mrb[158].mxu1  ;;  %v2284_v3 = vmul.f32 %v2220_v49, %v12889_v7 }
 0x2f9   :  { %3930 = vmatprep.mubr.f32.mxu0 %v18944_v32  ;;  %v1899_v9 = vmul.f32 %v12246_v56, %v19271_v4  ;;  %19275 = vst [vmem:[#allocation27_spill] sm:$0xff] %v12920_v28  ;;  %v2030_v38 = vmul.f32 0.5, %v12913_v51  ;;  %v12927_v25 = vpop.f32.mrb[159].mxu1  ;;  %v2285_v7 = vmul.f32 %v2221_v34, %v12901_v44 }
 0x2fa   :  { %19276 = vst [vmem:[#allocation109_spill] sm:$0xff] %v12927_v25 }
 0x2fb   :  { %v12925_v53 = vadd.f32 %v12258_v15, %v1899_v9  ;;  %8788 = vtanh.f32 %v2030_v38 }
 0x2fc   :  { %3931 = vmatmul.mubr.f32.gmra.mrb[108].mxu0 %v2278_v62  ;;  %v19274_v62 = vld [vmem:[#allocation12_spill] sm:$0xff]  ;;  %v12932_v28 = vpop.f32.mrb[160].mxu1 }
 0x2fd   :  { %3936 = vmatprep.mubr.f32.mxu0 %v18944_v32  ;;  %v1900_v4 = vmul.f32 %v12246_v56, %v19274_v62  ;;  %19278 = vst [vmem:[#allocation114_spill] sm:$0xff] %v12932_v28  ;;  %v2031_v5 = vmul.f32 0.5, %v12925_v53  ;;  %v12939_v25 = vpop.f32.mrb[161].mxu1 }
 0x2fe   :  { %19279 = vst [vmem:[#allocation30_spill] sm:$0xff] %v12939_v25 }
 0x2ff   :  { %v12937_v9 = vadd.f32 %v12258_v15, %v1900_v4  ;;  %8790 = vtanh.f32 %v2031_v5 }
 0x300   :  { %3937 = vmatmul.mubr.f32.gmra.mrb[110].mxu0 %v2279_v22  ;;  %v19277_v22 = vld [vmem:[#allocation11_spill] sm:$0xff]  ;;  %v12944_v28 = vpop.f32.mrb[162].mxu1 }
 0x301   :  { %3942 = vmatprep.mubr.f32.mxu0 %v18944_v32  ;;  %v1901_v62 = vmul.f32 %v12246_v56, %v19277_v22  ;;  %19281 = vst [vmem:[#allocation113_spill] sm:$0xff] %v12944_v28  ;;  %v2032_v38 = vmul.f32 0.5, %v12937_v9  ;;  %v12951_v25 = vpop.f32.mrb[163].mxu1 }
 0x302   :  { %19282 = vst [vmem:[#allocation119_spill] sm:$0xff] %v12951_v25 }
 0x303   :  { %v12949_v4 = vadd.f32 %v12258_v15, %v1901_v62  ;;  %8792 = vtanh.f32 %v2032_v38 }
 0x304   :  { %3943 = vmatmul.mubr.f32.gmra.mrb[112].mxu0 %v2280_v60  ;;  %v19280_v60 = vld [vmem:[#allocation149_spill] sm:$0xff]  ;;  %v12956_v28 = vpop.f32.mrb[164].mxu1 }
 0x305   :  { %3948 = vmatprep.mubr.f32.mxu0 %v18944_v32  ;;  %v1902_v22 = vmul.f32 %v12246_v56, %v19280_v60  ;;  %19284 = vst [vmem:[#allocation29_spill] sm:$0xff] %v12956_v28  ;;  %v2033_v5 = vmul.f32 0.5, %v12949_v4  ;;  %v12963_v25 = vpop.f32.mrb[165].mxu1  ;;  %v8789_v41 = vpop.eup %8788 }
 0x306   :  { %19285 = vst [vmem:[#allocation118_spill] sm:$0xff] %v12963_v25  ;;  %v2158_v31 = vmul.f32 0.5, %v8789_v41 }
 0x307   :  { %v12961_v62 = vadd.f32 %v12258_v15, %v1902_v22  ;;  %8794 = vtanh.f32 %v2033_v5 }
 0x308   :  { %3949 = vmatmul.mubr.f32.gmra.mrb[114].mxu0 %v2281_v23  ;;  %v19283_v23 = vld [vmem:[#allocation150_spill] sm:$0xff]  ;;  %v12968_v28 = vpop.f32.mrb[166].mxu1  ;;  %v2222_v49 = vadd.f32 0.5, %v2158_v31 }
 0x309   :  { %3954 = vmatprep.mubr.f32.mxu0 %v18944_v32  ;;  %v1903_v60 = vmul.f32 %v12246_v56, %v19283_v23  ;;  %19287 = vst [vmem:[#allocation122_spill] sm:$0xff] %v12968_v28  ;;  %v2034_v38 = vmul.f32 0.5, %v12961_v62  ;;  %v12975_v25 = vpop.f32.mrb[167].mxu1  ;;  %v8791_v27 = vpop.eup %8790 }
 0x30a   :  { %19288 = vst [vmem:[#allocation32_spill] sm:$0xff] %v12975_v25  ;;  %v2159_v35 = vmul.f32 0.5, %v8791_v27  ;;  %v2286_v44 = vmul.f32 %v2222_v49, %v12913_v51 }
 0x30b   :  { %v12973_v22 = vadd.f32 %v12258_v15, %v1903_v60  ;;  %8796 = vtanh.f32 %v2034_v38 }
 0x30c   :  { %3955 = vmatmul.mubr.f32.gmra.mrb[116].mxu0 %v2282_v33  ;;  %v19286_v33 = vld [vmem:[#allocation151_spill] sm:$0xff]  ;;  %v12980_v28 = vpop.f32.mrb[168].mxu1  ;;  %v2223_v34 = vadd.f32 0.5, %v2159_v35 }
 0x30d   :  { %3960 = vmatprep.mubr.f32.mxu0 %v18944_v32  ;;  %v1904_v23 = vmul.f32 %v12246_v56, %v19286_v33  ;;  %19290 = vst [vmem:[#allocation31_spill] sm:$0xff] %v12980_v28  ;;  %v2035_v5 = vmul.f32 0.5, %v12973_v22  ;;  %v12987_v25 = vpop.f32.mrb[169].mxu1  ;;  %v8793_v41 = vpop.eup %8792 }
 0x30e   :  { %19291 = vst [vmem:[#allocation65_spill] sm:$0xff] %v12987_v25  ;;  %v2160_v31 = vmul.f32 0.5, %v8793_v41  ;;  %v2287_v51 = vmul.f32 %v2223_v34, %v12925_v53 }
 0x30f   :  { %v12985_v60 = vadd.f32 %v12258_v15, %v1904_v23  ;;  %8798 = vtanh.f32 %v2035_v5 }
 0x310   :  { %3961 = vmatmul.mubr.f32.gmra.mrb[118].mxu0 %v2283_v57  ;;  %v19289_v57 = vld [vmem:[#allocation152_spill] sm:$0xff]  ;;  %v12992_v28 = vpop.f32.mrb[170].mxu1  ;;  %v2224_v49 = vadd.f32 0.5, %v2160_v31 }
 0x311   :  { %3966 = vmatprep.mubr.f32.mxu0 %v18944_v32  ;;  %v1905_v33 = vmul.f32 %v12246_v56, %v19289_v57  ;;  %19293 = vst [vmem:[#allocation34_spill] sm:$0xff] %v12992_v28  ;;  %v2036_v38 = vmul.f32 0.5, %v12985_v60  ;;  %v12999_v25 = vpop.f32.mrb[171].mxu1  ;;  %v8795_v27 = vpop.eup %8794 }
 0x312   :  { %19294 = vst [vmem:[#allocation108_spill] sm:$0xff] %v12999_v25  ;;  %v2161_v35 = vmul.f32 0.5, %v8795_v27  ;;  %v2288_v53 = vmul.f32 %v2224_v49, %v12937_v9 }
 0x313   :  { %v12997_v23 = vadd.f32 %v12258_v15, %v1905_v33  ;;  %8800 = vtanh.f32 %v2036_v38 }
 0x314   :  { %3967 = vmatmul.mubr.f32.gmra.mrb[120].mxu0 %v2284_v3  ;;  %v19292_v3 = vld [vmem:[#allocation153_spill] sm:$0xff]  ;;  %v13004_v28 = vpop.f32.mrb[172].mxu1  ;;  %v2225_v34 = vadd.f32 0.5, %v2161_v35 }
 0x315   :  { %3972 = vmatprep.mubr.f32.mxu0 %v18944_v32  ;;  %v1906_v57 = vmul.f32 %v12246_v56, %v19292_v3  ;;  %19296 = vst [vmem:[#allocation62_spill] sm:$0xff] %v13004_v28  ;;  %v2037_v5 = vmul.f32 0.5, %v12997_v23  ;;  %v13011_v25 = vpop.f32.mrb[173].mxu1  ;;  %v8797_v41 = vpop.eup %8796 }
 0x316   :  { %19297 = vst [vmem:[#allocation71_spill] sm:$0xff] %v13011_v25  ;;  %v2162_v31 = vmul.f32 0.5, %v8797_v41  ;;  %v2289_v9 = vmul.f32 %v2225_v34, %v12949_v4 }
 0x317   :  { %v13009_v33 = vadd.f32 %v12258_v15, %v1906_v57  ;;  %8802 = vtanh.f32 %v2037_v5 }
 0x318   :  { %3973 = vmatmul.mubr.f32.gmra.mrb[122].mxu0 %v2285_v7  ;;  %v19295_v7 = vld [vmem:[#allocation154_spill] sm:$0xff]  ;;  %v13016_v28 = vpop.f32.mrb[174].mxu1  ;;  %v2226_v49 = vadd.f32 0.5, %v2162_v31 }
 0x319   :  { %3978 = vmatprep.mubr.f32.mxu0 %v18944_v32  ;;  %v1907_v3 = vmul.f32 %v12246_v56, %v19295_v7  ;;  %19299 = vst [vmem:[#allocation33_spill] sm:$0xff] %v13016_v28  ;;  %v2038_v38 = vmul.f32 0.5, %v13009_v33  ;;  %v13023_v25 = vpop.f32.mrb[175].mxu1  ;;  %v8799_v27 = vpop.eup %8798 }
 0x31a   :  { %19300 = vst [vmem:[#allocation107_spill] sm:$0xff] %v13023_v25  ;;  %v2163_v35 = vmul.f32 0.5, %v8799_v27  ;;  %v2290_v4 = vmul.f32 %v2226_v49, %v12961_v62 }
 0x31b   :  { %v13021_v57 = vadd.f32 %v12258_v15, %v1907_v3  ;;  %8804 = vtanh.f32 %v2038_v38 }
 0x31c   :  { %3979 = vmatmul.mubr.f32.gmra.mrb[124].mxu0 %v2286_v44  ;;  %v19298_v44 = vld [vmem:[#allocation155_spill] sm:$0xff]  ;;  %v13028_v28 = vpop.f32.mrb[176].mxu1  ;;  %v2227_v34 = vadd.f32 0.5, %v2163_v35 }
 0x31d   :  { %3984 = vmatprep.mubr.f32.mxu0 %v18944_v32  ;;  %v1908_v7 = vmul.f32 %v12246_v56, %v19298_v44  ;;  %19302 = vst [vmem:[#allocation68_spill] sm:$0xff] %v13028_v28  ;;  %v2039_v5 = vmul.f32 0.5, %v13021_v57  ;;  %v13035_v25 = vpop.f32.mrb[177].mxu1  ;;  %v8801_v41 = vpop.eup %8800 }
 0x31e   :  { %19303 = vst [vmem:[#allocation77_spill] sm:$0xff] %v13035_v25  ;;  %v2164_v31 = vmul.f32 0.5, %v8801_v41  ;;  %v2291_v62 = vmul.f32 %v2227_v34, %v12973_v22 }
 0x31f   :  { %v13033_v3 = vadd.f32 %v12258_v15, %v1908_v7  ;;  %8806 = vtanh.f32 %v2039_v5 }
 0x320   :  { %3985 = vmatmul.mubr.f32.gmra.mrb[126].mxu0 %v2287_v51  ;;  %v19301_v51 = vld [vmem:[#allocation156_spill] sm:$0xff]  ;;  %v13040_v28 = vpop.f32.mrb[178].mxu1  ;;  %v2228_v49 = vadd.f32 0.5, %v2164_v31 }
 0x321   :  { %3990 = vmatprep.mubr.f32.mxu0 %v18944_v32  ;;  %v1909_v44 = vmul.f32 %v12246_v56, %v19301_v51  ;;  %19305 = vst [vmem:[#allocation36_spill] sm:$0xff] %v13040_v28  ;;  %v2040_v38 = vmul.f32 0.5, %v13033_v3  ;;  %v13047_v25 = vpop.f32.mrb[179].mxu1  ;;  %v8803_v27 = vpop.eup %8802 }
 0x322   :  { %19306 = vst [vmem:[#allocation112_spill] sm:$0xff] %v13047_v25  ;;  %v2165_v35 = vmul.f32 0.5, %v8803_v27  ;;  %v2292_v22 = vmul.f32 %v2228_v49, %v12985_v60 }
 0x323   :  { %v13045_v7 = vadd.f32 %v12258_v15, %v1909_v44  ;;  %8808 = vtanh.f32 %v2040_v38 }
 0x324   :  { %3991 = vmatmul.mubr.f32.gmra.mrb[128].mxu0 %v2288_v53  ;;  %v19304_v53 = vld [vmem:[#allocation157_spill] sm:$0xff]  ;;  %v13052_v28 = vpop.f32.mrb[180].mxu1  ;;  %v2229_v34 = vadd.f32 0.5, %v2165_v35 }
 0x325   :  { %3996 = vmatprep.mubr.f32.mxu0 %v18944_v32  ;;  %v1910_v51 = vmul.f32 %v12246_v56, %v19304_v53  ;;  %19308 = vst [vmem:[#allocation74_spill] sm:$0xff] %v13052_v28  ;;  %v2041_v5 = vmul.f32 0.5, %v13045_v7  ;;  %v13059_v25 = vpop.f32.mrb[181].mxu1  ;;  %v8805_v41 = vpop.eup %8804 }
 0x326   :  { %19309 = vst [vmem:[#allocation83_spill] sm:$0xff] %v13059_v25  ;;  %v2166_v31 = vmul.f32 0.5, %v8805_v41  ;;  %v2293_v60 = vmul.f32 %v2229_v34, %v12997_v23 }
 0x327   :  { %v13057_v44 = vadd.f32 %v12258_v15, %v1910_v51  ;;  %8810 = vtanh.f32 %v2041_v5 }
 0x328   :  { %3997 = vmatmul.mubr.f32.gmra.mrb[130].mxu0 %v2289_v9  ;;  %v19307_v9 = vld [vmem:[#allocation158_spill] sm:$0xff]  ;;  %v13064_v28 = vpop.f32.mrb[182].mxu1  ;;  %v2230_v49 = vadd.f32 0.5, %v2166_v31 }
 0x329   :  { %4002 = vmatprep.mubr.f32.mxu0 %v18944_v32  ;;  %v1911_v53 = vmul.f32 %v12246_v56, %v19307_v9  ;;  %19311 = vst [vmem:[#allocation35_spill] sm:$0xff] %v13064_v28  ;;  %v2042_v38 = vmul.f32 0.5, %v13057_v44  ;;  %v13071_v25 = vpop.f32.mrb[183].mxu1  ;;  %v8807_v27 = vpop.eup %8806 }
 0x32a   :  { %19312 = vst [vmem:[#allocation111_spill] sm:$0xff] %v13071_v25  ;;  %v2167_v35 = vmul.f32 0.5, %v8807_v27 }
 0x32b   :  { %v13069_v51 = vadd.f32 %v12258_v15, %v1911_v53  ;;  %8812 = vtanh.f32 %v2042_v38 }
 0x32c   :  { %4003 = vmatmul.mubr.f32.gmra.mrb[132].mxu0 %v2290_v4  ;;  %v19310_v4 = vld [vmem:[#allocation159_spill] sm:$0xff]  ;;  %v13076_v28 = vpop.f32.mrb[184].mxu1 }
 0x32d   :  { %4008 = vmatprep.mubr.f32.mxu0 %v18944_v32  ;;  %v1912_v9 = vmul.f32 %v12246_v56, %v19310_v4  ;;  %19314 = vst [vmem:[#allocation80_spill] sm:$0xff] %v13076_v28  ;;  %v2043_v5 = vmul.f32 0.5, %v13069_v51  ;;  %v13083_v25 = vpop.f32.mrb[185].mxu1  ;;  %v8809_v41 = vpop.eup %8808 }
 0x32e   :  { %19315 = vst [vmem:[#allocation88_spill] sm:$0xff] %v13083_v25  ;;  %v2168_v27 = vmul.f32 0.5, %v8809_v41 }
 0x32f   :  { %v13081_v53 = vadd.f32 %v12258_v15, %v1912_v9  ;;  %8814 = vtanh.f32 %v2043_v5 }
 0x330   :  { %4009 = vmatmul.mubr.f32.gmra.mrb[134].mxu0 %v2291_v62  ;;  %v19313_v62 = vld [vmem:[#allocation160_spill] sm:$0xff]  ;;  %v13091_v36 = vpop.f32.mrb[186].mxu1 }
 0x331   :  { %4014 = vmatprep.mubr.f32.mxu0 %v18944_v32  ;;  %v1913_v4 = vmul.f32 %v12246_v56, %v19313_v62  ;;  %v1914_v62 = vmul.f32 %v12246_v56, %v19316_v8  ;;  %19317 = vst [vmem:[#allocation116_spill] sm:$0xff] %v13091_v36  ;;  %v2044_v23 = vmul.f32 0.5, %v13081_v53  ;;  %v13101_v31 = vpop.f32.mrb[187].mxu1  ;;  %v2231_v8 = vadd.f32 0.5, %v2167_v35  ;;  %v19318_v36 = vld [vmem:[#allocation162_spill] sm:$0xff] }
 0x333   :  { %v13099_v34 = vadd.f32 %v12258_v15, %v1913_v4  ;;  %8816 = vtanh.f32 %v2044_v23 }
 0x334   :  { %4015 = vmatmul.mubr.f32.gmra.mrb[136].mxu0 %v2292_v22  ;;  %v13109_v25 = vpop.f32.mrb[188].mxu1 }
 0x335   :  { %4020 = vmatprep.mubr.f32.mxu0 %v18944_v32  ;;  %v13119_v35 = vpop.f32.mrb[189].mxu1 }
 0x337   :  { %v3704_v22 = vpop.f32.mrb[32].mxu0 }
 0x338   :  { %v13089_v28 = vadd.f32 %v3704_v22, %v12494_v55  ;;  %v3706_v38 = vpop.f32.mrb[33].mxu0  ;;  %4021 = vmatmul.mubr.f32.gmra.mrb[138].mxu0 %v2293_v60  ;;  %v2294_v55 = vmul.f32 %v2230_v49, %v13009_v33  ;;  %v8811_v60 = vpop.eup %8810  ;;  %v2045_v33 = vmul.f32 0.5, %v13099_v34  ;;  %v13117_v49 = vadd.f32 %v12258_v15, %v1914_v62 }
 0x339   :  { %v13094_v9 = vadd.f32 %v3706_v38, %v12501_v54  ;;  %4026 = vmatprep.mubr.f32.mxu0 %v18944_v32  ;;  %v1915_v54 = vmul.f32 %v12246_v56, %v19318_v36  ;;  %v2295_v56 = vmul.f32 %v2231_v8, %v13021_v57  ;;  %v2169_v36 = vmul.f32 0.5, %v8811_v60  ;;  %v8813_v41 = vpop.eup %8812 }
 0x33a   :  { %8818 = vtanh.f32 %v2045_v33  ;;  %v2046_v62 = vmul.f32 0.5, %v13117_v49  ;;  %v2170_v60 = vmul.f32 0.5, %v8813_v41 }
 0x33b   :  { %v3710_v22 = vpop.f32.mrb[34].mxu0  ;;  %v13133_v57 = vadd.f32 %v12258_v15, %v1915_v54 }
 0x33c   :  { %v13107_v38 = vadd.f32 %v3710_v22, %v12511_v10  ;;  %v3712_v5 = vpop.f32.mrb[35].mxu0  ;;  %4027 = vmatmul.mubr.f32.gmra.mrb[140].mxu0 %v2294_v55  ;;  %v2232_v10 = vadd.f32 0.5, %v2168_v27  ;;  %v2233_v27 = vadd.f32 0.5, %v2169_v36  ;;  %8820 = vtanh.f32 %v2046_v62 }
 0x33d   :  { %v13112_v4 = vadd.f32 %v3712_v5, %v12518_v46  ;;  %4032 = vmatprep.mubr.f32.mxu0 %v18944_v32  ;;  %v13125_v5 = vpop.f32.mrb[190].mxu1  ;;  %v2047_v15 = vmul.f32 0.5, %v13133_v57 }
 0x33e   :  { %19319 = vst [vmem:[#allocation38_spill] sm:$0xff] %v13125_v5  ;;  %v13135_v8 = vpop.f32.mrb[191].mxu1  ;;  %v2297_v54 = vmul.f32 %v2233_v27, %v13045_v7 }
 0x33f   :  { %v3716_v55 = vpop.f32.mrb[36].mxu0  ;;  %8822 = vtanh.f32 %v2047_v15 }
 0x340   :  { %v13123_v22 = vadd.f32 %v3716_v55, %v12528_v39  ;;  %v3718_v46 = vpop.f32.mrb[37].mxu0  ;;  %4033 = vmatmul.mubr.f32.gmra.mrb[142].mxu0 %v2295_v56  ;;  %v2296_v39 = vmul.f32 %v2232_v10, %v13033_v3  ;;  %v8815_v56 = vpop.eup %8814  ;;  %v2234_v10 = vadd.f32 0.5, %v2170_v60 }
 0x341   :  { %v13128_v23 = vadd.f32 %v3718_v46, %v12535_v1  ;;  %4038 = vmatprep.mubr.f32.mxu0 %v18944_v32  ;;  %v13141_v46 = vpop.f32.mrb[192].mxu1  ;;  %v2171_v36 = vmul.f32 0.5, %v8815_v56 }
 0x342   :  { %v13148_v3 = vpop.f32.mrb[193].mxu1  ;;  %v2298_v7 = vmul.f32 %v2234_v10, %v13057_v44 }
 0x343   :  { %v3722_v55 = vpop.f32.mrb[38].mxu0  ;;  %19320 = vst [vmem:[#allocation115_spill] sm:$0xff] %v13148_v3  ;;  %v2235_v27 = vadd.f32 0.5, %v2171_v36 }
 0x344   :  { %v13139_v5 = vadd.f32 %v3722_v55, %v12545_v26  ;;  %v3724_v1 = vpop.f32.mrb[39].mxu0  ;;  %4039 = vmatmul.mubr.f32.gmra.mrb[144].mxu0 %v2296_v39  ;;  %v8817_v26 = vpop.eup %8816 }
 0x345   :  { %v13144_v33 = vadd.f32 %v3724_v1, %v12552_v37  ;;  %4044 = vmatprep.mubr.f32.mxu0 %v18944_v32  ;;  %v13154_v37 = vpop.f32.mrb[194].mxu1  ;;  %v2172_v60 = vmul.f32 0.5, %v8817_v26  ;;  %v8819_v56 = vpop.eup %8818  ;;  %v2299_v44 = vmul.f32 %v2235_v27, %v13069_v51 }
 0x346   :  { %v13160_v62 = vpop.f32.mrb[195].mxu1  ;;  %v2173_v36 = vmul.f32 0.5, %v8819_v56  ;;  %v8821_v26 = vpop.eup %8820 }
 0x347   :  { %v3728_v41 = vpop.f32.mrb[40].mxu0  ;;  %19321 = vst [vmem:[#allocation37_spill] sm:$0xff] %v13160_v62  ;;  %v2236_v10 = vadd.f32 0.5, %v2172_v60  ;;  %v2174_v60 = vmul.f32 0.5, %v8821_v26 }
 0x348   :  { %v13152_v39 = vadd.f32 %v3728_v41, %v12562_v29  ;;  %v3730_v55 = vpop.f32.mrb[41].mxu0  ;;  %4045 = vmatmul.mubr.f32.gmra.mrb[146].mxu0 %v2297_v54  ;;  %v13166_v41 = vpop.f32.mrb[196].mxu1  ;;  %v2237_v27 = vadd.f32 0.5, %v2173_v36 }
 0x349   :  { %v13157_v1 = vadd.f32 %v3730_v55, %v12569_v21  ;;  %4050 = vmatprep.mubr.f32.mxu0 %v18944_v32  ;;  %19322 = vst [vmem:[#allocation121_spill] sm:$0xff] %v13166_v41  ;;  %v13172_v15 = vpop.f32.mrb[197].mxu1  ;;  %v2300_v51 = vmul.f32 %v2236_v10, %v13081_v53  ;;  %v8823_v56 = vpop.eup %8822  ;;  %v2238_v10 = vadd.f32 0.5, %v2174_v60  ;;  %v19377_v41 = vld [vmem:[#allocation98_spill] sm:$0xff] }
 0x34a   :  { %19323 = vst [vmem:[#allocation40_spill] sm:$0xff] %v13172_v15  ;;  %v2301_v53 = vmul.f32 %v2237_v27, %v13099_v34  ;;  %v2175_v36 = vmul.f32 0.5, %v8823_v56 }
 0x34b   :  { %v3734_v3 = vpop.f32.mrb[42].mxu0 }
 0x34c   :  { %v13164_v29 = vadd.f32 %v3734_v3, %v12579_v42  ;;  %v3736_v54 = vpop.f32.mrb[43].mxu0  ;;  %4051 = vmatmul.mubr.f32.gmra.mrb[148].mxu0 %v2298_v7  ;;  %v13178_v7 = vpop.f32.mrb[198].mxu1  ;;  %v2239_v34 = vadd.f32 0.5, %v2175_v36 }
 0x34d   :  { %v13169_v21 = vadd.f32 %v3736_v54, %v12586_v24  ;;  %4056 = vmatprep.mubr.f32.mxu0 %v18944_v32  ;;  %19324 = vst [vmem:[#allocation120_spill] sm:$0xff] %v13178_v7  ;;  %v13184_v54 = vpop.f32.mrb[199].mxu1  ;;  %v19363_v7 = vld [vmem:[#allocation96_spill] sm:$0xff] }
 0x34e   :  { %19325 = vst [vmem:[#allocation39_spill] sm:$0xff] %v13184_v54 }
 0x34f   :  { %v3740_v55 = vpop.f32.mrb[44].mxu0 }
 0x350   :  { %v13176_v42 = vadd.f32 %v3740_v55, %v12596_v43  ;;  %v3742_v3 = vpop.f32.mrb[45].mxu0  ;;  %4057 = vmatmul.mubr.f32.gmra.mrb[150].mxu0 %v2299_v44  ;;  %v13190_v44 = vpop.f32.mrb[200].mxu1 }
 0x351   :  { %v13181_v24 = vadd.f32 %v3742_v3, %v12603_v14  ;;  %4062 = vmatprep.mubr.f32.mxu0 %v18944_v32  ;;  %19326 = vst [vmem:[#allocation124_spill] sm:$0xff] %v13190_v44  ;;  %v13196_v3 = vpop.f32.mrb[201].mxu1  ;;  %v19362_v44 = vld [vmem:[#allocation91_spill] sm:$0xff] }
 0x352   :  { %19327 = vst [vmem:[#allocation42_spill] sm:$0xff] %v13196_v3 }
 0x353   :  { %v3746_v15 = vpop.f32.mrb[46].mxu0 }
 0x354   :  { %v13188_v43 = vadd.f32 %v3746_v15, %v12613_v19  ;;  %v3748_v55 = vpop.f32.mrb[47].mxu0  ;;  %4063 = vmatmul.mubr.f32.gmra.mrb[152].mxu0 %v2300_v51  ;;  %v13202_v15 = vpop.f32.mrb[202].mxu1 }
 0x355   :  { %v13193_v14 = vadd.f32 %v3748_v55, %v12620_v48  ;;  %4068 = vmatprep.mubr.f32.mxu0 %v18944_v32  ;;  %19328 = vst [vmem:[#allocation123_spill] sm:$0xff] %v13202_v15  ;;  %v13208_v48 = vpop.f32.mrb[203].mxu1  ;;  %v2302_v55 = vmul.f32 %v2238_v10, %v13117_v49  ;;  %v19359_v15 = vld [vmem:[#allocation92_spill] sm:$0xff] }
 0x356   :  { %19329 = vst [vmem:[#allocation41_spill] sm:$0xff] %v13208_v48  ;;  %v13214_v56 = vpop.f32.mrb[204].mxu1 }
 0x357   :  { %v3752_v26 = vpop.f32.mrb[48].mxu0  ;;  %19330 = vst [vmem:[#allocation126_spill] sm:$0xff] %v13214_v56  ;;  %v19354_v56 = vld [vmem:[#allocation22_spill] sm:$0xff] }
 0x358   :  { %v13200_v54 = vadd.f32 %v3752_v26, %v12630_v18  ;;  %v3754_v19 = vpop.f32.mrb[49].mxu0  ;;  %4069 = vmatmul.mubr.f32.gmra.mrb[154].mxu0 %v2301_v53  ;;  %v2303_v26 = vmul.f32 %v2239_v34, %v13133_v57 }
 0x359   :  { %v13205_v51 = vadd.f32 %v3754_v19, %v12637_v17  ;;  %4074 = vmatprep.mubr.f32.mxu0 %v18944_v32  ;;  %v13220_v17 = vpop.f32.mrb[205].mxu1 }
 0x35a   :  { %19331 = vst [vmem:[#allocation44_spill] sm:$0xff] %v13220_v17 }
 0x35b   :  { %v3758_v27 = vpop.f32.mrb[50].mxu0 }
 0x35c   :  { %v13212_v60 = vadd.f32 %v3758_v27, %v12647_v2  ;;  %v3760_v18 = vpop.f32.mrb[51].mxu0  ;;  %4075 = vmatmul.mubr.f32.gmra.mrb[156].mxu0 %v2302_v55  ;;  %v13226_v2 = vpop.f32.mrb[206].mxu1 }
 0x35d   :  { %v13217_v53 = vadd.f32 %v3760_v18, %v12654_v58  ;;  %4080 = vmatprep.mubr.f32.mxu0 %v18944_v32  ;;  %19332 = vst [vmem:[#allocation125_spill] sm:$0xff] %v13226_v2  ;;  %v13231_v55 = vpop.f32.mrb[207].mxu1  ;;  %v19349_v2 = vld [vmem:[#allocation81_spill] sm:$0xff] }
 0x35e   :  { %19333 = vst [vmem:[#allocation43_spill] sm:$0xff] %v13231_v55  ;;  %v13236_v18 = vpop.f32.mrb[208].mxu1 }
 0x35f   :  { %v3764_v19 = vpop.f32.mrb[52].mxu0  ;;  %19334 = vst [vmem:[#allocation128_spill] sm:$0xff] %v13236_v18 }
 0x360   :  { %v13224_v49 = vadd.f32 %v3764_v19, %v12664_v30  ;;  %v3766_v10 = vpop.f32.mrb[53].mxu0  ;;  %4081 = vmatmul.mubr.f32.gmra.mrb[158].mxu0 %v2303_v26  ;;  %v13241_v30 = vpop.f32.mrb[209].mxu1 }
 0x361   :  { %v13229_v36 = vadd.f32 %v3766_v10, %v12671_v12  ;;  %19335 = vst [vmem:[#allocation46_spill] sm:$0xff] %v13241_v30  ;;  %v13246_v19 = vpop.f32.mrb[210].mxu1 }
 0x362   :  { %19336 = vst [vmem:[#allocation127_spill] sm:$0xff] %v13246_v19 }
 0x363   :  { %v3770_v58 = vpop.f32.mrb[54].mxu0 }
 0x364   :  { %v13234_v32 = vadd.f32 %v3770_v58, %v12680_v47  ;;  %v3772_v27 = vpop.f32.mrb[55].mxu0  ;;  %v13251_v47 = vpop.f32.mrb[211].mxu1 }
 0x365   :  { %v13239_v57 = vadd.f32 %v3772_v27, %v12687_v20  ;;  %19337 = vst [vmem:[#allocation45_spill] sm:$0xff] %v13251_v47  ;;  %v13256_v27 = vpop.f32.mrb[212].mxu1 }
 0x366   :  { %19338 = vst [vmem:[#allocation130_spill] sm:$0xff] %v13256_v27 }
 0x367   :  { %v3776_v34 = vpop.f32.mrb[56].mxu0 }
 0x368   :  { %v13244_v26 = vadd.f32 %v3776_v34, %v12692_v63  ;;  %v3778_v12 = vpop.f32.mrb[57].mxu0  ;;  %v13261_v63 = vpop.f32.mrb[213].mxu1 }
 0x369   :  { %v13249_v10 = vadd.f32 %v3778_v12, %v12699_v0  ;;  %19339 = vst [vmem:[#allocation49_spill] sm:$0xff] %v13261_v63  ;;  %v13266_v12 = vpop.f32.mrb[214].mxu1 }
 0x36a   :  { %19340 = vst [vmem:[#allocation129_spill] sm:$0xff] %v13266_v12 }
 0x36b   :  { %v3782_v58 = vpop.f32.mrb[58].mxu0 }
 0x36c   :  { %v13254_v18 = vadd.f32 %v3782_v58, %v12704_v16  ;;  %v3784_v20 = vpop.f32.mrb[59].mxu0  ;;  %v13271_v16 = vpop.f32.mrb[215].mxu1 }
 0x36d   :  { %v13259_v30 = vadd.f32 %v3784_v20, %v12711_v59  ;;  %19341 = vst [vmem:[#allocation48_spill] sm:$0xff] %v13271_v16  ;;  %v13276_v20 = vpop.f32.mrb[216].mxu1  ;;  %v19346_v16 = vld [vmem:[#allocation19_spill] sm:$0xff] }
 0x36e   :  { %19342 = vst [vmem:[#allocation132_spill] sm:$0xff] %v13276_v20 }
 0x36f   :  { %v3788_v34 = vpop.f32.mrb[60].mxu0 }
 0x370   :  { %v13264_v19 = vadd.f32 %v3788_v34, %v12716_v13  ;;  %v3790_v0 = vpop.f32.mrb[61].mxu0  ;;  %v13281_v13 = vpop.f32.mrb[217].mxu1 }
 0x371   :  { %v13269_v47 = vadd.f32 %v3790_v0, %v12723_v40  ;;  %19344 = vst [vmem:[#allocation131_spill] sm:$0xff] %v13281_v13  ;;  %v13286_v0 = vpop.f32.mrb[218].mxu1  ;;  %v19351_v13 = vld [vmem:[#allocation87_spill] sm:$0xff] }
 0x372   :  { %19345 = vst [vmem:[#allocation50_spill] sm:$0xff] %v13286_v0 }
 0x373   :  { %v3794_v58 = vpop.f32.mrb[62].mxu0 }
 0x374   :  { %v13274_v27 = vadd.f32 %v3794_v58, %v12728_v61  ;;  %v3796_v59 = vpop.f32.mrb[63].mxu0  ;;  %v13291_v61 = vpop.f32.mrb[219].mxu1 }
 0x375   :  { %v13279_v63 = vadd.f32 %v3796_v59, %v12735_v11  ;;  %19348 = vst [vmem:[#allocation53_spill] sm:$0xff] %v13291_v61  ;;  %v13296_v59 = vpop.f32.mrb[220].mxu1  ;;  %v19356_v61 = vld [vmem:[#allocation86_spill] sm:$0xff] }
 0x376   :  { %19350 = vst [vmem:[#allocation133_spill] sm:$0xff] %v13296_v59 }
 0x377   :  { %19343 = vst [vmem:[#allocation51_spill] sm:$0xff] %v13279_v63  ;;  %v3800_v34 = vpop.f32.mrb[64].mxu0  ;;  %v19380_v63 = vld [vmem:[#allocation47_spill] sm:$0xff] }
 0x378   :  { %v13284_v12 = vadd.f32 %v3800_v34, %v12740_v45  ;;  %v3802_v40 = vpop.f32.mrb[65].mxu0  ;;  %v13301_v45 = vpop.f32.mrb[221].mxu1 }
 0x379   :  { %v13289_v55 = vadd.f32 %v3802_v40, %v19346_v16  ;;  %19353 = vst [vmem:[#allocation136_spill] sm:$0xff] %v13301_v45  ;;  %v13306_v40 = vpop.f32.mrb[222].mxu1 }
 0x37a   :  { %19355 = vst [vmem:[#allocation57_spill] sm:$0xff] %v13306_v40 }
 0x37b   :  { %19347 = vst [vmem:[#allocation134_spill] sm:$0xff] %v13289_v55  ;;  %v3806_v58 = vpop.f32.mrb[66].mxu0  ;;  %v19368_v55 = vld [vmem:[#allocation100_spill] sm:$0xff] }
 0x37c   :  { %v13294_v20 = vadd.f32 %v3806_v58, %v19349_v2  ;;  %v3808_v11 = vpop.f32.mrb[67].mxu0  ;;  %v13311_v2 = vpop.f32.mrb[223].mxu1 }
 0x37d   :  { %v13299_v17 = vadd.f32 %v3808_v11, %v19351_v13  ;;  %19358 = vst [vmem:[#allocation56_spill] sm:$0xff] %v13311_v2  ;;  %v19360_v11 = vld [vmem:[#allocation21_spill] sm:$0xff] }
 0x37f   :  { %19352 = vst [vmem:[#allocation52_spill] sm:$0xff] %v13299_v17  ;;  %v3812_v34 = vpop.f32.mrb[68].mxu0  ;;  %v19366_v17 = vld [vmem:[#allocation95_spill] sm:$0xff] }
 0x380   :  { %v13304_v0 = vadd.f32 %v3812_v34, %v19354_v56  ;;  %v3814_v16 = vpop.f32.mrb[69].mxu0 }
 0x381   :  { %v13309_v48 = vadd.f32 %v3814_v16, %v19356_v61  ;;  %v19365_v16 = vld [vmem:[#allocation24_spill] sm:$0xff] }
 0x383   :  { %19357 = vst [vmem:[#allocation135_spill] sm:$0xff] %v13309_v48  ;;  %v3818_v58 = vpop.f32.mrb[70].mxu0 }
 0x384   :  { %v13314_v59 = vadd.f32 %v3818_v58, %v19359_v15  ;;  %v3820_v13 = vpop.f32.mrb[71].mxu0 }
 0x385   :  { %v13317_v3 = vadd.f32 %v3820_v13, %v19360_v11 }
 0x387   :  { %19361 = vst [vmem:[#allocation138_spill] sm:$0xff] %v13317_v3  ;;  %v3824_v45 = vpop.f32.mrb[72].mxu0  ;;  %v19369_v3 = vld [vmem:[#allocation23_spill] sm:$0xff] }
 0x388   :  { %v13320_v56 = vadd.f32 %v3824_v45, %v19362_v44  ;;  %v3826_v34 = vpop.f32.mrb[73].mxu0 }
 0x389   :  { %v13323_v40 = vadd.f32 %v3826_v34, %v19363_v7 }
 0x38b   :  { %19364 = vst [vmem:[#allocation61_spill] sm:$0xff] %v13323_v40  ;;  %v3830_v61 = vpop.f32.mrb[74].mxu0  ;;  %v19371_v40 = vld [vmem:[#allocation99_spill] sm:$0xff] }
 0x38c   :  { %v13326_v48 = vadd.f32 %v3830_v61, %v19365_v16  ;;  %v3832_v2 = vpop.f32.mrb[75].mxu0 }
 0x38d   :  { %v13329_v15 = vadd.f32 %v3832_v2, %v19366_v17 }
 0x38f   :  { %19367 = vst [vmem:[#allocation137_spill] sm:$0xff] %v13329_v15  ;;  %v3836_v58 = vpop.f32.mrb[76].mxu0  ;;  %v19373_v15 = vld [vmem:[#allocation102_spill] sm:$0xff] }
 0x390   :  { %v13332_v13 = vadd.f32 %v3836_v58, %v19368_v55  ;;  %v3838_v11 = vpop.f32.mrb[77].mxu0 }
 0x391   :  { %v13335_v44 = vadd.f32 %v3838_v11, %v19369_v3 }
 0x393   :  { %19370 = vst [vmem:[#allocation60_spill] sm:$0xff] %v13335_v44  ;;  %v3842_v45 = vpop.f32.mrb[78].mxu0  ;;  %v19375_v44 = vld [vmem:[#allocation26_spill] sm:$0xff] }
 0x394   :  { %v13338_v7 = vadd.f32 %v3842_v45, %v12824_v50  ;;  %v3844_v34 = vpop.f32.mrb[79].mxu0 }
 0x395   :  { %v13341_v61 = vadd.f32 %v3844_v34, %v19371_v40 }
 0x397   :  { %19372 = vst [vmem:[#allocation140_spill] sm:$0xff] %v13341_v61  ;;  %v3848_v16 = vpop.f32.mrb[80].mxu0  ;;  %v19378_v61 = vld [vmem:[#allocation101_spill] sm:$0xff] }
 0x398   :  { %v13344_v17 = vadd.f32 %v3848_v16, %v12836_v6  ;;  %v3850_v2 = vpop.f32.mrb[81].mxu0 }
 0x399   :  { %v13347_v55 = vadd.f32 %v3850_v2, %v19373_v15  ;;  %v18429_v15 = vsub.s32 0, %v19380_v63  ;;  %v19381_v2 = vld [vmem:[#allocation104_spill] sm:$0xff] }
 0x39b   :  { %19374 = vst [vmem:[#allocation67_spill] sm:$0xff] %v13347_v55  ;;  %v3854_v58 = vpop.f32.mrb[82].mxu0 }
 0x39c   :  { %v13350_v3 = vadd.f32 %v3854_v58, %v12848_v52  ;;  %v3856_v11 = vpop.f32.mrb[83].mxu0  ;;  %v19382_v58 = vld [vmem:[#allocation25_spill] sm:$0xff] }
 0x39d   :  { %v13353_v50 = vadd.f32 %v3856_v11, %v19375_v44 }
 0x39f   :  { %19376 = vst [vmem:[#allocation139_spill] sm:$0xff] %v13353_v50  ;;  %v3860_v45 = vpop.f32.mrb[84].mxu0 }
 0x3a0   :  { %v13356_v40 = vadd.f32 %v3860_v45, %v19377_v41  ;;  %v3862_v34 = vpop.f32.mrb[85].mxu0  ;;  %v9279_v41 = vld [vmem:[%s18246_s6] sm:$0xff] }
 0x3a1   :  { %v13359_v6 = vadd.f32 %v3862_v34, %v19378_v61  ;;  %v13373_v11 = vrot.slane %v9279_v41, %v18429_v15  ;;  %v19384_v61 = vld [vmem:[#allocation97_spill] sm:$0xff]  ;;  %v19390_v15 = vld [vmem:[#allocation106_spill] sm:$0xff] }
 0x3a3   :  { %19379 = vst [vmem:[#allocation66_spill] sm:$0xff] %v13359_v6  ;;  %v3866_v16 = vpop.f32.mrb[86].mxu0  ;;  %v19385_v6 = vld [vmem:[#allocation103_spill] sm:$0xff]  ;;  %v13391_v41 = vadd.f32 %v13123_v22, %v13373_v11  ;;  %v13408_v22 = vadd.f32 %v13152_v39, %v13373_v11  ;;  %v13424_v39 = vadd.f32 %v13176_v42, %v13373_v11  ;;  %v13440_v42 = vadd.f32 %v13200_v54, %v13373_v11 }
 0x3a4   :  { %v13363_v55 = vadd.f32 %v3866_v16, %v19381_v2  ;;  %v3868_v52 = vpop.f32.mrb[87].mxu0  ;;  %v13383_v2 = vadd.f32 %v13107_v38, %v13373_v11  ;;  %v13456_v54 = vadd.f32 %v13224_v49, %v13373_v11  ;;  %v13472_v49 = vadd.f32 %v13244_v26, %v13373_v11 }
 0x3a5   :  { %v13366_v62 = vadd.f32 %v3868_v52, %v19382_v58  ;;  %v13387_v58 = vadd.f32 %v13089_v28, %v13373_v11  ;;  %19389 = vst [vmem:[#allocation13_spill] sm:$0xff] %v13391_v41  ;;  %19394 = vst [vmem:[#allocation55_spill] sm:$0xff] %v13408_v22  ;;  %v13488_v26 = vadd.f32 %v13264_v19, %v13373_v11 }
 0x3a6   :  { %19387 = vst [vmem:[#allocation141_spill] sm:$0xff] %v13383_v2  ;;  %19398 = vst [vmem:[#allocation78_spill] sm:$0xff] %v13424_v39  ;;  %v13504_v19 = vadd.f32 %v13284_v12, %v13373_v11  ;;  %v13520_v12 = vadd.f32 %v13304_v0, %v13373_v11  ;;  %v13536_v0 = vadd.f32 %v13320_v56, %v13373_v11 }
 0x3a7   :  { %19383 = vst [vmem:[#allocation142_spill] sm:$0xff] %v13366_v62  ;;  %v3872_v44 = vpop.f32.mrb[88].mxu0  ;;  %19388 = vst [vmem:[#allocation72_spill] sm:$0xff] %v13387_v58  ;;  %v19391_v62 = vld [vmem:[#allocation28_spill] sm:$0xff]  ;;  %v4351_v38 = vadd.f32 %v13383_v2, %v13387_v58  ;;  %v13552_v56 = vadd.f32 %v13332_v13, %v13373_v11  ;;  %v13568_v13 = vadd.f32 %v13344_v17, %v13373_v11 }
 0x3a8   :  { %v13376_v45 = vadd.f32 %v3872_v44, %v19384_v61  ;;  %v3874_v34 = vpop.f32.mrb[89].mxu0  ;;  %19402 = vst [vmem:[#allocation146_spill] sm:$0xff] %v13440_v42  ;;  %19406 = vst [vmem:[#allocation59_spill] sm:$0xff] %v13456_v54  ;;  %v13584_v17 = vadd.f32 %v13356_v40, %v13373_v11 }
 0x3a9   :  { %v13379_v16 = vadd.f32 %v3874_v34, %v19385_v6  ;;  %v13403_v34 = vadd.f32 %v13139_v5, %v13373_v11  ;;  %v13419_v5 = vadd.f32 %v13164_v29, %v13373_v11  ;;  %v13435_v29 = vadd.f32 %v13188_v43, %v13373_v11  ;;  %19410 = vst [vmem:[#allocation84_spill] sm:$0xff] %v13472_v49 }
 0x3aa   :  { %v13451_v43 = vadd.f32 %v13212_v60, %v13373_v11  ;;  %v13467_v60 = vadd.f32 %v13234_v32, %v13373_v11  ;;  %v13483_v32 = vadd.f32 %v13254_v18, %v13373_v11  ;;  %19414 = vst [vmem:[#allocation147_spill] sm:$0xff] %v13488_v26  ;;  %v13499_v18 = vadd.f32 %v13274_v27, %v13373_v11 }
 0x3ab   :  { %19386 = vst [vmem:[#allocation73_spill] sm:$0xff] %v13379_v16  ;;  %v3878_v52 = vpop.f32.mrb[90].mxu0  ;;  %19393 = vst [vmem:[#allocation79_spill] sm:$0xff] %v13403_v34  ;;  %v4352_v16 = vadd.f32 %v4351_v38, %v13391_v41  ;;  %v19399_v41 = vld [vmem:[#allocation27_spill] sm:$0xff]  ;;  %v13515_v27 = vadd.f32 %v13294_v20, %v13373_v11  ;;  %v13531_v20 = vadd.f32 %v13314_v59, %v13373_v11 }
 0x3ac   :  { %v13394_v44 = vadd.f32 %v3878_v52, %v19390_v15  ;;  %v3880_v61 = vpop.f32.mrb[91].mxu0  ;;  %v19395_v15 = vld [vmem:[#allocation105_spill] sm:$0xff]  ;;  %19397 = vst [vmem:[#allocation143_spill] sm:$0xff] %v13419_v5  ;;  %19401 = vst [vmem:[#allocation16_spill] sm:$0xff] %v13435_v29  ;;  %v13547_v59 = vadd.f32 %v13326_v48, %v13373_v11  ;;  %v13563_v48 = vadd.f32 %v13338_v7, %v13373_v11 }
 0x3ad   :  { %v13397_v6 = vadd.f32 %v3880_v61, %v19391_v62  ;;  %v19396_v62 = vld [vmem:[#allocation110_spill] sm:$0xff]  ;;  %v4353_v2 = vadd.f32 %v4352_v16, %v13403_v34  ;;  %19405 = vst [vmem:[#allocation85_spill] sm:$0xff] %v13451_v43  ;;  %19409 = vst [vmem:[#allocation145_spill] sm:$0xff] %v13467_v60  ;;  %v13579_v7 = vadd.f32 %v13350_v3, %v13373_v11 }
 0x3ae   :  { %v19404_v34 = vld [vmem:[#allocation30_spill] sm:$0xff]  ;;  %19413 = vst [vmem:[#allocation58_spill] sm:$0xff] %v13483_v32  ;;  %19417 = vst [vmem:[#allocation90_spill] sm:$0xff] %v13499_v18 }
 0x3af   :  { %19392 = vst [vmem:[#allocation144_spill] sm:$0xff] %v13397_v6  ;;  %v3884_v28 = vpop.f32.mrb[92].mxu0  ;;  %v4354_v38 = vadd.f32 %v4353_v2, %v13408_v22  ;;  %v19400_v6 = vld [vmem:[#allocation109_spill] sm:$0xff]  ;;  %v19403_v22 = vld [vmem:[#allocation114_spill] sm:$0xff]  ;;  %19418 = vst [vmem:[#allocation64_spill] sm:$0xff] %v13504_v19 }
 0x3b0   :  { %v13411_v52 = vadd.f32 %v3884_v28, %v19395_v15  ;;  %v3886_v50 = vpop.f32.mrb[93].mxu0  ;;  %19421 = vst [vmem:[#allocation89_spill] sm:$0xff] %v13515_v27  ;;  %19422 = vst [vmem:[#allocation94_spill] sm:$0xff] %v13520_v12 }
 0x3b1   :  { %v13414_v61 = vadd.f32 %v3886_v50, %v19396_v62  ;;  %v4355_v16 = vadd.f32 %v4354_v38, %v13419_v5  ;;  %v19408_v5 = vld [vmem:[#allocation119_spill] sm:$0xff]  ;;  %19425 = vst [vmem:[#allocation93_spill] sm:$0xff] %v13531_v20  ;;  %19426 = vst [vmem:[#allocation117_spill] sm:$0xff] %v13536_v0 }
 0x3b2   :  { %19429 = vst [vmem:[#allocation6_spill] sm:$0xff] %v13547_v59  ;;  %19430 = vst [vmem:[#allocation8_spill] sm:$0xff] %v13552_v56 }
 0x3b3   :  { %v3890_v58 = vpop.f32.mrb[94].mxu0  ;;  %v4356_v2 = vadd.f32 %v4355_v16, %v13424_v39  ;;  %v19407_v39 = vld [vmem:[#allocation113_spill] sm:$0xff]  ;;  %19433 = vst [vmem:[#allocation5_spill] sm:$0xff] %v13563_v48  ;;  %19434 = vst [vmem:[#allocation148_spill] sm:$0xff] %v13568_v13 }
 0x3b4   :  { %v13427_v28 = vadd.f32 %v3890_v58, %v19399_v41  ;;  %v3892_v15 = vpop.f32.mrb[95].mxu0  ;;  %19437 = vst [vmem:[#allocation7_spill] sm:$0xff] %v13579_v7  ;;  %19438 = vst [vmem:[#allocation14_spill] sm:$0xff] %v13584_v17 }
 0x3b5   :  { %v13430_v50 = vadd.f32 %v3892_v15, %v19400_v6  ;;  %v4357_v38 = vadd.f32 %v4356_v2, %v13435_v29  ;;  %v19412_v29 = vld [vmem:[#allocation118_spill] sm:$0xff] }
 0x3b7   :  { %v3896_v62 = vpop.f32.mrb[96].mxu0  ;;  %v4358_v16 = vadd.f32 %v4357_v38, %v13440_v42  ;;  %v19411_v42 = vld [vmem:[#allocation29_spill] sm:$0xff] }
 0x3b8   :  { %v13443_v58 = vadd.f32 %v3896_v62, %v19403_v22  ;;  %v3898_v41 = vpop.f32.mrb[97].mxu0 }
 0x3b9   :  { %v13446_v6 = vadd.f32 %v3898_v41, %v19404_v34  ;;  %v4359_v2 = vadd.f32 %v4358_v16, %v13451_v43  ;;  %v19416_v43 = vld [vmem:[#allocation32_spill] sm:$0xff] }
 0x3bb   :  { %v3902_v15 = vpop.f32.mrb[98].mxu0  ;;  %v4360_v38 = vadd.f32 %v4359_v2, %v13456_v54  ;;  %v19415_v54 = vld [vmem:[#allocation122_spill] sm:$0xff] }
 0x3bc   :  { %v13459_v22 = vadd.f32 %v3902_v15, %v19407_v39  ;;  %v3904_v62 = vpop.f32.mrb[99].mxu0 }
 0x3bd   :  { %v13462_v34 = vadd.f32 %v3904_v62, %v19408_v5  ;;  %v4361_v16 = vadd.f32 %v4360_v38, %v13467_v60  ;;  %v19420_v60 = vld [vmem:[#allocation65_spill] sm:$0xff] }
 0x3bf   :  { %v3908_v41 = vpop.f32.mrb[100].mxu0  ;;  %v4362_v2 = vadd.f32 %v4361_v16, %v13472_v49  ;;  %v19419_v49 = vld [vmem:[#allocation31_spill] sm:$0xff] }
 0x3c0   :  { %v13475_v39 = vadd.f32 %v3908_v41, %v19411_v42  ;;  %v3910_v15 = vpop.f32.mrb[101].mxu0 }
 0x3c1   :  { %v13478_v5 = vadd.f32 %v3910_v15, %v19412_v29  ;;  %v4363_v38 = vadd.f32 %v4362_v2, %v13483_v32  ;;  %v19424_v32 = vld [vmem:[#allocation108_spill] sm:$0xff] }
 0x3c3   :  { %v3914_v62 = vpop.f32.mrb[102].mxu0  ;;  %v4364_v16 = vadd.f32 %v4363_v38, %v13488_v26  ;;  %v19423_v26 = vld [vmem:[#allocation34_spill] sm:$0xff] }
 0x3c4   :  { %v13491_v42 = vadd.f32 %v3914_v62, %v19415_v54  ;;  %v3916_v41 = vpop.f32.mrb[103].mxu0 }
 0x3c5   :  { %v13494_v29 = vadd.f32 %v3916_v41, %v19416_v43  ;;  %v4365_v2 = vadd.f32 %v4364_v16, %v13499_v18  ;;  %v19428_v18 = vld [vmem:[#allocation71_spill] sm:$0xff] }
 0x3c7   :  { %v3920_v15 = vpop.f32.mrb[104].mxu0  ;;  %v4366_v38 = vadd.f32 %v4365_v2, %v13504_v19  ;;  %v19427_v19 = vld [vmem:[#allocation62_spill] sm:$0xff] }
 0x3c8   :  { %v13507_v54 = vadd.f32 %v3920_v15, %v19419_v49  ;;  %v3922_v62 = vpop.f32.mrb[105].mxu0 }
 0x3c9   :  { %v13510_v43 = vadd.f32 %v3922_v62, %v19420_v60  ;;  %v4367_v16 = vadd.f32 %v4366_v38, %v13515_v27  ;;  %v19432_v27 = vld [vmem:[#allocation107_spill] sm:$0xff] }
 0x3cb   :  { %v3926_v41 = vpop.f32.mrb[106].mxu0  ;;  %v4368_v2 = vadd.f32 %v4367_v16, %v13520_v12  ;;  %v19431_v12 = vld [vmem:[#allocation33_spill] sm:$0xff] }
 0x3cc   :  { %v13523_v49 = vadd.f32 %v3926_v41, %v19423_v26  ;;  %v3928_v15 = vpop.f32.mrb[107].mxu0 }
 0x3cd   :  { %v13526_v60 = vadd.f32 %v3928_v15, %v19424_v32  ;;  %v4369_v38 = vadd.f32 %v4368_v2, %v13531_v20  ;;  %v19436_v20 = vld [vmem:[#allocation77_spill] sm:$0xff] }
 0x3cf   :  { %v3932_v62 = vpop.f32.mrb[108].mxu0  ;;  %v4370_v16 = vadd.f32 %v4369_v38, %v13536_v0  ;;  %v19435_v0 = vld [vmem:[#allocation68_spill] sm:$0xff] }
 0x3d0   :  { %v13539_v26 = vadd.f32 %v3932_v62, %v19427_v19  ;;  %v3934_v41 = vpop.f32.mrb[109].mxu0 }
 0x3d1   :  { %v13542_v32 = vadd.f32 %v3934_v41, %v19428_v18  ;;  %v4371_v2 = vadd.f32 %v4370_v16, %v13547_v59  ;;  %v19440_v59 = vld [vmem:[#allocation112_spill] sm:$0xff] }
 0x3d3   :  { %v3938_v15 = vpop.f32.mrb[110].mxu0  ;;  %v4372_v38 = vadd.f32 %v4371_v2, %v13552_v56  ;;  %v19439_v56 = vld [vmem:[#allocation36_spill] sm:$0xff] }
 0x3d4   :  { %v13555_v19 = vadd.f32 %v3938_v15, %v19431_v12  ;;  %v3940_v62 = vpop.f32.mrb[111].mxu0 }
 0x3d5   :  { %v13558_v18 = vadd.f32 %v3940_v62, %v19432_v27  ;;  %v4373_v16 = vadd.f32 %v4372_v38, %v13563_v48  ;;  %v28_v38 = vld [vmem:[%s18246_s6 + $0x8] sm:$0xff] }
 0x3d7   :  { %v3944_v41 = vpop.f32.mrb[112].mxu0  ;;  %v4374_v2 = vadd.f32 %v4373_v16, %v13568_v13  ;;  %v19444_v13 = vsub.s32 0, %v19380_v63 }
 0x3d8   :  { %v13571_v12 = vadd.f32 %v3944_v41, %v19435_v0  ;;  %v3946_v15 = vpop.f32.mrb[113].mxu0 }
 0x3d9   :  { %v13574_v27 = vadd.f32 %v3946_v15, %v19436_v20  ;;  %v4375_v3 = vadd.f32 %v4374_v2, %v13579_v7  ;;  %v13598_v15 = vadd.f32 %v13363_v55, %v13373_v11  ;;  %v13610_v48 = vrot.slane %v28_v38, %v19444_v13  ;;  %v19445_v2 = vld [vmem:[#allocation83_spill] sm:$0xff] }
 0x3da   :  { %v13627_v13 = vadd.f32 %v13411_v52, %v13373_v11  ;;  %v19447_v38 = vld [vmem:[#allocation35_spill] sm:$0xff]  ;;  %v13646_v52 = vadd.f32 %v13427_v28, %v13373_v11 }
 0x3db   :  { %v3950_v62 = vpop.f32.mrb[114].mxu0  ;;  %19441 = vst [vmem:[#allocation54_spill] sm:$0xff] %v13598_v15  ;;  %v4376_v40 = vadd.f32 %v4375_v3, %v13584_v17  ;;  %v13618_v3 = vadd.f32 %v13394_v44, %v13373_v11  ;;  %v13638_v44 = vadd.f32 %v13128_v23, %v13610_v48 }
 0x3dc   :  { %v13587_v0 = vadd.f32 %v3950_v62, %v19439_v56  ;;  %v3952_v41 = vpop.f32.mrb[115].mxu0  ;;  %v13603_v56 = vadd.f32 %v13376_v45, %v13373_v11  ;;  %v19443_v62 = vld [vmem:[#allocation74_spill] sm:$0xff]  ;;  %v13622_v45 = vadd.f32 %v13112_v4, %v13610_v48  ;;  %v19448_v4 = vld [vmem:[#allocation111_spill] sm:$0xff]  ;;  %19449 = vst [vmem:[#allocation63_spill] sm:$0xff] %v13646_v52 }
 0x3dd   :  { %v13590_v20 = vadd.f32 %v3952_v41, %v19440_v59  ;;  %v4377_v55 = vadd.f32 %v4376_v40, %v13598_v15  ;;  %19446 = vst [vmem:[#allocation18_spill] sm:$0xff] %v13618_v3  ;;  %v13634_v40 = vadd.f32 %v13094_v9, %v13610_v48  ;;  %v13652_v9 = vadd.f32 %v13144_v33, %v13610_v48  ;;  %v19451_v15 = vld [vmem:[#allocation88_spill] sm:$0xff] }
 0x3de   :  { %19442 = vst [vmem:[#allocation15_spill] sm:$0xff] %v13603_v56 }
 0x3df   :  { %v3956_v16 = vpop.f32.mrb[116].mxu0 }
 0x3e0   :  { %v13606_v59 = vadd.f32 %v3956_v16, %v19443_v62  ;;  %v3958_v41 = vpop.f32.mrb[117].mxu0  ;;  %v4378_v62 = vadd.f32 %v4377_v55, %v13603_v56  ;;  %v13665_v56 = vadd.f32 %v13157_v1, %v13610_v48  ;;  %v13683_v1 = vadd.f32 %v13475_v39, %v13373_v11 }
 0x3e1   :  { %v13613_v7 = vadd.f32 %v3958_v41, %v19445_v2 }
 0x3e2   :  { %v4379_v55 = vadd.f32 %v4378_v62, %v13618_v3  ;;  %19453 = vst [vmem:[#allocation17_spill] sm:$0xff] %v13683_v1 }
 0x3e3   :  { %v3962_v16 = vpop.f32.mrb[118].mxu0 }
 0x3e4   :  { %v13630_v41 = vadd.f32 %v3962_v16, %v19447_v38  ;;  %v3964_v2 = vpop.f32.mrb[119].mxu0  ;;  %v4420_v16 = vadd.f32 %v13622_v45, %v13634_v40  ;;  %v4380_v23 = vadd.f32 %v4379_v55, %v13627_v13  ;;  %v13673_v55 = vadd.f32 %v13459_v22, %v13373_v11 }
 0x3e5   :  { %v13641_v63 = vadd.f32 %v3964_v2, %v19448_v4  ;;  %v13657_v2 = vadd.f32 %v13443_v58, %v13373_v11  ;;  %v19450_v4 = vld [vmem:[#allocation80_spill] sm:$0xff] }
 0x3e6   :  { %v4421_v28 = vadd.f32 %v4420_v16, %v13638_v44  ;;  %v4381_v17 = vadd.f32 %v4380_v23, %v13646_v52  ;;  %19452 = vst [vmem:[#allocation70_spill] sm:$0xff] %v13673_v55 }
 0x3e7   :  { %v3968_v38 = vpop.f32.mrb[120].mxu0 }
 0x3e8   :  { %v13660_v62 = vadd.f32 %v3968_v38, %v19450_v4  ;;  %v3970_v3 = vpop.f32.mrb[121].mxu0  ;;  %v4422_v58 = vadd.f32 %v4421_v28, %v13652_v9  ;;  %v13678_v38 = vadd.f32 %v13169_v21, %v13610_v48  ;;  %v4382_v4 = vadd.f32 %v4381_v17, %v13657_v2 }
 0x3e9   :  { %v13668_v33 = vadd.f32 %v3970_v3, %v19451_v15  ;;  %v19454_v15 = vld [vmem:[#allocation116_spill] sm:$0xff]  ;;  %v13691_v28 = vadd.f32 %v13181_v24, %v13610_v48  ;;  %v13699_v17 = vadd.f32 %v13491_v42, %v13373_v11  ;;  %v13709_v24 = vadd.f32 %v13507_v54, %v13373_v11 }
 0x3ea   :  { %v4423_v22 = vadd.f32 %v4422_v58, %v13665_v56  ;;  %v4383_v52 = vadd.f32 %v4382_v4, %v13673_v55  ;;  %v13715_v42 = vadd.f32 %v13205_v51, %v13610_v48  ;;  %v13733_v51 = vadd.f32 %v13539_v26, %v13373_v11 }
 0x3eb   :  { %v3974_v16 = vpop.f32.mrb[122].mxu0  ;;  %19455 = vst [vmem:[#allocation20_spill] sm:$0xff] %v13699_v17  ;;  %19456 = vst [vmem:[#allocation69_spill] sm:$0xff] %v13709_v24 }
 0x3ec   :  { %v13686_v3 = vadd.f32 %v3974_v16, %v19454_v15  ;;  %v3976_v23 = vpop.f32.mrb[123].mxu0  ;;  %v4424_v39 = vadd.f32 %v4423_v22, %v13678_v38  ;;  %v13704_v16 = vadd.f32 %v13193_v14, %v13610_v48  ;;  %v4384_v15 = vadd.f32 %v4383_v52, %v13683_v1  ;;  %19458 = vst [vmem:[#allocation75_spill] sm:$0xff] %v13733_v51 }
 0x3ed   :  { %v13694_v21 = vadd.f32 %v3976_v23, %v13101_v31  ;;  %v13723_v52 = vadd.f32 %v13523_v49, %v13373_v11  ;;  %v13739_v49 = vadd.f32 %v13229_v36, %v13610_v48  ;;  %v13757_v36 = vadd.f32 %v13571_v12, %v13373_v11 }
 0x3ee   :  { %v4425_v23 = vadd.f32 %v4424_v39, %v13691_v28  ;;  %v4385_v14 = vadd.f32 %v4384_v15, %v13699_v17 }
 0x3ef   :  { %v3980_v58 = vpop.f32.mrb[124].mxu0  ;;  %19457 = vst [vmem:[#allocation76_spill] sm:$0xff] %v13723_v52  ;;  %19461 = vst [vmem:[#allocation10_spill] sm:$0xff] %v13757_v36 }
 0x3f0   :  { %v8298_v31 = vadd.f32 %v3980_v58, %v13109_v25  ;;  %v3982_v4 = vpop.f32.mrb[125].mxu0  ;;  %v4426_v54 = vadd.f32 %v4425_v23, %v13704_v16  ;;  %v13728_v25 = vadd.f32 %v13217_v53, %v13610_v48  ;;  %v4386_v58 = vadd.f32 %v4385_v14, %v13709_v24 }
 0x3f1   :  { %v13718_v22 = vadd.f32 %v3982_v4, %v13119_v35  ;;  %v19459_v35 = vld [vmem:[#allocation38_spill] sm:$0xff]  ;;  %v13747_v14 = vadd.f32 %v13555_v19, %v13373_v11  ;;  %v13763_v19 = vadd.f32 %v13249_v10, %v13610_v48  ;;  %v13781_v10 = vadd.f32 %v13606_v59, %v13373_v11 }
 0x3f2   :  { %v4427_v17 = vadd.f32 %v4426_v54, %v13715_v42  ;;  %v4387_v53 = vadd.f32 %v4386_v58, %v13723_v52 }
 0x3f3   :  { %v3986_v39 = vpop.f32.mrb[126].mxu0  ;;  %19460 = vst [vmem:[#allocation82_spill] sm:$0xff] %v13747_v14  ;;  %19464 = vst [vmem:[#allocation12_spill] sm:$0xff] %v13781_v10 }
 0x3f4   :  { %v8300_v4 = vadd.f32 %v3986_v39, %v19459_v35  ;;  %v3988_v15 = vpop.f32.mrb[127].mxu0  ;;  %v4428_v26 = vadd.f32 %v4427_v17, %v13728_v25  ;;  %v13752_v39 = vadd.f32 %v13239_v57, %v13610_v48  ;;  %v4388_v35 = vadd.f32 %v4387_v53, %v13733_v51  ;;  %v19462_v17 = vld [vmem:[#allocation115_spill] sm:$0xff] }
 0x3f5   :  { %v13742_v23 = vadd.f32 %v3988_v15, %v13135_v8  ;;  %v13771_v53 = vadd.f32 %v13587_v0, %v13373_v11  ;;  %v13787_v0 = vadd.f32 %v13269_v47, %v13610_v48  ;;  %v13805_v47 = vadd.f32 %v13660_v62, %v13373_v11 }
 0x3f6   :  { %v4429_v15 = vadd.f32 %v4428_v26, %v13739_v49  ;;  %v4389_v57 = vadd.f32 %v4388_v35, %v13747_v14  ;;  %v13841_v55 = vadd.f32 %v8300_v4, %v13373_v11  ;;  %v19488_v4 = vld [vmem:[#allocation61_spill] sm:$0xff] }
 0x3f7   :  { %v3992_v54 = vpop.f32.mrb[128].mxu0  ;;  %19463 = vst [vmem:[#allocation9_spill] sm:$0xff] %v13771_v53  ;;  %19465 = vst [vmem:[#allocation11_spill] sm:$0xff] %v13787_v0 }
 0x3f8   :  { %v8302_v8 = vadd.f32 %v3992_v54, %v13141_v46  ;;  %v3994_v58 = vpop.f32.mrb[129].mxu0  ;;  %v4430_v12 = vadd.f32 %v4429_v15, %v13752_v39  ;;  %v13776_v46 = vadd.f32 %v13259_v30, %v13610_v48  ;;  %v4390_v54 = vadd.f32 %v4389_v57, %v13757_v36  ;;  %v19466_v15 = vld [vmem:[#allocation37_spill] sm:$0xff]  ;;  %19470 = vst [vmem:[#allocation151_spill] sm:$0xff] %v13805_v47 }
 0x3f9   :  { %v13766_v52 = vadd.f32 %v3994_v58, %v19462_v17  ;;  %v13795_v57 = vadd.f32 %v13630_v41, %v13373_v11  ;;  %v19472_v41 = vld [vmem:[#allocation134_spill] sm:$0xff]  ;;  %19483 = vst [vmem:[#allocation157_spill] sm:$0xff] %v13841_v55 }
 0x3fa   :  { %v4431_v17 = vadd.f32 %v4430_v12, %v13763_v19  ;;  %v4391_v30 = vadd.f32 %v4390_v54, %v13771_v53  ;;  %v13811_v51 = vadd.f32 %v19472_v41, %v13610_v48  ;;  %v13828_v41 = vadd.f32 %v8298_v31, %v13373_v11 }
 0x3fb   :  { %v3998_v26 = vpop.f32.mrb[130].mxu0  ;;  %19467 = vst [vmem:[#allocation149_spill] sm:$0xff] %v13795_v57 }
 0x3fc   :  { %v8304_v58 = vadd.f32 %v3998_v26, %v13154_v37  ;;  %v4000_v35 = vpop.f32.mrb[131].mxu0  ;;  %v4432_v59 = vadd.f32 %v4431_v17, %v13776_v46  ;;  %v19468_v37 = vld [vmem:[#allocation51_spill] sm:$0xff]  ;;  %v4392_v36 = vadd.f32 %v4391_v30, %v13781_v10  ;;  %19473 = vst [vmem:[#allocation152_spill] sm:$0xff] %v13811_v51  ;;  %v19474_v17 = vld [vmem:[#allocation40_spill] sm:$0xff]  ;;  %v13819_v30 = vadd.f32 %v13686_v3, %v13373_v11 }
 0x3fd   :  { %v13790_v14 = vadd.f32 %v4000_v35, %v19466_v15  ;;  %v13800_v26 = vadd.f32 %v19468_v37, %v13610_v48  ;;  %v19471_v35 = vld [vmem:[#allocation121_spill] sm:$0xff]  ;;  %19478 = vst [vmem:[#allocation155_spill] sm:$0xff] %v13828_v41  ;;  %v19480_v3 = vld [vmem:[#allocation135_spill] sm:$0xff] }
 0x3fe   :  { %v4433_v53 = vadd.f32 %v4432_v59, %v13787_v0  ;;  %v4393_v37 = vadd.f32 %v4392_v36, %v13795_v57  ;;  %19475 = vst [vmem:[#allocation153_spill] sm:$0xff] %v13819_v30  ;;  %v13834_v57 = vadd.f32 %v19480_v3, %v13610_v48  ;;  %v13850_v3 = vadd.f32 %v8302_v8, %v13373_v11 }
 0x3ff   :  { %19469 = vst [vmem:[#allocation150_spill] sm:$0xff] %v13800_v26  ;;  %v4004_v12 = vpop.f32.mrb[132].mxu0 }
 0x400   :  { %v8306_v15 = vadd.f32 %v4004_v12, %v19471_v35  ;;  %v4006_v54 = vpop.f32.mrb[133].mxu0  ;;  %v4434_v62 = vadd.f32 %v4433_v53, %v13800_v26  ;;  %v19476_v12 = vld [vmem:[#allocation52_spill] sm:$0xff]  ;;  %v4394_v10 = vadd.f32 %v4393_v37, %v13805_v47  ;;  %19481 = vst [vmem:[#allocation156_spill] sm:$0xff] %v13834_v57  ;;  %v19482_v53 = vld [vmem:[#allocation39_spill] sm:$0xff]  ;;  %v19484_v37 = vld [vmem:[#allocation138_spill] sm:$0xff] }
 0x401   :  { %v13814_v24 = vadd.f32 %v4006_v54, %v19474_v17  ;;  %v13824_v35 = vadd.f32 %v19476_v12, %v13610_v48  ;;  %v19479_v54 = vld [vmem:[#allocation120_spill] sm:$0xff]  ;;  %19486 = vst [vmem:[#allocation159_spill] sm:$0xff] %v13850_v3 }
 0x402   :  { %v4435_v36 = vadd.f32 %v4434_v62, %v13811_v51  ;;  %v4395_v12 = vadd.f32 %v4394_v10, %v13819_v30  ;;  %v19487_v47 = vld [vmem:[#allocation124_spill] sm:$0xff]  ;;  %v13856_v30 = vadd.f32 %v19488_v4, %v13610_v48  ;;  %v13863_v51 = vadd.f32 %v8304_v58, %v13373_v11 }
 0x403   :  { %19477 = vst [vmem:[#allocation154_spill] sm:$0xff] %v13824_v35  ;;  %v4010_v59 = vpop.f32.mrb[134].mxu0  ;;  %v13872_v4 = vadd.f32 %v8306_v15, %v13373_v11  ;;  %v19496_v58 = vld [vmem:[#allocation60_spill] sm:$0xff] }
 0x404   :  { %v8308_v17 = vadd.f32 %v4010_v59, %v19479_v54  ;;  %v4012_v1 = vpop.f32.mrb[135].mxu0  ;;  %v4436_v31 = vadd.f32 %v4435_v36, %v13824_v35  ;;  %v13846_v59 = vadd.f32 %v19484_v37, %v13610_v48  ;;  %v4396_v62 = vadd.f32 %v4395_v12, %v13828_v41  ;;  %19489 = vst [vmem:[#allocation160_spill] sm:$0xff] %v13856_v30  ;;  %v19490_v36 = vld [vmem:[#allocation42_spill] sm:$0xff]  ;;  %v19492_v12 = vld [vmem:[#allocation137_spill] sm:$0xff]  ;;  %v19495_v41 = vld [vmem:[#allocation123_spill] sm:$0xff] }
 0x405   :  { %v13837_v26 = vadd.f32 %v4012_v1, %v19482_v53  ;;  %19491 = vst [vmem:[#allocation161_spill] sm:$0xff] %v13863_v51  ;;  %19494 = vst [vmem:[#allocation19_spill] sm:$0xff] %v13872_v4 }
 0x406   :  { %19485 = vst [vmem:[#allocation158_spill] sm:$0xff] %v13846_v59  ;;  %v4437_v10 = vadd.f32 %v4436_v31, %v13834_v57  ;;  %v4397_v37 = vadd.f32 %v4396_v62, %v13841_v55  ;;  %v13878_v55 = vadd.f32 %v19496_v58, %v13610_v48  ;;  %v13885_v57 = vadd.f32 %v8308_v17, %v13373_v11  ;;  %v19504_v17 = vld [vmem:[#allocation67_spill] sm:$0xff] }
 0x407   :  { %v4016_v54 = vpop.f32.mrb[136].mxu0 }
 0x408   :  { %v8310_v1 = vadd.f32 %v4016_v54, %v19487_v47  ;;  %v4018_v53 = vpop.f32.mrb[137].mxu0  ;;  %v4438_v8 = vadd.f32 %v4437_v10, %v13846_v59  ;;  %v13868_v47 = vadd.f32 %v19492_v12, %v13610_v48  ;;  %v4398_v31 = vadd.f32 %v4397_v37, %v13850_v3  ;;  %19497 = vst [vmem:[#allocation81_spill] sm:$0xff] %v13878_v55  ;;  %v19498_v10 = vld [vmem:[#allocation41_spill] sm:$0xff]  ;;  %v19500_v37 = vld [vmem:[#allocation140_spill] sm:$0xff]  ;;  %v19503_v3 = vld [vmem:[#allocation126_spill] sm:$0xff] }
 0x409   :  { %v13859_v35 = vadd.f32 %v4018_v53, %v19490_v36  ;;  %19499 = vst [vmem:[#allocation87_spill] sm:$0xff] %v13885_v57 }
 0x40a   :  { %19493 = vst [vmem:[#allocation162_spill] sm:$0xff] %v13868_v47  ;;  %v4439_v62 = vadd.f32 %v4438_v8, %v13856_v30  ;;  %v4399_v12 = vadd.f32 %v4398_v31, %v13863_v51  ;;  %v13894_v58 = vadd.f32 %v8310_v1, %v13373_v11  ;;  %v13900_v51 = vadd.f32 %v19504_v17, %v13610_v48 }
 0x40b   :  { %v4022_v54 = vpop.f32.mrb[138].mxu0 }
 0x40c   :  { %v8312_v53 = vadd.f32 %v4022_v54, %v19495_v41  ;;  %v4024_v36 = vpop.f32.mrb[139].mxu0  ;;  %v4440_v15 = vadd.f32 %v4439_v62, %v13868_v47  ;;  %v13890_v41 = vadd.f32 %v19500_v37, %v13610_v48  ;;  %v4400_v8 = vadd.f32 %v4399_v12, %v13872_v4  ;;  %19502 = vst [vmem:[#allocation86_spill] sm:$0xff] %v13894_v58  ;;  %v19506_v62 = vld [vmem:[#allocation44_spill] sm:$0xff]  ;;  %v19508_v12 = vld [vmem:[#allocation139_spill] sm:$0xff]  ;;  %v19511_v4 = vld [vmem:[#allocation125_spill] sm:$0xff] }
 0x40d   :  { %v13881_v59 = vadd.f32 %v4024_v36, %v19498_v10  ;;  %19505 = vst [vmem:[#allocation92_spill] sm:$0xff] %v13900_v51 }
 0x40e   :  { %19501 = vst [vmem:[#allocation22_spill] sm:$0xff] %v13890_v41  ;;  %v4441_v31 = vadd.f32 %v4440_v15, %v13878_v55  ;;  %v4401_v37 = vadd.f32 %v4400_v8, %v13885_v57  ;;  %v13907_v30 = vadd.f32 %v8312_v53, %v13373_v11  ;;  %v19512_v53 = vld [vmem:[#allocation66_spill] sm:$0xff] }
 0x40f   :  { %v4028_v54 = vpop.f32.mrb[140].mxu0  ;;  %v13922_v57 = vadd.f32 %v19512_v53, %v13610_v48 }
 0x410   :  { %v8314_v36 = vadd.f32 %v4028_v54, %v19503_v3  ;;  %v4030_v10 = vpop.f32.mrb[141].mxu0  ;;  %19507 = vst [vmem:[#allocation21_spill] sm:$0xff] %v13907_v30  ;;  %v4442_v1 = vadd.f32 %v4441_v31, %v13890_v41  ;;  %v13912_v3 = vadd.f32 %v19508_v12, %v13610_v48  ;;  %v4402_v15 = vadd.f32 %v4401_v37, %v13894_v58  ;;  %v19514_v31 = vld [vmem:[#allocation43_spill] sm:$0xff]  ;;  %v19515_v37 = vld [vmem:[#allocation142_spill] sm:$0xff]  ;;  %v19517_v58 = vld [vmem:[#allocation128_spill] sm:$0xff] }
 0x411   :  { %v13903_v47 = vadd.f32 %v4030_v10, %v19506_v62  ;;  %19513 = vst [vmem:[#allocation24_spill] sm:$0xff] %v13922_v57 }
 0x412   :  { %19509 = vst [vmem:[#allocation91_spill] sm:$0xff] %v13912_v3  ;;  %v13916_v17 = vadd.f32 %v8314_v36, %v13373_v11  ;;  %v4443_v8 = vadd.f32 %v4442_v1, %v13900_v51  ;;  %v4403_v12 = vadd.f32 %v4402_v15, %v13907_v30 }
 0x413   :  { %v4034_v54 = vpop.f32.mrb[142].mxu0 }
 0x414   :  { %19510 = vst [vmem:[#allocation96_spill] sm:$0xff] %v13916_v17  ;;  %v8316_v10 = vadd.f32 %v4034_v54, %v19511_v4  ;;  %v4036_v62 = vpop.f32.mrb[143].mxu0  ;;  %v4444_v36 = vadd.f32 %v4443_v8, %v13912_v3  ;;  %v13934_v4 = vadd.f32 %v19515_v37, %v13610_v48  ;;  %v4404_v1 = vadd.f32 %v4403_v12, %v13916_v17  ;;  %v19521_v12 = vld [vmem:[#allocation144_spill] sm:$0xff]  ;;  %v19523_v17 = vld [vmem:[#allocation127_spill] sm:$0xff] }
 0x415   :  { %v13925_v41 = vadd.f32 %v4036_v62, %v19514_v31  ;;  %v19518_v31 = vld [vmem:[#allocation73_spill] sm:$0xff] }
 0x416   :  { %v13929_v55 = vadd.f32 %v8316_v10, %v13373_v11  ;;  %19516 = vst [vmem:[#allocation95_spill] sm:$0xff] %v13934_v4  ;;  %v4445_v62 = vadd.f32 %v4444_v36, %v13922_v57  ;;  %v13941_v15 = vadd.f32 %v19518_v31, %v13610_v48  ;;  %v19520_v10 = vld [vmem:[#allocation46_spill] sm:$0xff] }
 0x417   :  { %v4040_v54 = vpop.f32.mrb[144].mxu0 }
 0x418   :  { %v8318_v53 = vadd.f32 %v4040_v54, %v19517_v58  ;;  %v4042_v51 = vpop.f32.mrb[145].mxu0  ;;  %19519 = vst [vmem:[#allocation100_spill] sm:$0xff] %v13941_v15  ;;  %v4405_v8 = vadd.f32 %v4404_v1, %v13929_v55  ;;  %v4446_v3 = vadd.f32 %v4445_v62, %v13934_v4  ;;  %v13953_v58 = vadd.f32 %v19521_v12, %v13610_v48 }
 0x419   :  { %v13944_v30 = vadd.f32 %v4042_v51, %v19520_v10  ;;  %v13960_v1 = vadd.f32 %v13414_v61, %v13610_v48 }
 0x41a   :  { %v13948_v37 = vadd.f32 %v8318_v53, %v13373_v11  ;;  %19522 = vst [vmem:[#allocation23_spill] sm:$0xff] %v13953_v58  ;;  %v4447_v51 = vadd.f32 %v4446_v3, %v13941_v15  ;;  %v19525_v53 = vld [vmem:[#allocation45_spill] sm:$0xff]  ;;  %v19527_v3 = vld [vmem:[#allocation130_spill] sm:$0xff] }
 0x41b   :  { %v4046_v54 = vpop.f32.mrb[146].mxu0  ;;  %19524 = vst [vmem:[#allocation99_spill] sm:$0xff] %v13960_v1 }
 0x41c   :  { %v4406_v36 = vadd.f32 %v4405_v8, %v13948_v37  ;;  %v8320_v31 = vadd.f32 %v4046_v54, %v19523_v17  ;;  %v4048_v57 = vpop.f32.mrb[147].mxu0  ;;  %v4448_v12 = vadd.f32 %v4447_v51, %v13953_v58  ;;  %v13971_v8 = vadd.f32 %v13430_v50, %v13610_v48 }
 0x41d   :  { %v13963_v10 = vadd.f32 %v4048_v57, %v19525_v53  ;;  %v13978_v57 = vadd.f32 %v13446_v6, %v13610_v48 }
 0x41e   :  { %v13966_v62 = vadd.f32 %v8320_v31, %v13373_v11  ;;  %19526 = vst [vmem:[#allocation102_spill] sm:$0xff] %v13971_v8  ;;  %v4449_v61 = vadd.f32 %v4448_v12, %v13960_v1  ;;  %v19529_v31 = vld [vmem:[#allocation49_spill] sm:$0xff] }
 0x41f   :  { %v4052_v17 = vpop.f32.mrb[148].mxu0  ;;  %19528 = vst [vmem:[#allocation26_spill] sm:$0xff] %v13978_v57  ;;  %v19531_v12 = vld [vmem:[#allocation129_spill] sm:$0xff] }
 0x420   :  { %v4407_v54 = vadd.f32 %v4406_v36, %v13966_v62  ;;  %v8322_v15 = vadd.f32 %v4052_v17, %v19527_v3  ;;  %v4054_v4 = vpop.f32.mrb[149].mxu0  ;;  %v4450_v50 = vadd.f32 %v4449_v61, %v13971_v8  ;;  %v13989_v36 = vadd.f32 %v13462_v34, %v13610_v48 }
 0x421   :  { %v13981_v53 = vadd.f32 %v4054_v4, %v19529_v31  ;;  %v13996_v4 = vadd.f32 %v13478_v5, %v13610_v48 }
 0x422   :  { %v13984_v51 = vadd.f32 %v8322_v15, %v13373_v11  ;;  %19530 = vst [vmem:[#allocation98_spill] sm:$0xff] %v13989_v36  ;;  %v4451_v6 = vadd.f32 %v4450_v50, %v13978_v57  ;;  %v19533_v15 = vld [vmem:[#allocation48_spill] sm:$0xff] }
 0x423   :  { %v4058_v17 = vpop.f32.mrb[150].mxu0  ;;  %19532 = vst [vmem:[#allocation101_spill] sm:$0xff] %v13996_v4  ;;  %v19535_v50 = vld [vmem:[#allocation132_spill] sm:$0xff] }
 0x424   :  { %v4408_v3 = vadd.f32 %v4407_v54, %v13984_v51  ;;  %v8324_v1 = vadd.f32 %v4058_v17, %v19531_v12  ;;  %v4060_v58 = vpop.f32.mrb[151].mxu0  ;;  %v4452_v34 = vadd.f32 %v4451_v6, %v13989_v36  ;;  %v14007_v54 = vadd.f32 %v13494_v29, %v13610_v48 }
 0x425   :  { %v13999_v31 = vadd.f32 %v4060_v58, %v19533_v15  ;;  %v14014_v58 = vadd.f32 %v13510_v43, %v13610_v48 }
 0x426   :  { %v14002_v61 = vadd.f32 %v8324_v1, %v13373_v11  ;;  %19534 = vst [vmem:[#allocation104_spill] sm:$0xff] %v14007_v54  ;;  %v4453_v5 = vadd.f32 %v4452_v34, %v13996_v4  ;;  %v19537_v1 = vld [vmem:[#allocation131_spill] sm:$0xff]  ;;  %v19539_v34 = vld [vmem:[#allocation50_spill] sm:$0xff] }
 0x427   :  { %v4064_v17 = vpop.f32.mrb[152].mxu0  ;;  %19536 = vst [vmem:[#allocation25_spill] sm:$0xff] %v14014_v58 }
 0x428   :  { %v4409_v12 = vadd.f32 %v4408_v3, %v14002_v61  ;;  %v8326_v57 = vadd.f32 %v4064_v17, %v19535_v50  ;;  %v4066_v8 = vpop.f32.mrb[153].mxu0  ;;  %v4454_v29 = vadd.f32 %v4453_v5, %v14007_v54  ;;  %v14025_v3 = vadd.f32 %v13526_v60, %v13610_v48 }
 0x429   :  { %v14017_v15 = vadd.f32 %v4066_v8, %v19537_v1  ;;  %v14032_v8 = vadd.f32 %v13542_v32, %v13610_v48 }
 0x42a   :  { %v14020_v6 = vadd.f32 %v8326_v57, %v13373_v11  ;;  %19538 = vst [vmem:[#allocation97_spill] sm:$0xff] %v14025_v3  ;;  %v4455_v43 = vadd.f32 %v4454_v29, %v14014_v58  ;;  %v19541_v57 = vld [vmem:[#allocation53_spill] sm:$0xff] }
 0x42b   :  { %v4070_v17 = vpop.f32.mrb[154].mxu0  ;;  %19540 = vst [vmem:[#allocation103_spill] sm:$0xff] %v14032_v8  ;;  %v19542_v29 = vld [vmem:[#allocation133_spill] sm:$0xff] }
 0x42c   :  { %v4410_v50 = vadd.f32 %v4409_v12, %v14020_v6  ;;  %v8328_v4 = vadd.f32 %v4070_v17, %v19539_v34  ;;  %v4072_v36 = vpop.f32.mrb[155].mxu0  ;;  %v4456_v60 = vadd.f32 %v4455_v43, %v14025_v3  ;;  %v14043_v12 = vadd.f32 %v13558_v18, %v13610_v48 }
 0x42d   :  { %v14035_v1 = vadd.f32 %v4072_v36, %v19541_v57  ;;  %v14050_v36 = vadd.f32 %v13574_v27, %v13610_v48  ;;  %v14059_v3 = vadd.f32 %v13590_v20, %v13610_v48  ;;  %v14065_v27 = vadd.f32 %v13613_v7, %v13610_v48 }
 0x42e   :  { %v14038_v5 = vadd.f32 %v8328_v4, %v13373_v11  ;;  %v4457_v32 = vadd.f32 %v4456_v60, %v14032_v8  ;;  %v19543_v4 = vld [vmem:[#allocation136_spill] sm:$0xff]  ;;  %v14072_v20 = vadd.f32 %v13641_v63, %v13610_v48  ;;  %v14087_v63 = vadd.f32 %v13718_v22, %v13610_v48 }
 0x42f   :  { %v4076_v17 = vpop.f32.mrb[156].mxu0  ;;  %v14102_v22 = vadd.f32 %v13790_v14, %v13610_v48 }
 0x430   :  { %v4411_v34 = vadd.f32 %v4410_v50, %v14038_v5  ;;  %v8330_v58 = vadd.f32 %v4076_v17, %v19542_v29  ;;  %v4078_v54 = vpop.f32.mrb[157].mxu0  ;;  %v4458_v18 = vadd.f32 %v4457_v32, %v14043_v12  ;;  %v19544_v29 = vld [vmem:[#allocation57_spill] sm:$0xff] }
 0x431   :  { %v14053_v57 = vadd.f32 %v4078_v54, %v19543_v4  ;;  %v19545_v54 = vld [vmem:[#allocation56_spill] sm:$0xff] }
 0x432   :  { %v4347_v43 = vadd.f32 %v8330_v58, %v13373_v11  ;;  %v4459_v8 = vadd.f32 %v4458_v18, %v14050_v36  ;;  %v14077_v18 = vadd.f32 %v13668_v33, %v13610_v48  ;;  %v14092_v33 = vadd.f32 %v13742_v23, %v13610_v48 }
 0x433   :  { %v4082_v50 = vpop.f32.mrb[158].mxu0 }
 0x434   :  { %v4412_v17 = vadd.f32 %v4411_v34, %v4347_v43  ;;  %v8332_v0 = vadd.f32 %v4082_v50, %v19544_v29  ;;  %v4084_v60 = vpop.f32.mrb[159].mxu0  ;;  %v4460_v32 = vadd.f32 %v4459_v8, %v14059_v3 }
 0x435   :  { %v8333_v4 = vadd.f32 %v4084_v60, %v19545_v54  ;;  %v14082_v60 = vadd.f32 %v13694_v21, %v13610_v48  ;;  %v14097_v54 = vadd.f32 %v13766_v52, %v13610_v48  ;;  %v14112_v52 = vadd.f32 %v13837_v26, %v13610_v48 }
 0x436   :  { %v4349_v58 = vadd.f32 %v8332_v0, %v13373_v11  ;;  %v4461_v50 = vadd.f32 %v4460_v32, %v14065_v27 }
 0x438   :  { %v4413_v34 = vadd.f32 %v4412_v17, %v4349_v58  ;;  %v4462_v7 = vadd.f32 %v4461_v50, %v14072_v20  ;;  %v14107_v50 = vadd.f32 %v13814_v24, %v13610_v48  ;;  %v14122_v24 = vadd.f32 %v13881_v59, %v13610_v48 }
 0x43a   :  { %v4414_v29 = vrot.slane %v4413_v34, 4  ;;  %v4463_v11 = vadd.f32 %v4462_v7, %v14077_v18 }
 0x43c   :  { %v4415_v0 = vadd.f32 %v4414_v29, %v4413_v34  ;;  %v4464_v8 = vadd.f32 %v4463_v11, %v14082_v60  ;;  %v14117_v11 = vadd.f32 %v13859_v35, %v13610_v48  ;;  %v14132_v35 = vadd.f32 %v13925_v41, %v13610_v48 }
 0x43d   :  { %v14149_v41 = vadd.f32 %v13981_v53, %v13610_v48 }
 0x43e   :  { %v4465_v17 = vadd.f32 %v4464_v8, %v14087_v63  ;;  %v4416_v21 = vrot.slane %v4415_v0, 2 }
 0x43f   :  { %19546 = vst [vmem:[#allocation106_spill] sm:$0xff] %v14149_v41 }
 0x440   :  { %v4466_v32 = vadd.f32 %v4465_v17, %v14092_v33  ;;  %v4417_v23 = vadd.f32 %v4416_v21, %v4415_v0  ;;  %v14127_v17 = vadd.f32 %v13903_v47, %v13610_v48 }
 0x442   :  { %v4467_v34 = vadd.f32 %v4466_v32, %v14097_v54  ;;  %v4418_v14 = vrot.slane %v4417_v23, 1 }
 0x444   :  { %v4468_v29 = vadd.f32 %v4467_v34, %v14102_v22  ;;  %v4419_v26 = vadd.f32 %v4418_v14, %v4417_v23  ;;  %v14137_v34 = vadd.f32 %v13944_v30, %v13610_v48  ;;  %v14145_v23 = vadd.f32 %v13963_v10, %v13610_v48 }
 0x446   :  { %v4469_v7 = vadd.f32 %v4468_v29, %v14107_v50  ;;  %v14139_v59 = vmul.f32 0.001953125, %v4419_v26  ;;  %v14203_v26 = vadd.f32 %v14053_v57, %v13610_v48 }
 0x448   :  { %v4470_v8 = vadd.f32 %v4469_v7, %v14112_v52  ;;  %v14153_v7 = vsub.f32 %v13929_v55, %v14139_v59  ;;  %v14157_v30 = vsub.f32 %v13948_v37, %v14139_v59  ;;  %v14161_v14 = vsub.f32 %v13966_v62, %v14139_v59  ;;  %19550 = vst [vmem:[#allocation27_spill] sm:$0xff] %v14203_v26 }
 0x449   :  { %v14165_v10 = vsub.f32 %v13984_v51, %v14139_v59  ;;  %v14169_v53 = vsub.f32 %v14002_v61, %v14139_v59  ;;  %v14173_v55 = vsub.f32 %v14020_v6, %v14139_v59  ;;  %v14177_v37 = vsub.f32 %v14038_v5, %v14139_v59 }
 0x44a   :  { %v4471_v0 = vadd.f32 %v4470_v8, %v14117_v11  ;;  %v14180_v8 = vsub.f32 %v4347_v43, %v14139_v59  ;;  %v14183_v62 = vsub.f32 %v4349_v58, %v14139_v59  ;;  %v14188_v61 = vadd.f32 %v13999_v31, %v13610_v48  ;;  %v19551_v31 = vld [vmem:[#allocation72_spill] sm:$0xff] }
 0x44b   :  { %v14193_v6 = vadd.f32 %v14017_v15, %v13610_v48  ;;  %v14198_v43 = vadd.f32 %v14035_v1, %v13610_v48 }
 0x44c   :  { %v4472_v21 = vadd.f32 %v4471_v0, %v14122_v24  ;;  %19547 = vst [vmem:[#allocation28_spill] sm:$0xff] %v14188_v61 }
 0x44d   :  { %19548 = vst [vmem:[#allocation105_spill] sm:$0xff] %v14193_v6  ;;  %19549 = vst [vmem:[#allocation110_spill] sm:$0xff] %v14198_v43 }
 0x44e   :  { %v4473_v32 = vadd.f32 %v4472_v21, %v14127_v17  ;;  %v14207_v21 = vsub.f32 %v19551_v31, %v14139_v59 }
 0x450   :  { %v4474_v29 = vadd.f32 %v4473_v32, %v14132_v35  ;;  %19552 = vst [vmem:[#allocation109_spill] sm:$0xff] %v14207_v21  ;;  %v19553_v32 = vld [vmem:[#allocation141_spill] sm:$0xff]  ;;  %v4619_v57 = vmul.f32 %v14207_v21, %v14207_v21  ;;  %v19562_v21 = vld [vmem:[#allocation143_spill] sm:$0xff] }
 0x451   :  { %v14211_v15 = vsub.f32 %v19553_v32, %v14139_v59  ;;  %v19558_v32 = vld [vmem:[#allocation79_spill] sm:$0xff] }
 0x452   :  { %v4475_v47 = vadd.f32 %v4474_v29, %v14137_v34 }
 0x453   :  { %19554 = vst [vmem:[#allocation114_spill] sm:$0xff] %v14211_v15 }
 0x454   :  { %v4476_v51 = vadd.f32 %v4475_v47, %v14145_v23  ;;  %v14215_v47 = vadd.f32 %v8333_v4, %v13610_v48  ;;  %v19560_v48 = vld [vmem:[#allocation55_spill] sm:$0xff] }
 0x455   :  { %v14233_v4 = vsub.f32 %v19560_v48, %v14139_v59 }
 0x456   :  { %v4477_v0 = vadd.f32 %v4476_v51, %v14149_v41  ;;  %19555 = vst [vmem:[#allocation30_spill] sm:$0xff] %v14215_v47  ;;  %v19556_v51 = vld [vmem:[#allocation13_spill] sm:$0xff] }
 0x457   :  { %19561 = vst [vmem:[#allocation29_spill] sm:$0xff] %v14233_v4  ;;  %v4627_v48 = vmul.f32 %v14233_v4, %v14233_v4 }
 0x458   :  { %v4478_v5 = vadd.f32 %v4477_v0, %v14188_v61  ;;  %v14220_v0 = vsub.f32 %v19556_v51, %v14139_v59 }
 0x45a   :  { %v4479_v58 = vadd.f32 %v4478_v5, %v14193_v6  ;;  %19557 = vst [vmem:[#allocation113_spill] sm:$0xff] %v14220_v0  ;;  %v4621_v5 = vmul.f32 %v14211_v15, %v14211_v15 }
 0x45c   :  { %v4480_v29 = vadd.f32 %v4479_v58, %v14198_v43  ;;  %v14229_v58 = vsub.f32 %v19558_v32, %v14139_v59  ;;  %v4747_v51 = vadd.f32 %v4621_v5, %v4619_v57  ;;  %v14239_v43 = vsub.f32 %v19562_v21, %v14139_v59  ;;  %v19564_v32 = vld [vmem:[#allocation78_spill] sm:$0xff]  ;;  %v19566_v57 = vld [vmem:[#allocation16_spill] sm:$0xff] }
 0x45d   :  { %v14251_v5 = vsub.f32 %v19566_v57, %v14139_v59  ;;  %v19572_v57 = vld [vmem:[#allocation59_spill] sm:$0xff] }
 0x45e   :  { %v4481_v1 = vadd.f32 %v4480_v29, %v14203_v26  ;;  %19559 = vst [vmem:[#allocation119_spill] sm:$0xff] %v14229_v58  ;;  %v4623_v29 = vmul.f32 %v14220_v0, %v14220_v0  ;;  %19563 = vst [vmem:[#allocation118_spill] sm:$0xff] %v14239_v43  ;;  %v4629_v21 = vmul.f32 %v14239_v43, %v14239_v43 }
 0x45f   :  { %19567 = vst [vmem:[#allocation32_spill] sm:$0xff] %v14251_v5 }
 0x460   :  { %v4482_v31 = vadd.f32 %v4481_v1, %v14215_v47  ;;  %v4625_v1 = vmul.f32 %v14229_v58, %v14229_v58  ;;  %v4748_v15 = vadd.f32 %v4747_v51, %v4623_v29  ;;  %v14245_v47 = vsub.f32 %v19564_v32, %v14139_v59  ;;  %v19568_v58 = vld [vmem:[#allocation146_spill] sm:$0xff] }
 0x461   :  { %v14257_v29 = vsub.f32 %v19568_v58, %v14139_v59 }
 0x462   :  { %v4483_v26 = vrot.slane %v4482_v31, 4  ;;  %19565 = vst [vmem:[#allocation122_spill] sm:$0xff] %v14245_v47  ;;  %v4749_v6 = vadd.f32 %v4748_v15, %v4625_v1  ;;  %v4631_v51 = vmul.f32 %v14245_v47, %v14245_v47  ;;  %v19570_v15 = vld [vmem:[#allocation85_spill] sm:$0xff] }
 0x463   :  { %19569 = vst [vmem:[#allocation31_spill] sm:$0xff] %v14257_v29  ;;  %v4635_v58 = vmul.f32 %v14257_v29, %v14257_v29 }
 0x464   :  { %v4484_v61 = vadd.f32 %v4483_v26, %v4482_v31  ;;  %v4750_v0 = vadd.f32 %v4749_v6, %v4627_v48  ;;  %v14263_v26 = vsub.f32 %v19570_v15, %v14139_v59  ;;  %v4633_v31 = vmul.f32 %v14251_v5, %v14251_v5  ;;  %v19576_v5 = vld [vmem:[#allocation84_spill] sm:$0xff] }
 0x465   :  { %v14269_v6 = vsub.f32 %v19572_v57, %v14139_v59 }
 0x466   :  { %v4751_v32 = vadd.f32 %v4750_v0, %v4629_v21  ;;  %v4485_v41 = vrot.slane %v4484_v61, 2  ;;  %19571 = vst [vmem:[#allocation65_spill] sm:$0xff] %v14263_v26  ;;  %v19574_v0 = vld [vmem:[#allocation145_spill] sm:$0xff]  ;;  %v4637_v15 = vmul.f32 %v14263_v26, %v14263_v26 }
 0x467   :  { %19573 = vst [vmem:[#allocation34_spill] sm:$0xff] %v14269_v6  ;;  %v14275_v21 = vsub.f32 %v19574_v0, %v14139_v59  ;;  %v19580_v0 = vld [vmem:[#allocation147_spill] sm:$0xff] }
 0x468   :  { %v4752_v1 = vadd.f32 %v4751_v32, %v4631_v51  ;;  %v4486_v43 = vadd.f32 %v4485_v41, %v4484_v61  ;;  %v14281_v51 = vsub.f32 %v19576_v5, %v14139_v59  ;;  %v4639_v32 = vmul.f32 %v14269_v6, %v14269_v6 }
 0x469   :  { %19575 = vst [vmem:[#allocation108_spill] sm:$0xff] %v14275_v21  ;;  %v4641_v61 = vmul.f32 %v14275_v21, %v14275_v21  ;;  %v19582_v21 = vld [vmem:[#allocation64_spill] sm:$0xff] }
 0x46a   :  { %v4753_v48 = vadd.f32 %v4752_v1, %v4633_v31  ;;  %19577 = vst [vmem:[#allocation62_spill] sm:$0xff] %v14281_v51  ;;  %v4487_v4 = vrot.slane %v4486_v43, 1  ;;  %v19578_v31 = vld [vmem:[#allocation58_spill] sm:$0xff]  ;;  %v4643_v5 = vmul.f32 %v14281_v51, %v14281_v51 }
 0x46b   :  { %v14287_v41 = vsub.f32 %v19578_v31, %v14139_v59 }
 0x46c   :  { %v4754_v47 = vadd.f32 %v4753_v48, %v4635_v58  ;;  %v14293_v58 = vsub.f32 %v19580_v0, %v14139_v59  ;;  %v4488_v26 = vadd.f32 %v4487_v4, %v4486_v43  ;;  %v19584_v43 = vld [vmem:[#allocation89_spill] sm:$0xff] }
 0x46d   :  { %19579 = vst [vmem:[#allocation71_spill] sm:$0xff] %v14287_v41  ;;  %v4645_v31 = vmul.f32 %v14287_v41, %v14287_v41  ;;  %v14313_v4 = vsub.f32 %v19584_v43, %v14139_v59 }
 0x46e   :  { %v4755_v57 = vadd.f32 %v4754_v47, %v4637_v15  ;;  %v19581_v47 = vld [vmem:[#allocation90_spill] sm:$0xff]  ;;  %v14309_v29 = vmul.f32 0.001953125, %v4488_v26 }
 0x46f   :  { %v14299_v15 = vsub.f32 %v19581_v47, %v14139_v59  ;;  %19585 = vst [vmem:[#allocation107_spill] sm:$0xff] %v14313_v4 }
 0x470   :  { %v4756_v1 = vadd.f32 %v4755_v57, %v4639_v32  ;;  %v14305_v32 = vsub.f32 %v19582_v21, %v14139_v59  ;;  %v4647_v57 = vmul.f32 %v14293_v58, %v14293_v58  ;;  %v14325_v26 = vsub.f32 %v13634_v40, %v14309_v29 }
 0x472   :  { %v4757_v48 = vadd.f32 %v4756_v1, %v4641_v61  ;;  %19583 = vst [vmem:[#allocation33_spill] sm:$0xff] %v14305_v32  ;;  %v4649_v61 = vmul.f32 %v14299_v15, %v14299_v15  ;;  %v4651_v21 = vmul.f32 %v14305_v32, %v14305_v32  ;;  %19588 = vst [vmem:[#allocation77_spill] sm:$0xff] %v14325_v26 }
 0x474   :  { %v4758_v6 = vadd.f32 %v4757_v48, %v4643_v5  ;;  %v19586_v5 = vld [vmem:[#allocation94_spill] sm:$0xff] }
 0x475   :  { %v14319_v48 = vsub.f32 %v19586_v5, %v14139_v59  ;;  %v19592_v5 = vld [vmem:[#allocation117_spill] sm:$0xff] }
 0x476   :  { %v4759_v0 = vadd.f32 %v4758_v6, %v4645_v31  ;;  %v14329_v6 = vsub.f32 %v13622_v45, %v14309_v29  ;;  %v19590_v31 = vld [vmem:[#allocation93_spill] sm:$0xff]  ;;  %v14339_v32 = vsub.f32 %v19592_v5, %v14139_v59  ;;  %v14345_v45 = vsub.f32 %v13638_v44, %v14309_v29  ;;  %v19598_v44 = vld [vmem:[#allocation8_spill] sm:$0xff] }
 0x477   :  { %19587 = vst [vmem:[#allocation68_spill] sm:$0xff] %v14319_v48  ;;  %v14333_v43 = vsub.f32 %v19590_v31, %v14139_v59  ;;  %v4655_v40 = vmul.f32 %v14319_v48, %v14319_v48 }
 0x478   :  { %v4760_v1 = vadd.f32 %v4759_v0, %v4647_v57  ;;  %19589 = vst [vmem:[#allocation36_spill] sm:$0xff] %v14329_v6  ;;  %v4653_v57 = vmul.f32 %v14313_v4, %v14313_v4  ;;  %19593 = vst [vmem:[#allocation74_spill] sm:$0xff] %v14339_v32  ;;  %v4622_v31 = vmul.f32 %v14329_v6, %v14329_v6 }
 0x479   :  { %19591 = vst [vmem:[#allocation112_spill] sm:$0xff] %v14333_v43  ;;  %19594 = vst [vmem:[#allocation83_spill] sm:$0xff] %v14345_v45  ;;  %v4657_v5 = vmul.f32 %v14333_v43, %v14333_v43  ;;  %v4624_v43 = vmul.f32 %v14345_v45, %v14345_v45 }
 0x47a   :  { %v4761_v47 = vadd.f32 %v4760_v1, %v4649_v61  ;;  %v4620_v1 = vmul.f32 %v14325_v26, %v14325_v26  ;;  %v4659_v26 = vmul.f32 %v14339_v32, %v14339_v32  ;;  %v14381_v32 = vsub.f32 %v13678_v38, %v14309_v29 }
 0x47c   :  { %v4762_v0 = vadd.f32 %v4761_v47, %v4651_v21  ;;  %v19595_v21 = vld [vmem:[#allocation6_spill] sm:$0xff]  ;;  %19603 = vst [vmem:[#allocation38_spill] sm:$0xff] %v14381_v32 }
 0x47d   :  { %v14353_v47 = vsub.f32 %v19595_v21, %v14139_v59  ;;  %v14369_v21 = vsub.f32 %v13665_v56, %v14309_v29 }
 0x47e   :  { %v4763_v61 = vadd.f32 %v4762_v0, %v4653_v57  ;;  %v14359_v57 = vsub.f32 %v13652_v9, %v14309_v29  ;;  %v14363_v0 = vsub.f32 %v19598_v44, %v14139_v59 }
 0x47f   :  { %19596 = vst [vmem:[#allocation35_spill] sm:$0xff] %v14353_v47  ;;  %19600 = vst [vmem:[#allocation88_spill] sm:$0xff] %v14369_v21  ;;  %v4661_v44 = vmul.f32 %v14353_v47, %v14353_v47  ;;  %v4628_v38 = vmul.f32 %v14369_v21, %v14369_v21 }
 0x480   :  { %v4764_v4 = vadd.f32 %v4763_v61, %v4655_v40  ;;  %19597 = vst [vmem:[#allocation111_spill] sm:$0xff] %v14359_v57  ;;  %19599 = vst [vmem:[#allocation80_spill] sm:$0xff] %v14363_v0  ;;  %v4816_v40 = vadd.f32 %v4622_v31, %v4620_v1  ;;  %v19601_v61 = vld [vmem:[#allocation5_spill] sm:$0xff]  ;;  %v4626_v56 = vmul.f32 %v14359_v57, %v14359_v57 }
 0x481   :  { %v14375_v9 = vsub.f32 %v19601_v61, %v14139_v59  ;;  %v4663_v1 = vmul.f32 %v14363_v0, %v14363_v0  ;;  %v14393_v61 = vsub.f32 %v13691_v28, %v14309_v29  ;;  %v4630_v28 = vmul.f32 %v14381_v32, %v14381_v32 }
 0x482   :  { %v4765_v6 = vadd.f32 %v4764_v4, %v4657_v5  ;;  %v4817_v4 = vadd.f32 %v4816_v40, %v4624_v43  ;;  %v19604_v5 = vld [vmem:[#allocation148_spill] sm:$0xff] }
 0x483   :  { %19602 = vst [vmem:[#allocation116_spill] sm:$0xff] %v14375_v9  ;;  %v14387_v45 = vsub.f32 %v19604_v5, %v14139_v59  ;;  %19606 = vst [vmem:[#allocation37_spill] sm:$0xff] %v14393_v61  ;;  %v4665_v43 = vmul.f32 %v14375_v9, %v14375_v9  ;;  %v14405_v5 = vsub.f32 %v13704_v16, %v14309_v29 }
 0x484   :  { %v4766_v48 = vadd.f32 %v4765_v6, %v4659_v26  ;;  %v4818_v26 = vadd.f32 %v4817_v4, %v4626_v56  ;;  %v19607_v6 = vld [vmem:[#allocation7_spill] sm:$0xff]  ;;  %v4632_v16 = vmul.f32 %v14393_v61, %v14393_v61 }
 0x485   :  { %19605 = vst [vmem:[#allocation115_spill] sm:$0xff] %v14387_v45  ;;  %v14399_v57 = vsub.f32 %v19607_v6, %v14139_v59  ;;  %19609 = vst [vmem:[#allocation121_spill] sm:$0xff] %v14405_v5  ;;  %v4667_v56 = vmul.f32 %v14387_v45, %v14387_v45  ;;  %v14417_v6 = vsub.f32 %v13715_v42, %v14309_v29 }
 0x486   :  { %v4767_v31 = vadd.f32 %v4766_v48, %v4661_v44  ;;  %v4819_v48 = vadd.f32 %v4818_v26, %v4628_v38  ;;  %v19610_v44 = vld [vmem:[#allocation14_spill] sm:$0xff]  ;;  %v4634_v42 = vmul.f32 %v14405_v5, %v14405_v5 }
 0x487   :  { %19608 = vst [vmem:[#allocation51_spill] sm:$0xff] %v14399_v57  ;;  %v14411_v21 = vsub.f32 %v19610_v44, %v14139_v59  ;;  %19612 = vst [vmem:[#allocation40_spill] sm:$0xff] %v14417_v6  ;;  %v4669_v38 = vmul.f32 %v14399_v57, %v14399_v57  ;;  %v14429_v44 = vsub.f32 %v13728_v25, %v14309_v29 }
 0x488   :  { %v4768_v40 = vadd.f32 %v4767_v31, %v4663_v1  ;;  %v4820_v1 = vadd.f32 %v4819_v48, %v4630_v28  ;;  %v19613_v31 = vld [vmem:[#allocation54_spill] sm:$0xff]  ;;  %v4636_v25 = vmul.f32 %v14417_v6, %v14417_v6 }
 0x489   :  { %19611 = vst [vmem:[#allocation134_spill] sm:$0xff] %v14411_v21  ;;  %v14423_v32 = vsub.f32 %v19613_v31, %v14139_v59  ;;  %19615 = vst [vmem:[#allocation120_spill] sm:$0xff] %v14429_v44  ;;  %v4671_v28 = vmul.f32 %v14411_v21, %v14411_v21  ;;  %v14441_v31 = vsub.f32 %v13739_v49, %v14309_v29 }
 0x48a   :  { %v4769_v4 = vadd.f32 %v4768_v40, %v4665_v43  ;;  %v4821_v43 = vadd.f32 %v4820_v1, %v4632_v16  ;;  %v19616_v40 = vld [vmem:[#allocation15_spill] sm:$0xff]  ;;  %v4638_v49 = vmul.f32 %v14429_v44, %v14429_v44 }
 0x48b   :  { %19614 = vst [vmem:[#allocation52_spill] sm:$0xff] %v14423_v32  ;;  %v14435_v61 = vsub.f32 %v19616_v40, %v14139_v59  ;;  %19618 = vst [vmem:[#allocation39_spill] sm:$0xff] %v14441_v31  ;;  %v4673_v16 = vmul.f32 %v14423_v32, %v14423_v32  ;;  %v14453_v40 = vsub.f32 %v13752_v39, %v14309_v29 }
 0x48c   :  { %v4770_v26 = vadd.f32 %v4769_v4, %v4667_v56  ;;  %v4822_v56 = vadd.f32 %v4821_v43, %v4634_v42  ;;  %v19619_v4 = vld [vmem:[#allocation18_spill] sm:$0xff]  ;;  %v4640_v39 = vmul.f32 %v14441_v31, %v14441_v31 }
 0x48d   :  { %19617 = vst [vmem:[#allocation135_spill] sm:$0xff] %v14435_v61  ;;  %v14447_v5 = vsub.f32 %v19619_v4, %v14139_v59  ;;  %19621 = vst [vmem:[#allocation124_spill] sm:$0xff] %v14453_v40  ;;  %v4675_v42 = vmul.f32 %v14435_v61, %v14435_v61  ;;  %v14465_v4 = vsub.f32 %v13763_v19, %v14309_v29 }
 0x48e   :  { %v4771_v48 = vadd.f32 %v4770_v26, %v4669_v38  ;;  %v4823_v38 = vadd.f32 %v4822_v56, %v4636_v25  ;;  %v14459_v26 = vsub.f32 %v13627_v13, %v14139_v59  ;;  %v14477_v56 = vsub.f32 %v13776_v46, %v14309_v29 }
 0x48f   :  { %19620 = vst [vmem:[#allocation138_spill] sm:$0xff] %v14447_v5  ;;  %19623 = vst [vmem:[#allocation42_spill] sm:$0xff] %v14465_v4  ;;  %v4677_v13 = vmul.f32 %v14447_v5, %v14447_v5  ;;  %v4642_v19 = vmul.f32 %v14453_v40, %v14453_v40  ;;  %v4644_v46 = vmul.f32 %v14465_v4, %v14465_v4 }
 0x490   :  { %v4772_v1 = vadd.f32 %v4771_v48, %v4671_v28  ;;  %19622 = vst [vmem:[#allocation61_spill] sm:$0xff] %v14459_v26  ;;  %v4824_v28 = vadd.f32 %v4823_v38, %v4638_v49  ;;  %v19624_v48 = vld [vmem:[#allocation63_spill] sm:$0xff]  ;;  %19626 = vst [vmem:[#allocation123_spill] sm:$0xff] %v14477_v56  ;;  %v4679_v49 = vmul.f32 %v14459_v26, %v14459_v26 }
 0x491   :  { %v14471_v44 = vsub.f32 %v19624_v48, %v14139_v59  ;;  %v19627_v48 = vld [vmem:[#allocation11_spill] sm:$0xff] }
 0x492   :  { %v4773_v43 = vadd.f32 %v4772_v1, %v4673_v16  ;;  %v4825_v16 = vadd.f32 %v4824_v28, %v4640_v39  ;;  %v14483_v1 = vsub.f32 %v13657_v2, %v14139_v59  ;;  %v14489_v31 = vsub.f32 %v19627_v48, %v14309_v29  ;;  %v19630_v28 = vld [vmem:[#allocation150_spill] sm:$0xff]  ;;  %v19632_v48 = vld [vmem:[#allocation17_spill] sm:$0xff] }
 0x493   :  { %19625 = vst [vmem:[#allocation137_spill] sm:$0xff] %v14471_v44  ;;  %v4681_v2 = vmul.f32 %v14471_v44, %v14471_v44  ;;  %v14501_v6 = vsub.f32 %v19630_v28, %v14309_v29  ;;  %v14507_v4 = vsub.f32 %v19632_v48, %v14139_v59  ;;  %v19635_v28 = vld [vmem:[#allocation20_spill] sm:$0xff]  ;;  %v19636_v48 = vld [vmem:[#allocation154_spill] sm:$0xff] }
 0x494   :  { %v4774_v25 = vadd.f32 %v4773_v43, %v4675_v42  ;;  %19628 = vst [vmem:[#allocation60_spill] sm:$0xff] %v14489_v31  ;;  %v4826_v42 = vadd.f32 %v4825_v16, %v4642_v19  ;;  %v19629_v43 = vld [vmem:[#allocation70_spill] sm:$0xff]  ;;  %v4683_v19 = vmul.f32 %v14483_v1, %v14483_v1  ;;  %v14525_v26 = vsub.f32 %v19636_v48, %v14309_v29  ;;  %v19641_v48 = vld [vmem:[#allocation76_spill] sm:$0xff] }
 0x495   :  { %v14495_v40 = vsub.f32 %v19629_v43, %v14139_v59  ;;  %19631 = vst [vmem:[#allocation41_spill] sm:$0xff] %v14501_v6  ;;  %v19633_v43 = vld [vmem:[#allocation152_spill] sm:$0xff] }
 0x496   :  { %v4775_v38 = vadd.f32 %v4774_v25, %v4677_v13  ;;  %v4646_v13 = vmul.f32 %v14477_v56, %v14477_v56  ;;  %v4827_v25 = vadd.f32 %v4826_v42, %v4644_v46  ;;  %v14513_v44 = vsub.f32 %v19633_v43, %v14309_v29  ;;  %19637 = vst [vmem:[#allocation126_spill] sm:$0xff] %v14525_v26  ;;  %v19638_v43 = vld [vmem:[#allocation69_spill] sm:$0xff] }
 0x497   :  { %v14519_v56 = vsub.f32 %v19635_v28, %v14139_v59  ;;  %v4685_v46 = vmul.f32 %v14495_v40, %v14495_v40  ;;  %v19639_v28 = vld [vmem:[#allocation156_spill] sm:$0xff] }
 0x498   :  { %v4776_v39 = vadd.f32 %v4775_v38, %v4679_v49  ;;  %19634 = vst [vmem:[#allocation140_spill] sm:$0xff] %v14513_v44  ;;  %v4648_v49 = vmul.f32 %v14489_v31, %v14489_v31  ;;  %v4828_v38 = vadd.f32 %v4827_v25, %v4646_v13  ;;  %v14531_v31 = vsub.f32 %v19638_v43, %v14139_v59  ;;  %v19642_v43 = vld [vmem:[#allocation158_spill] sm:$0xff] }
 0x499   :  { %v4687_v13 = vmul.f32 %v14507_v4, %v14507_v4  ;;  %v14537_v5 = vsub.f32 %v19639_v28, %v14309_v29  ;;  %v14549_v61 = vsub.f32 %v19642_v43, %v14309_v29  ;;  %v19644_v28 = vld [vmem:[#allocation75_spill] sm:$0xff]  ;;  %v19647_v43 = vld [vmem:[#allocation82_spill] sm:$0xff] }
 0x49a   :  { %v4777_v16 = vadd.f32 %v4776_v39, %v4681_v2  ;;  %v4650_v2 = vmul.f32 %v14501_v6, %v14501_v6  ;;  %v4829_v39 = vadd.f32 %v4828_v38, %v4648_v49  ;;  %v14543_v6 = vsub.f32 %v19641_v48, %v14139_v59  ;;  %v19645_v48 = vld [vmem:[#allocation160_spill] sm:$0xff] }
 0x49b   :  { %19640 = vst [vmem:[#allocation67_spill] sm:$0xff] %v14537_v5  ;;  %v4689_v49 = vmul.f32 %v14519_v56, %v14519_v56  ;;  %19643 = vst [vmem:[#allocation44_spill] sm:$0xff] %v14549_v61  ;;  %v14561_v32 = vsub.f32 %v19645_v48, %v14309_v29  ;;  %v19650_v48 = vld [vmem:[#allocation10_spill] sm:$0xff] }
 0x49c   :  { %v4778_v42 = vadd.f32 %v4777_v16, %v4683_v19  ;;  %v4652_v19 = vmul.f32 %v14513_v44, %v14513_v44  ;;  %v4830_v16 = vadd.f32 %v4829_v39, %v4650_v2  ;;  %v14555_v44 = vsub.f32 %v19644_v28, %v14139_v59  ;;  %v19648_v28 = vld [vmem:[#allocation162_spill] sm:$0xff] }
 0x49d   :  { %v4691_v2 = vmul.f32 %v14531_v31, %v14531_v31  ;;  %19646 = vst [vmem:[#allocation139_spill] sm:$0xff] %v14561_v32  ;;  %v14573_v21 = vsub.f32 %v19648_v28, %v14309_v29  ;;  %v19653_v28 = vld [vmem:[#allocation9_spill] sm:$0xff] }
 0x49e   :  { %v4779_v25 = vadd.f32 %v4778_v42, %v4685_v46  ;;  %v4654_v46 = vmul.f32 %v14525_v26, %v14525_v26  ;;  %v4831_v42 = vadd.f32 %v4830_v16, %v4652_v19  ;;  %v14567_v26 = vsub.f32 %v19647_v43, %v14139_v59  ;;  %v19651_v43 = vld [vmem:[#allocation81_spill] sm:$0xff] }
 0x49f   :  { %v4693_v19 = vmul.f32 %v14543_v6, %v14543_v6  ;;  %19649 = vst [vmem:[#allocation125_spill] sm:$0xff] %v14573_v21  ;;  %v14585_v57 = vsub.f32 %v19651_v43, %v14309_v29  ;;  %v19656_v43 = vld [vmem:[#allocation12_spill] sm:$0xff] }
 0x4a0   :  { %v4780_v38 = vadd.f32 %v4779_v25, %v4687_v13  ;;  %v4656_v13 = vmul.f32 %v14537_v5, %v14537_v5  ;;  %v4832_v25 = vadd.f32 %v4831_v42, %v4654_v46  ;;  %v14579_v5 = vsub.f32 %v19650_v48, %v14139_v59  ;;  %v19654_v48 = vld [vmem:[#allocation22_spill] sm:$0xff] }
 0x4a1   :  { %v4695_v46 = vmul.f32 %v14555_v44, %v14555_v44  ;;  %19652 = vst [vmem:[#allocation66_spill] sm:$0xff] %v14585_v57  ;;  %v14597_v45 = vsub.f32 %v19654_v48, %v14309_v29  ;;  %v19659_v48 = vld [vmem:[#allocation149_spill] sm:$0xff] }
 0x4a2   :  { %v4781_v39 = vadd.f32 %v4780_v38, %v4689_v49  ;;  %v4658_v49 = vmul.f32 %v14549_v61, %v14549_v61  ;;  %v4833_v38 = vadd.f32 %v4832_v25, %v4656_v13  ;;  %v14591_v61 = vsub.f32 %v19653_v28, %v14139_v59  ;;  %v19657_v28 = vld [vmem:[#allocation92_spill] sm:$0xff] }
 0x4a3   :  { %v4697_v13 = vmul.f32 %v14567_v26, %v14567_v26  ;;  %19655 = vst [vmem:[#allocation43_spill] sm:$0xff] %v14597_v45  ;;  %v14609_v9 = vsub.f32 %v19657_v28, %v14309_v29  ;;  %v19662_v28 = vld [vmem:[#allocation151_spill] sm:$0xff] }
 0x4a4   :  { %v4782_v16 = vadd.f32 %v4781_v39, %v4691_v2  ;;  %v4660_v2 = vmul.f32 %v14561_v32, %v14561_v32  ;;  %v4834_v39 = vadd.f32 %v4833_v38, %v4658_v49  ;;  %v14603_v32 = vsub.f32 %v19656_v43, %v14139_v59  ;;  %v19660_v43 = vld [vmem:[#allocation91_spill] sm:$0xff] }
 0x4a5   :  { %v4699_v49 = vmul.f32 %v14579_v5, %v14579_v5  ;;  %19658 = vst [vmem:[#allocation142_spill] sm:$0xff] %v14609_v9  ;;  %v14621_v0 = vsub.f32 %v19660_v43, %v14309_v29  ;;  %v19666_v43 = vld [vmem:[#allocation153_spill] sm:$0xff] }
 0x4a6   :  { %v4783_v42 = vadd.f32 %v4782_v16, %v4693_v19  ;;  %v4662_v19 = vmul.f32 %v14573_v21, %v14573_v21  ;;  %v4835_v16 = vadd.f32 %v4834_v39, %v4660_v2  ;;  %v14615_v21 = vsub.f32 %v19659_v48, %v14139_v59  ;;  %v19664_v48 = vld [vmem:[#allocation24_spill] sm:$0xff] }
 0x4a7   :  { %v4701_v2 = vmul.f32 %v14591_v61, %v14591_v61  ;;  %19661 = vst [vmem:[#allocation128_spill] sm:$0xff] %v14621_v0  ;;  %v14633_v47 = vsub.f32 %v19664_v48, %v14309_v29  ;;  %v19670_v48 = vld [vmem:[#allocation155_spill] sm:$0xff] }
 0x4a8   :  { %v4784_v25 = vadd.f32 %v4783_v42, %v4695_v46  ;;  %v4664_v46 = vmul.f32 %v14585_v57, %v14585_v57  ;;  %v4836_v42 = vadd.f32 %v4835_v16, %v4662_v19  ;;  %v14627_v57 = vsub.f32 %v19662_v28, %v14139_v59  ;;  %v19668_v28 = vld [vmem:[#allocation95_spill] sm:$0xff] }
 0x4a9   :  { %v4703_v19 = vmul.f32 %v14603_v32, %v14603_v32  ;;  %19665 = vst [vmem:[#allocation46_spill] sm:$0xff] %v14633_v47  ;;  %v14645_v41 = vsub.f32 %v19668_v28, %v14309_v29  ;;  %v19674_v28 = vld [vmem:[#allocation157_spill] sm:$0xff] }
 0x4aa   :  { %v4785_v38 = vadd.f32 %v4784_v25, %v4697_v13  ;;  %v4666_v13 = vmul.f32 %v14597_v45, %v14597_v45  ;;  %v4837_v25 = vadd.f32 %v4836_v42, %v4664_v46  ;;  %19663 = vst [vmem:[#allocation73_spill] sm:$0xff] %v14627_v57  ;;  %v14639_v45 = vsub.f32 %v19666_v43, %v14139_v59  ;;  %v19672_v43 = vld [vmem:[#allocation100_spill] sm:$0xff] }
 0x4ab   :  { %v4705_v46 = vmul.f32 %v14615_v21, %v14615_v21  ;;  %19669 = vst [vmem:[#allocation127_spill] sm:$0xff] %v14645_v41  ;;  %v14657_v51 = vsub.f32 %v19672_v43, %v14309_v29  ;;  %v19678_v43 = vld [vmem:[#allocation159_spill] sm:$0xff] }
 0x4ac   :  { %v4786_v39 = vadd.f32 %v4785_v38, %v4699_v49  ;;  %v4668_v49 = vmul.f32 %v14609_v9, %v14609_v9  ;;  %v4838_v38 = vadd.f32 %v4837_v25, %v4666_v13  ;;  %19667 = vst [vmem:[#allocation144_spill] sm:$0xff] %v14639_v45  ;;  %v14651_v9 = vsub.f32 %v19670_v48, %v14139_v59  ;;  %v19676_v48 = vld [vmem:[#allocation23_spill] sm:$0xff] }
 0x4ad   :  { %v4707_v13 = vmul.f32 %v14627_v57, %v14627_v57  ;;  %19673 = vst [vmem:[#allocation130_spill] sm:$0xff] %v14657_v51  ;;  %v14669_v57 = vsub.f32 %v19676_v48, %v14309_v29  ;;  %v19682_v48 = vld [vmem:[#allocation161_spill] sm:$0xff] }
 0x4ae   :  { %v4787_v16 = vadd.f32 %v4786_v39, %v4701_v2  ;;  %v4670_v2 = vmul.f32 %v14621_v0, %v14621_v0  ;;  %v4839_v39 = vadd.f32 %v4838_v38, %v4668_v49  ;;  %19671 = vst [vmem:[#allocation45_spill] sm:$0xff] %v14651_v9  ;;  %v14663_v0 = vsub.f32 %v19674_v28, %v14139_v59  ;;  %v19680_v28 = vld [vmem:[#allocation99_spill] sm:$0xff] }
 0x4af   :  { %v4709_v49 = vmul.f32 %v14639_v45, %v14639_v45  ;;  %19677 = vst [vmem:[#allocation129_spill] sm:$0xff] %v14669_v57  ;;  %v14681_v45 = vsub.f32 %v19680_v28, %v14309_v29  ;;  %v19686_v28 = vld [vmem:[#allocation19_spill] sm:$0xff] }
 0x4b0   :  { %v4788_v42 = vadd.f32 %v4787_v16, %v4703_v19  ;;  %v4672_v19 = vmul.f32 %v14633_v47, %v14633_v47  ;;  %v4840_v16 = vadd.f32 %v4839_v39, %v4670_v2  ;;  %19675 = vst [vmem:[#allocation49_spill] sm:$0xff] %v14663_v0  ;;  %v14675_v47 = vsub.f32 %v19678_v43, %v14139_v59  ;;  %v19684_v43 = vld [vmem:[#allocation102_spill] sm:$0xff] }
 0x4b1   :  { %v4711_v2 = vmul.f32 %v14651_v9, %v14651_v9  ;;  %19681 = vst [vmem:[#allocation132_spill] sm:$0xff] %v14681_v45  ;;  %v14693_v9 = vsub.f32 %v19684_v43, %v14309_v29  ;;  %v19690_v43 = vld [vmem:[#allocation87_spill] sm:$0xff] }
 0x4b2   :  { %v4789_v25 = vadd.f32 %v4788_v42, %v4705_v46  ;;  %v4674_v46 = vmul.f32 %v14645_v41, %v14645_v41  ;;  %v4841_v42 = vadd.f32 %v4840_v16, %v4672_v19  ;;  %19679 = vst [vmem:[#allocation48_spill] sm:$0xff] %v14675_v47  ;;  %v14687_v41 = vsub.f32 %v19682_v48, %v14139_v59  ;;  %v19688_v48 = vld [vmem:[#allocation26_spill] sm:$0xff] }
 0x4b3   :  { %v4713_v19 = vmul.f32 %v14663_v0, %v14663_v0  ;;  %19685 = vst [vmem:[#allocation50_spill] sm:$0xff] %v14693_v9  ;;  %v14705_v0 = vsub.f32 %v19688_v48, %v14309_v29  ;;  %v19694_v48 = vld [vmem:[#allocation86_spill] sm:$0xff] }
 0x4b4   :  { %v4790_v38 = vadd.f32 %v4789_v25, %v4707_v13  ;;  %v4676_v13 = vmul.f32 %v14657_v51, %v14657_v51  ;;  %v4842_v25 = vadd.f32 %v4841_v42, %v4674_v46  ;;  %19683 = vst [vmem:[#allocation131_spill] sm:$0xff] %v14687_v41  ;;  %v14699_v51 = vsub.f32 %v19686_v28, %v14139_v59  ;;  %v19692_v28 = vld [vmem:[#allocation98_spill] sm:$0xff] }
 0x4b5   :  { %v4715_v46 = vmul.f32 %v14675_v47, %v14675_v47  ;;  %19689 = vst [vmem:[#allocation133_spill] sm:$0xff] %v14705_v0  ;;  %v14717_v47 = vsub.f32 %v19692_v28, %v14309_v29  ;;  %v19697_v28 = vld [vmem:[#allocation21_spill] sm:$0xff] }
 0x4b6   :  { %v4791_v39 = vadd.f32 %v4790_v38, %v4709_v49  ;;  %v4678_v49 = vmul.f32 %v14669_v57, %v14669_v57  ;;  %v4843_v38 = vadd.f32 %v4842_v25, %v4676_v13  ;;  %19687 = vst [vmem:[#allocation53_spill] sm:$0xff] %v14699_v51  ;;  %v14711_v57 = vsub.f32 %v19690_v43, %v14139_v59  ;;  %v19695_v43 = vld [vmem:[#allocation101_spill] sm:$0xff] }
 0x4b7   :  { %v4717_v13 = vmul.f32 %v14687_v41, %v14687_v41  ;;  %19693 = vst [vmem:[#allocation57_spill] sm:$0xff] %v14717_v47  ;;  %v14729_v41 = vsub.f32 %v19695_v43, %v14309_v29  ;;  %v19700_v43 = vld [vmem:[#allocation96_spill] sm:$0xff] }
 0x4b8   :  { %v4792_v16 = vadd.f32 %v4791_v39, %v4711_v2  ;;  %v4680_v2 = vmul.f32 %v14681_v45, %v14681_v45  ;;  %v4844_v39 = vadd.f32 %v4843_v38, %v4678_v49  ;;  %19691 = vst [vmem:[#allocation136_spill] sm:$0xff] %v14711_v57  ;;  %v14723_v45 = vsub.f32 %v19694_v48, %v14139_v59  ;;  %v19698_v48 = vld [vmem:[#allocation104_spill] sm:$0xff] }
 0x4b9   :  { %v4719_v49 = vmul.f32 %v14699_v51, %v14699_v51  ;;  %19696 = vst [vmem:[#allocation56_spill] sm:$0xff] %v14729_v41  ;;  %v14741_v51 = vsub.f32 %v19698_v48, %v14309_v29 }
 0x4ba   :  { %v4793_v42 = vadd.f32 %v4792_v16, %v4713_v19  ;;  %v4682_v19 = vmul.f32 %v14693_v9, %v14693_v9  ;;  %v4845_v16 = vadd.f32 %v4844_v39, %v4680_v2  ;;  %v14735_v9 = vsub.f32 %v19697_v28, %v14139_v59  ;;  %v19701_v28 = vld [vmem:[#allocation25_spill] sm:$0xff] }
 0x4bb   :  { %v4721_v2 = vmul.f32 %v14711_v57, %v14711_v57  ;;  %19699 = vst [vmem:[#allocation72_spill] sm:$0xff] %v14741_v51  ;;  %v14753_v57 = vsub.f32 %v19701_v28, %v14309_v29 }
 0x4bc   :  { %v4794_v25 = vadd.f32 %v4793_v42, %v4715_v46  ;;  %v4684_v46 = vmul.f32 %v14705_v0, %v14705_v0  ;;  %v4846_v42 = vadd.f32 %v4845_v16, %v4682_v19  ;;  %v14747_v0 = vsub.f32 %v19700_v43, %v14139_v59 }
 0x4bd   :  { %v4723_v19 = vmul.f32 %v14723_v45, %v14723_v45  ;;  %19702 = vst [vmem:[#allocation141_spill] sm:$0xff] %v14753_v57  ;;  %v4725_v48 = vmul.f32 %v14735_v9, %v14735_v9  ;;  %v4690_v43 = vmul.f32 %v14741_v51, %v14741_v51 }
 0x4be   :  { %v4795_v38 = vadd.f32 %v4794_v25, %v4717_v13  ;;  %v4686_v13 = vmul.f32 %v14717_v47, %v14717_v47  ;;  %v4847_v25 = vadd.f32 %v4846_v42, %v4684_v46  ;;  %v19703_v42 = vld [vmem:[#allocation97_spill] sm:$0xff]  ;;  %v19705_v47 = vld [vmem:[#allocation103_spill] sm:$0xff] }
 0x4bf   :  { %v14761_v59 = vsub.f32 %v19703_v42, %v14309_v29  ;;  %v14777_v42 = vsub.f32 %v14043_v12, %v14309_v29  ;;  %v4733_v12 = vmul.f32 %v14161_v14, %v14161_v14 }
 0x4c0   :  { %v4796_v39 = vadd.f32 %v4795_v38, %v4719_v49  ;;  %v4688_v49 = vmul.f32 %v14729_v41, %v14729_v41  ;;  %v4848_v38 = vadd.f32 %v4847_v25, %v4686_v13  ;;  %v14769_v41 = vsub.f32 %v19705_v47, %v14309_v29 }
 0x4c1   :  { %19704 = vst [vmem:[#allocation13_spill] sm:$0xff] %v14761_v59  ;;  %v4692_v13 = vmul.f32 %v14753_v57, %v14753_v57  ;;  %19707 = vst [vmem:[#allocation55_spill] sm:$0xff] %v14777_v42  ;;  %v4731_v47 = vmul.f32 %v14157_v30, %v14157_v30 }
 0x4c2   :  { %v4797_v16 = vadd.f32 %v4796_v39, %v4721_v2  ;;  %v4849_v2 = vadd.f32 %v4848_v38, %v4688_v49  ;;  %v4727_v39 = vmul.f32 %v14747_v0, %v14747_v0  ;;  %19706 = vst [vmem:[#allocation79_spill] sm:$0xff] %v14769_v41  ;;  %v4694_v49 = vmul.f32 %v14761_v59, %v14761_v59 }
 0x4c4   :  { %v4798_v46 = vadd.f32 %v4797_v16, %v4723_v19  ;;  %v4850_v25 = vadd.f32 %v4849_v2, %v4690_v43  ;;  %v4729_v19 = vmul.f32 %v14153_v7, %v14153_v7  ;;  %v4696_v43 = vmul.f32 %v14769_v41, %v14769_v41  ;;  %v19799_v41 = vld [vmem:[#allocation74_spill] sm:$0xff] }
 0x4c6   :  { %v4799_v28 = vadd.f32 %v4798_v46, %v4725_v48  ;;  %v4851_v38 = vadd.f32 %v4850_v25, %v4692_v13  ;;  %v14785_v46 = vsub.f32 %v14050_v36, %v14309_v29  ;;  %v4698_v13 = vmul.f32 %v14777_v42, %v14777_v42  ;;  %v19798_v42 = vld [vmem:[#allocation112_spill] sm:$0xff] }
 0x4c7   :  { %v4735_v36 = vmul.f32 %v14165_v10, %v14165_v10 }
 0x4c8   :  { %v4800_v16 = vadd.f32 %v4799_v28, %v4727_v39  ;;  %19708 = vst [vmem:[#allocation143_spill] sm:$0xff] %v14785_v46  ;;  %v4852_v2 = vadd.f32 %v4851_v38, %v4694_v49  ;;  %v14793_v28 = vsub.f32 %v14059_v3, %v14309_v29  ;;  %v4700_v49 = vmul.f32 %v14785_v46, %v14785_v46  ;;  %v19797_v46 = vld [vmem:[#allocation68_spill] sm:$0xff] }
 0x4c9   :  { %v4737_v3 = vmul.f32 %v14169_v53, %v14169_v53 }
 0x4ca   :  { %v4801_v48 = vadd.f32 %v4800_v16, %v4729_v19  ;;  %19709 = vst [vmem:[#allocation78_spill] sm:$0xff] %v14793_v28  ;;  %v4853_v25 = vadd.f32 %v4852_v2, %v4696_v43  ;;  %v14801_v16 = vsub.f32 %v14065_v27, %v14309_v29  ;;  %v4702_v43 = vmul.f32 %v14793_v28, %v14793_v28  ;;  %v19796_v28 = vld [vmem:[#allocation107_spill] sm:$0xff] }
 0x4cb   :  { %v4739_v27 = vmul.f32 %v14173_v55, %v14173_v55 }
 0x4cc   :  { %v4802_v39 = vadd.f32 %v4801_v48, %v4731_v47  ;;  %19710 = vst [vmem:[#allocation16_spill] sm:$0xff] %v14801_v16  ;;  %v4854_v38 = vadd.f32 %v4853_v25, %v4698_v13  ;;  %v14809_v48 = vsub.f32 %v14072_v20, %v14309_v29  ;;  %v4704_v13 = vmul.f32 %v14801_v16, %v14801_v16  ;;  %v19795_v16 = vld [vmem:[#allocation33_spill] sm:$0xff] }
 0x4cd   :  { %v4741_v20 = vmul.f32 %v14177_v37, %v14177_v37 }
 0x4ce   :  { %v4803_v19 = vadd.f32 %v4802_v39, %v4733_v12  ;;  %19711 = vst [vmem:[#allocation146_spill] sm:$0xff] %v14809_v48  ;;  %v4855_v2 = vadd.f32 %v4854_v38, %v4700_v49  ;;  %v14817_v39 = vsub.f32 %v14077_v18, %v14309_v29  ;;  %v4706_v49 = vmul.f32 %v14809_v48, %v14809_v48  ;;  %v19794_v48 = vld [vmem:[#allocation71_spill] sm:$0xff] }
 0x4cf   :  { %v4743_v18 = vmul.f32 %v14180_v8, %v14180_v8 }
 0x4d0   :  { %v4804_v47 = vadd.f32 %v4803_v19, %v4735_v36  ;;  %19712 = vst [vmem:[#allocation85_spill] sm:$0xff] %v14817_v39  ;;  %v4856_v25 = vadd.f32 %v4855_v2, %v4702_v43  ;;  %v14825_v19 = vsub.f32 %v14082_v60, %v14309_v29  ;;  %v4708_v43 = vmul.f32 %v14817_v39, %v14817_v39  ;;  %v19793_v39 = vld [vmem:[#allocation62_spill] sm:$0xff] }
 0x4d1   :  { %v4745_v60 = vmul.f32 %v14183_v62, %v14183_v62 }
 0x4d2   :  { %v4805_v12 = vadd.f32 %v4804_v47, %v4737_v3  ;;  %19713 = vst [vmem:[#allocation59_spill] sm:$0xff] %v14825_v19  ;;  %v4857_v38 = vadd.f32 %v4856_v25, %v4704_v13  ;;  %v14833_v47 = vsub.f32 %v14087_v63, %v14309_v29  ;;  %v4710_v13 = vmul.f32 %v14825_v19, %v14825_v19 }
 0x4d3   :  { %v14847_v63 = vsub.f32 %v14097_v54, %v14309_v29 }
 0x4d4   :  { %v4806_v36 = vadd.f32 %v4805_v12, %v4739_v27  ;;  %19714 = vst [vmem:[#allocation145_spill] sm:$0xff] %v14833_v47  ;;  %v4858_v2 = vadd.f32 %v4857_v38, %v4706_v49  ;;  %v14841_v12 = vsub.f32 %v14092_v33, %v14309_v29 }
 0x4d5   :  { %19716 = vst [vmem:[#allocation58_spill] sm:$0xff] %v14847_v63  ;;  %v4716_v54 = vmul.f32 %v14847_v63, %v14847_v63  ;;  %v19789_v63 = vld [vmem:[#allocation31_spill] sm:$0xff] }
 0x4d6   :  { %v4807_v3 = vadd.f32 %v4806_v36, %v4741_v20  ;;  %19715 = vst [vmem:[#allocation84_spill] sm:$0xff] %v14841_v12  ;;  %v4859_v25 = vadd.f32 %v4858_v2, %v4708_v43  ;;  %v4712_v36 = vmul.f32 %v14833_v47, %v14833_v47  ;;  %v4714_v33 = vmul.f32 %v14841_v12, %v14841_v12  ;;  %v19790_v12 = vld [vmem:[#allocation65_spill] sm:$0xff]  ;;  %v19792_v47 = vld [vmem:[#allocation108_spill] sm:$0xff] }
 0x4d7   :  { %v14859_v43 = vsub.f32 %v14107_v50, %v14309_v29 }
 0x4d8   :  { %v4808_v27 = vadd.f32 %v4807_v3, %v4743_v18  ;;  %v4860_v49 = vadd.f32 %v4859_v25, %v4710_v13  ;;  %v14853_v18 = vsub.f32 %v14102_v22, %v14309_v29 }
 0x4d9   :  { %19718 = vst [vmem:[#allocation90_spill] sm:$0xff] %v14859_v43  ;;  %v4720_v50 = vmul.f32 %v14859_v43, %v14859_v43 }
 0x4da   :  { %v4809_v20 = vadd.f32 %v4808_v27, %v4745_v60  ;;  %19717 = vst [vmem:[#allocation147_spill] sm:$0xff] %v14853_v18  ;;  %v4861_v3 = vadd.f32 %v4860_v49, %v4712_v36  ;;  %v14865_v27 = vsub.f32 %v14112_v52, %v14309_v29  ;;  %v4718_v22 = vmul.f32 %v14853_v18, %v14853_v18  ;;  %v19788_v18 = vld [vmem:[#allocation32_spill] sm:$0xff] }
 0x4dc   :  { %v4810_v38 = vrot.slane %v4809_v20, 4  ;;  %v4862_v2 = vadd.f32 %v4861_v3, %v4714_v33  ;;  %19719 = vst [vmem:[#allocation64_spill] sm:$0xff] %v14865_v27  ;;  %v4722_v52 = vmul.f32 %v14865_v27, %v14865_v27 }
 0x4de   :  { %v4811_v19 = vadd.f32 %v4810_v38, %v4809_v20  ;;  %v4863_v13 = vadd.f32 %v4862_v2, %v4716_v54  ;;  %v14871_v20 = vsub.f32 %v14117_v11, %v14309_v29  ;;  %v14877_v38 = vsub.f32 %v14122_v24, %v14309_v29 }
 0x4df   :  { %v14885_v2 = vsub.f32 %v14127_v17, %v14309_v29 }
 0x4e0   :  { %v4812_v60 = vrot.slane %v4811_v19, 2  ;;  %19720 = vst [vmem:[#allocation89_spill] sm:$0xff] %v14871_v20  ;;  %v4864_v36 = vadd.f32 %v4863_v13, %v4718_v22  ;;  %19721 = vst [vmem:[#allocation94_spill] sm:$0xff] %v14877_v38 }
 0x4e1   :  { %19722 = vst [vmem:[#allocation93_spill] sm:$0xff] %v14885_v2 }
 0x4e2   :  { %v4813_v25 = vadd.f32 %v4812_v60, %v4811_v19  ;;  %v4865_v33 = vadd.f32 %v4864_v36, %v4720_v50  ;;  %v4724_v19 = vmul.f32 %v14871_v20, %v14871_v20  ;;  %v4726_v60 = vmul.f32 %v14877_v38, %v14877_v38 }
 0x4e3   :  { %v14891_v50 = vsub.f32 %v14132_v35, %v14309_v29  ;;  %v14905_v35 = vsub.f32 %v14145_v23, %v14309_v29  ;;  %v19727_v23 = vld [vmem:[#allocation106_spill] sm:$0xff] }
 0x4e4   :  { %v4814_v49 = vrot.slane %v4813_v25, 1  ;;  %v4866_v54 = vadd.f32 %v4865_v33, %v4722_v52  ;;  %v19725_v33 = vld [vmem:[#allocation47_spill] sm:$0xff] }
 0x4e5   :  { %19723 = vst [vmem:[#allocation117_spill] sm:$0xff] %v14891_v50  ;;  %v4730_v17 = vmul.f32 %v14891_v50, %v14891_v50  ;;  %19726 = vst [vmem:[#allocation8_spill] sm:$0xff] %v14905_v35 }
 0x4e6   :  { %v4815_v3 = vadd.f32 %v4814_v49, %v4813_v25  ;;  %v4867_v22 = vadd.f32 %v4866_v54, %v4724_v19  ;;  %v4728_v25 = vmul.f32 %v14885_v2, %v14885_v2  ;;  %v14897_v49 = vsub.f32 %v14137_v34, %v14309_v29  ;;  %v9280_v34 = vld [vmem:[%s18246_s6] sm:$0xff] }
 0x4e7   :  { %v18589_v19 = vsub.s32 1, %v19725_v33 }
 0x4e8   :  { %v4885_v11 = vmul.f32 0.001953125, %v4815_v3  ;;  %v4868_v13 = vadd.f32 %v4867_v22, %v4726_v60  ;;  %19724 = vst [vmem:[#allocation6_spill] sm:$0xff] %v14897_v49  ;;  %v18590_v3 = vsub.s32 2, %v19725_v33  ;;  %v4732_v54 = vmul.f32 %v14897_v49, %v14897_v49 }
 0x4ea   :  { %v4887_v24 = vadd.f32 1e-05, %v4885_v11  ;;  %v4869_v36 = vadd.f32 %v4868_v13, %v4728_v25  ;;  %v14922_v25 = vsub.f32 %v19727_v23, %v14309_v29  ;;  %v19732_v23 = vld [vmem:[#allocation105_spill] sm:$0xff] }
 0x4ec   :  { %8824 = vrsqrt.f32 %v4887_v24  ;;  %v4870_v52 = vadd.f32 %v4869_v36, %v4730_v17  ;;  %v14914_v24 = vrot.slane %v9280_v34, %v18590_v3  ;;  %19728 = vst [vmem:[#allocation5_spill] sm:$0xff] %v14922_v25  ;;  %v4734_v36 = vmul.f32 %v14905_v35, %v14905_v35 }
 0x4ed   :  { %v14939_v3 = vsub.f32 %v19732_v23, %v14309_v29 }
 0x4ee   :  { %v4871_v22 = vadd.f32 %v4870_v52, %v4732_v54  ;;  %v19730_v54 = vld [vmem:[#allocation28_spill] sm:$0xff] }
 0x4ef   :  { %19733 = vst [vmem:[#allocation14_spill] sm:$0xff] %v14939_v3 }
 0x4f6   :  { %v8825_v11 = vpop.eup %8824 }
 0x4f7   :  { %v4891_v60 = vmul.f32 %v9280_v34, %v8825_v11  ;;  %v4872_v11 = vadd.f32 %v4871_v22, %v4734_v36  ;;  %v14933_v34 = vsub.f32 %v19730_v54, %v14309_v29  ;;  %v19734_v22 = vld [vmem:[#allocation110_spill] sm:$0xff]  ;;  %v19736_v54 = vld [vmem:[#allocation27_spill] sm:$0xff] }
 0x4f8   :  { %v14945_v36 = vsub.f32 %v19734_v22, %v14309_v29  ;;  %v14951_v49 = vsub.f32 %v19736_v54, %v14309_v29 }
 0x4f9   :  { %v14918_v13 = vrot.slane %v4891_v60, %v18589_v19  ;;  %19731 = vst [vmem:[#allocation7_spill] sm:$0xff] %v14933_v34  ;;  %v4736_v60 = vmul.f32 %v14922_v25, %v14922_v25  ;;  %v4738_v35 = vmul.f32 %v14933_v34, %v14933_v34 }
 0x4fa   :  { %19735 = vst [vmem:[#allocation54_spill] sm:$0xff] %v14945_v36  ;;  %19737 = vst [vmem:[#allocation15_spill] sm:$0xff] %v14951_v49  ;;  %v4742_v34 = vmul.f32 %v14945_v36, %v14945_v36 }
 0x4fb   :  { %v5027_v17 = vmul.f32 %v14918_v13, %v14183_v62  ;;  %v4873_v19 = vadd.f32 %v4872_v11, %v4736_v60  ;;  %v19738_v11 = vld [vmem:[#allocation30_spill] sm:$0xff]  ;;  %v4929_v22 = vmul.f32 %v14918_v13, %v14293_v58  ;;  %v4931_v54 = vmul.f32 %v14918_v13, %v14299_v15 }
 0x4fc   :  { %v14955_v60 = vsub.f32 %v19738_v11, %v14309_v29  ;;  %v4965_v29 = vmul.f32 %v14918_v13, %v14483_v1  ;;  %v4973_v36 = vmul.f32 %v14918_v13, %v14531_v31  ;;  %v4975_v58 = vmul.f32 %v14918_v13, %v14543_v6  ;;  %v19739_v6 = vld [vmem:[#allocation73_spill] sm:$0xff] }
 0x4fd   :  { %v14929_v52 = vadd.f32 %v14914_v24, %v5027_v17  ;;  %v4874_v62 = vadd.f32 %v4873_v19, %v4738_v35  ;;  %v4740_v17 = vmul.f32 %v14939_v3, %v14939_v3  ;;  %v4744_v19 = vmul.f32 %v14951_v49, %v14951_v49 }
 0x4fe   :  { %v4746_v35 = vmul.f32 %v14955_v60, %v14955_v60  ;;  %v4971_v49 = vmul.f32 %v14918_v13, %v14519_v56  ;;  %v4977_v15 = vmul.f32 %v14918_v13, %v14555_v44  ;;  %v4979_v1 = vmul.f32 %v14918_v13, %v14567_v26  ;;  %v19740_v44 = vld [vmem:[#allocation144_spill] sm:$0xff]  ;;  %v19741_v26 = vld [vmem:[#allocation45_spill] sm:$0xff] }
 0x4ff   :  { %19729 = vst [vmem:[#allocation148_spill] sm:$0xff] %v14929_v52  ;;  %v4875_v23 = vadd.f32 %v4874_v62, %v4740_v17  ;;  %v4967_v62 = vmul.f32 %v14918_v13, %v14495_v40  ;;  %v4969_v17 = vmul.f32 %v14918_v13, %v14507_v4  ;;  %v4981_v40 = vmul.f32 %v14918_v13, %v14579_v5  ;;  %v19742_v5 = vld [vmem:[#allocation49_spill] sm:$0xff] }
 0x500   :  { %v4983_v4 = vmul.f32 %v14918_v13, %v14591_v61  ;;  %v4985_v56 = vmul.f32 %v14918_v13, %v14603_v32  ;;  %v4987_v31 = vmul.f32 %v14918_v13, %v14615_v21  ;;  %v4991_v3 = vmul.f32 %v14918_v13, %v19740_v44  ;;  %v19743_v61 = vld [vmem:[#allocation48_spill] sm:$0xff]  ;;  %v19747_v44 = vld [vmem:[#allocation53_spill] sm:$0xff] }
 0x501   :  { %v4876_v11 = vadd.f32 %v4875_v23, %v4742_v34  ;;  %v4989_v23 = vmul.f32 %v14918_v13, %v19739_v6  ;;  %v4995_v25 = vmul.f32 %v14918_v13, %v19742_v5  ;;  %v4997_v50 = vmul.f32 %v14918_v13, %v19743_v61  ;;  %v19746_v6 = vld [vmem:[#allocation131_spill] sm:$0xff] }
 0x502   :  { %v15002_v32 = vadd.f32 %v14914_v24, %v4929_v22  ;;  %v15005_v21 = vadd.f32 %v14914_v24, %v4931_v54  ;;  %v4999_v2 = vmul.f32 %v14918_v13, %v19746_v6  ;;  %v5001_v38 = vmul.f32 %v14918_v13, %v19747_v44 }
 0x503   :  { %v4877_v34 = vadd.f32 %v4876_v11, %v4744_v19  ;;  %v4993_v19 = vmul.f32 %v14918_v13, %v19741_v26  ;;  %v19748_v26 = vld [vmem:[#allocation136_spill] sm:$0xff]  ;;  %v5005_v5 = vmul.f32 %v14918_v13, %v14723_v45  ;;  %v5007_v22 = vmul.f32 %v14918_v13, %v14735_v9 }
 0x504   :  { %19744 = vst [vmem:[#allocation18_spill] sm:$0xff] %v15002_v32  ;;  %19745 = vst [vmem:[#allocation63_spill] sm:$0xff] %v15005_v21  ;;  %v5009_v54 = vmul.f32 %v14918_v13, %v14747_v0  ;;  %v5011_v61 = vmul.f32 %v14918_v13, %v14153_v7  ;;  %v5013_v6 = vmul.f32 %v14918_v13, %v14157_v30 }
 0x505   :  { %v4878_v11 = vadd.f32 %v4877_v34, %v4746_v35  ;;  %v5003_v35 = vmul.f32 %v14918_v13, %v19748_v26  ;;  %v5015_v44 = vmul.f32 %v14918_v13, %v14161_v14  ;;  %v5017_v26 = vmul.f32 %v14918_v13, %v14165_v10 }
 0x506   :  { %v5019_v45 = vmul.f32 %v14918_v13, %v14169_v53  ;;  %v5021_v9 = vmul.f32 %v14918_v13, %v14173_v55  ;;  %v5023_v0 = vmul.f32 %v14918_v13, %v14177_v37  ;;  %v5025_v7 = vmul.f32 %v14918_v13, %v14180_v8 }
 0x507   :  { %v4879_v34 = vrot.slane %v4878_v11, 4  ;;  %v15036_v27 = vadd.f32 %v14914_v24, %v4965_v29  ;;  %v15039_v14 = vadd.f32 %v14914_v24, %v4967_v62  ;;  %v15042_v10 = vadd.f32 %v14914_v24, %v4969_v17 }
 0x508   :  { %v15045_v53 = vadd.f32 %v14914_v24, %v4971_v49  ;;  %v15048_v55 = vadd.f32 %v14914_v24, %v4973_v36  ;;  %v15051_v37 = vadd.f32 %v14914_v24, %v4975_v58  ;;  %v15054_v8 = vadd.f32 %v14914_v24, %v4977_v15 }
 0x509   :  { %v4880_v20 = vadd.f32 %v4879_v34, %v4878_v11  ;;  %19749 = vst [vmem:[#allocation11_spill] sm:$0xff] %v15036_v27  ;;  %19750 = vst [vmem:[#allocation70_spill] sm:$0xff] %v15039_v14  ;;  %v15057_v11 = vadd.f32 %v14914_v24, %v4979_v1  ;;  %v15060_v62 = vadd.f32 %v14914_v24, %v4981_v40 }
 0x50a   :  { %19751 = vst [vmem:[#allocation150_spill] sm:$0xff] %v15042_v10  ;;  %19752 = vst [vmem:[#allocation17_spill] sm:$0xff] %v15045_v53  ;;  %v15063_v17 = vadd.f32 %v14914_v24, %v4983_v4  ;;  %v15066_v49 = vadd.f32 %v14914_v24, %v4985_v56  ;;  %v15069_v36 = vadd.f32 %v14914_v24, %v4987_v31 }
 0x50b   :  { %v4881_v30 = vrot.slane %v4880_v20, 2  ;;  %19753 = vst [vmem:[#allocation152_spill] sm:$0xff] %v15048_v55  ;;  %19754 = vst [vmem:[#allocation20_spill] sm:$0xff] %v15051_v37  ;;  %v15072_v58 = vadd.f32 %v14914_v24, %v4989_v23  ;;  %v15078_v1 = vadd.f32 %v14914_v24, %v4993_v19  ;;  %v15081_v40 = vadd.f32 %v14914_v24, %v4995_v25 }
 0x50c   :  { %19755 = vst [vmem:[#allocation154_spill] sm:$0xff] %v15054_v8  ;;  %19756 = vst [vmem:[#allocation69_spill] sm:$0xff] %v15057_v11  ;;  %v15084_v4 = vadd.f32 %v14914_v24, %v4997_v50  ;;  %v15087_v56 = vadd.f32 %v14914_v24, %v4999_v2  ;;  %v15090_v31 = vadd.f32 %v14914_v24, %v5001_v38 }
 0x50d   :  { %v4882_v29 = vadd.f32 %v4881_v30, %v4880_v20  ;;  %19757 = vst [vmem:[#allocation156_spill] sm:$0xff] %v15060_v62  ;;  %19758 = vst [vmem:[#allocation76_spill] sm:$0xff] %v15063_v17  ;;  %v15075_v20 = vadd.f32 %v14914_v24, %v4991_v3  ;;  %v15093_v23 = vadd.f32 %v14914_v24, %v5003_v35 }
 0x50e   :  { %19759 = vst [vmem:[#allocation158_spill] sm:$0xff] %v15066_v49  ;;  %19760 = vst [vmem:[#allocation75_spill] sm:$0xff] %v15069_v36  ;;  %v15096_v3 = vadd.f32 %v14914_v24, %v5005_v5  ;;  %v15099_v34 = vadd.f32 %v14914_v24, %v5007_v22  ;;  %v15102_v25 = vadd.f32 %v14914_v24, %v5009_v54 }
 0x50f   :  { %19761 = vst [vmem:[#allocation160_spill] sm:$0xff] %v15072_v58  ;;  %19762 = vst [vmem:[#allocation82_spill] sm:$0xff] %v15075_v20  ;;  %v4883_v15 = vrot.slane %v4882_v29, 1  ;;  %v15105_v50 = vadd.f32 %v14914_v24, %v5011_v61  ;;  %v15108_v2 = vadd.f32 %v14914_v24, %v5013_v6  ;;  %v15111_v38 = vadd.f32 %v14914_v24, %v5015_v44 }
 0x510   :  { %19763 = vst [vmem:[#allocation162_spill] sm:$0xff] %v15078_v1  ;;  %19764 = vst [vmem:[#allocation10_spill] sm:$0xff] %v15081_v40  ;;  %v15114_v35 = vadd.f32 %v14914_v24, %v5017_v26  ;;  %v15117_v5 = vadd.f32 %v14914_v24, %v5019_v45  ;;  %v15120_v30 = vadd.f32 %v14914_v24, %v5021_v9  ;;  %v9281_v26 = vld [vmem:[%s18246_s6 + $0x8] sm:$0xff]  ;;  %v19781_v45 = vsub.s32 2, %v19725_v33 }
 0x511   :  { %19765 = vst [vmem:[#allocation81_spill] sm:$0xff] %v15084_v4  ;;  %19766 = vst [vmem:[#allocation9_spill] sm:$0xff] %v15087_v56  ;;  %v4884_v19 = vadd.f32 %v4883_v15, %v4882_v29  ;;  %v15123_v54 = vadd.f32 %v14914_v24, %v5023_v0  ;;  %v15126_v61 = vadd.f32 %v14914_v24, %v5025_v7  ;;  %v19780_v29 = vld [vmem:[#allocation109_spill] sm:$0xff]  ;;  %v19782_v9 = vld [vmem:[#allocation114_spill] sm:$0xff] }
 0x512   :  { %19767 = vst [vmem:[#allocation22_spill] sm:$0xff] %v15090_v31  ;;  %19768 = vst [vmem:[#allocation12_spill] sm:$0xff] %v15093_v23  ;;  %v4901_v44 = vmul.f32 %v14918_v13, %v19780_v29  ;;  %v15135_v15 = vrot.slane %v9281_v26, %v19781_v45  ;;  %v19783_v0 = vld [vmem:[#allocation113_spill] sm:$0xff]  ;;  %v19784_v7 = vld [vmem:[#allocation119_spill] sm:$0xff]  ;;  %v5228_v29 = vmul.f32 0.5, %v14929_v52 }
 0x513   :  { %19769 = vst [vmem:[#allocation92_spill] sm:$0xff] %v15096_v3  ;;  %19770 = vst [vmem:[#allocation149_spill] sm:$0xff] %v15099_v34  ;;  %v4886_v22 = vmul.f32 0.001953125, %v4884_v19  ;;  %v4903_v19 = vmul.f32 %v14918_v13, %v19782_v9  ;;  %v19787_v45 = vld [vmem:[#allocation122_spill] sm:$0xff]  ;;  %v4915_v9 = vmul.f32 %v14918_v13, %v19788_v18  ;;  %v4933_v18 = vmul.f32 %v14918_v13, %v19795_v16  ;;  %v19802_v16 = vld [vmem:[#allocation116_spill] sm:$0xff] }
 0x514   :  { %19771 = vst [vmem:[#allocation91_spill] sm:$0xff] %v15102_v25  ;;  %19772 = vst [vmem:[#allocation151_spill] sm:$0xff] %v15105_v50  ;;  %v4913_v43 = vmul.f32 %v14918_v13, %v19787_v45  ;;  %v4927_v45 = vmul.f32 %v14918_v13, %v19794_v48  ;;  %v19801_v48 = vld [vmem:[#allocation80_spill] sm:$0xff]  ;;  %v4947_v51 = vmul.f32 %v14918_v13, %v19802_v16  ;;  %v19807_v25 = vld [vmem:[#allocation135_spill] sm:$0xff] }
 0x515   :  { %19773 = vst [vmem:[#allocation24_spill] sm:$0xff] %v15108_v2  ;;  %19774 = vst [vmem:[#allocation153_spill] sm:$0xff] %v15111_v38  ;;  %v4888_v6 = vadd.f32 1e-05, %v4886_v22  ;;  %v4907_v22 = vmul.f32 %v14918_v13, %v19784_v7  ;;  %v19791_v7 = vld [vmem:[#allocation34_spill] sm:$0xff]  ;;  %v4945_v57 = vmul.f32 %v14918_v13, %v19801_v48  ;;  %v19809_v3 = vld [vmem:[#allocation61_spill] sm:$0xff]  ;;  %v15239_v31 = vadd.f32 %v14914_v24, %v4933_v18 }
 0x516   :  { %19775 = vst [vmem:[#allocation95_spill] sm:$0xff] %v15114_v35  ;;  %19776 = vst [vmem:[#allocation155_spill] sm:$0xff] %v15117_v5  ;;  %v19786_v5 = vld [vmem:[#allocation118_spill] sm:$0xff]  ;;  %v4921_v52 = vmul.f32 %v14918_v13, %v19791_v7  ;;  %v4939_v7 = vmul.f32 %v14918_v13, %v19798_v42  ;;  %v4961_v16 = vmul.f32 %v14918_v13, %v19809_v3  ;;  %v19810_v23 = vld [vmem:[#allocation137_spill] sm:$0xff] }
 0x517   :  { %19777 = vst [vmem:[#allocation100_spill] sm:$0xff] %v15120_v30  ;;  %19778 = vst [vmem:[#allocation157_spill] sm:$0xff] %v15123_v54  ;;  %v4905_v54 = vmul.f32 %v14918_v13, %v19783_v0  ;;  %8826 = vrsqrt.f32 %v4888_v6  ;;  %v4911_v35 = vmul.f32 %v14918_v13, %v19786_v5  ;;  %v4917_v0 = vmul.f32 %v14918_v13, %v19789_v63  ;;  %v19805_v42 = vld [vmem:[#allocation134_spill] sm:$0xff] }
 0x518   :  { %19779 = vst [vmem:[#allocation23_spill] sm:$0xff] %v15126_v61  ;;  %v19785_v61 = vld [vmem:[#allocation29_spill] sm:$0xff]  ;;  %v4919_v6 = vmul.f32 %v14918_v13, %v19790_v12  ;;  %v4925_v5 = vmul.f32 %v14918_v13, %v19793_v39  ;;  %v4935_v63 = vmul.f32 %v14918_v13, %v19796_v28  ;;  %v4937_v12 = vmul.f32 %v14918_v13, %v19797_v46  ;;  %v19800_v39 = vld [vmem:[#allocation35_spill] sm:$0xff]  ;;  %v19808_v34 = vld [vmem:[#allocation138_spill] sm:$0xff] }
 0x519   :  { %v4909_v30 = vmul.f32 %v14918_v13, %v19785_v61  ;;  %v4923_v61 = vmul.f32 %v14918_v13, %v19792_v47  ;;  %v4941_v47 = vmul.f32 %v14918_v13, %v19799_v41  ;;  %8828 = vtanh.f32 %v5228_v29  ;;  %v19803_v28 = vld [vmem:[#allocation115_spill] sm:$0xff]  ;;  %v19806_v41 = vld [vmem:[#allocation52_spill] sm:$0xff]  ;;  %19825 = vst [vmem:[#allocation97_spill] sm:$0xff] %v15239_v31 }
 0x51a   :  { %v4943_v59 = vmul.f32 %v14918_v13, %v19800_v39  ;;  %v4949_v38 = vmul.f32 %v14918_v13, %v19803_v28  ;;  %v19804_v46 = vld [vmem:[#allocation51_spill] sm:$0xff]  ;;  %v4953_v50 = vmul.f32 %v14918_v13, %v19805_v42  ;;  %v4955_v29 = vmul.f32 %v14918_v13, %v19806_v41 }
 0x51b   :  { %v4951_v2 = vmul.f32 %v14918_v13, %v19804_v46  ;;  %v4957_v39 = vmul.f32 %v14918_v13, %v19807_v25  ;;  %v4959_v48 = vmul.f32 %v14918_v13, %v19808_v34  ;;  %v4963_v28 = vmul.f32 %v14918_v13, %v19810_v23 }
 0x51c   :  { %v15197_v46 = vadd.f32 %v14914_v24, %v4901_v44  ;;  %v15200_v42 = vadd.f32 %v14914_v24, %v4903_v19  ;;  %v15203_v41 = vadd.f32 %v14914_v24, %v4905_v54  ;;  %v15206_v25 = vadd.f32 %v14914_v24, %v4907_v22 }
 0x51d   :  { %v15209_v34 = vadd.f32 %v14914_v24, %v4909_v30  ;;  %v15212_v3 = vadd.f32 %v14914_v24, %v4911_v35  ;;  %v15215_v13 = vadd.f32 %v14914_v24, %v4913_v43  ;;  %v15218_v23 = vadd.f32 %v14914_v24, %v4915_v9 }
 0x51e   :  { %19811 = vst [vmem:[#allocation159_spill] sm:$0xff] %v15197_v46  ;;  %19812 = vst [vmem:[#allocation99_spill] sm:$0xff] %v15200_v42  ;;  %v15221_v19 = vadd.f32 %v14914_v24, %v4917_v0  ;;  %v15224_v54 = vadd.f32 %v14914_v24, %v4919_v6  ;;  %v15227_v22 = vadd.f32 %v14914_v24, %v4921_v52 }
 0x51f   :  { %19813 = vst [vmem:[#allocation161_spill] sm:$0xff] %v15203_v41  ;;  %19814 = vst [vmem:[#allocation102_spill] sm:$0xff] %v15206_v25  ;;  %v15230_v30 = vadd.f32 %v14914_v24, %v4923_v61  ;;  %v15233_v43 = vadd.f32 %v14914_v24, %v4925_v5  ;;  %v15236_v9 = vadd.f32 %v14914_v24, %v4927_v45  ;;  %v19830_v61 = vsub.s32 1, %v19725_v33 }
 0x520   :  { %19815 = vst [vmem:[#allocation19_spill] sm:$0xff] %v15209_v34  ;;  %19816 = vst [vmem:[#allocation26_spill] sm:$0xff] %v15212_v3  ;;  %v15242_v0 = vadd.f32 %v14914_v24, %v4935_v63  ;;  %v15245_v6 = vadd.f32 %v14914_v24, %v4937_v12  ;;  %v15248_v52 = vadd.f32 %v14914_v24, %v4939_v7  ;;  %v15322_v33 = vmul.f32 0.5, %v15221_v19 }
 0x521   :  { %19817 = vst [vmem:[#allocation87_spill] sm:$0xff] %v15215_v13  ;;  %19818 = vst [vmem:[#allocation98_spill] sm:$0xff] %v15218_v23  ;;  %v8827_v44 = vpop.eup %8826  ;;  %v15258_v45 = vadd.f32 %v14914_v24, %v4943_v59  ;;  %v15261_v18 = vadd.f32 %v14914_v24, %v4945_v57  ;;  %v15264_v63 = vadd.f32 %v14914_v24, %v4947_v51 }
 0x522   :  { %19819 = vst [vmem:[#allocation86_spill] sm:$0xff] %v15221_v19  ;;  %19820 = vst [vmem:[#allocation101_spill] sm:$0xff] %v15224_v54  ;;  %v4892_v35 = vmul.f32 %v9281_v26, %v8827_v44  ;;  %v15251_v26 = vadd.f32 %v14914_v24, %v4941_v47  ;;  %v15267_v12 = vadd.f32 %v14914_v24, %v4949_v38  ;;  %v15343_v19 = vmul.f32 0.5, %v15005_v21 }
 0x523   :  { %19821 = vst [vmem:[#allocation21_spill] sm:$0xff] %v15227_v22  ;;  %19822 = vst [vmem:[#allocation104_spill] sm:$0xff] %v15230_v30  ;;  %v15270_v7 = vadd.f32 %v14914_v24, %v4951_v2  ;;  %v15273_v47 = vadd.f32 %v14914_v24, %v4953_v50  ;;  %v15276_v44 = vadd.f32 %v14914_v24, %v4955_v29  ;;  %v15278_v59 = vpop.eup %8828  ;;  %v15295_v29 = vmul.f32 0.5, %v15197_v46  ;;  %v19921_v46 = vld [vmem:[#allocation15_spill] sm:$0xff] }
 0x524   :  { %19823 = vst [vmem:[#allocation96_spill] sm:$0xff] %v15233_v43  ;;  %19824 = vst [vmem:[#allocation25_spill] sm:$0xff] %v15236_v9  ;;  %v15255_v5 = vrot.slane %v4892_v35, %v19830_v61  ;;  %v15283_v51 = vadd.f32 %v14914_v24, %v4957_v39  ;;  %v15286_v38 = vadd.f32 %v14914_v24, %v4959_v48  ;;  %v15298_v35 = vmul.f32 0.5, %v15200_v42  ;;  %v19919_v42 = vld [vmem:[#allocation14_spill] sm:$0xff] }
 0x525   :  { %19826 = vst [vmem:[#allocation103_spill] sm:$0xff] %v15242_v0  ;;  %19827 = vst [vmem:[#allocation106_spill] sm:$0xff] %v15245_v6  ;;  %v15289_v2 = vadd.f32 %v14914_v24, %v4961_v16  ;;  %v15292_v50 = vadd.f32 %v14914_v24, %v4963_v28  ;;  %v15307_v48 = vmul.f32 0.5, %v15206_v25  ;;  %v15310_v16 = vmul.f32 0.5, %v15209_v34  ;;  %v19902_v25 = vld [vmem:[#allocation59_spill] sm:$0xff] }
 0x526   :  { %19828 = vst [vmem:[#allocation28_spill] sm:$0xff] %v15248_v52  ;;  %19829 = vst [vmem:[#allocation105_spill] sm:$0xff] %v15251_v26  ;;  %v5028_v57 = vmul.f32 %v15255_v5, %v14955_v60  ;;  %v15301_v60 = vmul.f32 0.5, %v15203_v41  ;;  %v15313_v24 = vmul.f32 0.5, %v15212_v3  ;;  %v15316_v28 = vmul.f32 0.5, %v15215_v13  ;;  %v19906_v41 = vld [vmem:[#allocation84_spill] sm:$0xff] }
 0x527   :  { %19831 = vst [vmem:[#allocation110_spill] sm:$0xff] %v15258_v45  ;;  %19832 = vst [vmem:[#allocation27_spill] sm:$0xff] %v15261_v18  ;;  %v15319_v61 = vmul.f32 0.5, %v15218_v23  ;;  %v15331_v34 = vmul.f32 0.5, %v15230_v30  ;;  %v15334_v3 = vmul.f32 0.5, %v15233_v43  ;;  %v15337_v13 = vmul.f32 0.5, %v15236_v9 }
 0x528   :  { %19833 = vst [vmem:[#allocation30_spill] sm:$0xff] %v15264_v63  ;;  %19834 = vst [vmem:[#allocation73_spill] sm:$0xff] %v15267_v12  ;;  %v15304_v39 = vadd.f32 %v15135_v15, %v5028_v57  ;;  %v15325_v57 = vmul.f32 0.5, %v15224_v54  ;;  %v15340_v23 = vmul.f32 0.5, %v15002_v32  ;;  %v15346_v54 = vmul.f32 0.5, %v15239_v31 }
 0x529   :  { %19835 = vst [vmem:[#allocation144_spill] sm:$0xff] %v15270_v7  ;;  %19836 = vst [vmem:[#allocation45_spill] sm:$0xff] %v15273_v47  ;;  %v15352_v30 = vmul.f32 0.5, %v15245_v6  ;;  %v15355_v43 = vmul.f32 0.5, %v15248_v52  ;;  %v15358_v9 = vmul.f32 0.5, %v15251_v26  ;;  %v15361_v32 = vmul.f32 0.5, %v15258_v45 }
 0x52a   :  { %19837 = vst [vmem:[#allocation49_spill] sm:$0xff] %v15276_v44  ;;  %19838 = vst [vmem:[#allocation48_spill] sm:$0xff] %v15278_v59  ;;  %v15328_v59 = vmul.f32 0.5, %v15227_v22  ;;  %v15349_v22 = vmul.f32 0.5, %v15242_v0  ;;  %v15364_v21 = vmul.f32 0.5, %v15261_v18  ;;  %v15367_v31 = vmul.f32 0.5, %v15264_v63 }
 0x52b   :  { %19839 = vst [vmem:[#allocation131_spill] sm:$0xff] %v15283_v51  ;;  %19840 = vst [vmem:[#allocation53_spill] sm:$0xff] %v15286_v38  ;;  %v15370_v0 = vmul.f32 0.5, %v15267_v12  ;;  %v15373_v6 = vmul.f32 0.5, %v15270_v7  ;;  %v15376_v52 = vmul.f32 0.5, %v15273_v47  ;;  %v15379_v26 = vmul.f32 0.5, %v15276_v44 }
 0x52c   :  { %19841 = vst [vmem:[#allocation136_spill] sm:$0xff] %v15289_v2  ;;  %19842 = vst [vmem:[#allocation109_spill] sm:$0xff] %v15292_v50  ;;  %v15382_v45 = vmul.f32 0.5, %v15283_v51  ;;  %v15385_v18 = vmul.f32 0.5, %v15286_v38  ;;  %v15388_v63 = vmul.f32 0.5, %v15289_v2  ;;  %v15391_v12 = vmul.f32 0.5, %v15292_v50 }
 0x52d   :  { %19843 = vst [vmem:[#allocation114_spill] sm:$0xff] %v15304_v39  ;;  %19844 = vst [vmem:[#allocation113_spill] sm:$0xff] %v15367_v31  ;;  %v15394_v7 = vmul.f32 0.5, %v15036_v27  ;;  %v15397_v47 = vmul.f32 0.5, %v15039_v14  ;;  %v15400_v44 = vmul.f32 0.5, %v15042_v10  ;;  %v15403_v51 = vmul.f32 0.5, %v15045_v53 }
 0x52e   :  { %19845 = vst [vmem:[#allocation119_spill] sm:$0xff] %v15370_v0  ;;  %19846 = vst [vmem:[#allocation29_spill] sm:$0xff] %v15373_v6  ;;  %v15406_v38 = vmul.f32 0.5, %v15048_v55  ;;  %v15409_v2 = vmul.f32 0.5, %v15051_v37  ;;  %v15412_v50 = vmul.f32 0.5, %v15054_v8  ;;  %v15415_v27 = vmul.f32 0.5, %v15057_v11 }
 0x52f   :  { %19847 = vst [vmem:[#allocation118_spill] sm:$0xff] %v15376_v52  ;;  %19848 = vst [vmem:[#allocation122_spill] sm:$0xff] %v15379_v26  ;;  %v15418_v14 = vmul.f32 0.5, %v15060_v62  ;;  %v15421_v10 = vmul.f32 0.5, %v15063_v17  ;;  %v15424_v53 = vmul.f32 0.5, %v15066_v49  ;;  %v15427_v55 = vmul.f32 0.5, %v15069_v36 }
 0x530   :  { %19849 = vst [vmem:[#allocation32_spill] sm:$0xff] %v15382_v45  ;;  %19850 = vst [vmem:[#allocation31_spill] sm:$0xff] %v15385_v18  ;;  %v15430_v37 = vmul.f32 0.5, %v15072_v58  ;;  %v15433_v8 = vmul.f32 0.5, %v15075_v20  ;;  %v15436_v11 = vmul.f32 0.5, %v15078_v1  ;;  %v15439_v62 = vmul.f32 0.5, %v15081_v40 }
 0x531   :  { %19851 = vst [vmem:[#allocation65_spill] sm:$0xff] %v15388_v63  ;;  %19852 = vst [vmem:[#allocation34_spill] sm:$0xff] %v15391_v12  ;;  %v15442_v17 = vmul.f32 0.5, %v15084_v4  ;;  %v15445_v49 = vmul.f32 0.5, %v15087_v56  ;;  %v19871_v36 = vld [vmem:[#allocation22_spill] sm:$0xff]  ;;  %v19873_v58 = vld [vmem:[#allocation12_spill] sm:$0xff]  ;;  %8830 = vtanh.f32 %v15295_v29 }
 0x532   :  { %19853 = vst [vmem:[#allocation108_spill] sm:$0xff] %v15394_v7  ;;  %19854 = vst [vmem:[#allocation62_spill] sm:$0xff] %v15397_v47  ;;  %v19875_v20 = vld [vmem:[#allocation92_spill] sm:$0xff]  ;;  %v19877_v1 = vld [vmem:[#allocation149_spill] sm:$0xff]  ;;  %8832 = vtanh.f32 %v15298_v35 }
 0x533   :  { %19855 = vst [vmem:[#allocation71_spill] sm:$0xff] %v15400_v44  ;;  %19856 = vst [vmem:[#allocation33_spill] sm:$0xff] %v15403_v51  ;;  %v19879_v40 = vld [vmem:[#allocation91_spill] sm:$0xff]  ;;  %v19883_v56 = vld [vmem:[#allocation24_spill] sm:$0xff] }
 0x534   :  { %19857 = vst [vmem:[#allocation107_spill] sm:$0xff] %v15406_v38  ;;  %19858 = vst [vmem:[#allocation68_spill] sm:$0xff] %v15409_v2  ;;  %v19881_v4 = vld [vmem:[#allocation151_spill] sm:$0xff]  ;;  %v19899_v2 = vld [vmem:[#allocation16_spill] sm:$0xff] }
 0x535   :  { %19859 = vst [vmem:[#allocation112_spill] sm:$0xff] %v15412_v50  ;;  %19860 = vst [vmem:[#allocation74_spill] sm:$0xff] %v15415_v27  ;;  %v19897_v27 = vld [vmem:[#allocation143_spill] sm:$0xff]  ;;  %v19898_v50 = vld [vmem:[#allocation78_spill] sm:$0xff] }
 0x536   :  { %19861 = vst [vmem:[#allocation35_spill] sm:$0xff] %v15418_v14  ;;  %19862 = vst [vmem:[#allocation80_spill] sm:$0xff] %v15421_v10  ;;  %v19895_v10 = vld [vmem:[#allocation79_spill] sm:$0xff]  ;;  %v19900_v38 = vld [vmem:[#allocation146_spill] sm:$0xff] }
 0x537   :  { %19863 = vst [vmem:[#allocation116_spill] sm:$0xff] %v15424_v53  ;;  %19864 = vst [vmem:[#allocation115_spill] sm:$0xff] %v15427_v55  ;;  %v15448_v55 = vmul.f32 0.5, %v19871_v36  ;;  %v19885_v36 = vld [vmem:[#allocation153_spill] sm:$0xff]  ;;  %v19896_v14 = vld [vmem:[#allocation55_spill] sm:$0xff] }
 0x538   :  { %19865 = vst [vmem:[#allocation51_spill] sm:$0xff] %v15430_v37  ;;  %19866 = vst [vmem:[#allocation134_spill] sm:$0xff] %v15433_v8  ;;  %v15451_v37 = vmul.f32 0.5, %v19873_v58  ;;  %v15454_v8 = vmul.f32 0.5, %v19875_v20  ;;  %v19894_v53 = vld [vmem:[#allocation13_spill] sm:$0xff]  ;;  %v19907_v47 = vld [vmem:[#allocation58_spill] sm:$0xff] }
 0x539   :  { %19867 = vst [vmem:[#allocation52_spill] sm:$0xff] %v15436_v11  ;;  %19868 = vst [vmem:[#allocation135_spill] sm:$0xff] %v15439_v62  ;;  %v15457_v11 = vmul.f32 0.5, %v19877_v1  ;;  %v15460_v62 = vmul.f32 0.5, %v19879_v40  ;;  %v19901_v51 = vld [vmem:[#allocation85_spill] sm:$0xff]  ;;  %v19908_v7 = vld [vmem:[#allocation147_spill] sm:$0xff] }
 0x53a   :  { %19869 = vst [vmem:[#allocation138_spill] sm:$0xff] %v15442_v17  ;;  %19870 = vst [vmem:[#allocation61_spill] sm:$0xff] %v15445_v49  ;;  %v15463_v17 = vmul.f32 0.5, %v19881_v4  ;;  %v15466_v49 = vmul.f32 0.5, %v19883_v56  ;;  %v19903_v44 = vld [vmem:[#allocation145_spill] sm:$0xff]  ;;  %v19909_v12 = vld [vmem:[#allocation90_spill] sm:$0xff] }
 0x53b   :  { %19872 = vst [vmem:[#allocation137_spill] sm:$0xff] %v15448_v55  ;;  %19874 = vst [vmem:[#allocation163_spill] sm:$0xff] %v15451_v37  ;;  %v15469_v55 = vmul.f32 0.5, %v19885_v36  ;;  %v19887_v37 = vld [vmem:[#allocation60_spill] sm:$0xff]  ;;  %v19914_v26 = vld [vmem:[#allocation117_spill] sm:$0xff] }
 0x53c   :  { %19876 = vst [vmem:[#allocation164_spill] sm:$0xff] %v15454_v8  ;;  %19878 = vst [vmem:[#allocation165_spill] sm:$0xff] %v15457_v11  ;;  %v4930_v20 = vmul.f32 %v15255_v5, %v19887_v37  ;;  %v19888_v8 = vld [vmem:[#allocation41_spill] sm:$0xff]  ;;  %v4976_v37 = vmul.f32 %v15255_v5, %v19894_v53  ;;  %v4990_v53 = vmul.f32 %v15255_v5, %v19901_v51  ;;  %v19910_v63 = vld [vmem:[#allocation64_spill] sm:$0xff] }
 0x53d   :  { %19880 = vst [vmem:[#allocation166_spill] sm:$0xff] %v15460_v62  ;;  %19882 = vst [vmem:[#allocation167_spill] sm:$0xff] %v15463_v17  ;;  %v4932_v1 = vmul.f32 %v15255_v5, %v19888_v8  ;;  %v19889_v11 = vld [vmem:[#allocation133_spill] sm:$0xff]  ;;  %v19891_v17 = vld [vmem:[#allocation56_spill] sm:$0xff]  ;;  %v4978_v8 = vmul.f32 %v15255_v5, %v19895_v10  ;;  %v4992_v10 = vmul.f32 %v15255_v5, %v19902_v25 }
 0x53e   :  { %19884 = vst [vmem:[#allocation168_spill] sm:$0xff] %v15466_v49  ;;  %19886 = vst [vmem:[#allocation169_spill] sm:$0xff] %v15469_v55  ;;  %v4966_v40 = vmul.f32 %v15255_v5, %v19889_v11  ;;  %v19890_v62 = vld [vmem:[#allocation57_spill] sm:$0xff]  ;;  %v4970_v56 = vmul.f32 %v15255_v5, %v19891_v17  ;;  %v19892_v49 = vld [vmem:[#allocation72_spill] sm:$0xff]  ;;  %v4980_v11 = vmul.f32 %v15255_v5, %v19896_v14 }
 0x53f   :  { %v4968_v4 = vmul.f32 %v15255_v5, %v19890_v62  ;;  %v4972_v36 = vmul.f32 %v15255_v5, %v19892_v49  ;;  %v19893_v55 = vld [vmem:[#allocation141_spill] sm:$0xff]  ;;  %v4982_v62 = vmul.f32 %v15255_v5, %v19897_v27  ;;  %v4984_v17 = vmul.f32 %v15255_v5, %v19898_v50  ;;  %v19916_v52 = vld [vmem:[#allocation8_spill] sm:$0xff]  ;;  %v19918_v0 = vld [vmem:[#allocation7_spill] sm:$0xff] }
 0x540   :  { %v4974_v58 = vmul.f32 %v15255_v5, %v19893_v55  ;;  %v4986_v49 = vmul.f32 %v15255_v5, %v19899_v2  ;;  %v4988_v55 = vmul.f32 %v15255_v5, %v19900_v38  ;;  %v4994_v14 = vmul.f32 %v15255_v5, %v19903_v44  ;;  %v19917_v6 = vld [vmem:[#allocation5_spill] sm:$0xff]  ;;  %v19920_v31 = vld [vmem:[#allocation54_spill] sm:$0xff] }
 0x541   :  { %v15507_v27 = vadd.f32 %v15135_v15, %v4930_v20  ;;  %v15510_v50 = vadd.f32 %v15135_v15, %v4932_v1  ;;  %v4996_v2 = vmul.f32 %v15255_v5, %v19906_v41  ;;  %v4998_v38 = vmul.f32 %v15255_v5, %v19907_v47  ;;  %v19911_v20 = vld [vmem:[#allocation89_spill] sm:$0xff]  ;;  %v19912_v1 = vld [vmem:[#allocation94_spill] sm:$0xff] }
 0x542   :  { %v5000_v51 = vmul.f32 %v15255_v5, %v19908_v7  ;;  %v5002_v25 = vmul.f32 %v15255_v5, %v19909_v12  ;;  %v5004_v44 = vmul.f32 %v15255_v5, %v19910_v63  ;;  %v5006_v18 = vmul.f32 %v15255_v5, %v19911_v20  ;;  %v19971_v35 = vld [vmem:[#allocation121_spill] sm:$0xff] }
 0x543   :  { %19904 = vst [vmem:[#allocation60_spill] sm:$0xff] %v15507_v27  ;;  %19905 = vst [vmem:[#allocation41_spill] sm:$0xff] %v15510_v50  ;;  %v5008_v45 = vmul.f32 %v15255_v5, %v19912_v1  ;;  %v19913_v50 = vld [vmem:[#allocation93_spill] sm:$0xff]  ;;  %v5012_v47 = vmul.f32 %v15255_v5, %v19914_v26  ;;  %v19915_v27 = vld [vmem:[#allocation6_spill] sm:$0xff]  ;;  %v5016_v12 = vmul.f32 %v15255_v5, %v19916_v52 }
 0x544   :  { %v5010_v41 = vmul.f32 %v15255_v5, %v19913_v50  ;;  %v5014_v7 = vmul.f32 %v15255_v5, %v19915_v27  ;;  %v5018_v63 = vmul.f32 %v15255_v5, %v19917_v6  ;;  %v5020_v20 = vmul.f32 %v15255_v5, %v19918_v0 }
 0x545   :  { %v5022_v1 = vmul.f32 %v15255_v5, %v19919_v42  ;;  %v5024_v50 = vmul.f32 %v15255_v5, %v19920_v31  ;;  %v5026_v26 = vmul.f32 %v15255_v5, %v19921_v46  ;;  %v15545_v27 = vadd.f32 %v15135_v15, %v4966_v40 }
 0x546   :  { %v15548_v52 = vadd.f32 %v15135_v15, %v4968_v4  ;;  %v15551_v6 = vadd.f32 %v15135_v15, %v4970_v56  ;;  %v15554_v0 = vadd.f32 %v15135_v15, %v4972_v36  ;;  %v15557_v42 = vadd.f32 %v15135_v15, %v4974_v58 }
 0x547   :  { %19922 = vst [vmem:[#allocation133_spill] sm:$0xff] %v15545_v27  ;;  %v15560_v31 = vadd.f32 %v15135_v15, %v4976_v37  ;;  %v15563_v46 = vadd.f32 %v15135_v15, %v4978_v8  ;;  %v15566_v40 = vadd.f32 %v15135_v15, %v4980_v11  ;;  %v15569_v4 = vadd.f32 %v15135_v15, %v4982_v62 }
 0x548   :  { %19923 = vst [vmem:[#allocation57_spill] sm:$0xff] %v15548_v52  ;;  %19924 = vst [vmem:[#allocation56_spill] sm:$0xff] %v15551_v6  ;;  %v15572_v56 = vadd.f32 %v15135_v15, %v4984_v17  ;;  %v15575_v36 = vadd.f32 %v15135_v15, %v4986_v49  ;;  %v15578_v58 = vadd.f32 %v15135_v15, %v4988_v55 }
 0x549   :  { %19925 = vst [vmem:[#allocation72_spill] sm:$0xff] %v15554_v0  ;;  %19926 = vst [vmem:[#allocation141_spill] sm:$0xff] %v15557_v42  ;;  %v15581_v37 = vadd.f32 %v15135_v15, %v4990_v53  ;;  %v15584_v8 = vadd.f32 %v15135_v15, %v4992_v10  ;;  %v15587_v11 = vadd.f32 %v15135_v15, %v4994_v14 }
 0x54a   :  { %19927 = vst [vmem:[#allocation13_spill] sm:$0xff] %v15560_v31  ;;  %19928 = vst [vmem:[#allocation79_spill] sm:$0xff] %v15563_v46  ;;  %v15590_v62 = vadd.f32 %v15135_v15, %v4996_v2  ;;  %v15593_v17 = vadd.f32 %v15135_v15, %v4998_v38  ;;  %v15596_v49 = vadd.f32 %v15135_v15, %v5000_v51 }
 0x54b   :  { %19929 = vst [vmem:[#allocation55_spill] sm:$0xff] %v15566_v40  ;;  %19930 = vst [vmem:[#allocation143_spill] sm:$0xff] %v15569_v4  ;;  %v15599_v55 = vadd.f32 %v15135_v15, %v5002_v25  ;;  %v15602_v53 = vadd.f32 %v15135_v15, %v5004_v44  ;;  %v15605_v10 = vadd.f32 %v15135_v15, %v5006_v18  ;;  %v20118_v4 = vld [vmem:[#allocation167_spill] sm:$0xff]  ;;  %v20122_v40 = vld [vmem:[#allocation168_spill] sm:$0xff] }
 0x54c   :  { %19931 = vst [vmem:[#allocation78_spill] sm:$0xff] %v15572_v56  ;;  %19932 = vst [vmem:[#allocation16_spill] sm:$0xff] %v15575_v36  ;;  %v15608_v14 = vadd.f32 %v15135_v15, %v5008_v45  ;;  %v15611_v2 = vadd.f32 %v15135_v15, %v5010_v41  ;;  %v15614_v38 = vadd.f32 %v15135_v15, %v5012_v47  ;;  %v19950_v45 = vmin.f32 %v15304_v39, 20.0  ;;  %v19961_v39 = vld [vmem:[#allocation157_spill] sm:$0xff]  ;;  %v19992_v36 = vld [vmem:[#allocation132_spill] sm:$0xff] }
 0x54d   :  { %19933 = vst [vmem:[#allocation146_spill] sm:$0xff] %v15578_v58  ;;  %19934 = vst [vmem:[#allocation85_spill] sm:$0xff] %v15581_v37  ;;  %v15617_v51 = vadd.f32 %v15135_v15, %v5014_v7  ;;  %v15620_v25 = vadd.f32 %v15135_v15, %v5016_v12  ;;  %v15623_v44 = vadd.f32 %v15135_v15, %v5018_v63  ;;  %v19954_v12 = vld [vmem:[#allocation95_spill] sm:$0xff]  ;;  %v19990_v37 = vld [vmem:[#allocation130_spill] sm:$0xff] }
 0x54e   :  { %19935 = vst [vmem:[#allocation59_spill] sm:$0xff] %v15584_v8  ;;  %19936 = vst [vmem:[#allocation145_spill] sm:$0xff] %v15587_v11  ;;  %v15626_v18 = vadd.f32 %v15135_v15, %v5020_v20  ;;  %v15631_v41 = vadd.f32 %v15135_v15, %v5022_v1  ;;  %v15634_v47 = vadd.f32 %v15135_v15, %v5024_v50  ;;  %v19956_v63 = vld [vmem:[#allocation155_spill] sm:$0xff]  ;;  %v19958_v20 = vld [vmem:[#allocation100_spill] sm:$0xff]  ;;  %v15652_v50 = vmul.f32 0.5, %v19961_v39 }
 0x54f   :  { %19937 = vst [vmem:[#allocation84_spill] sm:$0xff] %v15590_v62  ;;  %19938 = vst [vmem:[#allocation58_spill] sm:$0xff] %v15593_v17  ;;  %v15637_v7 = vadd.f32 %v15135_v15, %v5026_v26  ;;  %v19969_v39 = vld [vmem:[#allocation38_spill] sm:$0xff]  ;;  %v19991_v58 = vld [vmem:[#allocation129_spill] sm:$0xff] }
 0x550   :  { %19939 = vst [vmem:[#allocation147_spill] sm:$0xff] %v15596_v49  ;;  %19940 = vst [vmem:[#allocation90_spill] sm:$0xff] %v15599_v55  ;;  %v19993_v56 = vld [vmem:[#allocation50_spill] sm:$0xff] }
 0x551   :  { %19941 = vst [vmem:[#allocation64_spill] sm:$0xff] %v15602_v53  ;;  %19942 = vst [vmem:[#allocation89_spill] sm:$0xff] %v15605_v10 }
 0x552   :  { %19943 = vst [vmem:[#allocation94_spill] sm:$0xff] %v15608_v14  ;;  %19944 = vst [vmem:[#allocation93_spill] sm:$0xff] %v15611_v2  ;;  %v5739_v14 = vmul.f32 1.442695, %v19950_v45  ;;  %v19960_v45 = vld [vmem:[#allocation77_spill] sm:$0xff]  ;;  %v19977_v2 = vld [vmem:[#allocation123_spill] sm:$0xff] }
 0x553   :  { %19945 = vst [vmem:[#allocation117_spill] sm:$0xff] %v15614_v38  ;;  %19946 = vst [vmem:[#allocation6_spill] sm:$0xff] %v15617_v51  ;;  %v4902_v1 = vmul.f32 %v15255_v5, %v19960_v45 }
 0x554   :  { %19947 = vst [vmem:[#allocation8_spill] sm:$0xff] %v15620_v25  ;;  %19948 = vst [vmem:[#allocation5_spill] sm:$0xff] %v15623_v44  ;;  %v15640_v25 = vmul.f32 0.5, %v19954_v12  ;;  %v15643_v44 = vmul.f32 0.5, %v19956_v63  ;;  %v19965_v12 = vld [vmem:[#allocation36_spill] sm:$0xff]  ;;  %8834 = vpow2.f32 %v5739_v14 }
 0x555   :  { %19949 = vst [vmem:[#allocation7_spill] sm:$0xff] %v15626_v18  ;;  %19951 = vst [vmem:[#allocation14_spill] sm:$0xff] %v15631_v41  ;;  %v15646_v18 = vmul.f32 0.5, %v19958_v20  ;;  %v4904_v63 = vmul.f32 %v15255_v5, %v19965_v12  ;;  %v4916_v41 = vmul.f32 %v15255_v5, %v19971_v35  ;;  %v19972_v12 = vld [vmem:[#allocation40_spill] sm:$0xff]  ;;  %8836 = vtanh.f32 %v15301_v60 }
 0x556   :  { %19952 = vst [vmem:[#allocation54_spill] sm:$0xff] %v15634_v47  ;;  %19953 = vst [vmem:[#allocation15_spill] sm:$0xff] %v15637_v7  ;;  %v19963_v47 = vld [vmem:[#allocation23_spill] sm:$0xff]  ;;  %v19975_v14 = vld [vmem:[#allocation124_spill] sm:$0xff]  ;;  %v4928_v35 = vmul.f32 %v15255_v5, %v19977_v2  ;;  %8838 = vtanh.f32 %v15307_v48 }
 0x557   :  { %19955 = vst [vmem:[#allocation170_spill] sm:$0xff] %v15640_v25  ;;  %19957 = vst [vmem:[#allocation171_spill] sm:$0xff] %v15643_v44  ;;  %v15655_v26 = vmul.f32 0.5, %v19963_v47  ;;  %v19966_v7 = vld [vmem:[#allocation83_spill] sm:$0xff]  ;;  %v19968_v44 = vld [vmem:[#allocation88_spill] sm:$0xff]  ;;  %v4918_v25 = vmul.f32 %v15255_v5, %v19972_v12  ;;  %8840 = vtanh.f32 %v15310_v16 }
 0x558   :  { %19959 = vst [vmem:[#allocation172_spill] sm:$0xff] %v15646_v18  ;;  %19962 = vst [vmem:[#allocation77_spill] sm:$0xff] %v15652_v50  ;;  %v4906_v20 = vmul.f32 %v15255_v5, %v19966_v7  ;;  %v19967_v18 = vld [vmem:[#allocation111_spill] sm:$0xff]  ;;  %v4910_v45 = vmul.f32 %v15255_v5, %v19968_v44  ;;  %v4912_v50 = vmul.f32 %v15255_v5, %v19969_v39  ;;  %v19970_v47 = vld [vmem:[#allocation37_spill] sm:$0xff]  ;;  %8842 = vtanh.f32 %v15313_v24 }
 0x559   :  { %19964 = vst [vmem:[#allocation173_spill] sm:$0xff] %v15655_v26  ;;  %v4908_v29 = vmul.f32 %v15255_v5, %v19967_v18  ;;  %v4914_v26 = vmul.f32 %v15255_v5, %v19970_v47  ;;  %v19973_v7 = vld [vmem:[#allocation120_spill] sm:$0xff]  ;;  %v19974_v18 = vld [vmem:[#allocation39_spill] sm:$0xff]  ;;  %v4924_v39 = vmul.f32 %v15255_v5, %v19975_v14  ;;  %v19976_v44 = vld [vmem:[#allocation42_spill] sm:$0xff]  ;;  %8844 = vtanh.f32 %v15316_v28 }
 0x55a   :  { %v4920_v51 = vmul.f32 %v15255_v5, %v19973_v7  ;;  %v4922_v38 = vmul.f32 %v15255_v5, %v19974_v18  ;;  %v4926_v47 = vmul.f32 %v15255_v5, %v19976_v44  ;;  %v19978_v12 = vld [vmem:[#allocation140_spill] sm:$0xff]  ;;  %v19979_v7 = vld [vmem:[#allocation126_spill] sm:$0xff]  ;;  %v19980_v18 = vld [vmem:[#allocation67_spill] sm:$0xff]  ;;  %8846 = vtanh.f32 %v15319_v61 }
 0x55b   :  { %v4934_v10 = vmul.f32 %v15255_v5, %v19978_v12  ;;  %v4936_v53 = vmul.f32 %v15255_v5, %v19979_v7  ;;  %v4938_v60 = vmul.f32 %v15255_v5, %v19980_v18  ;;  %v19981_v14 = vld [vmem:[#allocation44_spill] sm:$0xff]  ;;  %v19982_v44 = vld [vmem:[#allocation139_spill] sm:$0xff]  ;;  %v19983_v2 = vld [vmem:[#allocation125_spill] sm:$0xff]  ;;  %v4962_v28 = vmul.f32 %v15255_v5, %v19992_v36 }
 0x55c   :  { %v4940_v55 = vmul.f32 %v15255_v5, %v19981_v14  ;;  %v4942_v49 = vmul.f32 %v15255_v5, %v19982_v44  ;;  %v4944_v48 = vmul.f32 %v15255_v5, %v19983_v2  ;;  %v19984_v12 = vld [vmem:[#allocation66_spill] sm:$0xff]  ;;  %v19985_v7 = vld [vmem:[#allocation43_spill] sm:$0xff]  ;;  %v19987_v14 = vld [vmem:[#allocation128_spill] sm:$0xff]  ;;  %8848 = vtanh.f32 %v15322_v33 }
 0x55d   :  { %v4946_v17 = vmul.f32 %v15255_v5, %v19984_v12  ;;  %v4948_v62 = vmul.f32 %v15255_v5, %v19985_v7  ;;  %v19986_v18 = vld [vmem:[#allocation142_spill] sm:$0xff]  ;;  %v4952_v11 = vmul.f32 %v15255_v5, %v19987_v14  ;;  %v19989_v2 = vld [vmem:[#allocation127_spill] sm:$0xff]  ;;  %v8831_v12 = vpop.eup %8830  ;;  %v4958_v7 = vmul.f32 %v15255_v5, %v19990_v37 }
 0x55e   :  { %v4950_v16 = vmul.f32 %v15255_v5, %v19986_v18  ;;  %v19988_v44 = vld [vmem:[#allocation46_spill] sm:$0xff]  ;;  %v4956_v24 = vmul.f32 %v15255_v5, %v19989_v2  ;;  %v4960_v18 = vmul.f32 %v15255_v5, %v19991_v58  ;;  %v8833_v14 = vpop.eup %8832  ;;  %v15724_v2 = vadd.f32 %v15135_v15, %v4902_v1  ;;  %v20133_v46 = vld [vmem:[#allocation171_spill] sm:$0xff] }
 0x55f   :  { %v4954_v8 = vmul.f32 %v15255_v5, %v19988_v44  ;;  %v4964_v44 = vmul.f32 %v15255_v5, %v19993_v56  ;;  %v15727_v61 = vadd.f32 %v15135_v15, %v4904_v63  ;;  %8850 = vtanh.f32 %v15325_v57  ;;  %v15740_v5 = vpop.eup %8834 }
 0x560   :  { %v15731_v37 = vadd.f32 %v15135_v15, %v4906_v20  ;;  %v15734_v58 = vadd.f32 %v15135_v15, %v4908_v29  ;;  %v15737_v33 = vadd.f32 %v15135_v15, %v4910_v45  ;;  %8852 = vtanh.f32 %v15328_v59  ;;  %19998 = vst [vmem:[#allocation38_spill] sm:$0xff] %v15740_v5  ;;  %v15752_v63 = vpop.eup %8836 }
 0x561   :  { %19994 = vst [vmem:[#allocation36_spill] sm:$0xff] %v15727_v61  ;;  %v15743_v56 = vadd.f32 %v15135_v15, %v4912_v50  ;;  %v15746_v36 = vadd.f32 %v15135_v15, %v4914_v26  ;;  %v15749_v57 = vadd.f32 %v15135_v15, %v4916_v41  ;;  %8854 = vtanh.f32 %v15331_v34  ;;  %v15764_v50 = vpop.eup %8838 }
 0x562   :  { %19995 = vst [vmem:[#allocation83_spill] sm:$0xff] %v15731_v37  ;;  %19996 = vst [vmem:[#allocation111_spill] sm:$0xff] %v15734_v58  ;;  %v15755_v20 = vadd.f32 %v15135_v15, %v4918_v25  ;;  %v15758_v59 = vadd.f32 %v15135_v15, %v4920_v51  ;;  %v15761_v1 = vadd.f32 %v15135_v15, %v4922_v38  ;;  %8856 = vtanh.f32 %v15334_v3  ;;  %v15776_v51 = vpop.eup %8840 }
 0x563   :  { %19997 = vst [vmem:[#allocation88_spill] sm:$0xff] %v15737_v33  ;;  %19999 = vst [vmem:[#allocation37_spill] sm:$0xff] %v15743_v56  ;;  %v15767_v41 = vadd.f32 %v15135_v15, %v4924_v39  ;;  %v15770_v34 = vadd.f32 %v15135_v15, %v4926_v47  ;;  %v15773_v26 = vadd.f32 %v15135_v15, %v4928_v35  ;;  %8858 = vtanh.f32 %v15337_v13  ;;  %v15785_v29 = vpop.eup %8842 }
 0x564   :  { %20000 = vst [vmem:[#allocation121_spill] sm:$0xff] %v15746_v36  ;;  %20001 = vst [vmem:[#allocation40_spill] sm:$0xff] %v15749_v57  ;;  %v15779_v38 = vadd.f32 %v15135_v15, %v4934_v10  ;;  %v15782_v3 = vadd.f32 %v15135_v15, %v4936_v53  ;;  %8860 = vtanh.f32 %v15340_v23  ;;  %v5293_v25 = vmul.f32 0.5, %v8831_v12  ;;  %v15794_v47 = vpop.eup %8844 }
 0x565   :  { %20002 = vst [vmem:[#allocation120_spill] sm:$0xff] %v15755_v20  ;;  %20003 = vst [vmem:[#allocation39_spill] sm:$0xff] %v15758_v59  ;;  %v15788_v45 = vadd.f32 %v15135_v15, %v4938_v60  ;;  %v15791_v39 = vadd.f32 %v15135_v15, %v4940_v55  ;;  %8862 = vtanh.f32 %v15343_v19  ;;  %v5294_v13 = vmul.f32 0.5, %v8833_v14  ;;  %v15806_v35 = vpop.eup %8846  ;;  %v20032_v59 = vld [vmem:[#allocation41_spill] sm:$0xff] }
 0x566   :  { %20004 = vst [vmem:[#allocation124_spill] sm:$0xff] %v15761_v1  ;;  %20005 = vst [vmem:[#allocation42_spill] sm:$0xff] %v15767_v41  ;;  %v15797_v10 = vadd.f32 %v15135_v15, %v4942_v49  ;;  %v15800_v53 = vadd.f32 %v15135_v15, %v4944_v48  ;;  %v15803_v23 = vadd.f32 %v15135_v15, %v4946_v17  ;;  %8864 = vtanh.f32 %v15346_v54  ;;  %v15818_v49 = vpop.eup %8848  ;;  %v20031_v1 = vld [vmem:[#allocation122_spill] sm:$0xff] }
 0x567   :  { %20006 = vst [vmem:[#allocation123_spill] sm:$0xff] %v15770_v34  ;;  %20007 = vst [vmem:[#allocation140_spill] sm:$0xff] %v15773_v26  ;;  %v15809_v55 = vadd.f32 %v15135_v15, %v4948_v62  ;;  %v15812_v19 = vadd.f32 %v15135_v15, %v4950_v16  ;;  %v15815_v60 = vadd.f32 %v15135_v15, %v4952_v11  ;;  %8866 = vtanh.f32 %v15349_v22 }
 0x568   :  { %20008 = vst [vmem:[#allocation126_spill] sm:$0xff] %v15788_v45  ;;  %20009 = vst [vmem:[#allocation67_spill] sm:$0xff] %v15791_v39  ;;  %v15821_v17 = vadd.f32 %v15135_v15, %v4954_v8  ;;  %v15824_v54 = vadd.f32 %v15135_v15, %v4956_v24  ;;  %8868 = vtanh.f32 %v15352_v30  ;;  %v5357_v62 = vadd.f32 0.5, %v5293_v25 }
 0x569   :  { %20010 = vst [vmem:[#allocation44_spill] sm:$0xff] %v15797_v10  ;;  %20011 = vst [vmem:[#allocation139_spill] sm:$0xff] %v15800_v53  ;;  %v15827_v48 = vpop.eup %8850  ;;  %v15830_v16 = vadd.f32 %v15135_v15, %v4958_v7  ;;  %v15833_v11 = vadd.f32 %v15135_v15, %v4960_v18  ;;  %8870 = vtanh.f32 %v15355_v43  ;;  %v5358_v22 = vadd.f32 0.5, %v5294_v13  ;;  %v20025_v18 = vld [vmem:[#allocation99_spill] sm:$0xff]  ;;  %v20034_v43 = vld [vmem:[#allocation32_spill] sm:$0xff] }
 0x56a   :  { %20012 = vst [vmem:[#allocation125_spill] sm:$0xff] %v15803_v23  ;;  %20013 = vst [vmem:[#allocation66_spill] sm:$0xff] %v15809_v55  ;;  %v15836_v12 = vpop.eup %8852  ;;  %v15839_v8 = vadd.f32 %v15135_v15, %v4962_v28  ;;  %v15842_v24 = vadd.f32 %v15135_v15, %v4964_v44  ;;  %8872 = vtanh.f32 %v15358_v9  ;;  %v20022_v15 = vld [vmem:[#allocation159_spill] sm:$0xff]  ;;  %vm5501_vm10 = vcmp.gt.f32.partialorder %v15779_v38, 20.0 }
 0x56b   :  { %20014 = vst [vmem:[#allocation43_spill] sm:$0xff] %v15812_v19  ;;  %20015 = vst [vmem:[#allocation142_spill] sm:$0xff] %v15815_v60  ;;  %v15846_v7 = vpop.eup %8854  ;;  %8874 = vtanh.f32 %v15361_v32  ;;  %v15856_v28 = vmul.f32 %v5357_v62, %v20022_v15  ;;  %v20024_v32 = vld [vmem:[#allocation113_spill] sm:$0xff]  ;;  %v15864_v30 = vmul.f32 %v5358_v22, %v20025_v18  ;;  %v5295_v22 = vmul.f32 0.5, %v15752_v63  ;;  %v20036_v15 = vld [vmem:[#allocation31_spill] sm:$0xff] }
 0x56c   :  { %20016 = vst [vmem:[#allocation128_spill] sm:$0xff] %v15821_v17  ;;  %20017 = vst [vmem:[#allocation46_spill] sm:$0xff] %v15824_v54  ;;  %v15852_v25 = vpop.eup %8856  ;;  %8876 = vtanh.f32 %v15364_v21  ;;  %v20027_v21 = vld [vmem:[#allocation119_spill] sm:$0xff]  ;;  %v20040_v62 = vld [vmem:[#allocation34_spill] sm:$0xff]  ;;  %vm5502_vm3 = vcmp.gt.f32.partialorder %v15782_v3, 20.0  ;;  %vm5485_vm2 = vcmp.gt.f32.partialorder %v15724_v2, 20.0 }
 0x56d   :  { %20018 = vst [vmem:[#allocation127_spill] sm:$0xff] %v15830_v16  ;;  %20019 = vst [vmem:[#allocation130_spill] sm:$0xff] %v15833_v11  ;;  %v15860_v13 = vpop.eup %8858  ;;  %8878 = vtanh.f32 %v20024_v32  ;;  %v20028_v32 = vld [vmem:[#allocation29_spill] sm:$0xff]  ;;  %v20042_v63 = vld [vmem:[#allocation108_spill] sm:$0xff] }
 0x56e   :  { %20020 = vst [vmem:[#allocation129_spill] sm:$0xff] %v15839_v8  ;;  %20021 = vst [vmem:[#allocation132_spill] sm:$0xff] %v15842_v24  ;;  %v15868_v5 = vpop.eup %8860  ;;  %8880 = vtanh.f32 %v20027_v21  ;;  %v5296_v21 = vmul.f32 0.5, %v15764_v50 }
 0x56f   :  { %20023 = vst [vmem:[#allocation50_spill] sm:$0xff] %v15856_v28  ;;  %20026 = vst [vmem:[#allocation159_spill] sm:$0xff] %v15864_v30  ;;  %v15874_v9 = vpop.eup %8862  ;;  %8882 = vtanh.f32 %v20028_v32  ;;  %v20029_v30 = vld [vmem:[#allocation118_spill] sm:$0xff]  ;;  %v5297_v32 = vmul.f32 0.5, %v15776_v51 }
 0x570   :  { %v8865_v14 = vpop.eup %8864  ;;  %8884 = vtanh.f32 %v20029_v30  ;;  %v5360_v30 = vadd.f32 0.5, %v5296_v21 }
 0x571   :  { %v8867_v44 = vpop.eup %8866  ;;  %8886 = vtanh.f32 %v20031_v1  ;;  %v5359_v1 = vadd.f32 0.5, %v5295_v22  ;;  %v5361_v22 = vadd.f32 0.5, %v5297_v32 }
 0x572   :  { %v15888_v41 = vpop.eup %8868  ;;  %8888 = vtanh.f32 %v20034_v43  ;;  %v5298_v43 = vmul.f32 0.5, %v15785_v29 }
 0x573   :  { %20033 = vst [vmem:[#allocation113_spill] sm:$0xff] %v15888_v41  ;;  %v15894_v28 = vpop.eup %8870  ;;  %8890 = vtanh.f32 %v20036_v15  ;;  %v20038_v41 = vld [vmem:[#allocation65_spill] sm:$0xff]  ;;  %v5299_v15 = vmul.f32 0.5, %v15794_v47 }
 0x574   :  { %20035 = vst [vmem:[#allocation99_spill] sm:$0xff] %v15894_v28  ;;  %v15899_v18 = vpop.eup %8872  ;;  %8892 = vtanh.f32 %v20038_v41  ;;  %v20045_v47 = vld [vmem:[#allocation161_spill] sm:$0xff]  ;;  %v5301_v41 = vmul.f32 0.5, %v15818_v49  ;;  %v5362_v29 = vadd.f32 0.5, %v5298_v43  ;;  %v5303_v49 = vmul.f32 0.5, %v15836_v12 }
 0x575   :  { %20037 = vst [vmem:[#allocation119_spill] sm:$0xff] %v15899_v18  ;;  %v15904_v45 = vpop.eup %8874  ;;  %8894 = vtanh.f32 %v20040_v62  ;;  %v5300_v62 = vmul.f32 0.5, %v15806_v35  ;;  %v15920_v32 = vmul.f32 %v5359_v1, %v20045_v47  ;;  %v20049_v18 = vld [vmem:[#allocation102_spill] sm:$0xff]  ;;  %v5302_v35 = vmul.f32 0.5, %v15827_v48  ;;  %v20053_v47 = vld [vmem:[#allocation19_spill] sm:$0xff] }
 0x576   :  { %20039 = vst [vmem:[#allocation29_spill] sm:$0xff] %v15904_v45  ;;  %v15909_v28 = vpop.eup %8876  ;;  %8896 = vtanh.f32 %v20042_v63  ;;  %v20044_v45 = vld [vmem:[#allocation62_spill] sm:$0xff]  ;;  %v20048_v63 = vld [vmem:[#allocation71_spill] sm:$0xff]  ;;  %v15928_v21 = vmul.f32 %v5360_v30, %v20049_v18  ;;  %v5363_v1 = vadd.f32 0.5, %v5299_v15  ;;  %v5304_v43 = vmul.f32 0.5, %v15846_v7 }
 0x577   :  { %20041 = vst [vmem:[#allocation118_spill] sm:$0xff] %v15909_v28  ;;  %v15915_v50 = vpop.eup %8878  ;;  %8898 = vtanh.f32 %v20044_v45  ;;  %20046 = vst [vmem:[#allocation32_spill] sm:$0xff] %v15920_v32  ;;  %v20052_v45 = vld [vmem:[#allocation33_spill] sm:$0xff]  ;;  %v15935_v32 = vmul.f32 %v5361_v22, %v20053_v47  ;;  %v5305_v18 = vmul.f32 0.5, %v15852_v25  ;;  %v5306_v48 = vmul.f32 0.5, %v15860_v13  ;;  %v20060_v47 = vld [vmem:[#allocation112_spill] sm:$0xff] }
 0x578   :  { %20043 = vst [vmem:[#allocation122_spill] sm:$0xff] %v15915_v50  ;;  %v15923_v28 = vpop.eup %8880  ;;  %8900 = vtanh.f32 %v20048_v63  ;;  %20050 = vst [vmem:[#allocation65_spill] sm:$0xff] %v15928_v21  ;;  %v20058_v63 = vld [vmem:[#allocation68_spill] sm:$0xff]  ;;  %v5307_v15 = vmul.f32 0.5, %v15868_v5  ;;  %v5364_v22 = vadd.f32 0.5, %v5300_v62  ;;  %v5309_v12 = vmul.f32 0.5, %v8865_v14 }
 0x579   :  { %20047 = vst [vmem:[#allocation31_spill] sm:$0xff] %v15923_v28  ;;  %v15930_v50 = vpop.eup %8882  ;;  %8902 = vtanh.f32 %v20052_v45  ;;  %20054 = vst [vmem:[#allocation108_spill] sm:$0xff] %v15935_v32  ;;  %v20056_v28 = vld [vmem:[#allocation107_spill] sm:$0xff]  ;;  %v20061_v32 = vld [vmem:[#allocation26_spill] sm:$0xff]  ;;  %v5366_v13 = vadd.f32 0.5, %v5302_v35  ;;  %v5367_v62 = vadd.f32 0.5, %v5303_v49 }
 0x57a   :  { %20051 = vst [vmem:[#allocation34_spill] sm:$0xff] %v15930_v50  ;;  %v15937_v51 = vpop.eup %8884  ;;  %8904 = vtanh.f32 %v20056_v28  ;;  %v5308_v28 = vmul.f32 0.5, %v15874_v9  ;;  %v15953_v7 = vmul.f32 %v5362_v29, %v20061_v32  ;;  %v20064_v21 = vld [vmem:[#allocation74_spill] sm:$0xff]  ;;  %v20066_v5 = vld [vmem:[#allocation35_spill] sm:$0xff]  ;;  %v20068_v14 = vld [vmem:[#allocation80_spill] sm:$0xff]  ;;  %v5370_v9 = vadd.f32 0.5, %v5306_v48 }
 0x57b   :  { %20055 = vst [vmem:[#allocation62_spill] sm:$0xff] %v15937_v51  ;;  %v15943_v30 = vpop.eup %8886  ;;  %8906 = vtanh.f32 %v20058_v63  ;;  %v5310_v63 = vmul.f32 0.5, %v8867_v44  ;;  %v5371_v29 = vadd.f32 0.5, %v5307_v15  ;;  %v20069_v32 = vld [vmem:[#allocation87_spill] sm:$0xff]  ;;  %v20071_v44 = vld [vmem:[#allocation116_spill] sm:$0xff]  ;;  %v5373_v35 = vadd.f32 0.5, %v5309_v12 }
 0x57c   :  { %20057 = vst [vmem:[#allocation161_spill] sm:$0xff] %v15943_v30  ;;  %v15948_v45 = vpop.eup %8888  ;;  %8908 = vtanh.f32 %v20060_v47  ;;  %20062 = vst [vmem:[#allocation102_spill] sm:$0xff] %v15953_v7  ;;  %v5365_v30 = vadd.f32 0.5, %v5301_v41  ;;  %v5369_v47 = vadd.f32 0.5, %v5305_v18  ;;  %v5372_v41 = vadd.f32 0.5, %v5308_v28  ;;  %v20077_v15 = vld [vmem:[#allocation101_spill] sm:$0xff] }
 0x57d   :  { %20059 = vst [vmem:[#allocation71_spill] sm:$0xff] %v15948_v45  ;;  %v15955_v25 = vpop.eup %8890  ;;  %8910 = vtanh.f32 %v20064_v21  ;;  %v5368_v45 = vadd.f32 0.5, %v5304_v43  ;;  %v20074_v43 = vld [vmem:[#allocation115_spill] sm:$0xff]  ;;  %v5374_v18 = vadd.f32 0.5, %v5310_v63  ;;  %v20080_v28 = vld [vmem:[#allocation21_spill] sm:$0xff] }
 0x57e   :  { %20063 = vst [vmem:[#allocation33_spill] sm:$0xff] %v15955_v25  ;;  %v15958_v51 = vpop.eup %8892  ;;  %8912 = vtanh.f32 %v20066_v5  ;;  %v15965_v25 = vmul.f32 %v5363_v1, %v20069_v32  ;;  %v15980_v1 = vmul.f32 %v5366_v13, %v20077_v15  ;;  %v15986_v12 = vmul.f32 %v5367_v62, %v20080_v28  ;;  %v20091_v28 = vld [vmem:[#allocation52_spill] sm:$0xff] }
 0x57f   :  { %20065 = vst [vmem:[#allocation19_spill] sm:$0xff] %v15958_v51  ;;  %v15961_v50 = vpop.eup %8894  ;;  %8914 = vtanh.f32 %v20068_v14  ;;  %v20072_v51 = vld [vmem:[#allocation98_spill] sm:$0xff] }
 0x580   :  { %20067 = vst [vmem:[#allocation107_spill] sm:$0xff] %v15961_v50  ;;  %20070 = vst [vmem:[#allocation68_spill] sm:$0xff] %v15965_v25  ;;  %v15967_v21 = vpop.eup %8896  ;;  %8916 = vtanh.f32 %v20071_v44  ;;  %v15971_v5 = vmul.f32 %v5364_v22, %v20072_v51  ;;  %v20075_v14 = vld [vmem:[#allocation86_spill] sm:$0xff]  ;;  %v20079_v50 = vld [vmem:[#allocation51_spill] sm:$0xff] }
 0x581   :  { %v15973_v49 = vpop.eup %8898  ;;  %8918 = vtanh.f32 %v20074_v43  ;;  %v15977_v48 = vmul.f32 %v5365_v30, %v20075_v14  ;;  %20078 = vst [vmem:[#allocation74_spill] sm:$0xff] %v15980_v1  ;;  %20081 = vst [vmem:[#allocation35_spill] sm:$0xff] %v15986_v12  ;;  %v20082_v51 = vld [vmem:[#allocation104_spill] sm:$0xff]  ;;  %v20086_v30 = vld [vmem:[#allocation134_spill] sm:$0xff] }
 0x582   :  { %20073 = vst [vmem:[#allocation112_spill] sm:$0xff] %v15971_v5  ;;  %v15982_v32 = vpop.eup %8900  ;;  %8920 = vtanh.f32 %v20079_v50  ;;  %v15989_v22 = vmul.f32 %v5368_v45, %v20082_v51  ;;  %v20084_v44 = vld [vmem:[#allocation96_spill] sm:$0xff]  ;;  %v20087_v43 = vld [vmem:[#allocation25_spill] sm:$0xff]  ;;  %v20089_v14 = vld [vmem:[#allocation18_spill] sm:$0xff]  ;;  %v20135_v50 = vmin.f32 %v15724_v2, 20.0 }
 0x583   :  { %20076 = vst [vmem:[#allocation26_spill] sm:$0xff] %v15977_v48  ;;  %v15992_v5 = vmul.f32 %v5369_v47, %v20084_v44  ;;  %v15994_v63 = vpop.eup %8902  ;;  %8922 = vtanh.f32 %v20086_v30  ;;  %v15998_v13 = vmul.f32 %v5370_v9, %v20087_v43  ;;  %v16001_v15 = vmul.f32 %v5371_v29, %v20089_v14  ;;  %v20092_v45 = vld [vmem:[#allocation63_spill] sm:$0xff]  ;;  %v20094_v47 = vld [vmem:[#allocation97_spill] sm:$0xff]  ;;  %v20106_v1 = vld [vmem:[#allocation164_spill] sm:$0xff] }
 0x584   :  { %20083 = vst [vmem:[#allocation80_spill] sm:$0xff] %v15989_v22  ;;  %v16004_v62 = vpop.eup %8904  ;;  %8924 = vtanh.f32 %v20091_v28  ;;  %v16008_v51 = vmul.f32 %v5372_v41, %v20092_v45  ;;  %v16011_v44 = vmul.f32 %v5373_v35, %v20094_v47  ;;  %v20096_v9 = vld [vmem:[#allocation135_spill] sm:$0xff]  ;;  %v20099_v41 = vld [vmem:[#allocation138_spill] sm:$0xff]  ;;  %v20138_v47 = vmin.f32 %v15727_v61, 20.0 }
 0x585   :  { %20085 = vst [vmem:[#allocation87_spill] sm:$0xff] %v15992_v5  ;;  %20088 = vst [vmem:[#allocation116_spill] sm:$0xff] %v15998_v13  ;;  %v16014_v5 = vpop.eup %8906  ;;  %8926 = vtanh.f32 %v20096_v9  ;;  %v20097_v29 = vld [vmem:[#allocation103_spill] sm:$0xff]  ;;  %v20100_v9 = vld [vmem:[#allocation61_spill] sm:$0xff] }
 0x586   :  { %20090 = vst [vmem:[#allocation98_spill] sm:$0xff] %v16001_v15  ;;  %20093 = vst [vmem:[#allocation115_spill] sm:$0xff] %v16008_v51  ;;  %v16018_v43 = vmul.f32 %v5374_v18, %v20097_v29  ;;  %v16022_v28 = vpop.eup %8908  ;;  %8928 = vtanh.f32 %v20099_v41  ;;  %v20101_v51 = vld [vmem:[#allocation137_spill] sm:$0xff]  ;;  %v20102_v15 = vld [vmem:[#allocation163_spill] sm:$0xff]  ;;  %v5327_v29 = vmul.f32 0.5, %v15982_v32  ;;  %v20141_v32 = vmin.f32 %v15731_v37, 20.0 }
 0x587   :  { %20095 = vst [vmem:[#allocation86_spill] sm:$0xff] %v16011_v44  ;;  %v16028_v30 = vpop.eup %8910  ;;  %8930 = vtanh.f32 %v20100_v9  ;;  %v20114_v9 = vld [vmem:[#allocation166_spill] sm:$0xff]  ;;  %v5613_v18 = vmul.f32 1.442695, %v20135_v50  ;;  %v5615_v41 = vmul.f32 1.442695, %v20138_v47 }
 0x588   :  { %20098 = vst [vmem:[#allocation101_spill] sm:$0xff] %v16018_v43  ;;  %v16034_v14 = vpop.eup %8912  ;;  %8932 = vtanh.f32 %v20101_v51  ;;  %v20110_v43 = vld [vmem:[#allocation165_spill] sm:$0xff]  ;;  %v20145_v47 = vmin.f32 %v15737_v33, 20.0 }
 0x589   :  { %v16040_v35 = vpop.eup %8914  ;;  %8934 = vtanh.f32 %v20102_v15  ;;  %v20128_v15 = vld [vmem:[#allocation170_spill] sm:$0xff] }
 0x58a   :  { %v16046_v12 = vpop.eup %8916  ;;  %8936 = vtanh.f32 %v20106_v1  ;;  %v20125_v1 = vld [vmem:[#allocation169_spill] sm:$0xff]  ;;  %v5621_v61 = vmul.f32 1.442695, %v20145_v47 }
 0x58b   :  { %v16052_v7 = vpop.eup %8918  ;;  %8938 = vtanh.f32 %v20110_v43  ;;  %v5391_v43 = vadd.f32 0.5, %v5327_v29  ;;  %v20147_v29 = vmin.f32 %v15743_v56, 20.0 }
 0x58c   :  { %v16058_v22 = vpop.eup %8920  ;;  %8940 = vtanh.f32 %v20114_v9  ;;  %v5325_v9 = vmul.f32 0.5, %v15967_v21  ;;  %v5329_v21 = vmul.f32 0.5, %v16004_v62  ;;  %v20144_v62 = vmin.f32 %v15734_v58, 20.0  ;;  %v20150_v58 = vld [vmem:[#allocation11_spill] sm:$0xff] }
 0x58d   :  { %v16064_v25 = vpop.eup %8922  ;;  %8942 = vtanh.f32 %v20118_v4  ;;  %v5326_v4 = vmul.f32 0.5, %v15973_v49  ;;  %v5328_v49 = vmul.f32 0.5, %v15994_v63 }
 0x58e   :  { %v16070_v13 = vpop.eup %8924  ;;  %8944 = vtanh.f32 %v20122_v40  ;;  %v20129_v40 = vld [vmem:[#allocation7_spill] sm:$0xff]  ;;  %v5389_v45 = vadd.f32 0.5, %v5325_v9  ;;  %v5619_v9 = vmul.f32 1.442695, %v20144_v62 }
 0x58f   :  { %v16076_v48 = vpop.eup %8926  ;;  %8946 = vtanh.f32 %v20125_v1  ;;  %v5390_v63 = vadd.f32 0.5, %v5326_v4  ;;  %v5617_v1 = vmul.f32 1.442695, %v20141_v32  ;;  %v5623_v4 = vmul.f32 1.442695, %v20147_v29  ;;  %v20155_v29 = vld [vmem:[#allocation150_spill] sm:$0xff] }
 0x590   :  { %v16082_v44 = vpop.eup %8928  ;;  %8948 = vtanh.f32 %v20128_v15  ;;  %v20137_v15 = vld [vmem:[#allocation172_spill] sm:$0xff]  ;;  %v20148_v32 = vmin.f32 %v15746_v36, 20.0  ;;  %v16124_v62 = vmul.f32 %v5389_v45, %v20150_v58  ;;  %v16133_v56 = vmul.f32 %v5391_v43, %v20155_v29 }
 0x591   :  { %20127 = vst [vmem:[#allocation51_spill] sm:$0xff] %v16082_v44  ;;  %v16088_v51 = vpop.eup %8930  ;;  %8950 = vtanh.f32 %v20133_v46  ;;  %v20140_v46 = vld [vmem:[#allocation77_spill] sm:$0xff]  ;;  %v20158_v58 = vmin.f32 %v15749_v57, 20.0  ;;  %v20162_v43 = vmin.f32 %v15755_v20, 20.0  ;;  %v20255_v20 = vld [vmem:[#allocation99_spill] sm:$0xff] }
 0x592   :  { %20132 = vst [vmem:[#allocation21_spill] sm:$0xff] %v16088_v51  ;;  %v16095_v44 = vpop.eup %8932  ;;  %8952 = vtanh.f32 %v20137_v15  ;;  %v5330_v15 = vmul.f32 0.5, %v16014_v5  ;;  %v5331_v5 = vmul.f32 0.5, %v16022_v28  ;;  %20151 = vst [vmem:[#allocation52_spill] sm:$0xff] %v16124_v62  ;;  %v5333_v28 = vmul.f32 0.5, %v16034_v14  ;;  %v20164_v14 = vld [vmem:[#allocation152_spill] sm:$0xff] }
 0x593   :  { %20136 = vst [vmem:[#allocation104_spill] sm:$0xff] %v16095_v44  ;;  %v16101_v51 = vpop.eup %8934  ;;  %8954 = vtanh.f32 %v20140_v46  ;;  %v20143_v44 = vld [vmem:[#allocation173_spill] sm:$0xff]  ;;  %v5392_v46 = vadd.f32 0.5, %v5328_v49  ;;  %v5332_v49 = vmul.f32 0.5, %v16028_v30  ;;  %20156 = vst [vmem:[#allocation135_spill] sm:$0xff] %v16133_v56  ;;  %v5334_v30 = vmul.f32 0.5, %v16040_v35 }
 0x594   :  { %20139 = vst [vmem:[#allocation96_spill] sm:$0xff] %v16101_v51  ;;  %v16106_v50 = vpop.eup %8936  ;;  %8956 = vtanh.f32 %v20143_v44  ;;  %v5393_v44 = vadd.f32 0.5, %v5329_v21  ;;  %v5394_v21 = vadd.f32 0.5, %v5330_v15  ;;  %v5627_v45 = vmul.f32 1.442695, %v20158_v58 }
 0x595   :  { %20142 = vst [vmem:[#allocation134_spill] sm:$0xff] %v16106_v50  ;;  %v16114_v51 = vpop.eup %8938  ;;  %8958 = vpow2.f32 %v5613_v18  ;;  %v5625_v50 = vmul.f32 1.442695, %v20148_v32  ;;  %v20153_v18 = vld [vmem:[#allocation70_spill] sm:$0xff]  ;;  %v5395_v29 = vadd.f32 0.5, %v5331_v5  ;;  %v5335_v35 = vmul.f32 0.5, %v16046_v12 }
 0x596   :  { %20146 = vst [vmem:[#allocation25_spill] sm:$0xff] %v16114_v51  ;;  %v16120_v37 = vpop.eup %8940  ;;  %8960 = vpow2.f32 %v5615_v41  ;;  %v16130_v51 = vmul.f32 %v5390_v63, %v20153_v18  ;;  %v16151_v15 = vmul.f32 %v5393_v44, %v20164_v14  ;;  %v20172_v5 = vld [vmem:[#allocation20_spill] sm:$0xff]  ;;  %v5398_v12 = vadd.f32 0.5, %v5334_v30 }
 0x597   :  { %20149 = vst [vmem:[#allocation18_spill] sm:$0xff] %v16120_v37  ;;  %v16126_v47 = vpop.eup %8942  ;;  %8962 = vpow2.f32 %v5617_v1  ;;  %v5629_v1 = vmul.f32 1.442695, %v20162_v43 }
 0x598   :  { %20152 = vst [vmem:[#allocation63_spill] sm:$0xff] %v16126_v47  ;;  %20154 = vst [vmem:[#allocation97_spill] sm:$0xff] %v16130_v51  ;;  %v16135_v32 = vpop.eup %8944  ;;  %8964 = vpow2.f32 %v5619_v9  ;;  %v20160_v47 = vld [vmem:[#allocation17_spill] sm:$0xff]  ;;  %v20166_v9 = vld [vmem:[#allocation39_spill] sm:$0xff] }
 0x599   :  { %20157 = vst [vmem:[#allocation103_spill] sm:$0xff] %v16135_v32  ;;  %v16140_v41 = vpop.eup %8946  ;;  %v16144_v63 = vmul.f32 %v5392_v46, %v20160_v47  ;;  %8966 = vpow2.f32 %v5621_v61  ;;  %20165 = vst [vmem:[#allocation163_spill] sm:$0xff] %v16151_v15  ;;  %v20167_v58 = vmin.f32 %v20166_v9, 20.0  ;;  %v5396_v46 = vadd.f32 0.5, %v5332_v49  ;;  %v20169_v61 = vld [vmem:[#allocation124_spill] sm:$0xff]  ;;  %v20253_v9 = vld [vmem:[#allocation90_spill] sm:$0xff] }
 0x59a   :  { %20159 = vst [vmem:[#allocation138_spill] sm:$0xff] %v16140_v41  ;;  %v16148_v18 = vpop.eup %8948  ;;  %8968 = vpow2.f32 %v5623_v4  ;;  %v20170_v47 = vmin.f32 %v20169_v61, 20.0  ;;  %v20174_v4 = vld [vmem:[#allocation42_spill] sm:$0xff]  ;;  %v20204_v15 = vmin.f32 %v15800_v53, 20.0 }
 0x59b   :  { %20161 = vst [vmem:[#allocation61_spill] sm:$0xff] %v16144_v63  ;;  %20163 = vst [vmem:[#allocation137_spill] sm:$0xff] %v16148_v18  ;;  %v5631_v32 = vmul.f32 1.442695, %v20167_v58  ;;  %v16155_v41 = vpop.eup %8950  ;;  %8970 = vpow2.f32 %v5625_v50  ;;  %v5397_v18 = vadd.f32 0.5, %v5333_v28  ;;  %v16163_v63 = vmul.f32 %v5394_v21, %v20172_v5 }
 0x59c   :  { %20168 = vst [vmem:[#allocation164_spill] sm:$0xff] %v16155_v41  ;;  %v5633_v37 = vmul.f32 1.442695, %v20170_v47  ;;  %v16160_v43 = vpop.eup %8952  ;;  %8972 = vpow2.f32 %v5627_v45  ;;  %v20175_v44 = vmin.f32 %v20174_v4, 20.0  ;;  %v5336_v41 = vmul.f32 0.5, %v16052_v7  ;;  %v20182_v7 = vld [vmem:[#allocation69_spill] sm:$0xff] }
 0x59d   :  { %20171 = vst [vmem:[#allocation165_spill] sm:$0xff] %v16160_v43  ;;  %20173 = vst [vmem:[#allocation166_spill] sm:$0xff] %v16163_v63  ;;  %v16167_v58 = vpop.eup %8954  ;;  %8974 = vpow2.f32 %v5629_v1  ;;  %v20177_v50 = vmin.f32 %v15770_v34, 20.0  ;;  %v5337_v28 = vmul.f32 0.5, %v16058_v22  ;;  %v20179_v43 = vld [vmem:[#allocation154_spill] sm:$0xff]  ;;  %v20181_v45 = vmin.f32 %v15773_v26, 20.0 }
 0x59e   :  { %v5635_v14 = vmul.f32 1.442695, %v20175_v44  ;;  %20176 = vst [vmem:[#allocation167_spill] sm:$0xff] %v16167_v58  ;;  %v16172_v47 = vpop.eup %8956  ;;  %v16176_v21 = vmul.f32 %v5395_v29, %v20179_v43  ;;  %8976 = vpow2.f32 %v5631_v32  ;;  %v5399_v58 = vadd.f32 0.5, %v5335_v35  ;;  %v20184_v1 = vld [vmem:[#allocation60_spill] sm:$0xff] }
 0x59f   :  { %v5637_v49 = vmul.f32 1.442695, %v20177_v50  ;;  %20178 = vst [vmem:[#allocation168_spill] sm:$0xff] %v16172_v47  ;;  %v5639_v5 = vmul.f32 1.442695, %v20181_v45  ;;  %v16180_v44 = vpop.eup %8958  ;;  %v16183_v30 = vmul.f32 %v5396_v46, %v20182_v7  ;;  %8978 = vpow2.f32 %v5633_v37  ;;  %v20187_v29 = vld [vmem:[#allocation156_spill] sm:$0xff] }
 0x5a0   :  { %20180 = vst [vmem:[#allocation169_spill] sm:$0xff] %v16176_v21  ;;  %v20185_v50 = vmin.f32 %v20184_v1, 20.0  ;;  %v16187_v47 = vpop.eup %8960  ;;  %v16190_v22 = vmul.f32 0.5, %v16064_v25  ;;  %v16193_v32 = vmul.f32 %v5397_v18, %v20187_v29  ;;  %8980 = vpow2.f32 %v5635_v14  ;;  %v20191_v37 = vld [vmem:[#allocation76_spill] sm:$0xff] }
 0x5a1   :  { %20183 = vst [vmem:[#allocation170_spill] sm:$0xff] %v16183_v30  ;;  %v20189_v43 = vmin.f32 %v20032_v59, 20.0  ;;  %v16197_v35 = vpop.eup %8962  ;;  %v16199_v46 = vadd.f32 0.5, %v5336_v41  ;;  %v16202_v7 = vmul.f32 %v5398_v12, %v20191_v37  ;;  %8982 = vpow2.f32 %v5637_v49  ;;  %v20198_v49 = vld [vmem:[#allocation158_spill] sm:$0xff] }
 0x5a2   :  { %v5641_v63 = vmul.f32 1.442695, %v20185_v50  ;;  %20186 = vst [vmem:[#allocation171_spill] sm:$0xff] %v16190_v22  ;;  %20188 = vst [vmem:[#allocation172_spill] sm:$0xff] %v16193_v32  ;;  %v20193_v50 = vmin.f32 %v15779_v38, 20.0  ;;  %v16206_v25 = vpop.eup %8964  ;;  %v16209_v18 = vmul.f32 0.5, %v16070_v13  ;;  %8984 = vpow2.f32 %v5639_v5 }
 0x5a3   :  { %v5643_v45 = vmul.f32 1.442695, %v20189_v43  ;;  %20190 = vst [vmem:[#allocation77_spill] sm:$0xff] %v16199_v46  ;;  %20192 = vst [vmem:[#allocation173_spill] sm:$0xff] %v16202_v7  ;;  %v16211_v14 = vadd.f32 0.5, %v5337_v28  ;;  %v20196_v29 = vmin.f32 %v15782_v3, 20.0  ;;  %v16215_v41 = vpop.eup %8966  ;;  %v16221_v37 = vmul.f32 %v5399_v58, %v20198_v49 }
 0x5a4   :  { %v5645_v30 = vmul.f32 1.442695, %v20193_v50  ;;  %20194 = vst [vmem:[#allocation11_spill] sm:$0xff] %v16209_v18  ;;  %v16218_v12 = vmul.f32 0.5, %v16076_v48  ;;  %8986 = vpow2.f32 %v5641_v63  ;;  %v20200_v50 = vld [vmem:[#allocation126_spill] sm:$0xff]  ;;  %v16225_v13 = vpop.eup %8968  ;;  %v20202_v28 = vmin.f32 %v15791_v39, 20.0 }
 0x5a5   :  { %20195 = vst [vmem:[#allocation70_spill] sm:$0xff] %v16211_v14  ;;  %v5647_v43 = vmul.f32 1.442695, %v20196_v29  ;;  %20199 = vst [vmem:[#allocation17_spill] sm:$0xff] %v16221_v37  ;;  %v20201_v7 = vmin.f32 %v20200_v50, 20.0  ;;  %8988 = vpow2.f32 %v5643_v45  ;;  %v20203_v29 = vmin.f32 %v15797_v10, 20.0  ;;  %v16233_v56 = vpop.eup %8970 }
 0x5a6   :  { %20197 = vst [vmem:[#allocation150_spill] sm:$0xff] %v16218_v12  ;;  %v5651_v5 = vmul.f32 1.442695, %v20202_v28  ;;  %v5655_v48 = vmul.f32 1.442695, %v20204_v15  ;;  %8990 = vpow2.f32 %v5645_v30  ;;  %v20205_v63 = vmin.f32 %v15803_v23, 20.0  ;;  %v16241_v51 = vpop.eup %8972 }
 0x5a7   :  { %v5649_v32 = vmul.f32 1.442695, %v20201_v7  ;;  %v5653_v21 = vmul.f32 1.442695, %v20203_v29  ;;  %v20206_v7 = vmin.f32 %v15809_v55, 20.0  ;;  %v20207_v45 = vmin.f32 %v15812_v19, 20.0  ;;  %v16249_v1 = vpop.eup %8974 }
 0x5a8   :  { %v5657_v58 = vmul.f32 1.442695, %v20205_v63  ;;  %8992 = vpow2.f32 %v5647_v43  ;;  %v20208_v28 = vmin.f32 %v15815_v60, 20.0  ;;  %v20209_v15 = vmin.f32 %v15821_v17, 20.0  ;;  %v16257_v12 = vpop.eup %8976  ;;  %v20256_v60 = vld [vmem:[#allocation64_spill] sm:$0xff]  ;;  %v20289_v50 = vld [vmem:[#allocation29_spill] sm:$0xff] }
 0x5a9   :  { %v5659_v49 = vmul.f32 1.442695, %v20206_v7  ;;  %v5661_v37 = vmul.f32 1.442695, %v20207_v45  ;;  %v20210_v30 = vmin.f32 %v15824_v54, 20.0  ;;  %8994 = vpow2.f32 %v5649_v32  ;;  %20214 = vst [vmem:[#allocation152_spill] sm:$0xff] %v16257_v12 }
 0x5aa   :  { %v5663_v29 = vmul.f32 1.442695, %v20208_v28  ;;  %v5665_v62 = vmul.f32 1.442695, %v20209_v15  ;;  %v20211_v63 = vmin.f32 %v15830_v16, 20.0  ;;  %v20212_v45 = vmin.f32 %v15833_v11, 20.0 }
 0x5ab   :  { %v5667_v59 = vmul.f32 1.442695, %v20210_v30  ;;  %v20213_v43 = vmin.f32 %v15839_v8, 20.0  ;;  %8996 = vpow2.f32 %v5651_v5  ;;  %v20215_v28 = vmin.f32 %v15842_v24, 20.0 }
 0x5ac   :  { %v5669_v7 = vmul.f32 1.442695, %v20211_v63  ;;  %v5671_v26 = vmul.f32 1.442695, %v20212_v45  ;;  %v20216_v30 = vmin.f32 %v15545_v27, 20.0  ;;  %v20217_v32 = vmin.f32 %v15548_v52, 20.0  ;;  %v16267_v63 = vpop.eup %8978 }
 0x5ad   :  { %v5673_v34 = vmul.f32 1.442695, %v20213_v43  ;;  %v5675_v15 = vmul.f32 1.442695, %v20215_v28  ;;  %20218 = vst [vmem:[#allocation20_spill] sm:$0xff] %v16267_v63  ;;  %8998 = vpow2.f32 %v5653_v21  ;;  %v20219_v45 = vmin.f32 %v15551_v6, 20.0 }
 0x5ae   :  { %v5677_v14 = vmul.f32 1.442695, %v20216_v30  ;;  %v16265_v18 = vmul.f32 1.442695, %v20217_v32  ;;  %v20220_v43 = vmin.f32 %v15554_v0, 20.0  ;;  %v20221_v28 = vmin.f32 %v15557_v42, 20.0  ;;  %v16281_v30 = vpop.eup %8980 }
 0x5af   :  { %v16271_v8 = vmul.f32 1.442695, %v20219_v45  ;;  %20222 = vst [vmem:[#allocation154_spill] sm:$0xff] %v16281_v30  ;;  %9000 = vpow2.f32 %v5655_v48  ;;  %v20223_v32 = vmin.f32 %v15560_v31, 20.0  ;;  %v20224_v21 = vld [vmem:[#allocation79_spill] sm:$0xff]  ;;  %v20231_v48 = vld [vmem:[#allocation78_spill] sm:$0xff] }
 0x5b0   :  { %v16275_v5 = vmul.f32 1.442695, %v20220_v43  ;;  %v16279_v24 = vmul.f32 1.442695, %v20221_v28  ;;  %v20225_v27 = vmin.f32 %v20224_v21, 20.0  ;;  %v20226_v45 = vld [vmem:[#allocation55_spill] sm:$0xff]  ;;  %v16295_v43 = vpop.eup %8982  ;;  %9002 = vpow2.f32 %v5657_v58 }
 0x5b1   :  { %v16285_v52 = vmul.f32 1.442695, %v20223_v32  ;;  %v20227_v46 = vmin.f32 %v20226_v45, 20.0  ;;  %20228 = vst [vmem:[#allocation69_spill] sm:$0xff] %v16295_v43  ;;  %v20229_v28 = vld [vmem:[#allocation143_spill] sm:$0xff]  ;;  %v20232_v11 = vmin.f32 %v20231_v48, 20.0  ;;  %9004 = vpow2.f32 %v5659_v49 }
 0x5b2   :  { %v16289_v6 = vmul.f32 1.442695, %v20225_v27  ;;  %v20230_v42 = vmin.f32 %v20229_v28, 20.0  ;;  %v20233_v32 = vld [vmem:[#allocation16_spill] sm:$0xff]  ;;  %v16309_v27 = vpop.eup %8984  ;;  %v20238_v58 = vld [vmem:[#allocation85_spill] sm:$0xff]  ;;  %9006 = vpow2.f32 %v5661_v37  ;;  %v20257_v30 = vmin.f32 %v20256_v60, 20.0 }
 0x5b3   :  { %v16293_v0 = vmul.f32 1.442695, %v20227_v46  ;;  %v16303_v31 = vmul.f32 1.442695, %v20232_v11  ;;  %v20234_v16 = vmin.f32 %v20233_v32, 20.0  ;;  %20235 = vst [vmem:[#allocation156_spill] sm:$0xff] %v16309_v27  ;;  %v16323_v11 = vpop.eup %8986  ;;  %9008 = vpow2.f32 %v5663_v29 }
 0x5b4   :  { %v16299_v22 = vmul.f32 1.442695, %v20230_v42  ;;  %v20236_v46 = vld [vmem:[#allocation146_spill] sm:$0xff]  ;;  %v20239_v43 = vmin.f32 %v20238_v58, 20.0  ;;  %v20240_v42 = vld [vmem:[#allocation59_spill] sm:$0xff]  ;;  %20242 = vst [vmem:[#allocation76_spill] sm:$0xff] %v16323_v11  ;;  %9010 = vpow2.f32 %v5665_v62 }
 0x5b5   :  { %v16307_v21 = vmul.f32 1.442695, %v20234_v16  ;;  %v20237_v45 = vmin.f32 %v20236_v46, 20.0  ;;  %v20241_v61 = vmin.f32 %v20240_v42, 20.0  ;;  %v20243_v16 = vld [vmem:[#allocation145_spill] sm:$0xff]  ;;  %v20245_v49 = vld [vmem:[#allocation84_spill] sm:$0xff]  ;;  %9012 = vpow2.f32 %v5667_v59 }
 0x5b6   :  { %v16317_v28 = vmul.f32 1.442695, %v20239_v43  ;;  %v20244_v32 = vmin.f32 %v20243_v16, 20.0  ;;  %v20246_v27 = vmin.f32 %v20245_v49, 20.0  ;;  %v16337_v43 = vpop.eup %8988  ;;  %v5753_v42 = vmul.f32 -0.5, %v16187_v47  ;;  %v20250_v37 = vld [vmem:[#allocation113_spill] sm:$0xff] }
 0x5b7   :  { %v16313_v4 = vmul.f32 1.442695, %v20237_v45  ;;  %v16321_v48 = vmul.f32 1.442695, %v20241_v61  ;;  %v20247_v45 = vld [vmem:[#allocation58_spill] sm:$0xff]  ;;  %20249 = vst [vmem:[#allocation158_spill] sm:$0xff] %v16337_v43  ;;  %v16342_v16 = vpop.eup %8990  ;;  %9014 = vpow2.f32 %v5669_v7 }
 0x5b8   :  { %v16327_v54 = vmul.f32 1.442695, %v20244_v32  ;;  %v16331_v46 = vmul.f32 1.442695, %v20246_v27  ;;  %v20248_v17 = vmin.f32 %v20247_v45, 20.0  ;;  %v5744_v61 = vmul.f32 -0.5, %v16180_v44  ;;  %v16353_v29 = vpop.eup %8992 }
 0x5b9   :  { %v5311_v11 = vmul.f32 0.5, %v20250_v37  ;;  %v20251_v32 = vld [vmem:[#allocation147_spill] sm:$0xff]  ;;  %v20254_v45 = vmin.f32 %v20253_v9, 20.0  ;;  %v5312_v43 = vmul.f32 0.5, %v20255_v20  ;;  %v16357_v19 = vmul.f32 1.442695, %v20257_v30  ;;  %v16367_v9 = vpop.eup %8994 }
 0x5ba   :  { %v16335_v58 = vmul.f32 1.442695, %v20248_v17  ;;  %v20252_v49 = vmin.f32 %v20251_v32, 20.0  ;;  %v20258_v37 = vld [vmem:[#allocation89_spill] sm:$0xff]  ;;  %v20260_v32 = vld [vmem:[#allocation94_spill] sm:$0xff]  ;;  %9016 = vpow2.f32 %v5671_v26  ;;  %v20268_v7 = vld [vmem:[#allocation8_spill] sm:$0xff] }
 0x5bb   :  { %v16350_v17 = vmul.f32 1.442695, %v20254_v45  ;;  %v20259_v63 = vmin.f32 %v20258_v37, 20.0  ;;  %v20262_v45 = vld [vmem:[#allocation93_spill] sm:$0xff]  ;;  %v20266_v30 = vld [vmem:[#allocation6_spill] sm:$0xff]  ;;  %v5375_v33 = vadd.f32 0.5, %v5311_v11  ;;  %9018 = vpow2.f32 %v5673_v34 }
 0x5bc   :  { %v16346_v27 = vmul.f32 1.442695, %v20252_v49  ;;  %v20261_v49 = vmin.f32 %v20260_v32, 20.0  ;;  %v20263_v20 = vmin.f32 %v20262_v45, 20.0  ;;  %v20264_v59 = vld [vmem:[#allocation117_spill] sm:$0xff]  ;;  %v20267_v23 = vmin.f32 %v20266_v30, 20.0 }
 0x5bd   :  { %v16361_v62 = vmul.f32 1.442695, %v20259_v63  ;;  %v20265_v55 = vmin.f32 %v20264_v59, 20.0  ;;  %v16381_v63 = vpop.eup %8996  ;;  %v5754_v32 = vadd.f32 1.0, %v5753_v42  ;;  %v20270_v59 = vld [vmem:[#allocation5_spill] sm:$0xff]  ;;  %v5376_v30 = vadd.f32 0.5, %v5312_v43 }
 0x5be   :  { %v16365_v57 = vmul.f32 1.442695, %v20261_v49  ;;  %v16371_v36 = vmul.f32 1.442695, %v20263_v20  ;;  %v16379_v37 = vmul.f32 1.442695, %v20267_v23  ;;  %v16383_v53 = vpop.eup %8998  ;;  %9020 = vpow2.f32 %v5675_v15 }
 0x5bf   :  { %v16375_v60 = vmul.f32 1.442695, %v20265_v55  ;;  %v5745_v49 = vadd.f32 1.0, %v5744_v61  ;;  %v20269_v20 = vmin.f32 %v20268_v7, 20.0  ;;  %v20271_v55 = vmin.f32 %v20270_v59, 20.0  ;;  %v16393_v23 = vpop.eup %9000  ;;  %v20277_v34 = vld [vmem:[#allocation106_spill] sm:$0xff] }
 0x5c0   :  { %v20273_v26 = vmin.f32 %v20129_v40, 20.0  ;;  %v16400_v42 = vadd.f32 1.0, %v16180_v44  ;;  %v16403_v11 = vpop.eup %9002  ;;  %9022 = vpow2.f32 %v5677_v14  ;;  %v16417_v40 = vmul.f32 %v16187_v47, %v5754_v32  ;;  %v20280_v43 = vld [vmem:[#allocation28_spill] sm:$0xff] }
 0x5c1   :  { %v16387_v45 = vmul.f32 1.442695, %v20269_v20  ;;  %v16391_v10 = vmul.f32 1.442695, %v20271_v55  ;;  %v5888_v20 = vmul.f32 -0.5, %v16342_v16  ;;  %v16407_v55 = vadd.f32 1.0, %v16187_v47  ;;  %v16410_v15 = vpop.eup %9004 }
 0x5c2   :  { %v16397_v61 = vmul.f32 1.442695, %v20273_v26  ;;  %9024 = vpow2.f32 %v16265_v18  ;;  %v16414_v26 = vmul.f32 %v16180_v44, %v5745_v49  ;;  %20276 = vst [vmem:[#allocation175_spill] sm:$0xff] %v16417_v40  ;;  %v16420_v59 = vmul.f32 %v5375_v33, %v20277_v34  ;;  %v16422_v14 = vpop.eup %9006 }
 0x5c3   :  { %20272 = vst [vmem:[#allocation113_spill] sm:$0xff] %v16391_v10  ;;  %20279 = vst [vmem:[#allocation176_spill] sm:$0xff] %v16422_v14  ;;  %9026 = vpow2.f32 %v16271_v8  ;;  %v5897_v7 = vmul.f32 -0.5, %v16353_v29  ;;  %v16430_v18 = vadd.f32 1.0, %v16197_v35  ;;  %v16432_v49 = vpop.eup %9008  ;;  %v5762_v32 = vmul.f32 -0.5, %v16197_v35 }
 0x5c4   :  { %20274 = vst [vmem:[#allocation99_spill] sm:$0xff] %v16397_v61  ;;  %20275 = vst [vmem:[#allocation174_spill] sm:$0xff] %v16414_v26  ;;  %v16427_v61 = vmul.f32 %v5376_v30, %v20280_v43  ;;  %9028 = vpow2.f32 %v16275_v5  ;;  %v16438_v34 = vadd.f32 1.0, %v16206_v25  ;;  %v16440_v8 = vpop.eup %9010  ;;  %v5889_v30 = vadd.f32 1.0, %v5888_v20 }
 0x5c5   :  { %20278 = vst [vmem:[#allocation106_spill] sm:$0xff] %v16420_v59  ;;  %20282 = vst [vmem:[#allocation177_spill] sm:$0xff] %v16440_v8  ;;  %9030 = vpow2.f32 %v16279_v24  ;;  %v5906_v43 = vmul.f32 -0.5, %v16367_v9  ;;  %v5771_v10 = vmul.f32 -0.5, %v16206_v25  ;;  %v5915_v5 = vmul.f32 -0.5, %v16381_v63  ;;  %v20284_v59 = vld [vmem:[#allocation119_spill] sm:$0xff] }
 0x5c6   :  { %20281 = vst [vmem:[#allocation28_spill] sm:$0xff] %v16427_v61  ;;  %v16445_v61 = vpop.eup %9012  ;;  %9032 = vpow2.f32 %v16285_v52  ;;  %v5313_v40 = vmul.f32 0.5, %v20284_v59  ;;  %v16455_v24 = vadd.f32 1.0, %v16342_v16  ;;  %v5898_v8 = vadd.f32 1.0, %v5897_v7 }
 0x5c7   :  { %20283 = vst [vmem:[#allocation178_spill] sm:$0xff] %v16445_v61  ;;  %v16451_v26 = vpop.eup %9014  ;;  %9034 = vpow2.f32 %v16289_v6  ;;  %v16462_v52 = vadd.f32 1.0, %v16353_v29  ;;  %v16466_v59 = vadd.f32 1.0, %v16367_v9  ;;  %v16472_v6 = vmul.f32 %v16342_v16, %v5889_v30 }
 0x5c8   :  { %20285 = vst [vmem:[#allocation119_spill] sm:$0xff] %v16451_v26  ;;  %v16458_v39 = vpop.eup %9016  ;;  %9036 = vpow2.f32 %v16293_v0  ;;  %v5907_v7 = vadd.f32 1.0, %v5906_v43  ;;  %v5763_v20 = vadd.f32 1.0, %v5762_v32  ;;  %v5916_v0 = vadd.f32 1.0, %v5915_v5 }
 0x5c9   :  { %20286 = vst [vmem:[#allocation179_spill] sm:$0xff] %v16458_v39  ;;  %v16468_v26 = vpop.eup %9018  ;;  %9038 = vpow2.f32 %v16299_v22  ;;  %v5772_v61 = vadd.f32 1.0, %v5771_v10  ;;  %v5314_v33 = vmul.f32 0.5, %v20289_v50  ;;  %v16486_v30 = vadd.f32 1.0, %v16381_v63 }
 0x5ca   :  { %20287 = vst [vmem:[#allocation180_spill] sm:$0xff] %v16468_v26  ;;  %v16474_v39 = vpop.eup %9020  ;;  %9040 = vpow2.f32 %v16303_v31  ;;  %v16482_v26 = vmul.f32 %v16353_v29, %v5898_v8  ;;  %v5377_v10 = vadd.f32 0.5, %v5313_v40  ;;  %v5924_v50 = vmul.f32 -0.5, %v16383_v53 }
 0x5cb   :  { %20288 = vst [vmem:[#allocation181_spill] sm:$0xff] %v16474_v39  ;;  %v16478_v12 = vpop.eup %9022  ;;  %9042 = vpow2.f32 %v16307_v21  ;;  %v16497_v21 = vmul.f32 %v16367_v9, %v5907_v7  ;;  %v16500_v8 = vmul.f32 %v16197_v35, %v5763_v20  ;;  %v5933_v5 = vmul.f32 -0.5, %v16393_v23  ;;  %v20301_v39 = vld [vmem:[#allocation122_spill] sm:$0xff] }
 0x5cc   :  { %20290 = vst [vmem:[#allocation29_spill] sm:$0xff] %v16478_v12  ;;  %v16488_v32 = vpop.eup %9024  ;;  %9044 = vpow2.f32 %v16313_v4  ;;  %v16507_v40 = vmul.f32 %v16381_v63, %v5916_v0  ;;  %v16510_v4 = vmul.f32 %v16206_v25, %v5772_v61  ;;  %v5378_v31 = vadd.f32 0.5, %v5314_v33  ;;  %v20299_v33 = vld [vmem:[#allocation118_spill] sm:$0xff] }
 0x5cd   :  { %20291 = vst [vmem:[#allocation182_spill] sm:$0xff] %v16488_v32  ;;  %v16493_v43 = vpop.eup %9026  ;;  %9046 = vpow2.f32 %v16317_v28  ;;  %20293 = vst [vmem:[#allocation184_spill] sm:$0xff] %v16500_v8  ;;  %v16516_v20 = vadd.f32 1.0, %v16383_v53  ;;  %v5780_v7 = vmul.f32 -0.5, %v16215_v41  ;;  %v5925_v61 = vadd.f32 1.0, %v5924_v50 }
 0x5ce   :  { %20292 = vst [vmem:[#allocation183_spill] sm:$0xff] %v16493_v43  ;;  %v16503_v22 = vpop.eup %9028  ;;  %9048 = vpow2.f32 %v16321_v48  ;;  %20295 = vst [vmem:[#allocation186_spill] sm:$0xff] %v16510_v4  ;;  %v20298_v48 = vld [vmem:[#allocation105_spill] sm:$0xff]  ;;  %v5315_v32 = vmul.f32 0.5, %v20299_v33  ;;  %v5934_v12 = vadd.f32 1.0, %v5933_v5  ;;  %v5316_v4 = vmul.f32 0.5, %v20301_v39 }
 0x5cf   :  { %20294 = vst [vmem:[#allocation185_spill] sm:$0xff] %v16503_v22  ;;  %v16512_v28 = vpop.eup %9030  ;;  %9050 = vpow2.f32 %v16327_v54  ;;  %v5789_v22 = vmul.f32 -0.5, %v16225_v13  ;;  %v16524_v0 = vmul.f32 %v5377_v10, %v20298_v48  ;;  %v16539_v10 = vadd.f32 1.0, %v16393_v23 }
 0x5d0   :  { %20296 = vst [vmem:[#allocation187_spill] sm:$0xff] %v16512_v28  ;;  %v16520_v43 = vpop.eup %9032  ;;  %9052 = vpow2.f32 %v16331_v46  ;;  %v20303_v46 = vld [vmem:[#allocation110_spill] sm:$0xff]  ;;  %v5942_v39 = vmul.f32 -0.5, %v16403_v11 }
 0x5d1   :  { %20297 = vst [vmem:[#allocation188_spill] sm:$0xff] %v16520_v43  ;;  %v16527_v28 = vpop.eup %9034  ;;  %9054 = vpow2.f32 %v16335_v58  ;;  %v16536_v43 = vmul.f32 %v5378_v31, %v20303_v46  ;;  %v5781_v58 = vadd.f32 1.0, %v5780_v7  ;;  %v5790_v5 = vadd.f32 1.0, %v5789_v22 }
 0x5d2   :  { %20300 = vst [vmem:[#allocation105_spill] sm:$0xff] %v16527_v28  ;;  %v16532_v8 = vpop.eup %9036  ;;  %9056 = vpow2.f32 %v16346_v27  ;;  %v16550_v27 = vmul.f32 %v16383_v53, %v5925_v61  ;;  %v16553_v31 = vadd.f32 1.0, %v16215_v41  ;;  %v5379_v46 = vadd.f32 0.5, %v5315_v32 }
 0x5d3   :  { %20302 = vst [vmem:[#allocation118_spill] sm:$0xff] %v16532_v8  ;;  %v16542_v48 = vpop.eup %9038  ;;  %9058 = vpow2.f32 %v16350_v17  ;;  %v16559_v17 = vmul.f32 %v16393_v23, %v5934_v12  ;;  %v5380_v7 = vadd.f32 0.5, %v5316_v4  ;;  %v5951_v32 = vmul.f32 -0.5, %v16410_v15 }
 0x5d4   :  { %20304 = vst [vmem:[#allocation122_spill] sm:$0xff] %v16542_v48  ;;  %v16546_v33 = vpop.eup %9040  ;;  %9060 = vpow2.f32 %v16357_v19  ;;  %v16566_v19 = vadd.f32 1.0, %v16225_v13  ;;  %v16574_v12 = vmul.f32 %v16215_v41, %v5781_v58  ;;  %v5943_v4 = vadd.f32 1.0, %v5942_v39  ;;  %v20313_v39 = vld [vmem:[#allocation31_spill] sm:$0xff]  ;;  %v20315_v48 = vld [vmem:[#allocation34_spill] sm:$0xff] }
 0x5d5   :  { %20305 = vst [vmem:[#allocation110_spill] sm:$0xff] %v16546_v33  ;;  %v16555_v50 = vpop.eup %9042  ;;  %9062 = vpow2.f32 %v16361_v62  ;;  %v16577_v62 = vmul.f32 %v16225_v13, %v5790_v5  ;;  %v5798_v61 = vmul.f32 -0.5, %v16233_v56  ;;  %v16594_v5 = vadd.f32 1.0, %v16403_v11 }
 0x5d6   :  { %20306 = vst [vmem:[#allocation189_spill] sm:$0xff] %v16555_v50  ;;  %v16562_v54 = vpop.eup %9044  ;;  %9064 = vpow2.f32 %v16365_v57  ;;  %v20310_v57 = vld [vmem:[#allocation27_spill] sm:$0xff]  ;;  %v5318_v8 = vmul.f32 0.5, %v20315_v48  ;;  %v5960_v48 = vmul.f32 -0.5, %v16422_v14 }
 0x5d7   :  { %20307 = vst [vmem:[#allocation190_spill] sm:$0xff] %v16562_v54  ;;  %v16570_v50 = vpop.eup %9046  ;;  %9066 = vpow2.f32 %v16371_v36  ;;  %v16583_v54 = vmul.f32 %v5379_v46, %v20310_v57  ;;  %v20312_v36 = vld [vmem:[#allocation30_spill] sm:$0xff]  ;;  %v5952_v57 = vadd.f32 1.0, %v5951_v32 }
 0x5d8   :  { %20308 = vst [vmem:[#allocation191_spill] sm:$0xff] %v16570_v50  ;;  %v16579_v22 = vpop.eup %9048  ;;  %9068 = vpow2.f32 %v16375_v60  ;;  %v5807_v50 = vmul.f32 -0.5, %v16241_v51  ;;  %v16591_v58 = vmul.f32 %v5380_v7, %v20312_v36  ;;  %v16609_v7 = vadd.f32 1.0, %v16410_v15 }
 0x5d9   :  { %20309 = vst [vmem:[#allocation192_spill] sm:$0xff] %v16579_v22  ;;  %v16587_v33 = vpop.eup %9050  ;;  %9070 = vpow2.f32 %v16379_v37  ;;  %v5317_v22 = vmul.f32 0.5, %v20313_v39  ;;  %v16606_v37 = vmul.f32 %v16403_v11, %v5943_v4 }
 0x5da   :  { %20311 = vst [vmem:[#allocation27_spill] sm:$0xff] %v16587_v33  ;;  %v16597_v60 = vpop.eup %9052  ;;  %9072 = vpow2.f32 %v16387_v45  ;;  %v5799_v45 = vadd.f32 1.0, %v5798_v61  ;;  %v5808_v32 = vadd.f32 1.0, %v5807_v50  ;;  %v5382_v61 = vadd.f32 0.5, %v5318_v8 }
 0x5db   :  { %20314 = vst [vmem:[#allocation30_spill] sm:$0xff] %v16597_v60  ;;  %v16602_v33 = vpop.eup %9054  ;;  %9074 = vlog2.f32 %v16455_v24  ;;  %v16620_v24 = vadd.f32 1.0, %v16233_v56  ;;  %v5381_v4 = vadd.f32 0.5, %v5317_v22  ;;  %v5969_v60 = vmul.f32 -0.5, %v16432_v49 }
 0x5dc   :  { %20316 = vst [vmem:[#allocation31_spill] sm:$0xff] %v16602_v33  ;;  %v16612_v39 = vpop.eup %9056  ;;  %9076 = vlog2.f32 %v16462_v52  ;;  %v16627_v52 = vmul.f32 %v16410_v15, %v5952_v57  ;;  %v16640_v22 = vadd.f32 1.0, %v16241_v51  ;;  %v5816_v57 = vmul.f32 -0.5, %v16249_v1 }
 0x5dd   :  { %20317 = vst [vmem:[#allocation34_spill] sm:$0xff] %v16612_v39  ;;  %v16616_v46 = vpop.eup %9058  ;;  %9078 = vlog2.f32 %v16400_v42  ;;  %v20321_v42 = vand.u32 2147483647, %v16342_v16  ;;  %v20325_v8 = vand.u32 2147483647, %v16353_v29  ;;  %v20348_v39 = vld [vmem:[#allocation126_spill] sm:$0xff] }
 0x5de   :  { %20318 = vst [vmem:[#allocation193_spill] sm:$0xff] %v16616_v46  ;;  %v16623_v28 = vpop.eup %9060  ;;  %9080 = vlog2.f32 %v16407_v55  ;;  %v5961_v55 = vadd.f32 1.0, %v5960_v48  ;;  %vm5503_vm4 = vcmp.gt.f32.partialorder %v20348_v39, 20.0  ;;  %v20395_v33 = vand.u32 2147483647, %v16410_v15  ;;  %v20402_v15 = vld [vmem:[#allocation186_spill] sm:$0xff] }
 0x5df   :  { %20319 = vst [vmem:[#allocation194_spill] sm:$0xff] %v16623_v28  ;;  %v16630_v36 = vpop.eup %9062  ;;  %vm16634_vm0 = vcmp.lt.f32.partialorder %v20321_v42, 0.0004427343  ;;  %9082 = vlog2.f32 %v16466_v59  ;;  %vm16649_vm6 = vcmp.lt.f32.partialorder %v20325_v8, 0.0004427343  ;;  %v16655_v59 = vmul.f32 %v16233_v56, %v5799_v45 }
 0x5e0   :  { %20320 = vst [vmem:[#allocation195_spill] sm:$0xff] %v16630_v36  ;;  %v16644_v28 = vpop.eup %9064  ;;  %9084 = vlog2.f32 %v16486_v30  ;;  %v16658_v42 = vmul.f32 %v16241_v51, %v5808_v32  ;;  %v20333_v30 = vld [vmem:[#allocation73_spill] sm:$0xff]  ;;  %v16674_v45 = vadd.f32 1.0, %v16422_v14  ;;  %v5970_v32 = vadd.f32 1.0, %v5969_v60 }
 0x5e1   :  { %20324 = vst [vmem:[#allocation196_spill] sm:$0xff] %v16644_v28  ;;  %v16660_v50 = vpop.eup %9066  ;;  %v20330_v28 = vand.u32 2147483647, %v16180_v44  ;;  %9086 = vlog2.f32 %v16430_v18  ;;  %v16671_v8 = vmul.f32 %v5381_v4, %v20333_v30  ;;  %v20339_v18 = vld [vmem:[#allocation144_spill] sm:$0xff]  ;;  %v16691_v30 = vadd.f32 1.0, %v16432_v49 }
 0x5e2   :  { %20328 = vst [vmem:[#allocation197_spill] sm:$0xff] %v16658_v42  ;;  %20329 = vst [vmem:[#allocation198_spill] sm:$0xff] %v16660_v50  ;;  %v16676_v48 = vpop.eup %9068  ;;  %v20336_v50 = vand.u32 2147483647, %v16187_v47  ;;  %9088 = vlog2.f32 %v16438_v34  ;;  %v20343_v47 = vand.u32 2147483647, %v16367_v9  ;;  %v16716_v9 = vmul.f32 %v16422_v14, %v5961_v55 }
 0x5e3   :  { %vm16665_vm1 = vcmp.lt.f32.partialorder %v20330_v28, 0.0004427343  ;;  %20334 = vst [vmem:[#allocation73_spill] sm:$0xff] %v16671_v8  ;;  %20335 = vst [vmem:[#allocation199_spill] sm:$0xff] %v16676_v48  ;;  %v16687_v28 = vmul.f32 %v5382_v61, %v20339_v18  ;;  %v16693_v60 = vpop.eup %9070  ;;  %v20342_v48 = vld [vmem:[#allocation36_spill] sm:$0xff]  ;;  %9090 = vlog2.f32 %v16516_v20  ;;  %v5817_v61 = vadd.f32 1.0, %v5816_v57 }
 0x5e4   :  { %vm16681_vm5 = vcmp.lt.f32.partialorder %v20336_v50, 0.0004427343  ;;  %20341 = vst [vmem:[#allocation200_spill] sm:$0xff] %v16693_v60  ;;  %vm5486_vm7 = vcmp.gt.f32.partialorder %v20342_v48, 20.0  ;;  %vm16698_vm8 = vcmp.lt.f32.partialorder %v20343_v47, 0.0004427343  ;;  %v16705_v36 = vpop.eup %9072  ;;  %9092 = vlog2.f32 %v16539_v10 }
 0x5e5   :  { %20340 = vst [vmem:[#allocation144_spill] sm:$0xff] %v16687_v28  ;;  %v20346_v18 = vld [vmem:[#allocation152_spill] sm:$0xff]  ;;  %20347 = vst [vmem:[#allocation36_spill] sm:$0xff] %v16705_v36  ;;  %v20349_v60 = vand.u32 2147483647, %v16381_v63  ;;  %v16719_v20 = vadd.f32 1.0, %v16249_v1  ;;  %v9075_v34 = vpop.eup %9074  ;;  %9094 = vlog2.f32 %v16553_v31  ;;  %v16731_v10 = vmul.f32 %v16432_v49, %v5970_v32 }
 0x5e6   :  { %v5825_v4 = vmul.f32 -0.5, %v20346_v18  ;;  %20352 = vst [vmem:[#allocation152_spill] sm:$0xff] %v16716_v9  ;;  %v20353_v57 = vld [vmem:[#allocation62_spill] sm:$0xff]  ;;  %v20354_v36 = vld [vmem:[#allocation67_spill] sm:$0xff]  ;;  %v20355_v28 = vand.u32 2147483647, %v16197_v35  ;;  %9096 = vlog2.f32 %v16566_v19 }
 0x5e7   :  { %vm16710_vm12 = vcmp.lt.f32.partialorder %v20349_v60, 0.0004427343  ;;  %v5319_v47 = vmul.f32 0.5, %v20353_v57  ;;  %20358 = vst [vmem:[#allocation126_spill] sm:$0xff] %v16731_v10  ;;  %v16735_v60 = vadd.f32 1.0, %v20346_v18  ;;  %v9077_v57 = vpop.eup %9076  ;;  %v20359_v9 = vld [vmem:[#allocation83_spill] sm:$0xff]  ;;  %9098 = vlog2.f32 %v16594_v5 }
 0x5e8   :  { %vm16725_vm11 = vcmp.lt.f32.partialorder %v20355_v28, 0.0004427343  ;;  %v5887_v8 = vmul.f32 0.6931472, %v9075_v34  ;;  %v20360_v28 = vld [vmem:[#allocation161_spill] sm:$0xff]  ;;  %v9079_v31 = vpop.eup %9078  ;;  %v16751_v34 = vmul.f32 %v16249_v1, %v5817_v61  ;;  %v16753_v10 = vadd.f32 1.0, %v5825_v4 }
 0x5e9   :  { %v16741_v42 = vmul.f32 0.5, %v20360_v28  ;;  %v5896_v14 = vmul.f32 0.6931472, %v9077_v57  ;;  %v20361_v32 = vand.u32 2147483647, %v16206_v25  ;;  %v9081_v19 = vpop.eup %9080  ;;  %v20365_v57 = vld [vmem:[#allocation111_spill] sm:$0xff]  ;;  %9100 = vlog2.f32 %v16609_v7 }
 0x5ea   :  { %20364 = vst [vmem:[#allocation62_spill] sm:$0xff] %v16751_v34  ;;  %v5893_v28 = vsel %vm16634_vm0, %v16472_v6, %v5887_v8  ;;  %v5743_v35 = vmul.f32 0.6931472, %v9079_v31  ;;  %v20366_v25 = vand.u32 2147483647, %v16383_v53  ;;  %v16766_v5 = vadd.f32 0.5, %v5319_v47  ;;  %v9083_v4 = vpop.eup %9082 }
 0x5eb   :  { %vm16745_vm14 = vcmp.lt.f32.partialorder %v20361_v32, 0.0004427343  ;;  %v5902_v61 = vsel %vm16649_vm6, %v16482_v26, %v5896_v14  ;;  %v6333_v6 = vsel %vm5501_vm10, %v15779_v38, %v5893_v28  ;;  %v5752_v46 = vmul.f32 0.6931472, %v9081_v19  ;;  %v20370_v8 = vld [vmem:[#allocation44_spill] sm:$0xff]  ;;  %v9085_v26 = vpop.eup %9084  ;;  %v20377_v14 = vld [vmem:[#allocation86_spill] sm:$0xff] }
 0x5ec   :  { %vm16761_vm13 = vcmp.lt.f32.partialorder %v20366_v25, 0.0004427343  ;;  %20369 = vst [vmem:[#allocation67_spill] sm:$0xff] %v16766_v5  ;;  %v20371_v53 = vand.u32 2147483647, %v16393_v23  ;;  %9102 = vlog2.f32 %v16620_v24  ;;  %v6334_v38 = vsel %vm5502_vm3, %v15782_v3, %v5902_v61  ;;  %v20378_v23 = vld [vmem:[#allocation174_spill] sm:$0xff] }
 0x5ed   :  { %v20374_v7 = vand.u32 2147483647, %v16215_v41  ;;  %v6397_v16 = vmul.f32 %v6333_v6, %v20377_v14  ;;  %v5749_v19 = vsel %vm16665_vm1, %v20378_v23, %v5743_v35  ;;  %v5905_v28 = vmul.f32 0.6931472, %v9083_v4  ;;  %v20379_v25 = vld [vmem:[#allocation139_spill] sm:$0xff]  ;;  %v20380_v41 = vld [vmem:[#allocation88_spill] sm:$0xff] }
 0x5ee   :  { %vm16777_vm15 = vcmp.lt.f32.partialorder %v20371_v53, 0.0004427343  ;;  %vm5506_vm10 = vcmp.gt.f32.partialorder %v20379_v25, 20.0  ;;  %vm5489_vm6 = vcmp.gt.f32.partialorder %v20380_v41, 20.0  ;;  %v20381_v53 = vand.u32 2147483647, %v16225_v13 }
 0x5ef   :  { %vm16783_vm9 = vcmp.lt.f32.partialorder %v20374_v7, 0.0004427343  ;;  %v9087_v7 = vpop.eup %9086  ;;  %v20384_v34 = vld [vmem:[#allocation101_spill] sm:$0xff]  ;;  %v20385_v61 = vld [vmem:[#allocation175_spill] sm:$0xff]  ;;  %v6317_v29 = vsel %vm5485_vm2, %v15724_v2, %v5749_v19  ;;  %v5914_v35 = vmul.f32 0.6931472, %v9085_v26  ;;  %9104 = vlog2.f32 %v16640_v22 }
 0x5f0   :  { %vm16799_vm0 = vcmp.lt.f32.partialorder %v20381_v53, 0.0004427343  ;;  %v6398_v3 = vmul.f32 %v6334_v38, %v20384_v34  ;;  %v5758_v6 = vsel %vm16681_vm5, %v20385_v61, %v5752_v46  ;;  %v20386_v4 = vld [vmem:[#allocation37_spill] sm:$0xff]  ;;  %v9089_v14 = vpop.eup %9088  ;;  %v20387_v23 = vld [vmem:[#allocation50_spill] sm:$0xff]  ;;  %v5911_v34 = vsel %vm16698_vm8, %v16497_v21, %v5905_v28  ;;  %v20388_v61 = vld [vmem:[#allocation159_spill] sm:$0xff] }
 0x5f1   :  { %vm5490_vm3 = vcmp.gt.f32.partialorder %v20386_v4, 20.0  ;;  %v6318_v13 = vsel %vm5486_vm7, %v20342_v48, %v5758_v6  ;;  %v6381_v53 = vmul.f32 %v6317_v29, %v20387_v23  ;;  %v5761_v44 = vmul.f32 0.6931472, %v9087_v7  ;;  %v9091_v46 = vpop.eup %9090  ;;  %v20390_v50 = vld [vmem:[#allocation106_spill] sm:$0xff]  ;;  %v20391_v28 = vld [vmem:[#allocation184_spill] sm:$0xff]  ;;  %v20410_v31 = vld [vmem:[#allocation121_spill] sm:$0xff] }
 0x5f2   :  { %v8138_v38 = vpack.c.bf16 %v6398_v3, %v6397_v16  ;;  %v6382_v5 = vmul.f32 %v6318_v13, %v20388_v61  ;;  %v5920_v2 = vsel %vm16710_vm12, %v16507_v40, %v5914_v35  ;;  %v6335_v26 = vsel %vm5503_vm4, %v20348_v39, %v5911_v34  ;;  %v9093_v48 = vpop.eup %9092  ;;  %v20398_v29 = vld [vmem:[#allocation28_spill] sm:$0xff]  ;;  %v20401_v13 = vld [vmem:[#allocation66_spill] sm:$0xff] }
 0x5f3   :  { %vm20389_vm1 = vcmp.gt.f32.partialorder %v20354_v36, 20.0  ;;  %v6399_v21 = vmul.f32 %v6335_v26, %v20390_v50  ;;  %v5767_v16 = vsel %vm16725_vm11, %v20391_v28, %v5761_v44  ;;  %v5770_v7 = vmul.f32 0.6931472, %v9089_v14  ;;  %v20400_v14 = vld [vmem:[#allocation125_spill] sm:$0xff]  ;;  %v20403_v44 = vld [vmem:[#allocation32_spill] sm:$0xff] }
 0x5f4   :  { %v6336_v19 = vsel %vm20389_vm1, %v20354_v36, %v5920_v2  ;;  %v20392_v3 = vand.u32 2147483647, %v16403_v11  ;;  %vm16840_vm5 = vcmp.lt.f32.partialorder %v20395_v33, 0.0004427343  ;;  %v9095_v36 = vpop.eup %9094  ;;  %8139 = vmatprep.subr.bf16.mxu1 %v8138_v38  ;;  %v8140_v6 = vpack.c.bf16 %v6382_v5, %v6381_v53  ;;  %v20408_v50 = vld [vmem:[#allocation65_spill] sm:$0xff] }
 0x5f5   :  { %v6400_v35 = vmul.f32 %v6336_v19, %v20398_v29  ;;  %vm20399_vm7 = vcmp.gt.f32.partialorder %v20359_v9, 20.0  ;;  %v5923_v11 = vmul.f32 0.6931472, %v9091_v46  ;;  %vm5507_vm8 = vcmp.gt.f32.partialorder %v20400_v14, 20.0  ;;  %v9097_v23 = vpop.eup %9096 }
 0x5f6   :  { %vm16834_vm2 = vcmp.lt.f32.partialorder %v20392_v3, 0.0004427343  ;;  %v6319_v63 = vsel %vm20399_vm7, %v20359_v9, %v5767_v16  ;;  %vm5508_vm4 = vcmp.gt.f32.partialorder %v20401_v13, 20.0  ;;  %v5776_v34 = vsel %vm16745_vm14, %v20402_v15, %v5770_v7  ;;  %v9099_v9 = vpop.eup %9098  ;;  %8141 = vmatpush3.bf16.msra.mxu1 %v8140_v6 }
 0x5f7   :  { %v6383_v61 = vmul.f32 %v6319_v63, %v20403_v44  ;;  %v5932_v38 = vmul.f32 0.6931472, %v9093_v48  ;;  %v5779_v5 = vmul.f32 0.6931472, %v9095_v36  ;;  %v20404_v53 = vand.u32 2147483647, %v16233_v56  ;;  %v9101_v48 = vpop.eup %9100 }
 0x5f8   :  { %v8142_v46 = vpack.c.bf16 %v6400_v35, %v6399_v21  ;;  %vm20407_vm11 = vcmp.gt.f32.partialorder %v20365_v57, 20.0  ;;  %v5929_v55 = vsel %vm16761_vm13, %v16550_v27, %v5923_v11  ;;  %v5788_v19 = vmul.f32 0.6931472, %v9097_v23  ;;  %v9103_v16 = vpop.eup %9102  ;;  %v20414_v63 = vld [vmem:[#allocation178_spill] sm:$0xff] }
 0x5f9   :  { %vm16856_vm12 = vcmp.lt.f32.partialorder %v20404_v53, 0.0004427343  ;;  %v6320_v26 = vsel %vm20407_vm11, %v20365_v57, %v5776_v34  ;;  %v5938_v56 = vsel %vm16777_vm15, %v16559_v17, %v5932_v38  ;;  %vm20409_vm14 = vcmp.gt.f32.partialorder %v20370_v8, 20.0  ;;  %v20424_v53 = vld [vmem:[#allocation43_spill] sm:$0xff] }
 0x5fa   :  { %v6384_v28 = vmul.f32 %v6320_v26, %v20408_v50  ;;  %v6337_v21 = vsel %vm20409_vm14, %v20370_v8, %v5929_v55  ;;  %v5785_v57 = vsel %vm16783_vm9, %v16574_v12, %v5779_v5  ;;  %8143 = vmatprep.subr.bf16.mxu1 %v8142_v46  ;;  %v6338_v27 = vsel %vm5506_vm10, %v20379_v25, %v5938_v56  ;;  %v20411_v25 = vld [vmem:[#allocation108_spill] sm:$0xff]  ;;  %v20428_v46 = vld [vmem:[#allocation154_spill] sm:$0xff]  ;;  %v20433_v56 = vld [vmem:[#allocation71_spill] sm:$0xff] }
 0x5fb   :  { %v6401_v32 = vmul.f32 %v6337_v21, %v16524_v0  ;;  %v5794_v17 = vsel %vm16799_vm0, %v16577_v62, %v5788_v19  ;;  %v6321_v8 = vsel %vm5489_vm6, %v20380_v41, %v5785_v57  ;;  %vm5491_vm13 = vcmp.gt.f32.partialorder %v20410_v31, 20.0  ;;  %v20412_v0 = vld [vmem:[#allocation102_spill] sm:$0xff]  ;;  %v20413_v41 = vld [vmem:[#allocation177_spill] sm:$0xff]  ;;  %v20434_v57 = vld [vmem:[#allocation120_spill] sm:$0xff] }
 0x5fc   :  { %v8144_v47 = vpack.c.bf16 %v6384_v28, %v6383_v61  ;;  %v6402_v12 = vmul.f32 %v6338_v27, %v16536_v43  ;;  %v6322_v7 = vsel %vm5490_vm3, %v20386_v4, %v5794_v17  ;;  %v6385_v3 = vmul.f32 %v6321_v8, %v20411_v25  ;;  %v20420_v61 = vld [vmem:[#allocation176_spill] sm:$0xff]  ;;  %v20429_v19 = vld [vmem:[#allocation142_spill] sm:$0xff]  ;;  %v20438_v17 = vld [vmem:[#allocation33_spill] sm:$0xff] }
 0x5fd   :  { %v6386_v33 = vmul.f32 %v6322_v7, %v20412_v0  ;;  %v5941_v36 = vmul.f32 0.6931472, %v9099_v9  ;;  %v5950_v24 = vmul.f32 0.6931472, %v9101_v48  ;;  %v5797_v62 = vmul.f32 0.6931472, %v9103_v16 }
 0x5fe   :  { %8145 = vmatpush3.bf16.msra.mxu1 %v8144_v47  ;;  %v8146_v6 = vpack.c.bf16 %v6402_v12, %v6401_v32  ;;  %v5975_v29 = vadd.f32 1.0, %v20413_v41  ;;  %v5978_v35 = vmul.f32 -0.5, %v20413_v41  ;;  %v5984_v11 = vadd.f32 1.0, %v20414_v63  ;;  %v20439_v47 = vld [vmem:[#allocation68_spill] sm:$0xff]  ;;  %v20440_v7 = vld [vmem:[#allocation39_spill] sm:$0xff]  ;;  %v20441_v25 = vld [vmem:[#allocation45_spill] sm:$0xff] }
 0x5ff   :  { %v5947_v43 = vsel %vm16834_vm2, %v16606_v37, %v5941_v36  ;;  %v5956_v4 = vsel %vm16840_vm5, %v16627_v52, %v5950_v24  ;;  %v5987_v23 = vmul.f32 -0.5, %v20414_v63  ;;  %v8148_v15 = vpack.c.bf16 %v6386_v33, %v6385_v3  ;;  %v20442_v3 = vld [vmem:[#allocation67_spill] sm:$0xff]  ;;  %v20465_v50 = vld [vmem:[#allocation26_spill] sm:$0xff] }
 0x600   :  { %8147 = vmatprep.subr.bf16.mxu1 %v8146_v6  ;;  %v6339_v22 = vsel %vm5507_vm8, %v20400_v14, %v5947_v43  ;;  %v6340_v34 = vsel %vm5508_vm4, %v20401_v13, %v5956_v4  ;;  %9106 = vlog2.f32 %v16674_v45  ;;  %v5803_v40 = vsel %vm16856_vm12, %v16655_v59, %v5797_v62  ;;  %v20418_v13 = vld [vmem:[#allocation40_spill] sm:$0xff]  ;;  %v20458_v14 = vld [vmem:[#allocation42_spill] sm:$0xff] }
 0x601   :  { %v6403_v37 = vmul.f32 %v6339_v22, %v16583_v54  ;;  %v6404_v52 = vmul.f32 %v6340_v34, %v16591_v58  ;;  %9108 = vlog2.f32 %v16691_v30  ;;  %v20415_v39 = vand.u32 2147483647, %v16241_v51  ;;  %v20419_v30 = vld [vmem:[#allocation20_spill] sm:$0xff]  ;;  %v20452_v34 = vld [vmem:[#allocation179_spill] sm:$0xff] }
 0x602   :  { %8149 = vmatpush3.bf16.msra.mxu1 %v8148_v15  ;;  %9110 = vlog2.f32 %v16719_v20  ;;  %v16926_v54 = vmul.f32 %v20346_v18, %v16753_v10  ;;  %v5384_v58 = vadd.f32 0.5, %v16741_v42  ;;  %v5981_v45 = vand.u32 2147483647, %v20413_v41 }
 0x603   :  { %vm16919_vm9 = vcmp.lt.f32.partialorder %v20415_v39, 0.0004427343  ;;  %v8150_v59 = vpack.c.bf16 %v6404_v52, %v6403_v37  ;;  %vm5492_vm15 = vcmp.gt.f32.partialorder %v20418_v13, 20.0  ;;  %9112 = vlog2.f32 %v16735_v60 }
 0x604   :  { %v5979_v51 = vadd.f32 1.0, %v5978_v35  ;;  %v5831_v44 = vadd.f32 1.0, %v20419_v30  ;;  %v6323_v20 = vsel %vm5491_vm13, %v20410_v31, %v5803_v40  ;;  %v20421_v38 = vand.u32 2147483647, %v20420_v61  ;;  %v9105_v31 = vpop.eup %9104  ;;  %v20446_v35 = vld [vmem:[#allocation119_spill] sm:$0xff]  ;;  %v20453_v40 = vld [vmem:[#allocation197_spill] sm:$0xff] }
 0x605   :  { %9114 = vlog2.f32 %v5975_v29  ;;  %v5988_v42 = vadd.f32 1.0, %v5987_v23  ;;  %v5834_v5 = vmul.f32 -0.5, %v20419_v30  ;;  %8151 = vmatprep.subr.bf16.mxu1 %v8150_v59  ;;  %vm5509_vm10 = vcmp.gt.f32.partialorder %v20424_v53, 20.0  ;;  %v20457_v61 = vld [vmem:[#allocation124_spill] sm:$0xff] }
 0x606   :  { %vm16938_vm0 = vcmp.lt.f32.partialorder %v20421_v38, 0.0004427343  ;;  %v20425_v60 = vand.u32 2147483647, %v16432_v49  ;;  %9116 = vlog2.f32 %v5984_v11  ;;  %v5990_v9 = vand.u32 2147483647, %v20414_v63 }
 0x607   :  { %v5840_v26 = vadd.f32 1.0, %v20428_v46  ;;  %v5843_v55 = vmul.f32 -0.5, %v20428_v46  ;;  %vm5510_vm3 = vcmp.gt.f32.partialorder %v20429_v19, 20.0  ;;  %v20430_v48 = vand.u32 2147483647, %v16249_v1  ;;  %v20447_v11 = vld [vmem:[#allocation128_spill] sm:$0xff] }
 0x608   :  { %vm16946_vm6 = vcmp.lt.f32.partialorder %v20425_v60, 0.0004427343  ;;  %9118 = vlog2.f32 %v5831_v44  ;;  %v5835_v49 = vadd.f32 1.0, %v5834_v5  ;;  %v5837_v28 = vand.u32 2147483647, %v20419_v30  ;;  %v20459_v60 = vld [vmem:[#allocation112_spill] sm:$0xff] }
 0x609   :  { %vm16956_vm1 = vcmp.lt.f32.partialorder %v20430_v48, 0.0004427343  ;;  %v5321_v21 = vmul.f32 0.5, %v20433_v56  ;;  %vm5493_vm2 = vcmp.gt.f32.partialorder %v20434_v57, 20.0  ;;  %v20435_v16 = vand.u32 2147483647, %v20346_v18 }
 0x60a   :  { %9120 = vlog2.f32 %v5840_v26  ;;  %v5844_v1 = vadd.f32 1.0, %v5843_v55  ;;  %v5846_v32 = vand.u32 2147483647, %v20428_v46  ;;  %v5322_v8 = vmul.f32 0.5, %v20438_v17  ;;  %v20443_v18 = vld [vmem:[#allocation49_spill] sm:$0xff]  ;;  %v9107_v4 = vpop.eup %9106 }
 0x60b   :  { %vm16965_vm5 = vcmp.lt.f32.partialorder %v20435_v16, 0.0004427343  ;;  %v6387_v12 = vmul.f32 %v6323_v20, %v20439_v47  ;;  %vm5494_vm7 = vcmp.gt.f32.partialorder %v20440_v7, 20.0  ;;  %v16975_v0 = vmul.f32 %v20442_v3, %v20441_v25  ;;  %v9109_v52 = vpop.eup %9108  ;;  %v20464_v47 = vld [vmem:[#allocation144_spill] sm:$0xff] }
 0x60c   :  { %v16978_v33 = vmul.f32 %v5384_v58, %v20443_v18  ;;  %v5980_v36 = vmul.f32 %v20413_v41, %v5979_v51  ;;  %v5806_v24 = vmul.f32 0.6931472, %v9105_v31  ;;  %vm16981_vm8 = vcmp.lt.f32.partialorder %v5981_v45, 0.0004427343  ;;  %v20454_v45 = vld [vmem:[#allocation46_spill] sm:$0xff] }
 0x60d   :  { %v16986_v6 = vmul.f32 %v20414_v63, %v5988_v42  ;;  %v16989_v29 = vmul.f32 %v20419_v30, %v5835_v49  ;;  %v5993_v43 = vadd.f32 1.0, %v20446_v35  ;;  %vm16993_vm12 = vcmp.lt.f32.partialorder %v5990_v9, 0.0004427343  ;;  %v9111_v30 = vpop.eup %9110  ;;  %v20461_v49 = vld [vmem:[#allocation126_spill] sm:$0xff] }
 0x60e   :  { %vm16997_vm11 = vcmp.lt.f32.partialorder %v5837_v28, 0.0004427343  ;;  %v5845_v15 = vmul.f32 %v20428_v46, %v5844_v1  ;;  %v17002_v63 = vadd.f32 0.5, %v5321_v21  ;;  %v5996_v22 = vmul.f32 -0.5, %v20446_v35  ;;  %v9113_v5 = vpop.eup %9112  ;;  %v20460_v46 = vld [vmem:[#allocation152_spill] sm:$0xff] }
 0x60f   :  { %v6002_v37 = vadd.f32 1.0, %v20452_v34  ;;  %v5812_v39 = vsel %vm16919_vm9, %v20453_v40, %v5806_v24  ;;  %v5959_v58 = vmul.f32 0.6931472, %v9107_v4  ;;  %vm5512_vm14 = vcmp.gt.f32.partialorder %v20454_v45, 20.0  ;;  %v9115_v48 = vpop.eup %9114 }
 0x610   :  { %vm17010_vm13 = vcmp.lt.f32.partialorder %v5846_v32, 0.0004427343  ;;  %v17014_v51 = vadd.f32 0.5, %v5322_v8  ;;  %9122 = vlog2.f32 %v5993_v43  ;;  %v6324_v44 = vsel %vm5492_vm15, %v20418_v13, %v5812_v39  ;;  %v9117_v16 = vpop.eup %9116  ;;  %v20462_v32 = vld [vmem:[#allocation73_spill] sm:$0xff]  ;;  %v20463_v8 = vld [vmem:[#allocation62_spill] sm:$0xff] }
 0x611   :  { %v5968_v20 = vmul.f32 0.6931472, %v9109_v52  ;;  %vm5495_vm4 = vcmp.gt.f32.partialorder %v20457_v61, 20.0  ;;  %vm5496_vm9 = vcmp.gt.f32.partialorder %v20458_v14, 20.0  ;;  %v5997_v38 = vadd.f32 1.0, %v5996_v22  ;;  %v20466_v22 = vld [vmem:[#allocation74_spill] sm:$0xff] }
 0x612   :  { %v5999_v42 = vand.u32 2147483647, %v20446_v35  ;;  %v6388_v9 = vmul.f32 %v6324_v44, %v20459_v60  ;;  %v5965_v26 = vsel %vm16938_vm0, %v20460_v46, %v5959_v58  ;;  %v5815_v55 = vmul.f32 0.6931472, %v9111_v30  ;;  %v9119_v31 = vpop.eup %9118  ;;  %v20468_v30 = vld [vmem:[#allocation35_spill] sm:$0xff]  ;;  %v20469_v44 = vld [vmem:[#allocation80_spill] sm:$0xff] }
 0x613   :  { %9124 = vlog2.f32 %v6002_v37  ;;  %v5974_v13 = vsel %vm16946_vm6, %v20461_v49, %v5968_v20  ;;  %v6341_v28 = vsel %vm5509_vm10, %v20424_v53, %v5965_v26  ;;  %v5824_v56 = vmul.f32 0.6931472, %v9113_v5  ;;  %v20471_v60 = vld [vmem:[#allocation127_spill] sm:$0xff]  ;;  %v20472_v26 = vld [vmem:[#allocation130_spill] sm:$0xff] }
 0x614   :  { %v5998_v21 = vmul.f32 %v20446_v35, %v5997_v38  ;;  %v8152_v1 = vpack.c.bf16 %v6388_v9, %v6387_v12  ;;  %v6342_v10 = vsel %vm5510_vm3, %v20429_v19, %v5974_v13  ;;  %v6405_v17 = vmul.f32 %v6341_v28, %v20462_v32  ;;  %v9121_v18 = vpop.eup %9120  ;;  %v20474_v13 = vld [vmem:[#allocation53_spill] sm:$0xff] }
 0x615   :  { %v5821_v2 = vsel %vm16956_vm1, %v20463_v8, %v5815_v55  ;;  %v6406_v25 = vmul.f32 %v6342_v10, %v20464_v47  ;;  %v5830_v53 = vsel %vm16965_vm5, %v16926_v54, %v5824_v56  ;;  %v5977_v3 = vmul.f32 0.6931472, %v9115_v48  ;;  %v20473_v48 = vld [vmem:[#allocation69_spill] sm:$0xff]  ;;  %v20479_v8 = vld [vmem:[#allocation75_spill] sm:$0xff]  ;;  %v20481_v47 = vld [vmem:[#allocation54_spill] sm:$0xff] }
 0x616   :  { %v6325_v12 = vsel %vm5493_vm2, %v20434_v57, %v5821_v2  ;;  %8153 = vmatpush3.bf16.msra.mxu1 %v8152_v1  ;;  %v6326_v19 = vsel %vm5494_vm7, %v20440_v7, %v5830_v53  ;;  %v5986_v35 = vmul.f32 0.6931472, %v9117_v16  ;;  %v5833_v43 = vmul.f32 0.6931472, %v9119_v31  ;;  %v20480_v2 = vld [vmem:[#allocation77_spill] sm:$0xff] }
 0x617   :  { %v6389_v24 = vmul.f32 %v6325_v12, %v20465_v50  ;;  %v8154_v4 = vpack.c.bf16 %v6406_v25, %v6405_v17  ;;  %v6390_v37 = vmul.f32 %v6326_v19, %v20466_v22  ;;  %v5983_v54 = vsel %vm16981_vm8, %v5980_v36, %v5977_v3  ;;  %v20483_v12 = vld [vmem:[#allocation11_spill] sm:$0xff] }
 0x618   :  { %v5842_v27 = vmul.f32 0.6931472, %v9121_v18  ;;  %v5992_v57 = vsel %vm16993_vm12, %v16986_v6, %v5986_v35  ;;  %vm20467_vm15 = vcmp.gt.f32.partialorder %v20447_v11, 20.0  ;;  %v5839_v7 = vsel %vm16997_vm11, %v16989_v29, %v5833_v43  ;;  %v20484_v18 = vld [vmem:[#allocation113_spill] sm:$0xff]  ;;  %v20486_v35 = vld [vmem:[#allocation70_spill] sm:$0xff] }
 0x619   :  { %v6343_v52 = vsel %vm20467_vm15, %v20447_v11, %v5983_v54  ;;  %v6005_v40 = vmul.f32 -0.5, %v20452_v34  ;;  %8155 = vmatprep.subr.bf16.mxu1 %v8154_v4  ;;  %v8156_v39 = vpack.c.bf16 %v6390_v37, %v6389_v24  ;;  %v6344_v36 = vsel %vm5512_vm14, %v20454_v45, %v5992_v57  ;;  %v20485_v24 = vld [vmem:[#allocation160_spill] sm:$0xff]  ;;  %v20487_v4 = vld [vmem:[#allocation99_spill] sm:$0xff] }
 0x61a   :  { %v6407_v62 = vmul.f32 %v6343_v52, %v16975_v0  ;;  %v5848_v6 = vsel %vm17010_vm13, %v5845_v15, %v5842_v27  ;;  %v9123_v23 = vpop.eup %9122  ;;  %v6408_v11 = vmul.f32 %v6344_v36, %v16978_v33  ;;  %v6327_v29 = vsel %vm5495_vm4, %v20457_v61, %v5839_v7  ;;  %v20470_v33 = vld [vmem:[#allocation131_spill] sm:$0xff]  ;;  %v20489_v27 = vld [vmem:[#allocation150_spill] sm:$0xff] }
 0x61b   :  { %v6328_v41 = vsel %vm5496_vm9, %v20458_v14, %v5848_v6  ;;  %v6006_v58 = vadd.f32 1.0, %v6005_v40  ;;  %8157 = vmatpush3.bf16.msra.mxu1 %v8156_v39  ;;  %v6391_v45 = vmul.f32 %v6327_v29, %v20468_v30  ;;  %v5995_v20 = vmul.f32 0.6931472, %v9123_v23  ;;  %v20488_v37 = vld [vmem:[#allocation19_spill] sm:$0xff]  ;;  %v20492_v39 = vld [vmem:[#allocation180_spill] sm:$0xff] }
 0x61c   :  { %v6392_v0 = vmul.f32 %v6328_v41, %v20469_v44  ;;  %v6008_v15 = vand.u32 2147483647, %v20452_v34  ;;  %v8158_v38 = vpack.c.bf16 %v6408_v11, %v6407_v62  ;;  %v5449_v5 = vmul.f32 %v17002_v63, %v20470_v33  ;;  %v20490_v52 = vld [vmem:[#allocation15_spill] sm:$0xff]  ;;  %v20494_v11 = vld [vmem:[#allocation181_spill] sm:$0xff]  ;;  %v17125_v41 = vpop.trf.xlu0  ;;  %v20496_v44 = vld [vmem:[#allocation140_spill] sm:$0xff] }
 0x61d   :  { %v9125_v59 = vpop.eup %9124  ;;  %vm5513_vm0 = vcmp.gt.f32.partialorder %v20471_v60, 20.0  ;;  %vm6000_vm10 = vcmp.lt.f32.partialorder %v5999_v42, 0.0004427343  ;;  %v6007_v46 = vmul.f32 %v20452_v34, %v6006_v58  ;;  %vm5514_vm6 = vcmp.gt.f32.partialorder %v20472_v26, 20.0  ;;  %v20475_v42 = vld [vmem:[#allocation156_spill] sm:$0xff]  ;;  %v20477_v34 = vld [vmem:[#allocation14_spill] sm:$0xff] }
 0x61e   :  { %v8160_v61 = vpack.c.bf16 %v6392_v0, %v6391_v45  ;;  %v6001_v9 = vsel %vm6000_vm10, %v5998_v21, %v5995_v20  ;;  %v6004_v14 = vmul.f32 0.6931472, %v9125_v59  ;;  %8159 = vmatprep.subr.bf16.mxu1 %v8158_v38  ;;  %vm6009_vm3 = vcmp.lt.f32.partialorder %v6008_v15, 0.0004427343  ;;  %v20476_v21 = vld [vmem:[#allocation171_spill] sm:$0xff] }
 0x61f   :  { %v6345_v55 = vsel %vm5513_vm0, %v20471_v60, %v6001_v9  ;;  %v5849_v49 = vadd.f32 1.0, %v20473_v48  ;;  %v5450_v63 = vmul.f32 %v17014_v51, %v20474_v13  ;;  %v5858_v16 = vadd.f32 1.0, %v20475_v42  ;;  %v20493_v6 = vld [vmem:[#allocation107_spill] sm:$0xff]  ;;  %v20499_v60 = vld [vmem:[#allocation76_spill] sm:$0xff] }
 0x620   :  { %8161 = vmatpush3.bf16.msra.mxu1 %v8160_v61  ;;  %v6010_v28 = vsel %vm6009_vm3, %v6007_v46, %v6004_v14  ;;  %v6409_v56 = vmul.f32 %v6345_v55, %v5449_v5  ;;  %v17091_v1 = vadd.f32 0.5, %v20476_v21  ;;  %v20478_v10 = vmin.f32 %v20477_v34, 20.0  ;;  %v20495_v58 = vld [vmem:[#allocation123_spill] sm:$0xff]  ;;  %v20500_v55 = vld [vmem:[#allocation158_spill] sm:$0xff]  ;;  %v20504_v21 = vld [vmem:[#allocation129_spill] sm:$0xff] }
 0x621   :  { %v6346_v17 = vsel %vm5514_vm6, %v20472_v26, %v6010_v28  ;;  %9126 = vlog2.f32 %v5849_v49  ;;  %v17098_v31 = vmul.f32 %v20480_v2, %v20479_v8  ;;  %v20482_v25 = vmin.f32 %v20481_v47, 20.0  ;;  %v17205_v28 = vpop.trf.xlu0 }
 0x622   :  { %v5733_v32 = vmul.f32 1.442695, %v20478_v10  ;;  %v6410_v53 = vmul.f32 %v6346_v17, %v5450_v63  ;;  %9128 = vlog2.f32 %v5858_v16  ;;  %v17103_v3 = vadd.f32 0.5, %v20483_v12 }
 0x623   :  { %v5735_v51 = vmul.f32 1.442695, %v20482_v25  ;;  %9130 = vpow2.f32 %v20484_v18  ;;  %v5852_v19 = vmul.f32 -0.5, %v20473_v48  ;;  %v5861_v50 = vmul.f32 -0.5, %v20475_v42  ;;  %v20506_v25 = vld [vmem:[#allocation109_spill] sm:$0xff] }
 0x624   :  { %v17110_v43 = vmul.f32 %v20486_v35, %v20485_v24  ;;  %9132 = vpow2.f32 %v20487_v4  ;;  %v8162_v22 = vpack.c.bf16 %v6410_v53, %v6409_v56  ;;  %v5323_v54 = vmul.f32 0.5, %v20488_v37  ;;  %v20503_v56 = vld [vmem:[#allocation136_spill] sm:$0xff]  ;;  %v20511_v37 = vld [vmem:[#allocation87_spill] sm:$0xff] }
 0x625   :  { %v17115_v57 = vadd.f32 0.5, %v20489_v27  ;;  %9134 = vpow2.f32 %v5733_v32  ;;  %v20491_v7 = vmin.f32 %v20490_v52, 20.0  ;;  %v6011_v36 = vadd.f32 1.0, %v20492_v39  ;;  %v20505_v32 = vld [vmem:[#allocation132_spill] sm:$0xff] }
 0x626   :  { %9136 = vpow2.f32 %v5735_v51  ;;  %8163 = vmatprep.subr.bf16.mxu1 %v8162_v22  ;;  %v5855_v62 = vand.u32 2147483647, %v20473_v48  ;;  %v5324_v23 = vmul.f32 0.5, %v20493_v6  ;;  %v6020_v29 = vadd.f32 1.0, %v20494_v11 }
 0x627   :  { %v17119_v40 = vmul.f32 1.442695, %v20491_v7  ;;  %vm5497_vm1 = vcmp.gt.f32.partialorder %v20495_v58, 20.0  ;;  %v5853_v30 = vadd.f32 1.0, %v5852_v19  ;;  %v5862_v45 = vadd.f32 1.0, %v5861_v50 }
 0x628   :  { %9138 = vlog2.f32 %v6011_v36  ;;  %vm5498_vm2 = vcmp.gt.f32.partialorder %v20496_v44, 20.0  ;;  %v5864_v0 = vand.u32 2147483647, %v20475_v42  ;;  %v5387_v20 = vadd.f32 0.5, %v5323_v54 }
 0x629   :  { %9140 = vlog2.f32 %v6020_v29  ;;  %v6014_v15 = vmul.f32 -0.5, %v20492_v39  ;;  %v6023_v59 = vmul.f32 -0.5, %v20494_v11  ;;  %vm17132_vm5 = vcmp.lt.f32.partialorder %v5855_v62, 0.0004427343  ;;  %v20512_v62 = vld [vmem:[#allocation116_spill] sm:$0xff] }
 0x62a   :  { %v5388_v33 = vadd.f32 0.5, %v5324_v23  ;;  %v6017_v5 = vand.u32 2147483647, %v20492_v39  ;;  %v5867_v61 = vadd.f32 1.0, %v20499_v60  ;;  %v5854_v14 = vmul.f32 %v20473_v48, %v5853_v30 }
 0x62b   :  { %v9127_v9 = vpop.eup %9126  ;;  %v5863_v46 = vmul.f32 %v20475_v42, %v5862_v45  ;;  %v6026_v26 = vand.u32 2147483647, %v20494_v11  ;;  %v5876_v49 = vadd.f32 1.0, %v20500_v55  ;;  %vm17142_vm7 = vcmp.lt.f32.partialorder %v5864_v0, 0.0004427343  ;;  %v20514_v0 = vld [vmem:[#allocation41_spill] sm:$0xff] }
 0x62c   :  { %v9129_v13 = vpop.eup %9128  ;;  %v5851_v63 = vmul.f32 0.6931472, %v9127_v9  ;;  %v5451_v16 = vmul.f32 %v5387_v20, %v20503_v56  ;;  %vm5515_vm8 = vcmp.gt.f32.partialorder %v20504_v21, 20.0  ;;  %9142 = vlog2.f32 %v5867_v61  ;;  %v20515_v20 = vld [vmem:[#allocation51_spill] sm:$0xff] }
 0x62d   :  { %v17148_v10 = vpop.eup %9130  ;;  %v5860_v48 = vmul.f32 0.6931472, %v9129_v13  ;;  %vm5516_vm4 = vcmp.gt.f32.partialorder %v20505_v32, 20.0  ;;  %v6015_v42 = vadd.f32 1.0, %v6014_v15  ;;  %v6024_v17 = vadd.f32 1.0, %v6023_v59  ;;  %v20516_v59 = vld [vmem:[#allocation31_spill] sm:$0xff] }
 0x62e   :  { %9144 = vlog2.f32 %v5876_v49  ;;  %v17151_v8 = vpop.eup %9132  ;;  %v5857_v2 = vsel %vm17132_vm5, %v5854_v14, %v5851_v63  ;;  %v5452_v51 = vmul.f32 %v5388_v33, %v20506_v25  ;;  %vm17156_vm12 = vcmp.lt.f32.partialorder %v6017_v5, 0.0004427343  ;;  %v20522_v13 = vld [vmem:[#allocation21_spill] sm:$0xff] }
 0x62f   :  { %v5870_v12 = vmul.f32 -0.5, %v20499_v60  ;;  %v17161_v18 = vpop.eup %9134  ;;  %v5866_v19 = vsel %vm17142_vm7, %v5863_v46, %v5860_v48  ;;  %v6329_v50 = vsel %vm5497_vm1, %v20495_v58, %v5857_v2  ;;  %vm17168_vm11 = vcmp.lt.f32.partialorder %v6026_v26, 0.0004427343  ;;  %v20513_v58 = vld [vmem:[#allocation60_spill] sm:$0xff] }
 0x630   :  { %v5873_v35 = vand.u32 2147483647, %v20499_v60  ;;  %v17173_v4 = vpop.eup %9136  ;;  %v6330_v22 = vsel %vm5498_vm2, %v20496_v44, %v5866_v19  ;;  %v6393_v54 = vmul.f32 %v6329_v50, %v20511_v37  ;;  %v5879_v27 = vmul.f32 -0.5, %v20500_v55 }
 0x631   :  { %v5882_v7 = vand.u32 2147483647, %v20500_v55  ;;  %v6394_v6 = vmul.f32 %v6330_v22, %v20512_v62  ;;  %v6016_v23 = vmul.f32 %v20492_v39, %v6015_v42  ;;  %v6025_v29 = vmul.f32 %v20494_v11, %v6024_v17  ;;  %v20519_v39 = vld [vmem:[#allocation34_spill] sm:$0xff] }
 0x632   :  { %v9139_v36 = vpop.eup %9138  ;;  %vm5499_vm14 = vcmp.gt.f32.partialorder %v20513_v58, 20.0  ;;  %vm5500_vm13 = vcmp.gt.f32.partialorder %v20514_v0, 20.0  ;;  %v5871_v44 = vadd.f32 1.0, %v5870_v12  ;;  %v5341_v15 = vmul.f32 0.5, %v20515_v20  ;;  %v20527_v20 = vld [vmem:[#allocation81_spill] sm:$0xff] }
 0x633   :  { %v9141_v30 = vpop.eup %9140  ;;  %v6013_v45 = vmul.f32 0.6931472, %v9139_v36  ;;  %v6173_v38 = vadd.f32 1.0, %v20516_v59  ;;  %v8164_v33 = vpack.c.bf16 %v6394_v6, %v6393_v54  ;;  %vm17188_vm9 = vcmp.lt.f32.partialorder %v5873_v35, 0.0004427343  ;;  %v20523_v54 = vld [vmem:[#allocation29_spill] sm:$0xff] }
 0x634   :  { %v6022_v5 = vmul.f32 0.6931472, %v9141_v30  ;;  %v6182_v9 = vadd.f32 1.0, %v20519_v39  ;;  %v5880_v14 = vadd.f32 1.0, %v5879_v27  ;;  %vm17195_vm15 = vcmp.lt.f32.partialorder %v5882_v7, 0.0004427343 }
 0x635   :  { %v6019_v11 = vsel %vm17156_vm12, %v6016_v23, %v6013_v45  ;;  %9146 = vlog2.f32 %v6173_v38  ;;  %8165 = vmatpush3.bf16.msra.mxu1 %v8164_v33  ;;  %v5342_v63 = vmul.f32 0.5, %v20522_v13  ;;  %v5872_v17 = vmul.f32 %v20499_v60, %v5871_v44  ;;  %v20524_v7 = vld [vmem:[#allocation98_spill] sm:$0xff]  ;;  %v20525_v23 = vld [vmem:[#allocation115_spill] sm:$0xff] }
 0x636   :  { %v6028_v26 = vsel %vm17168_vm11, %v6025_v29, %v6022_v5  ;;  %v6347_v49 = vsel %vm5515_vm8, %v20504_v21, %v6019_v11  ;;  %9148 = vlog2.f32 %v6182_v9  ;;  %v9143_v56 = vpop.eup %9142  ;;  %v6176_v2 = vmul.f32 -0.5, %v20516_v59  ;;  %v20526_v45 = vld [vmem:[#allocation182_spill] sm:$0xff]  ;;  %v20529_v5 = vld [vmem:[#allocation147_spill] sm:$0xff]  ;;  %v20530_v11 = vld [vmem:[#allocation9_spill] sm:$0xff] }
 0x637   :  { %v6348_v48 = vsel %vm5516_vm4, %v20505_v32, %v6028_v26  ;;  %v6411_v42 = vmul.f32 %v6347_v49, %v5451_v16  ;;  %v5869_v12 = vmul.f32 0.6931472, %v9143_v56  ;;  %v6185_v21 = vmul.f32 -0.5, %v20519_v39  ;;  %v20528_v38 = vld [vmem:[#allocation58_spill] sm:$0xff] }
 0x638   :  { %v9145_v25 = vpop.eup %9144  ;;  %v6412_v53 = vmul.f32 %v6348_v48, %v5452_v51  ;;  %v8503_v19 = vunpack.i.l.bf16 %v17125_v41  ;;  %v5881_v24 = vmul.f32 %v20500_v55, %v5880_v14  ;;  %v5405_v32 = vadd.f32 0.5, %v5341_v15  ;;  %v20532_v48 = vld [vmem:[#allocation193_spill] sm:$0xff] }
 0x639   :  { %v5878_v50 = vmul.f32 0.6931472, %v9145_v25  ;;  %v5875_v22 = vsel %vm17188_vm9, %v5872_v17, %v5869_v12  ;;  %v5406_v16 = vadd.f32 0.5, %v5342_v63  ;;  %v6179_v37 = vand.u32 2147483647, %v20516_v59  ;;  %v20531_v63 = vld [vmem:[#allocation133_spill] sm:$0xff] }
 0x63a   :  { %v8166_v35 = vpack.c.bf16 %v6412_v53, %v6411_v42  ;;  %6637 = vmatprep.mubr.f32.mxu1 %v8503_v19  ;;  %v6331_v51 = vsel %vm5499_vm14, %v20513_v58, %v5875_v22  ;;  %v6029_v27 = vadd.f32 1.0, %v20523_v54  ;;  %v6177_v62 = vadd.f32 1.0, %v6176_v2  ;;  %v17248_v53 = vpop.trf.xlu0  ;;  %v20534_v19 = vld [vmem:[#allocation104_spill] sm:$0xff] }
 0x63b   :  { %v5884_v60 = vsel %vm17195_vm15, %v5881_v24, %v5878_v50  ;;  %v6395_v36 = vmul.f32 %v6331_v51, %v20524_v7  ;;  %v6186_v6 = vadd.f32 1.0, %v6185_v21  ;;  %v6188_v30 = vand.u32 2147483647, %v20519_v39  ;;  %v20533_v21 = vld [vmem:[#allocation57_spill] sm:$0xff]  ;;  %v20535_v22 = vld [vmem:[#allocation96_spill] sm:$0xff] }
 0x63c   :  { %8167 = vmatprep.subr.bf16.mxu1 %v8166_v35  ;;  %v6332_v55 = vsel %vm5500_vm13, %v20514_v0, %v5884_v60  ;;  %9150 = vlog2.f32 %v6029_v27  ;;  %v6038_v58 = vadd.f32 1.0, %v20526_v45  ;;  %v8506_v44 = vunpack.i.h.bf16 %v17125_v41 }
 0x63d   :  { %v6396_v29 = vmul.f32 %v6332_v55, %v20525_v23  ;;  %9152 = vpow2.f32 %v17119_v40  ;;  %v5469_v15 = vmul.f32 %v5405_v32, %v20527_v20  ;;  %vm5533_vm0 = vcmp.gt.f32.partialorder %v20528_v38, 20.0 }
 0x63e   :  { %vm5534_vm10 = vcmp.gt.f32.partialorder %v20529_v5, 20.0  ;;  %v6032_v61 = vmul.f32 -0.5, %v20523_v54  ;;  %9154 = vlog2.f32 %v6038_v58  ;;  %v5470_v14 = vmul.f32 %v5406_v16, %v20530_v11  ;;  %v20536_v16 = vld [vmem:[#allocation194_spill] sm:$0xff] }
 0x63f   :  { %v9147_v0 = vpop.eup %9146  ;;  %v8168_v33 = vpack.c.bf16 %v6396_v29, %v6395_v36  ;;  %v6178_v26 = vmul.f32 %v20516_v59, %v6177_v62  ;;  %vm6180_vm6 = vcmp.lt.f32.partialorder %v6179_v37, 0.0004427343  ;;  %v6187_v41 = vmul.f32 %v20519_v39, %v6186_v6  ;;  %v20553_v62 = vld [vmem:[#allocation72_spill] sm:$0xff] }
 0x640   :  { %v9149_v9 = vpop.eup %9148  ;;  %v6175_v46 = vmul.f32 0.6931472, %v9147_v0  ;;  %vm6189_vm3 = vcmp.lt.f32.partialorder %v6188_v30, 0.0004427343  ;;  %v6041_v49 = vmul.f32 -0.5, %v20526_v45  ;;  %vm5517_vm1 = vcmp.gt.f32.partialorder %v20531_v63, 20.0 }
 0x641   :  { %8169 = vmatpush3.bf16.msra.mxu1 %v8168_v33  ;;  %v6184_v40 = vmul.f32 0.6931472, %v9149_v9  ;;  %v6035_v56 = vand.u32 2147483647, %v20523_v54  ;;  %v6191_v42 = vadd.f32 1.0, %v20532_v48  ;;  %v6033_v2 = vadd.f32 1.0, %v6032_v61 }
 0x642   :  { %v6181_v13 = vsel %vm6180_vm6, %v6178_v26, %v6175_v46  ;;  %v6044_v25 = vand.u32 2147483647, %v20526_v45  ;;  %vm5518_vm2 = vcmp.gt.f32.partialorder %v20533_v21, 20.0  ;;  %v5343_v50 = vmul.f32 0.5, %v20534_v19  ;;  %v20543_v46 = vld [vmem:[#allocation52_spill] sm:$0xff] }
 0x643   :  { %v6190_v17 = vsel %vm6189_vm3, %v6187_v41, %v6184_v40  ;;  %v6365_v59 = vsel %vm5533_vm0, %v20528_v38, %v6181_v13  ;;  %9156 = vlog2.f32 %v6191_v42  ;;  %v6042_v35 = vadd.f32 1.0, %v6041_v49  ;;  %v20544_v13 = vld [vmem:[#allocation90_spill] sm:$0xff]  ;;  %v20545_v42 = vld [vmem:[#allocation97_spill] sm:$0xff] }
 0x644   :  { %v6366_v39 = vsel %vm5534_vm10, %v20529_v5, %v6190_v17  ;;  %v6429_v12 = vmul.f32 %v6365_v59, %v5469_v15  ;;  %6638 = vmatmul.mubr.f32.vlgmr.msra.gmra.mrb[224].mxu1 %v8506_v44  ;;  %v5344_v32 = vmul.f32 0.5, %v20535_v22  ;;  %v6200_v60 = vadd.f32 1.0, %v20536_v16  ;;  %v20546_v59 = vld [vmem:[#allocation22_spill] sm:$0xff] }
 0x645   :  { %v6430_v24 = vmul.f32 %v6366_v39, %v5470_v14  ;;  %vm17257_vm5 = vcmp.lt.f32.partialorder %v6035_v56, 0.0004427343  ;;  %v6194_v37 = vmul.f32 -0.5, %v20532_v48  ;;  %v8508_v27 = vunpack.i.l.bf16 %v17205_v28 }
 0x646   :  { %v9151_v55 = vpop.eup %9150  ;;  %v6034_v36 = vmul.f32 %v20523_v54, %v6033_v2  ;;  %vm17264_vm7 = vcmp.lt.f32.partialorder %v6044_v25, 0.0004427343  ;;  %9158 = vlog2.f32 %v6200_v60  ;;  %v6203_v29 = vmul.f32 -0.5, %v20536_v16  ;;  %v20541_v54 = vld [vmem:[#allocation183_spill] sm:$0xff]  ;;  %v20547_v25 = vld [vmem:[#allocation64_spill] sm:$0xff] }
 0x647   :  { %v8170_v7 = vpack.c.bf16 %v6430_v24, %v6429_v12  ;;  %v17268_v6 = vpop.eup %9152  ;;  %v6031_v23 = vmul.f32 0.6931472, %v9151_v55  ;;  %6642 = vmatprep.mubr.f32.mxu1 %v8508_v27  ;;  %v8511_v30 = vunpack.i.h.bf16 %v17205_v28  ;;  %v6043_v44 = vmul.f32 %v20526_v45, %v6042_v35  ;;  %v20542_v45 = vld [vmem:[#allocation185_spill] sm:$0xff]  ;;  %v20548_v12 = vld [vmem:[#allocation12_spill] sm:$0xff]  ;;  %v20552_v55 = vld [vmem:[#allocation195_spill] sm:$0xff] }
 0x648   :  { %v9155_v58 = vpop.eup %9154  ;;  %v5407_v20 = vadd.f32 0.5, %v5343_v50  ;;  %v5408_v15 = vadd.f32 0.5, %v5344_v32  ;;  %v6047_v38 = vadd.f32 1.0, %v20541_v54  ;;  %v6195_v5 = vadd.f32 1.0, %v6194_v37  ;;  %v20551_v37 = vld [vmem:[#allocation56_spill] sm:$0xff] }
 0x649   :  { %8171 = vmatprep.subr.bf16.mxu1 %v8170_v7  ;;  %v6037_v0 = vsel %vm17257_vm5, %v6034_v36, %v6031_v23  ;;  %v6040_v33 = vmul.f32 0.6931472, %v9155_v58  ;;  %v6197_v61 = vand.u32 2147483647, %v20532_v48  ;;  %6643 = vmatmul.mubr.f32.gmra.mrb[226].mxu1 %v8511_v30  ;;  %v6206_v9 = vand.u32 2147483647, %v20536_v16  ;;  %v17312_v23 = vpop.trf.xlu0 }
 0x64a   :  { %v6349_v28 = vsel %vm5517_vm1, %v20531_v63, %v6037_v0  ;;  %9160 = vlog2.f32 %v6047_v38  ;;  %v6056_v11 = vadd.f32 1.0, %v20542_v45  ;;  %v6204_v40 = vadd.f32 1.0, %v6203_v29  ;;  %v20556_v58 = vld [vmem:[#allocation134_spill] sm:$0xff]  ;;  %v20557_v38 = vld [vmem:[#allocation25_spill] sm:$0xff] }
 0x64b   :  { %v6046_v14 = vsel %vm17264_vm7, %v6043_v44, %v6040_v33  ;;  %v6413_v26 = vmul.f32 %v6349_v28, %v20543_v46  ;;  %v6050_v41 = vmul.f32 -0.5, %v20541_v54  ;;  %vm5535_vm8 = vcmp.gt.f32.partialorder %v20544_v13, 20.0  ;;  %v20558_v33 = vld [vmem:[#allocation196_spill] sm:$0xff] }
 0x64c   :  { %v6350_v49 = vsel %vm5518_vm2, %v20533_v21, %v6046_v14  ;;  %9162 = vlog2.f32 %v6056_v11  ;;  %v6059_v63 = vmul.f32 -0.5, %v20542_v45  ;;  %v5471_v2 = vmul.f32 %v5407_v20, %v20546_v59 }
 0x64d   :  { %v9157_v56 = vpop.eup %9156  ;;  %v6414_v17 = vmul.f32 %v6350_v49, %v20545_v42  ;;  %vm5536_vm4 = vcmp.gt.f32.partialorder %v20547_v25, 20.0  ;;  %v6053_v39 = vand.u32 2147483647, %v20541_v54  ;;  %v5472_v19 = vmul.f32 %v5408_v15, %v20548_v12 }
 0x64e   :  { %v6193_v50 = vmul.f32 0.6931472, %v9157_v56  ;;  %v6196_v24 = vmul.f32 %v20532_v48, %v6195_v5  ;;  %vm6198_vm12 = vcmp.lt.f32.partialorder %v6197_v61, 0.0004427343  ;;  %v6205_v35 = vmul.f32 %v20536_v16, %v6204_v40 }
 0x64f   :  { %v8172_v21 = vpack.c.bf16 %v6414_v17, %v6413_v26  ;;  %vm17298_vm11 = vcmp.lt.f32.partialorder %v6206_v9, 0.0004427343  ;;  %v6051_v32 = vadd.f32 1.0, %v6050_v41  ;;  %vm5519_vm14 = vcmp.gt.f32.partialorder %v20551_v37, 20.0 }
 0x650   :  { %v9159_v60 = vpop.eup %9158  ;;  %v6199_v51 = vsel %vm6198_vm12, %v6196_v24, %v6193_v50  ;;  %v6060_v27 = vadd.f32 1.0, %v6059_v63  ;;  %v6209_v7 = vadd.f32 1.0, %v20552_v55  ;;  %vm5520_vm13 = vcmp.gt.f32.partialorder %v20553_v62, 20.0  ;;  %v20563_v50 = vld [vmem:[#allocation188_spill] sm:$0xff] }
 0x651   :  { %8173 = vmatpush3.bf16.msra.mxu1 %v8172_v21  ;;  %v6202_v36 = vmul.f32 0.6931472, %v9159_v60  ;;  %v6367_v48 = vsel %vm5535_vm8, %v20544_v13, %v6199_v51  ;;  %vm17308_vm9 = vcmp.lt.f32.partialorder %v6053_v39, 0.0004427343  ;;  %v6062_v30 = vand.u32 2147483647, %v20542_v45 }
 0x652   :  { %v6431_v29 = vmul.f32 %v6367_v48, %v5471_v2  ;;  %v5345_v44 = vmul.f32 0.5, %v20556_v58  ;;  %9164 = vlog2.f32 %v6209_v7  ;;  %v6052_v15 = vmul.f32 %v20541_v54, %v6051_v32  ;;  %v20561_v2 = vld [vmem:[#allocation187_spill] sm:$0xff]  ;;  %v20564_v32 = vld [vmem:[#allocation61_spill] sm:$0xff]  ;;  %v20566_v7 = vld [vmem:[#allocation92_spill] sm:$0xff] }
 0x653   :  { %v6208_v20 = vsel %vm17298_vm11, %v6205_v35, %v6202_v36  ;;  %v5346_v0 = vmul.f32 0.5, %v20557_v38  ;;  %v6218_v5 = vadd.f32 1.0, %v20558_v33  ;;  %v6061_v9 = vmul.f32 %v20542_v45, %v6060_v27  ;;  %v20562_v39 = vld [vmem:[#allocation135_spill] sm:$0xff]  ;;  %v20565_v51 = vld [vmem:[#allocation89_spill] sm:$0xff]  ;;  %v20567_v48 = vld [vmem:[#allocation94_spill] sm:$0xff] }
 0x654   :  { %v9161_v61 = vpop.eup %9160  ;;  %v6368_v28 = vsel %vm5536_vm4, %v20547_v25, %v6208_v20  ;;  %v8513_v11 = vunpack.i.l.bf16 %v17248_v53  ;;  %v6212_v26 = vmul.f32 -0.5, %v20552_v55  ;;  %vm17327_vm15 = vcmp.lt.f32.partialorder %v6062_v30, 0.0004427343  ;;  %v20570_v20 = vld [vmem:[#allocation149_spill] sm:$0xff] }
 0x655   :  { %v6432_v14 = vmul.f32 %v6368_v28, %v5472_v19  ;;  %v6049_v46 = vmul.f32 0.6931472, %v9161_v61  ;;  %9166 = vlog2.f32 %v6218_v5  ;;  %v5409_v41 = vadd.f32 0.5, %v5345_v44 }
 0x656   :  { %v9163_v40 = vpop.eup %9162  ;;  %6647 = vmatprep.mubr.f32.mxu1 %v8513_v11  ;;  %v8516_v49 = vunpack.i.h.bf16 %v17248_v53  ;;  %v6221_v56 = vmul.f32 -0.5, %v20558_v33  ;;  %v5410_v17 = vadd.f32 0.5, %v5346_v0  ;;  %v6215_v59 = vand.u32 2147483647, %v20552_v55  ;;  %v20573_v11 = vld [vmem:[#allocation141_spill] sm:$0xff] }
 0x657   :  { %v8174_v13 = vpack.c.bf16 %v6432_v14, %v6431_v29  ;;  %v6055_v45 = vsel %vm17308_vm9, %v6052_v15, %v6049_v46  ;;  %v6058_v63 = vmul.f32 0.6931472, %v9163_v40  ;;  %v6065_v25 = vadd.f32 1.0, %v20561_v2  ;;  %v20575_v40 = vld [vmem:[#allocation13_spill] sm:$0xff] }
 0x658   :  { %v6351_v42 = vsel %vm5519_vm14, %v20551_v37, %v6055_v45  ;;  %6648 = vmatmul.mubr.f32.gmra.mrb[228].mxu1 %v8516_v49  ;;  %v6213_v19 = vadd.f32 1.0, %v6212_v26  ;;  %v6074_v24 = vadd.f32 1.0, %v20563_v50  ;;  %v6224_v35 = vand.u32 2147483647, %v20558_v33 }
 0x659   :  { %8175 = vmatprep.subr.bf16.mxu1 %v8174_v13  ;;  %v6064_v53 = vsel %vm17327_vm15, %v6061_v9, %v6058_v63  ;;  %v6415_v12 = vmul.f32 %v6351_v42, %v20562_v39  ;;  %9168 = vlog2.f32 %v6065_v25  ;;  %v6068_v22 = vmul.f32 -0.5, %v20561_v2  ;;  %v17376_v13 = vpop.trf.xlu0  ;;  %v20582_v25 = vld [vmem:[#allocation199_spill] sm:$0xff]  ;;  %v20590_v63 = vld [vmem:[#allocation93_spill] sm:$0xff] }
 0x65a   :  { %v6352_v21 = vsel %vm5520_vm13, %v20553_v62, %v6064_v53  ;;  %vm5537_vm0 = vcmp.gt.f32.partialorder %v20565_v51, 20.0  ;;  %v6222_v37 = vadd.f32 1.0, %v6221_v56  ;;  %9170 = vlog2.f32 %v6074_v24 }
 0x65b   :  { %v6416_v60 = vmul.f32 %v6352_v21, %v20564_v32  ;;  %v5473_v36 = vmul.f32 %v5409_v41, %v20566_v7  ;;  %vm5538_vm10 = vcmp.gt.f32.partialorder %v20567_v48, 20.0  ;;  %vm17353_vm6 = vcmp.lt.f32.partialorder %v6215_v59, 0.0004427343  ;;  %v20576_v41 = vld [vmem:[#allocation18_spill] sm:$0xff] }
 0x65c   :  { %v9165_v27 = vpop.eup %9164  ;;  %v6077_v62 = vmul.f32 -0.5, %v20563_v50  ;;  %v6214_v58 = vmul.f32 %v20552_v55, %v6213_v19  ;;  %v6071_v44 = vand.u32 2147483647, %v20561_v2  ;;  %v5474_v15 = vmul.f32 %v5410_v17, %v20570_v20  ;;  %v20574_v55 = vld [vmem:[#allocation198_spill] sm:$0xff] }
 0x65d   :  { %v8176_v29 = vpack.c.bf16 %v6416_v60, %v6415_v12  ;;  %v6211_v30 = vmul.f32 0.6931472, %v9165_v27  ;;  %vm17361_vm3 = vcmp.lt.f32.partialorder %v6224_v35, 0.0004427343  ;;  %v6069_v0 = vadd.f32 1.0, %v6068_v22  ;;  %v20584_v20 = vld [vmem:[#allocation118_spill] sm:$0xff] }
 0x65e   :  { %v6080_v5 = vand.u32 2147483647, %v20563_v50  ;;  %v6223_v9 = vmul.f32 %v20558_v33, %v6222_v37  ;;  %vm5521_vm1 = vcmp.gt.f32.partialorder %v20573_v11, 20.0  ;;  %v6227_v14 = vadd.f32 1.0, %v20574_v55  ;;  %v20579_v33 = vld [vmem:[#allocation63_spill] sm:$0xff]  ;;  %v20605_v59 = vld [vmem:[#allocation110_spill] sm:$0xff] }
 0x65f   :  { %v9167_v61 = vpop.eup %9166  ;;  %8177 = vmatpush3.bf16.msra.mxu1 %v8176_v29  ;;  %v6217_v28 = vsel %vm17353_vm6, %v6214_v58, %v6211_v30  ;;  %vm5522_vm2 = vcmp.gt.f32.partialorder %v20575_v40, 20.0  ;;  %v6078_v54 = vadd.f32 1.0, %v6077_v62  ;;  %v5347_v49 = vmul.f32 0.5, %v20576_v41  ;;  %v20583_v29 = vld [vmem:[#allocation105_spill] sm:$0xff] }
 0x660   :  { %v6220_v46 = vmul.f32 0.6931472, %v9167_v61  ;;  %v6369_v26 = vsel %vm5537_vm0, %v20565_v51, %v6217_v28  ;;  %vm17378_vm5 = vcmp.lt.f32.partialorder %v6071_v44, 0.0004427343  ;;  %v5348_v56 = vmul.f32 0.5, %v20579_v33  ;;  %v20586_v28 = vld [vmem:[#allocation82_spill] sm:$0xff] }
 0x661   :  { %v6433_v45 = vmul.f32 %v6369_v26, %v5473_v36  ;;  %9172 = vlog2.f32 %v6227_v14  ;;  %v6070_v17 = vmul.f32 %v20561_v2, %v6069_v0  ;;  %vm17386_vm7 = vcmp.lt.f32.partialorder %v6080_v5, 0.0004427343  ;;  %v20585_v0 = vld [vmem:[#allocation163_spill] sm:$0xff]  ;;  %v20587_v14 = vld [vmem:[#allocation166_spill] sm:$0xff] }
 0x662   :  { %v6226_v42 = vsel %vm17361_vm3, %v6223_v9, %v6220_v46  ;;  %v6236_v53 = vadd.f32 1.0, %v20582_v25  ;;  %v6230_v12 = vmul.f32 -0.5, %v20574_v55  ;;  %v8518_v19 = vunpack.i.l.bf16 %v17312_v23 }
 0x663   :  { %v6370_v39 = vsel %vm5538_vm10, %v20567_v48, %v6226_v42  ;;  %v9169_v24 = vpop.eup %9168  ;;  %v6079_v35 = vmul.f32 %v20563_v50, %v6078_v54  ;;  %v5411_v22 = vadd.f32 0.5, %v5347_v49  ;;  %v5412_v60 = vadd.f32 0.5, %v5348_v56  ;;  %v17400_v48 = vpop.trf.xlu1  ;;  %v20588_v54 = vld [vmem:[#allocation91_spill] sm:$0xff] }
 0x664   :  { %v6434_v21 = vmul.f32 %v6370_v39, %v5474_v15  ;;  %9174 = vlog2.f32 %v6236_v53  ;;  %v9171_v2 = vpop.eup %9170  ;;  %v6067_v32 = vmul.f32 0.6931472, %v9169_v24  ;;  %6652 = vmatprep.mubr.f32.mxu1 %v8518_v19  ;;  %v8521_v51 = vunpack.i.h.bf16 %v17312_v23  ;;  %v20589_v49 = vld [vmem:[#allocation151_spill] sm:$0xff] }
 0x665   :  { %v6076_v27 = vmul.f32 0.6931472, %v9171_v2  ;;  %v6233_v7 = vand.u32 2147483647, %v20574_v55  ;;  %v6239_v36 = vmul.f32 -0.5, %v20582_v25  ;;  %v6231_v50 = vadd.f32 1.0, %v6230_v12 }
 0x666   :  { %v8178_v37 = vpack.c.bf16 %v6434_v21, %v6433_v45  ;;  %v6073_v16 = vsel %vm17378_vm5, %v6070_v17, %v6067_v32  ;;  %v6242_v62 = vand.u32 2147483647, %v20582_v25  ;;  %6653 = vmatmul.mubr.f32.gmra.mrb[230].mxu1 %v8521_v51  ;;  %v6083_v30 = vadd.f32 1.0, %v20583_v29  ;;  %v20594_v21 = vld [vmem:[#allocation79_spill] sm:$0xff] }
 0x667   :  { %v6082_v23 = vsel %vm17386_vm7, %v6079_v35, %v6076_v27  ;;  %v6353_v58 = vsel %vm5521_vm1, %v20573_v11, %v6073_v16  ;;  %v6086_v44 = vmul.f32 -0.5, %v20583_v29  ;;  %v6092_v15 = vadd.f32 1.0, %v20584_v20  ;;  %v17429_v17 = vpop.trf.xlu1  ;;  %v20595_v35 = vld [vmem:[#allocation200_spill] sm:$0xff]  ;;  %v20596_v32 = vld [vmem:[#allocation55_spill] sm:$0xff]  ;;  %v17444_v27 = vpop.trf.xlu0 }
 0x668   :  { %8179 = vmatprep.subr.bf16.mxu1 %v8178_v37  ;;  %v6354_v38 = vsel %vm5522_vm2, %v20575_v40, %v6082_v23  ;;  %v6417_v5 = vmul.f32 %v6353_v58, %v20585_v0  ;;  %9176 = vlog2.f32 %v6083_v30  ;;  %v6095_v61 = vmul.f32 -0.5, %v20584_v20  ;;  %v20591_v40 = vld [vmem:[#allocation117_spill] sm:$0xff]  ;;  %v20597_v51 = vld [vmem:[#allocation103_spill] sm:$0xff]  ;;  %v20601_v23 = vld [vmem:[#allocation36_spill] sm:$0xff] }
 0x669   :  { %v17420_v9 = vmul.f32 %v17091_v1, %v20586_v28  ;;  %v6418_v46 = vmul.f32 %v6354_v38, %v20587_v14  ;;  %v6240_v11 = vadd.f32 1.0, %v6239_v36  ;;  %9178 = vlog2.f32 %v6092_v15  ;;  %v20600_v36 = vld [vmem:[#allocation138_spill] sm:$0xff] }
 0x66a   :  { %v5475_v41 = vmul.f32 %v5411_v22, %v20588_v54  ;;  %v5476_v45 = vmul.f32 %v5412_v60, %v20589_v49  ;;  %vm5539_vm8 = vcmp.gt.f32.partialorder %v20590_v63, 20.0  ;;  %vm5540_vm4 = vcmp.gt.f32.partialorder %v20591_v40, 20.0 }
 0x66b   :  { %v9173_v26 = vpop.eup %9172  ;;  %v8180_v33 = vpack.c.bf16 %v6418_v46, %v6417_v5  ;;  %v6232_v42 = vmul.f32 %v20574_v55, %v6231_v50  ;;  %v6089_v1 = vand.u32 2147483647, %v20583_v29  ;;  %vm6234_vm12 = vcmp.lt.f32.partialorder %v6233_v7, 0.0004427343  ;;  %v17461_v0 = vpop.trf.xlu1 }
 0x66c   :  { %v6229_v56 = vmul.f32 0.6931472, %v9173_v26  ;;  %vm17431_vm11 = vcmp.lt.f32.partialorder %v6242_v62, 0.0004427343  ;;  %v6087_v53 = vadd.f32 1.0, %v6086_v44  ;;  %v6096_v39 = vadd.f32 1.0, %v6095_v61 }
 0x66d   :  { %8181 = vmatpush3.bf16.msra.mxu1 %v8180_v33  ;;  %v6241_v24 = vmul.f32 %v20582_v25, %v6240_v11  ;;  %vm5523_vm14 = vcmp.gt.f32.partialorder %v20594_v21, 20.0  ;;  %v6245_v55 = vadd.f32 1.0, %v20595_v35  ;;  %vm5524_vm13 = vcmp.gt.f32.partialorder %v20596_v32, 20.0  ;;  %v20604_v33 = vld [vmem:[#allocation122_spill] sm:$0xff]  ;;  %v20609_v25 = vld [vmem:[#allocation24_spill] sm:$0xff] }
 0x66e   :  { %v9175_v12 = vpop.eup %9174  ;;  %v6235_v19 = vsel %vm6234_vm12, %v6232_v42, %v6229_v56  ;;  %v6098_v60 = vand.u32 2147483647, %v20584_v20  ;;  %v5349_v37 = vmul.f32 0.5, %v20597_v51  ;;  %vm17446_vm9 = vcmp.lt.f32.partialorder %v6089_v1, 0.0004427343 }
 0x66f   :  { %v6238_v22 = vmul.f32 0.6931472, %v9175_v12  ;;  %v6371_v2 = vsel %vm5539_vm8, %v20590_v63, %v6235_v19  ;;  %v5350_v16 = vmul.f32 0.5, %v20600_v36  ;;  %9180 = vlog2.f32 %v6245_v55  ;;  %v20606_v12 = vld [vmem:[#allocation169_spill] sm:$0xff]  ;;  %v17486_v55 = vpop.trf.xlu0 }
 0x670   :  { %v6435_v7 = vmul.f32 %v6371_v2, %v5475_v41  ;;  %v6088_v62 = vmul.f32 %v20583_v29, %v6087_v53  ;;  %v6097_v30 = vmul.f32 %v20584_v20, %v6096_v39  ;;  %v6254_v58 = vadd.f32 1.0, %v20601_v23  ;;  %v20607_v2 = vld [vmem:[#allocation162_spill] sm:$0xff]  ;;  %v20610_v36 = vld [vmem:[#allocation153_spill] sm:$0xff] }
 0x671   :  { %v6244_v50 = vsel %vm17431_vm11, %v6241_v24, %v6238_v22  ;;  %v6248_v15 = vmul.f32 -0.5, %v20595_v35  ;;  %v8523_v38 = vunpack.i.l.bf16 %v17376_v13  ;;  %vm17463_vm15 = vcmp.lt.f32.partialorder %v6098_v60, 0.0004427343  ;;  %v17488_v22 = vpop.trf.xlu1  ;;  %v20608_v60 = vld [vmem:[#allocation170_spill] sm:$0xff] }
 0x672   :  { %v6372_v44 = vsel %vm5540_vm4, %v20591_v40, %v6244_v50  ;;  %v9177_v5 = vpop.eup %9176  ;;  %v5413_v29 = vadd.f32 0.5, %v5349_v37  ;;  %9182 = vlog2.f32 %v6254_v58  ;;  %v5414_v46 = vadd.f32 0.5, %v5350_v16  ;;  %v20611_v50 = vld [vmem:[#allocation6_spill] sm:$0xff] }
 0x673   :  { %v6436_v61 = vmul.f32 %v6372_v44, %v5476_v45  ;;  %v9179_v20 = vpop.eup %9178  ;;  %v6085_v14 = vmul.f32 0.6931472, %v9177_v5  ;;  %6657 = vmatprep.mubr.f32.mxu1 %v8523_v38  ;;  %v8526_v11 = vunpack.i.h.bf16 %v17376_v13  ;;  %v6251_v41 = vand.u32 2147483647, %v20595_v35 }
 0x674   :  { %v6094_v54 = vmul.f32 0.6931472, %v9179_v20  ;;  %v6257_v49 = vmul.f32 -0.5, %v20601_v23  ;;  %v6249_v63 = vadd.f32 1.0, %v6248_v15  ;;  %v6260_v40 = vand.u32 2147483647, %v20601_v23 }
 0x675   :  { %v8182_v26 = vpack.c.bf16 %v6436_v61, %v6435_v7  ;;  %v6091_v45 = vsel %vm17446_vm9, %v6088_v62, %v6085_v14  ;;  %6658 = vmatmul.mubr.f32.gmra.mrb[232].mxu1 %v8526_v11  ;;  %v6101_v56 = vadd.f32 1.0, %v20604_v33  ;;  %v6104_v1 = vmul.f32 -0.5, %v20604_v33  ;;  %v20612_v62 = vld [vmem:[#allocation8_spill] sm:$0xff]  ;;  %v20615_v20 = vld [vmem:[#allocation143_spill] sm:$0xff]  ;;  %v20616_v11 = vld [vmem:[#allocation78_spill] sm:$0xff] }
 0x676   :  { %v6100_v42 = vsel %vm17463_vm15, %v6097_v30, %v6094_v54  ;;  %v6355_v13 = vsel %vm5523_vm14, %v20594_v21, %v6091_v45  ;;  %v6110_v53 = vadd.f32 1.0, %v20605_v59  ;;  %v6113_v24 = vmul.f32 -0.5, %v20605_v59  ;;  %v20617_v54 = vld [vmem:[#allocation137_spill] sm:$0xff]  ;;  %v17516_v45 = vpop.trf.xlu1 }
 0x677   :  { %8183 = vmatprep.subr.bf16.mxu1 %v8182_v26  ;;  %v6356_v39 = vsel %vm5524_vm13, %v20596_v32, %v6100_v42  ;;  %v6419_v19 = vmul.f32 %v6355_v13, %v20606_v12  ;;  %9184 = vlog2.f32 %v6101_v56  ;;  %v17492_v21 = vmul.f32 %v17103_v3, %v20607_v2 }
 0x678   :  { %v6420_v51 = vmul.f32 %v6356_v39, %v20608_v60  ;;  %v6258_v37 = vadd.f32 1.0, %v6257_v49  ;;  %9186 = vlog2.f32 %v6110_v53  ;;  %v5477_v32 = vmul.f32 %v5413_v29, %v20609_v25  ;;  %v17514_v49 = vpop.trf.xlu0 }
 0x679   :  { %v9181_v7 = vpop.eup %9180  ;;  %v5478_v16 = vmul.f32 %v5414_v46, %v20610_v36  ;;  %vm5541_vm0 = vcmp.gt.f32.partialorder %v20611_v50, 20.0  ;;  %vm5542_vm10 = vcmp.gt.f32.partialorder %v20612_v62, 20.0  ;;  %v6250_v44 = vmul.f32 %v20595_v35, %v6249_v63 }
 0x67a   :  { %v8184_v30 = vpack.c.bf16 %v6420_v51, %v6419_v19  ;;  %v6247_v58 = vmul.f32 0.6931472, %v9181_v7  ;;  %v6107_v3 = vand.u32 2147483647, %v20604_v33  ;;  %vm6252_vm6 = vcmp.lt.f32.partialorder %v6251_v41, 0.0004427343 }
 0x67b   :  { %vm17501_vm3 = vcmp.lt.f32.partialorder %v6260_v40, 0.0004427343  ;;  %v6105_v38 = vadd.f32 1.0, %v6104_v1  ;;  %v6114_v5 = vadd.f32 1.0, %v6113_v24  ;;  %v6259_v29 = vmul.f32 %v20601_v23, %v6258_v37  ;;  %v20620_v40 = vld [vmem:[#allocation164_spill] sm:$0xff] }
 0x67c   :  { %v9183_v61 = vpop.eup %9182  ;;  %8185 = vmatpush3.bf16.msra.mxu1 %v8184_v30  ;;  %v6253_v28 = vsel %vm6252_vm6, %v6250_v44, %v6247_v58  ;;  %vm5525_vm1 = vcmp.gt.f32.partialorder %v20615_v20, 20.0  ;;  %v6263_v14 = vadd.f32 1.0, %v17148_v10  ;;  %vm5526_vm2 = vcmp.gt.f32.partialorder %v20616_v11, 20.0 }
 0x67d   :  { %v6256_v46 = vmul.f32 0.6931472, %v9183_v61  ;;  %v6373_v35 = vsel %vm5541_vm0, %v20611_v50, %v6253_v28  ;;  %v6116_v26 = vand.u32 2147483647, %v20605_v59  ;;  %v5351_v41 = vmul.f32 0.5, %v20617_v54  ;;  %v20624_v61 = vld [vmem:[#allocation190_spill] sm:$0xff] }
 0x67e   :  { %v6437_v23 = vmul.f32 %v6373_v35, %v5477_v32  ;;  %vm17518_vm5 = vcmp.lt.f32.partialorder %v6107_v3, 0.0004427343  ;;  %v5352_v56 = vmul.f32 0.5, %v20620_v40  ;;  %9188 = vlog2.f32 %v6263_v14  ;;  %v20623_v3 = vld [vmem:[#allocation189_spill] sm:$0xff]  ;;  %v20625_v14 = vld [vmem:[#allocation172_spill] sm:$0xff]  ;;  %v20628_v40 = vld [vmem:[#allocation95_spill] sm:$0xff] }
 0x67f   :  { %v6262_v42 = vsel %vm17501_vm3, %v6259_v29, %v6256_v46  ;;  %v6106_v13 = vmul.f32 %v20604_v33, %v6105_v38  ;;  %v6115_v1 = vmul.f32 %v20605_v59, %v6114_v5  ;;  %v6272_v53 = vadd.f32 1.0, %v17151_v8 }
 0x680   :  { %v6374_v39 = vsel %vm5542_vm10, %v20612_v62, %v6262_v42  ;;  %v6266_v12 = vmul.f32 -0.5, %v17148_v10  ;;  %v8528_v19 = vunpack.i.l.bf16 %v17444_v27  ;;  %vm17533_vm7 = vcmp.lt.f32.partialorder %v6116_v26, 0.0004427343  ;;  %v17540_v62 = vpop.trf.xlu0  ;;  %v20626_v26 = vld [vmem:[#allocation10_spill] sm:$0xff]  ;;  %v20629_v42 = vld [vmem:[#allocation155_spill] sm:$0xff] }
 0x681   :  { %v9185_v24 = vpop.eup %9184  ;;  %v6438_v2 = vmul.f32 %v6374_v39, %v5478_v16  ;;  %v5415_v51 = vadd.f32 0.5, %v5351_v41  ;;  %9190 = vlog2.f32 %v6272_v53  ;;  %v5416_v37 = vadd.f32 0.5, %v5352_v56  ;;  %v17542_v16 = vpop.trf.xlu1  ;;  %v20627_v41 = vld [vmem:[#allocation173_spill] sm:$0xff] }
 0x682   :  { %v9187_v33 = vpop.eup %9186  ;;  %v6103_v59 = vmul.f32 0.6931472, %v9185_v24  ;;  %6662 = vmatprep.mubr.f32.mxu1 %v8528_v19  ;;  %v8531_v7 = vunpack.i.h.bf16 %v17444_v27  ;;  %v6269_v36 = vand.u32 2147483647, %v17148_v10  ;;  %v6275_v50 = vmul.f32 -0.5, %v17151_v8 }
 0x683   :  { %v8186_v25 = vpack.c.bf16 %v6438_v2, %v6437_v23  ;;  %v6112_v32 = vmul.f32 0.6931472, %v9187_v33  ;;  %v6267_v58 = vadd.f32 1.0, %v6266_v12  ;;  %v6278_v44 = vand.u32 2147483647, %v17151_v8 }
 0x684   :  { %v6109_v30 = vsel %vm17518_vm5, %v6106_v13, %v6103_v59  ;;  %6663 = vmatmul.mubr.f32.gmra.mrb[234].mxu1 %v8531_v7  ;;  %v6119_v15 = vadd.f32 1.0, %v20623_v3  ;;  %v6122_v5 = vmul.f32 -0.5, %v20623_v3  ;;  %v6128_v28 = vadd.f32 1.0, %v20624_v61  ;;  %v17571_v19 = vpop.trf.xlu0  ;;  %v20634_v7 = vld [vmem:[#allocation16_spill] sm:$0xff] }
 0x685   :  { %8187 = vmatprep.subr.bf16.mxu1 %v8186_v25  ;;  %v6118_v27 = vsel %vm17533_vm7, %v6115_v1, %v6112_v32  ;;  %v6357_v38 = vsel %vm5525_vm1, %v20615_v20, %v6109_v30  ;;  %v6131_v35 = vmul.f32 -0.5, %v20624_v61  ;;  %v17562_v54 = vmul.f32 %v17115_v57, %v20626_v26  ;;  %v20630_v1 = vld [vmem:[#allocation5_spill] sm:$0xff]  ;;  %v17573_v24 = vpop.trf.xlu1 }
 0x686   :  { %v6358_v29 = vsel %vm5526_vm2, %v20616_v11, %v6118_v27  ;;  %v6421_v46 = vmul.f32 %v6357_v38, %v20625_v14  ;;  %9192 = vlog2.f32 %v6119_v15  ;;  %v6276_v20 = vadd.f32 1.0, %v6275_v50  ;;  %v20631_v11 = vld [vmem:[#allocation7_spill] sm:$0xff]  ;;  %v20636_v30 = vld [vmem:[#allocation165_spill] sm:$0xff] }
 0x687   :  { %v6422_v23 = vmul.f32 %v6358_v29, %v20627_v41  ;;  %9194 = vlog2.f32 %v6128_v28  ;;  %v5479_v56 = vmul.f32 %v5415_v51, %v20628_v40  ;;  %v5480_v13 = vmul.f32 %v5416_v37, %v20629_v42 }
 0x688   :  { %v9189_v63 = vpop.eup %9188  ;;  %vm5543_vm8 = vcmp.gt.f32.partialorder %v20630_v1, 20.0  ;;  %vm5544_vm4 = vcmp.gt.f32.partialorder %v20631_v11, 20.0  ;;  %v6268_v12 = vmul.f32 %v17148_v10, %v6267_v58  ;;  %v6125_v57 = vand.u32 2147483647, %v20623_v3  ;;  %v17603_v26 = vpop.trf.xlu0 }
 0x689   :  { %v8188_v53 = vpack.c.bf16 %v6422_v23, %v6421_v46  ;;  %v6265_v39 = vmul.f32 0.6931472, %v9189_v63  ;;  %vm6270_vm12 = vcmp.lt.f32.partialorder %v6269_v36, 0.0004427343  ;;  %vm17575_vm11 = vcmp.lt.f32.partialorder %v6278_v44, 0.0004427343  ;;  %v17605_v41 = vpop.trf.xlu1 }
 0x68a   :  { %v6123_v60 = vadd.f32 1.0, %v6122_v5  ;;  %v6132_v51 = vadd.f32 1.0, %v6131_v35  ;;  %v6277_v37 = vmul.f32 %v17151_v8, %v6276_v20  ;;  %vm5527_vm14 = vcmp.gt.f32.partialorder %v20634_v7, 20.0  ;;  %v20635_v36 = vld [vmem:[#allocation146_spill] sm:$0xff]  ;;  %v20639_v8 = vld [vmem:[#allocation167_spill] sm:$0xff] }
 0x68b   :  { %v9191_v33 = vpop.eup %9190  ;;  %8189 = vmatpush3.bf16.msra.mxu1 %v8188_v53  ;;  %v6271_v59 = vsel %vm6270_vm12, %v6268_v12, %v6265_v39  ;;  %v6281_v10 = vadd.f32 1.0, %v17161_v18  ;;  %vm5528_vm13 = vcmp.gt.f32.partialorder %v20635_v36, 20.0  ;;  %v6134_v50 = vand.u32 2147483647, %v20624_v61 }
 0x68c   :  { %v6274_v25 = vmul.f32 0.6931472, %v9191_v33  ;;  %v6375_v32 = vsel %vm5543_vm8, %v20630_v1, %v6271_v59  ;;  %v5353_v58 = vmul.f32 0.5, %v20636_v30  ;;  %vm17588_vm9 = vcmp.lt.f32.partialorder %v6125_v57, 0.0004427343  ;;  %v20642_v57 = vld [vmem:[#allocation191_spill] sm:$0xff]  ;;  %v17630_v30 = vpop.trf.xlu0 }
 0x68d   :  { %v6439_v44 = vmul.f32 %v6375_v32, %v5479_v56  ;;  %v5354_v27 = vmul.f32 0.5, %v20639_v8  ;;  %9196 = vlog2.f32 %v6281_v10  ;;  %v6124_v5 = vmul.f32 %v20623_v3, %v6123_v60  ;;  %v20643_v33 = vld [vmem:[#allocation192_spill] sm:$0xff] }
 0x68e   :  { %v6280_v38 = vsel %vm17575_vm11, %v6277_v37, %v6274_v25  ;;  %v6133_v28 = vmul.f32 %v20624_v61, %v6132_v51  ;;  %v6290_v29 = vadd.f32 1.0, %v17173_v4  ;;  %v6284_v46 = vmul.f32 -0.5, %v17161_v18  ;;  %v20644_v25 = vld [vmem:[#allocation17_spill] sm:$0xff] }
 0x68f   :  { %v6376_v14 = vsel %vm5544_vm4, %v20631_v11, %v6280_v38  ;;  %v8533_v35 = vunpack.i.l.bf16 %v17486_v55  ;;  %vm17607_vm15 = vcmp.lt.f32.partialorder %v6134_v50, 0.0004427343  ;;  %v5417_v61 = vadd.f32 0.5, %v5353_v58  ;;  %v17632_v58 = vpop.trf.xlu1 }
 0x690   :  { %v9193_v23 = vpop.eup %9192  ;;  %v6440_v20 = vmul.f32 %v6376_v14, %v5480_v13  ;;  %9198 = vlog2.f32 %v6290_v29  ;;  %v5418_v56 = vadd.f32 0.5, %v5354_v27  ;;  %v8536_v42 = vunpack.i.h.bf16 %v17486_v55  ;;  %v20645_v27 = vld [vmem:[#allocation100_spill] sm:$0xff] }
 0x691   :  { %v9195_v63 = vpop.eup %9194  ;;  %v6121_v40 = vmul.f32 0.6931472, %v9193_v23  ;;  %6667 = vmatprep.mubr.f32.mxu1 %v8533_v35  ;;  %v6287_v53 = vand.u32 2147483647, %v17161_v18  ;;  %v6293_v39 = vmul.f32 -0.5, %v17173_v4  ;;  %v6285_v12 = vadd.f32 1.0, %v6284_v46 }
 0x692   :  { %v8190_v1 = vpack.c.bf16 %v6440_v20, %v6439_v44  ;;  %v6130_v11 = vmul.f32 0.6931472, %v9195_v63  ;;  %6668 = vmatmul.mubr.f32.gmra.mrb[236].mxu1 %v8536_v42  ;;  %v6137_v2 = vadd.f32 1.0, %v20642_v57  ;;  %v6140_v60 = vmul.f32 -0.5, %v20642_v57  ;;  %v20646_v46 = vld [vmem:[#allocation157_spill] sm:$0xff]  ;;  %v20649_v23 = vld [vmem:[#allocation168_spill] sm:$0xff] }
 0x693   :  { %v6127_v13 = vsel %vm17588_vm9, %v6124_v5, %v6121_v40  ;;  %v6146_v59 = vadd.f32 1.0, %v20643_v33  ;;  %v6149_v37 = vmul.f32 -0.5, %v20643_v33  ;;  %v6296_v50 = vand.u32 2147483647, %v17173_v4  ;;  %v20650_v40 = vld [vmem:[#allocation85_spill] sm:$0xff] }
 0x694   :  { %8191 = vmatprep.subr.bf16.mxu1 %v8190_v1  ;;  %v6136_v51 = vsel %vm17607_vm15, %v6133_v28, %v6130_v11  ;;  %v6359_v55 = vsel %vm5527_vm14, %v20634_v7, %v6127_v13  ;;  %9200 = vlog2.f32 %v6137_v2  ;;  %v6294_v7 = vadd.f32 1.0, %v6293_v39  ;;  %v20653_v11 = vld [vmem:[#allocation59_spill] sm:$0xff]  ;;  %v20654_v39 = vld [vmem:[#allocation48_spill] sm:$0xff] }
 0x695   :  { %v6360_v10 = vsel %vm5528_vm13, %v20635_v36, %v6136_v51  ;;  %v6423_v32 = vmul.f32 %v6359_v55, %v20644_v25  ;;  %v6143_v15 = vand.u32 2147483647, %v20642_v57  ;;  %9202 = vlog2.f32 %v6146_v59 }
 0x696   :  { %v6424_v44 = vmul.f32 %v6360_v10, %v17098_v31  ;;  %v5481_v38 = vmul.f32 %v5417_v61, %v20645_v27  ;;  %vm5545_vm0 = vcmp.gt.f32.partialorder %v20477_v34, 20.0  ;;  %vm5546_vm10 = vcmp.gt.f32.partialorder %v20481_v47, 20.0 }
 0x697   :  { %v9197_v8 = vpop.eup %9196  ;;  %v6286_v36 = vmul.f32 %v17161_v18, %v6285_v12  ;;  %v6141_v29 = vadd.f32 1.0, %v6140_v60  ;;  %v6150_v14 = vadd.f32 1.0, %v6149_v37  ;;  %v5482_v35 = vmul.f32 %v5418_v56, %v20646_v46  ;;  %v17661_v12 = vpop.trf.xlu1  ;;  %v20655_v37 = vld [vmem:[#allocation38_spill] sm:$0xff] }
 0x698   :  { %v8192_v5 = vpack.c.bf16 %v6424_v44, %v6423_v32  ;;  %v6283_v28 = vmul.f32 0.6931472, %v9197_v8  ;;  %vm6288_vm6 = vcmp.lt.f32.partialorder %v6287_v53, 0.0004427343  ;;  %vm17641_vm3 = vcmp.lt.f32.partialorder %v6296_v50, 0.0004427343 }
 0x699   :  { %v5355_v20 = vmul.f32 0.5, %v20649_v23  ;;  %v6295_v63 = vmul.f32 %v17173_v4, %v6294_v7  ;;  %vm5529_vm1 = vcmp.gt.f32.partialorder %v20650_v40, 20.0  ;;  %vm17648_vm2 = vcmp.lt.f32.partialorder %v6143_v15, 0.0004427343  ;;  %v17659_v4 = vpop.trf.xlu0 }
 0x69a   :  { %v9199_v3 = vpop.eup %9198  ;;  %8193 = vmatpush3.bf16.msra.mxu1 %v8192_v5  ;;  %v6289_v61 = vsel %vm6288_vm6, %v6286_v36, %v6283_v28  ;;  %v6299_v56 = vadd.f32 1.0, %v17268_v6  ;;  %vm5530_vm5 = vcmp.gt.f32.partialorder %v20653_v11, 20.0  ;;  %v6152_v53 = vand.u32 2147483647, %v20643_v33  ;;  %v20658_v5 = vld [vmem:[#allocation23_spill] sm:$0xff] }
 0x69b   :  { %v6292_v42 = vmul.f32 0.6931472, %v9199_v3  ;;  %v6377_v1 = vsel %vm5545_vm0, %v20477_v34, %v6289_v61  ;;  %v5356_v13 = vmul.f32 0.5, %v20654_v39  ;;  %v6142_v60 = vmul.f32 %v20642_v57, %v6141_v29  ;;  %v17684_v46 = vpop.trf.xlu1  ;;  %v20662_v39 = vld [vmem:[#allocation114_spill] sm:$0xff] }
 0x69c   :  { %v6441_v2 = vmul.f32 %v6377_v1, %v5481_v38  ;;  %v6151_v51 = vmul.f32 %v20643_v33, %v6150_v14  ;;  %9204 = vlog2.f32 %v6299_v56  ;;  %v5419_v34 = vadd.f32 0.5, %v5355_v20  ;;  %v20659_v20 = vld [vmem:[#allocation27_spill] sm:$0xff] }
 0x69d   :  { %v6298_v55 = vsel %vm17641_vm3, %v6295_v63, %v6292_v42  ;;  %v6302_v59 = vmul.f32 -0.5, %v17268_v6  ;;  %v6308_v10 = vadd.f32 1.0, %v20655_v37  ;;  %v6311_v32 = vmul.f32 -0.5, %v20655_v37  ;;  %v17682_v14 = vpop.trf.xlu0  ;;  %v20660_v63 = vld [vmem:[#allocation148_spill] sm:$0xff]  ;;  %v20661_v42 = vld [vmem:[#allocation30_spill] sm:$0xff] }
 0x69e   :  { %v6378_v25 = vsel %vm5546_vm10, %v20481_v47, %v6298_v55  ;;  %v8538_v50 = vunpack.i.l.bf16 %v17514_v49  ;;  %v9201_v57 = vpop.eup %9200  ;;  %vm17674_vm7 = vcmp.lt.f32.partialorder %v6152_v53, 0.0004427343  ;;  %v5420_v7 = vadd.f32 0.5, %v5356_v13 }
 0x69f   :  { %v6442_v44 = vmul.f32 %v6378_v25, %v5482_v35  ;;  %9206 = vlog2.f32 %v6308_v10  ;;  %v9203_v15 = vpop.eup %9202  ;;  %v6139_v8 = vmul.f32 0.6931472, %v9201_v57  ;;  %v6305_v27 = vand.u32 2147483647, %v17268_v6 }
 0x6a0   :  { %6672 = vmatprep.mubr.f32.mxu1 %v8538_v50  ;;  %v8541_v38 = vunpack.i.h.bf16 %v17514_v49  ;;  %v6148_v36 = vmul.f32 0.6931472, %v9203_v15  ;;  %v5483_v28 = vmul.f32 %v5419_v34, %v20658_v5  ;;  %vm5547_vm8 = vcmp.gt.f32.partialorder %v20490_v52, 20.0 }
 0x6a1   :  { %v8194_v47 = vpack.c.bf16 %v6442_v44, %v6441_v2  ;;  %v6303_v29 = vadd.f32 1.0, %v6302_v59  ;;  %v6145_v35 = vsel %vm17648_vm2, %v6142_v60, %v6139_v8  ;;  %v6312_v31 = vadd.f32 1.0, %v6311_v32  ;;  %v17716_v25 = vpop.trf.xlu0 }
 0x6a2   :  { %v6314_v23 = vand.u32 2147483647, %v20655_v37  ;;  %6673 = vmatmul.mubr.f32.gmra.mrb[238].mxu1 %v8541_v38  ;;  %v6155_v49 = vadd.f32 1.0, %v20659_v20  ;;  %v6154_v3 = vsel %vm17674_vm7, %v6151_v51, %v6148_v36  ;;  %v6361_v61 = vsel %vm5529_vm1, %v20650_v40, %v6145_v35 }
 0x6a3   :  { %8195 = vmatprep.subr.bf16.mxu1 %v8194_v47  ;;  %v5484_v56 = vmul.f32 %v5420_v7, %v20660_v63  ;;  %v6164_v1 = vadd.f32 1.0, %v20661_v42  ;;  %v6362_v18 = vsel %vm5530_vm5, %v20653_v11, %v6154_v3  ;;  %v6425_v53 = vmul.f32 %v6361_v61, %v17110_v43  ;;  %v20667_v47 = vld [vmem:[#allocation145_spill] sm:$0xff] }
 0x6a4   :  { %vm5548_vm4 = vcmp.gt.f32.partialorder %v20662_v39, 20.0  ;;  %vm17702_vm12 = vcmp.lt.f32.partialorder %v6305_v27, 0.0004427343  ;;  %9208 = vlog2.f32 %v6155_v49  ;;  %v6426_v2 = vmul.f32 %v6362_v18, %v17420_v9  ;;  %v17718_v9 = vpop.trf.xlu1 }
 0x6a5   :  { %v6304_v40 = vmul.f32 %v17268_v6, %v6303_v29  ;;  %v6158_v60 = vmul.f32 -0.5, %v20659_v20  ;;  %9210 = vlog2.f32 %v6164_v1  ;;  %v6313_v55 = vmul.f32 %v20655_v37, %v6312_v31  ;;  %v8577_v5 = vpop.trf.xlu0 }
 0x6a6   :  { %v9205_v51 = vpop.eup %9204  ;;  %vm17710_vm11 = vcmp.lt.f32.partialorder %v6314_v23, 0.0004427343  ;;  %v8543_v43 = vunpack.i.l.bf16 %v17540_v62  ;;  %v8196_v34 = vpack.c.bf16 %v6426_v2, %v6425_v53  ;;  %v6167_v10 = vmul.f32 -0.5, %v20661_v42  ;;  %v20670_v53 = vld [vmem:[#allocation84_spill] sm:$0xff] }
 0x6a7   :  { %v6301_v59 = vmul.f32 0.6931472, %v9205_v51  ;;  %v6161_v6 = vand.u32 2147483647, %v20659_v20  ;;  %v8546_v32 = vunpack.i.h.bf16 %v17540_v62  ;;  %v8548_v37 = vunpack.i.l.bf16 %v17571_v19 }
 0x6a8   :  { %6677 = vmatprep.mubr.f32.mxu1 %v8543_v43  ;;  %8197 = vmatpush3.bf16.msra.mxu1 %v8196_v34  ;;  %v6159_v44 = vadd.f32 1.0, %v6158_v60  ;;  %v8551_v33 = vunpack.i.h.bf16 %v17571_v19  ;;  %v6168_v27 = vadd.f32 1.0, %v6167_v10  ;;  %v8553_v62 = vunpack.i.l.bf16 %v17603_v26 }
 0x6a9   :  { %v9207_v50 = vpop.eup %9206  ;;  %v6307_v57 = vsel %vm17702_vm12, %v6304_v40, %v6301_v59  ;;  %6678 = vmatmul.mubr.f32.gmra.mrb[240].mxu1 %v8546_v32  ;;  %vm5531_vm14 = vcmp.gt.f32.partialorder %v20667_v47, 20.0  ;;  %vm17733_vm13 = vcmp.lt.f32.partialorder %v6161_v6, 0.0004427343  ;;  %v8556_v31 = vunpack.i.h.bf16 %v17603_v26 }
 0x6aa   :  { %v6310_v7 = vmul.f32 0.6931472, %v9207_v50  ;;  %v6379_v15 = vsel %vm5547_vm8, %v20490_v52, %v6307_v57  ;;  %6682 = vmatprep.mubr.f32.mxu1 %v8548_v37  ;;  %v6170_v52 = vand.u32 2147483647, %v20661_v42  ;;  %v6160_v3 = vmul.f32 %v20659_v20, %v6159_v44 }
 0x6ab   :  { %v6443_v8 = vmul.f32 %v6379_v15, %v5483_v28  ;;  %v17741_v28 = vpop.trf.xlu1  ;;  %v6169_v61 = vmul.f32 %v20661_v42, %v6168_v27  ;;  %v8558_v63 = vunpack.i.l.bf16 %v17630_v30  ;;  %vm5532_vm9 = vcmp.gt.f32.partialorder %v20670_v53, 20.0 }
 0x6ac   :  { %v6316_v38 = vsel %vm17710_vm11, %v6313_v55, %v6310_v7  ;;  %vm6171_vm15 = vcmp.lt.f32.partialorder %v6170_v52, 0.0004427343  ;;  %v8563_v2 = vunpack.i.l.bf16 %v17659_v4  ;;  %v8568_v55 = vunpack.i.l.bf16 %v17682_v14 }
 0x6ad   :  { %v6380_v19 = vsel %vm5548_vm4, %v20662_v39, %v6316_v38  ;;  %6683 = vmatmul.mubr.f32.gmra.mrb[242].mxu1 %v8551_v33  ;;  %v8573_v43 = vunpack.i.l.bf16 %v17716_v25  ;;  %v8576_v34 = vunpack.i.h.bf16 %v17716_v25  ;;  %v8615_v10 = vunpack.i.l.bf16 %v17400_v48 }
 0x6ae   :  { %v9209_v29 = vpop.eup %9208  ;;  %v6444_v35 = vmul.f32 %v6380_v19, %v5484_v56  ;;  %6687 = vmatprep.mubr.f32.mxu1 %v8553_v62  ;;  %v8561_v56 = vunpack.i.h.bf16 %v17630_v30  ;;  %v8566_v30 = vunpack.i.h.bf16 %v17659_v4  ;;  %v8581_v4 = vunpack.i.h.bf16 %v8577_v5 }
 0x6af   :  { %v9211_v23 = vpop.eup %9210  ;;  %v6157_v49 = vmul.f32 0.6931472, %v9209_v29  ;;  %v17757_v40 = vpop.trf.xlu1  ;;  %v8618_v6 = vunpack.i.h.bf16 %v17400_v48  ;;  %v8623_v32 = vunpack.i.h.bf16 %v17429_v17  ;;  %v8625_v25 = vunpack.i.l.bf16 %v17461_v0 }
 0x6b0   :  { %v8198_v1 = vpack.c.bf16 %v6444_v35, %v6443_v8  ;;  %v6166_v18 = vmul.f32 0.6931472, %v9211_v23  ;;  %v8628_v37 = vunpack.i.h.bf16 %v17461_v0  ;;  %v8630_v50 = vunpack.i.l.bf16 %v17488_v22 }
 0x6b1   :  { %v6163_v39 = vsel %vm17733_vm13, %v6160_v3, %v6157_v49  ;;  %6688 = vmatmul.mubr.f32.gmra.mrb[244].mxu1 %v8556_v31  ;;  %v8633_v57 = vunpack.i.h.bf16 %v17488_v22  ;;  %v8635_v48 = vunpack.i.l.bf16 %v17516_v45  ;;  %v8638_v44 = vunpack.i.h.bf16 %v17516_v45 }
 0x6b2   :  { %8199 = vmatprep.subr.bf16.mxu1 %v8198_v1  ;;  %v6172_v26 = vsel %vm6171_vm15, %v6169_v61, %v6166_v18  ;;  %v6363_v20 = vsel %vm5531_vm14, %v20667_v47, %v6163_v39  ;;  %6692 = vmatprep.mubr.f32.mxu1 %v8558_v63  ;;  %v8643_v33 = vunpack.i.h.bf16 %v17542_v16  ;;  %v8645_v0 = vunpack.i.l.bf16 %v17573_v24 }
 0x6b3   :  { %v6364_v42 = vsel %vm5532_vm9, %v20670_v53, %v6172_v26  ;;  %v6427_v13 = vmul.f32 %v6363_v20, %v17492_v21  ;;  %v17762_v11 = vpop.trf.xlu1  ;;  %v8571_v21 = vunpack.i.h.bf16 %v17682_v14  ;;  %v8620_v14 = vunpack.i.l.bf16 %v17429_v17 }
 0x6b4   :  { %v6428_v60 = vmul.f32 %v6364_v42, %v17562_v54  ;;  %v8578_v54 = vunpack.i.l.bf16 %v8577_v5  ;;  %v8640_v17 = vunpack.i.l.bf16 %v17542_v16  ;;  %v8648_v7 = vunpack.i.h.bf16 %v17573_v24 }
 0x6b5   :  { %6693 = vmatmul.mubr.f32.gmra.mrb[246].mxu1 %v8561_v56  ;;  %v8650_v22 = vunpack.i.l.bf16 %v17605_v41  ;;  %v8653_v15 = vunpack.i.h.bf16 %v17605_v41  ;;  %v8655_v45 = vunpack.i.l.bf16 %v17632_v58  ;;  %v8658_v8 = vunpack.i.h.bf16 %v17632_v58 }
 0x6b6   :  { %v8200_v51 = vpack.c.bf16 %v6428_v60, %v6427_v13  ;;  %6697 = vmatprep.mubr.f32.mxu1 %v8563_v2  ;;  %v8660_v16 = vunpack.i.l.bf16 %v17661_v12  ;;  %v8663_v27 = vunpack.i.h.bf16 %v17661_v12  ;;  %v8665_v24 = vunpack.i.l.bf16 %v17684_v46 }
 0x6b7   :  { %v17767_v59 = vpop.trf.xlu1  ;;  %v8668_v62 = vunpack.i.h.bf16 %v17684_v46  ;;  %v8670_v41 = vunpack.i.l.bf16 %v17718_v9  ;;  %v8673_v38 = vunpack.i.h.bf16 %v17718_v9  ;;  %v8675_v58 = vunpack.i.l.bf16 %v17741_v28 }
 0x6b8   :  { %8201 = vmatpush3.bf16.msra.mxu1 %v8200_v51  ;;  %v8678_v47 = vunpack.i.h.bf16 %v17741_v28  ;;  %v8680_v12 = vunpack.i.l.bf16 %v17757_v40  ;;  %v8683_v36 = vunpack.i.h.bf16 %v17757_v40  ;;  %v8685_v46 = vunpack.i.l.bf16 %v17762_v11 }
 0x6b9   :  { %6698 = vmatmul.mubr.f32.gmra.mrb[248].mxu1 %v8566_v30  ;;  %v8688_v19 = vunpack.i.h.bf16 %v17762_v11  ;;  %v8690_v9 = vunpack.i.l.bf16 %v17767_v59  ;;  %v8693_v52 = vunpack.i.h.bf16 %v17767_v59 }
 0x6ba   :  { %6702 = vmatprep.mubr.f32.mxu1 %v8568_v55 }
 0x6bd   :  { %6703 = vmatmul.mubr.f32.gmra.mrb[250].mxu1 %v8571_v21 }
 0x6be   :  { %6707 = vmatprep.mubr.f32.mxu1 %v8573_v43 }
 0x6c1   :  { %6708 = vmatmul.mubr.f32.gmra.mrb[252].mxu1 %v8576_v34 }
 0x6c2   :  { %6712 = vmatprep.mubr.f32.mxu1 %v8578_v54 }
 0x6c5   :  { %6713 = vmatmul.mubr.f32.gmra.mrb[254].mxu1 %v8581_v4 }
 0x6c6   :  { %6782 = vmatprep.mubr.f32.mxu1 %v8615_v10 }
 0x6c9   :  { %6783 = vmatmul.mubr.f32.vlgmr.msra.gmra.mrb[0].mxu1 %v8618_v6 }
 0x6ca   :  { %6787 = vmatprep.mubr.f32.mxu1 %v8620_v14 }
 0x6cd   :  { %6788 = vmatmul.mubr.f32.gmra.mrb[2].mxu1 %v8623_v32 }
 0x6ce   :  { %6792 = vmatprep.mubr.f32.mxu1 %v8625_v25 }
 0x6d1   :  { %6793 = vmatmul.mubr.f32.gmra.mrb[4].mxu1 %v8628_v37 }
 0x6d2   :  { %6797 = vmatprep.mubr.f32.mxu1 %v8630_v50 }
 0x6d5   :  { %6798 = vmatmul.mubr.f32.gmra.mrb[6].mxu1 %v8633_v57 }
 0x6d6   :  { %6802 = vmatprep.mubr.f32.mxu1 %v8635_v48 }
 0x6d9   :  { %6803 = vmatmul.mubr.f32.gmra.mrb[8].mxu1 %v8638_v44 }
 0x6da   :  { %6807 = vmatprep.mubr.f32.mxu1 %v8640_v17 }
 0x6dd   :  { %6808 = vmatmul.mubr.f32.gmra.mrb[10].mxu1 %v8643_v33 }
 0x6de   :  { %6812 = vmatprep.mubr.f32.mxu1 %v8645_v0 }
 0x6e1   :  { %6813 = vmatmul.mubr.f32.gmra.mrb[12].mxu1 %v8648_v7 }
 0x6e2   :  { %6817 = vmatprep.mubr.f32.mxu1 %v8650_v22 }
 0x6e5   :  { %6818 = vmatmul.mubr.f32.gmra.mrb[14].mxu1 %v8653_v15 }
 0x6e6   :  { %6822 = vmatprep.mubr.f32.mxu1 %v8655_v45 }
 0x6e9   :  { %6823 = vmatmul.mubr.f32.gmra.mrb[16].mxu1 %v8658_v8 }
 0x6ea   :  { %6827 = vmatprep.mubr.f32.mxu1 %v8660_v16 }
 0x6ed   :  { %6828 = vmatmul.mubr.f32.gmra.mrb[18].mxu1 %v8663_v27 }
 0x6ee   :  { %6832 = vmatprep.mubr.f32.mxu1 %v8665_v24 }
 0x6f1   :  { %6833 = vmatmul.mubr.f32.gmra.mrb[20].mxu1 %v8668_v62 }
 0x6f2   :  { %6837 = vmatprep.mubr.f32.mxu1 %v8670_v41 }
 0x6f5   :  { %6838 = vmatmul.mubr.f32.gmra.mrb[22].mxu1 %v8673_v38 }
 0x6f6   :  { %6842 = vmatprep.mubr.f32.mxu1 %v8675_v58 }
 0x6f9   :  { %6843 = vmatmul.mubr.f32.gmra.mrb[24].mxu1 %v8678_v47 }
 0x6fa   :  { %6847 = vmatprep.mubr.f32.mxu1 %v8680_v12 }
 0x6fd   :  { %6848 = vmatmul.mubr.f32.gmra.mrb[26].mxu1 %v8683_v36 }
 0x6fe   :  { %6852 = vmatprep.mubr.f32.mxu1 %v8685_v46 }
 0x701   :  { %6853 = vmatmul.mubr.f32.gmra.mrb[28].mxu1 %v8688_v19 }
 0x702   :  { %6857 = vmatprep.mubr.f32.mxu1 %v8690_v9 }
 0x705   :  { %6858 = vmatmul.mubr.f32.gmra.mrb[30].mxu1 %v8693_v52 }
 0x717   :  { %v7738_v5 = vpop.f32.mrb[224].mxu1 }
 0x718   :  { %v7739_v28 = vpop.f32.mrb[225].mxu1 }
 0x719   :  { %v7740_v29 = vadd.f32 %v7739_v28, %v7738_v5 }
 0x71c   :  { %v7741_v35 = vpop.f32.mrb[226].mxu1 }
 0x71d   :  { %v7742_v31 = vpop.f32.mrb[227].mxu1 }
 0x71e   :  { %v7743_v23 = vadd.f32 %v7742_v31, %v7741_v35 }
 0x72b   :  { %v7744_v49 = vpop.f32.mrb[228].mxu1 }
 0x72c   :  { %v7745_v3 = vpop.f32.mrb[229].mxu1 }
 0x72d   :  { %v7746_v61 = vadd.f32 %v7745_v3, %v7744_v49 }
 0x739   :  { %v7747_v63 = vpop.f32.mrb[230].mxu1 }
 0x73a   :  { %v7748_v1 = vpop.f32.mrb[231].mxu1 }
 0x73b   :  { %v7749_v18 = vadd.f32 %v7748_v1, %v7747_v63 }
 0x748   :  { %v7750_v53 = vpop.f32.mrb[232].mxu1 }
 0x749   :  { %v7751_v39 = vpop.f32.mrb[233].mxu1 }
 0x74a   :  { %v7752_v56 = vadd.f32 %v7751_v39, %v7750_v53 }
 0x757   :  { %v7753_v26 = vpop.f32.mrb[234].mxu1 }
 0x758   :  { %v7754_v20 = vpop.f32.mrb[235].mxu1 }
 0x759   :  { %v7755_v42 = vadd.f32 %v7754_v20, %v7753_v26 }
 0x765   :  { %v7756_v13 = vpop.f32.mrb[236].mxu1 }
 0x766   :  { %v7757_v2 = vpop.f32.mrb[237].mxu1 }
 0x767   :  { %v7758_v40 = vadd.f32 %v7757_v2, %v7756_v13 }
 0x775   :  { %v7759_v60 = vpop.f32.mrb[238].mxu1 }
 0x776   :  { %v7760_v51 = vpop.f32.mrb[239].mxu1 }
 0x777   :  { %v7761_v30 = vadd.f32 %v7760_v51, %v7759_v60 }
 0x77c   :  { %v7762_v55 = vpop.f32.mrb[240].mxu1 }
 0x77d   :  { %v7763_v11 = vpop.f32.mrb[241].mxu1 }
 0x77e   :  { %v17801_v21 = vadd.f32 %v7763_v11, %v7762_v55 }
 0x780   :  { %v7765_v43 = vpop.f32.mrb[242].mxu1 }
 0x781   :  { %v7766_v34 = vpop.f32.mrb[243].mxu1 }
 0x782   :  { %v17803_v54 = vadd.f32 %v7766_v34, %v7765_v43 }
 0x784   :  { %v7768_v59 = vpop.f32.mrb[244].mxu1 }
 0x785   :  { %v7769_v4 = vpop.f32.mrb[245].mxu1 }
 0x786   :  { %v17805_v10 = vadd.f32 %v7769_v4, %v7768_v59 }
 0x788   :  { %v7771_v6 = vpop.f32.mrb[246].mxu1 }
 0x789   :  { %v7772_v14 = vpop.f32.mrb[247].mxu1 }
 0x78a   :  { %v17807_v32 = vadd.f32 %v7772_v14, %v7771_v6 }
 0x78c   :  { %v7774_v25 = vpop.f32.mrb[248].mxu1 }
 0x78d   :  { %v7775_v37 = vpop.f32.mrb[249].mxu1 }
 0x78e   :  { %v17809_v50 = vadd.f32 %v7775_v37, %v7774_v25 }
 0x790   :  { %v7777_v57 = vpop.f32.mrb[250].mxu1 }
 0x791   :  { %v7778_v48 = vpop.f32.mrb[251].mxu1 }
 0x792   :  { %v17811_v44 = vadd.f32 %v7778_v48, %v7777_v57 }
 0x794   :  { %v7780_v17 = vpop.f32.mrb[252].mxu1 }
 0x795   :  { %v7781_v33 = vpop.f32.mrb[253].mxu1 }
 0x796   :  { %v17813_v0 = vadd.f32 %v7781_v33, %v7780_v17 }
 0x798   :  { %v7783_v7 = vpop.f32.mrb[254].mxu1 }
 0x799   :  { %v7784_v22 = vpop.f32.mrb[255].mxu1 }
 0x79a   :  { %v17815_v15 = vadd.f32 %v7784_v22, %v7783_v7 }
 0x79c   :  { %v7818_v45 = vpop.f32.mrb[0].mxu1 }
 0x79d   :  { %v7819_v8 = vpop.f32.mrb[1].mxu1 }
 0x79e   :  { %v7820_v16 = vadd.f32 %v7819_v8, %v7818_v45 }
 0x7a0   :  { %v17817_v27 = vadd.f32 %v7820_v16, %v7740_v29  ;;  %v7821_v24 = vpop.f32.mrb[2].mxu1 }
 0x7a1   :  { %v7822_v62 = vpop.f32.mrb[3].mxu1 }
 0x7a2   :  { %v7823_v41 = vadd.f32 %v7822_v62, %v7821_v24 }
 0x7a4   :  { %v17819_v38 = vadd.f32 %v7823_v41, %v7743_v23  ;;  %v7824_v58 = vpop.f32.mrb[4].mxu1 }
 0x7a5   :  { %v7825_v47 = vpop.f32.mrb[5].mxu1 }
 0x7a6   :  { %v6863_v12 = vadd.f32 %v17819_v38, %v17817_v27  ;;  %v7826_v36 = vadd.f32 %v7825_v47, %v7824_v58 }
 0x7a8   :  { %v17823_v46 = vadd.f32 %v7826_v36, %v7746_v61  ;;  %v7827_v19 = vpop.f32.mrb[6].mxu1 }
 0x7a9   :  { %v7828_v9 = vpop.f32.mrb[7].mxu1 }
 0x7aa   :  { %v6864_v52 = vadd.f32 %v6863_v12, %v17823_v46  ;;  %v7829_v5 = vadd.f32 %v7828_v9, %v7827_v19 }
 0x7ac   :  { %v17826_v28 = vadd.f32 %v7829_v5, %v7749_v18  ;;  %v7830_v29 = vpop.f32.mrb[8].mxu1 }
 0x7ad   :  { %v7831_v35 = vpop.f32.mrb[9].mxu1 }
 0x7ae   :  { %v6865_v31 = vadd.f32 %v6864_v52, %v17826_v28  ;;  %v7832_v23 = vadd.f32 %v7831_v35, %v7830_v29 }
 0x7b0   :  { %v17829_v49 = vadd.f32 %v7832_v23, %v7752_v56  ;;  %v7833_v3 = vpop.f32.mrb[10].mxu1 }
 0x7b1   :  { %v7834_v63 = vpop.f32.mrb[11].mxu1 }
 0x7b2   :  { %v6866_v1 = vadd.f32 %v6865_v31, %v17829_v49  ;;  %v7835_v61 = vadd.f32 %v7834_v63, %v7833_v3 }
 0x7b4   :  { %v17832_v53 = vadd.f32 %v7835_v61, %v7755_v42  ;;  %v7836_v39 = vpop.f32.mrb[12].mxu1 }
 0x7b5   :  { %v7837_v26 = vpop.f32.mrb[13].mxu1 }
 0x7b6   :  { %v6867_v20 = vadd.f32 %v6866_v1, %v17832_v53  ;;  %v7838_v18 = vadd.f32 %v7837_v26, %v7836_v39 }
 0x7b8   :  { %v6815_v13 = vadd.f32 %v7838_v18, %v7758_v40  ;;  %v7839_v2 = vpop.f32.mrb[14].mxu1 }
 0x7b9   :  { %v7840_v60 = vpop.f32.mrb[15].mxu1 }
 0x7ba   :  { %v6868_v51 = vadd.f32 %v6867_v20, %v6815_v13  ;;  %v7841_v55 = vadd.f32 %v7840_v60, %v7839_v2 }
 0x7bc   :  { %v6820_v11 = vadd.f32 %v7841_v55, %v7761_v30  ;;  %v7842_v56 = vpop.f32.mrb[16].mxu1 }
 0x7bd   :  { %v7843_v43 = vpop.f32.mrb[17].mxu1 }
 0x7be   :  { %v6869_v34 = vadd.f32 %v6868_v51, %v6820_v11  ;;  %v7844_v59 = vadd.f32 %v7843_v43, %v7842_v56 }
 0x7c0   :  { %v6825_v4 = vadd.f32 %v7844_v59, %v17801_v21  ;;  %v7845_v6 = vpop.f32.mrb[18].mxu1 }
 0x7c1   :  { %v7846_v42 = vpop.f32.mrb[19].mxu1 }
 0x7c2   :  { %v6870_v14 = vadd.f32 %v6869_v34, %v6825_v4  ;;  %v7847_v25 = vadd.f32 %v7846_v42, %v7845_v6 }
 0x7c4   :  { %v6830_v37 = vadd.f32 %v7847_v25, %v17803_v54  ;;  %v7848_v57 = vpop.f32.mrb[20].mxu1 }
 0x7c5   :  { %v7849_v48 = vpop.f32.mrb[21].mxu1 }
 0x7c6   :  { %v6871_v40 = vadd.f32 %v6870_v14, %v6830_v37  ;;  %v7850_v17 = vadd.f32 %v7849_v48, %v7848_v57 }
 0x7c8   :  { %v6835_v33 = vadd.f32 %v7850_v17, %v17805_v10  ;;  %v7851_v7 = vpop.f32.mrb[22].mxu1 }
 0x7c9   :  { %v7852_v30 = vpop.f32.mrb[23].mxu1 }
 0x7ca   :  { %v6872_v22 = vadd.f32 %v6871_v40, %v6835_v33  ;;  %v7853_v45 = vadd.f32 %v7852_v30, %v7851_v7 }
 0x7cc   :  { %v6840_v8 = vadd.f32 %v7853_v45, %v17807_v32  ;;  %v7854_v16 = vpop.f32.mrb[24].mxu1 }
 0x7cd   :  { %v7855_v21 = vpop.f32.mrb[25].mxu1 }
 0x7ce   :  { %v6873_v24 = vadd.f32 %v6872_v22, %v6840_v8  ;;  %v7856_v62 = vadd.f32 %v7855_v21, %v7854_v16 }
 0x7d0   :  { %v6845_v41 = vadd.f32 %v7856_v62, %v17809_v50  ;;  %v7857_v58 = vpop.f32.mrb[26].mxu1 }
 0x7d1   :  { %v7858_v54 = vpop.f32.mrb[27].mxu1 }
 0x7d2   :  { %v6874_v47 = vadd.f32 %v6873_v24, %v6845_v41  ;;  %v7859_v12 = vadd.f32 %v7858_v54, %v7857_v58 }
 0x7d4   :  { %v6850_v36 = vadd.f32 %v7859_v12, %v17811_v44  ;;  %v7860_v19 = vpop.f32.mrb[28].mxu1 }
 0x7d5   :  { %v7861_v10 = vpop.f32.mrb[29].mxu1 }
 0x7d6   :  { %v6875_v9 = vadd.f32 %v6874_v47, %v6850_v36  ;;  %v7862_v52 = vadd.f32 %v7861_v10, %v7860_v19 }
 0x7d8   :  { %v6855_v5 = vadd.f32 %v7862_v52, %v17813_v0  ;;  %v7863_v29 = vpop.f32.mrb[30].mxu1 }
 0x7d9   :  { %v7864_v32 = vpop.f32.mrb[31].mxu1 }
 0x7da   :  { %v6876_v35 = vadd.f32 %v6875_v9, %v6855_v5  ;;  %v7865_v31 = vadd.f32 %v7864_v32, %v7863_v29 }
 0x7dc   :  { %v6860_v23 = vadd.f32 %v7865_v31, %v17815_v15 }
 0x7de   :  { %v6877_v3 = vadd.f32 %v6876_v35, %v6860_v23 }
 0x7e0   :  { %v6878_v50 = vrot.slane %v6877_v3, 4 }
 0x7e2   :  { %v6879_v63 = vadd.f32 %v6878_v50, %v6877_v3 }
 0x7e4   :  { %v6880_v1 = vrot.slane %v6879_v63, 2 }
 0x7e6   :  { %v6881_v61 = vadd.f32 %v6880_v1, %v6879_v63  ;;  %v9282_v63 = vld [vmem:[%s18246_s6] sm:$0xff] }
 0x7e8   :  { %v6882_v39 = vrot.slane %v6881_v61, 1 }
 0x7ea   :  { %v6883_v26 = vadd.f32 %v6882_v39, %v6881_v61 }
 0x7ec   :  { %v6884_v44 = vmul.f32 0.0078125, %v6883_v26 }
 0x7ee   :  { %v6885_v20 = vsub.f32 %v17817_v27, %v6884_v44  ;;  %v6886_v18 = vsub.f32 %v17819_v38, %v6884_v44  ;;  %v6887_v0 = vsub.f32 %v17823_v46, %v6884_v44  ;;  %v6888_v2 = vsub.f32 %v17826_v28, %v6884_v44 }
 0x7ef   :  { %v6889_v60 = vsub.f32 %v17829_v49, %v6884_v44  ;;  %v6890_v15 = vsub.f32 %v17832_v53, %v6884_v44  ;;  %v6891_v51 = vsub.f32 %v6815_v13, %v6884_v44  ;;  %v6892_v55 = vsub.f32 %v6820_v11, %v6884_v44 }
 0x7f0   :  { %v6893_v56 = vsub.f32 %v6825_v4, %v6884_v44  ;;  %v6894_v43 = vsub.f32 %v6830_v37, %v6884_v44  ;;  %v6895_v34 = vsub.f32 %v6835_v33, %v6884_v44  ;;  %v6896_v59 = vsub.f32 %v6840_v8, %v6884_v44 }
 0x7f1   :  { %v6897_v6 = vsub.f32 %v6845_v41, %v6884_v44  ;;  %v6898_v42 = vsub.f32 %v6850_v36, %v6884_v44  ;;  %v6899_v14 = vsub.f32 %v6855_v5, %v6884_v44  ;;  %v6900_v27 = vsub.f32 %v6860_v23, %v6884_v44  ;;  %v20671_v23 = vld [vmem:[#allocation47_spill] sm:$0xff] }
 0x7f2   :  { %v6901_v25 = vmul.f32 %v6885_v20, %v6885_v20  ;;  %v6902_v38 = vmul.f32 %v6886_v18, %v6886_v18  ;;  %v6903_v57 = vmul.f32 %v6887_v0, %v6887_v0  ;;  %v6904_v48 = vmul.f32 %v6888_v2, %v6888_v2 }
 0x7f3   :  { %v6905_v40 = vmul.f32 %v6889_v60, %v6889_v60  ;;  %v6906_v17 = vmul.f32 %v6890_v15, %v6890_v15  ;;  %v6907_v13 = vmul.f32 %v6891_v51, %v6891_v51  ;;  %v6908_v4 = vmul.f32 %v6892_v55, %v6892_v55 }
 0x7f4   :  { %v6917_v46 = vadd.f32 %v6902_v38, %v6901_v25  ;;  %v6909_v33 = vmul.f32 %v6893_v56, %v6893_v56  ;;  %v6910_v30 = vmul.f32 %v6894_v43, %v6894_v43  ;;  %v6911_v45 = vmul.f32 %v6895_v34, %v6895_v34 }
 0x7f5   :  { %v6912_v16 = vmul.f32 %v6896_v59, %v6896_v59  ;;  %v6913_v24 = vmul.f32 %v6897_v6, %v6897_v6  ;;  %v6914_v41 = vmul.f32 %v6898_v42, %v6898_v42  ;;  %v6915_v54 = vmul.f32 %v6899_v14, %v6899_v14 }
 0x7f6   :  { %v6918_v28 = vadd.f32 %v6917_v46, %v6903_v57  ;;  %v6916_v12 = vmul.f32 %v6900_v27, %v6900_v27  ;;  %v6944_v3 = vsub.s32 6, %v20671_v23  ;;  %v6964_v39 = vsub.s32 7, %v20671_v23 }
 0x7f8   :  { %v6919_v49 = vadd.f32 %v6918_v28, %v6904_v48 }
 0x7fa   :  { %v6920_v53 = vadd.f32 %v6919_v49, %v6905_v40 }
 0x7fc   :  { %v6921_v11 = vadd.f32 %v6920_v53, %v6906_v17 }
 0x7fe   :  { %v6922_v37 = vadd.f32 %v6921_v11, %v6907_v13 }
 0x800   :  { %v6923_v7 = vadd.f32 %v6922_v37, %v6908_v4 }
 0x802   :  { %v6924_v22 = vadd.f32 %v6923_v7, %v6909_v33  ;;  %v6965_v33 = vrot.slane %v9282_v63, %v6964_v39 }
 0x804   :  { %v6925_v8 = vadd.f32 %v6924_v22, %v6910_v30 }
 0x806   :  { %v6926_v21 = vadd.f32 %v6925_v8, %v6911_v45  ;;  %v9288_v45 = vld [vmem:[%s18242_s2 + $0x28] sm:$0xff] }
 0x808   :  { %v6927_v62 = vadd.f32 %v6926_v21, %v6912_v16 }
 0x80a   :  { %v6928_v58 = vadd.f32 %v6927_v62, %v6913_v24 }
 0x80c   :  { %v6929_v47 = vadd.f32 %v6928_v58, %v6914_v41  ;;  %v9289_v58 = vld [vmem:[%s18242_s2 + $0x30] sm:$0xff] }
 0x80e   :  { %v6930_v36 = vadd.f32 %v6929_v47, %v6915_v54 }
 0x810   :  { %v6931_v19 = vadd.f32 %v6930_v36, %v6916_v12  ;;  %v9290_v36 = vld [vmem:[%s18242_s2 + $0x38] sm:$0xff] }
 0x812   :  { %v6932_v10 = vrot.slane %v6931_v19, 4 }
 0x814   :  { %v6933_v9 = vadd.f32 %v6932_v10, %v6931_v19 }
 0x816   :  { %v6934_v52 = vrot.slane %v6933_v9, 2 }
 0x818   :  { %v6935_v5 = vadd.f32 %v6934_v52, %v6933_v9 }
 0x81a   :  { %v6936_v29 = vrot.slane %v6935_v5, 1 }
 0x81c   :  { %v6937_v32 = vadd.f32 %v6936_v29, %v6935_v5  ;;  %v9291_v5 = vld [vmem:[%s18242_s2 + $0x40] sm:$0xff] }
 0x81e   :  { %v6938_v35 = vmul.f32 0.0078125, %v6937_v32 }
 0x820   :  { %v6939_v31 = vadd.f32 1e-05, %v6938_v35  ;;  %v9292_v35 = vld [vmem:[%s18242_s2 + $0x48] sm:$0xff] }
 0x822   :  { %9212 = vrsqrt.f32 %v6939_v31 }
 0x82c   :  { %v9213_v50 = vpop.eup %9212 }
 0x82d   :  { %v6941_v1 = vmul.f32 %v9282_v63, %v9213_v50 }
 0x82f   :  { %v6945_v61 = vrot.slane %v6941_v1, %v6944_v3  ;;  %v9293_v1 = vld [vmem:[%s18242_s2 + $0x50] sm:$0xff] }
 0x831   :  { %v6946_v26 = vmul.f32 %v6945_v61, %v6885_v20  ;;  %v6947_v44 = vmul.f32 %v6945_v61, %v6886_v18  ;;  %v6948_v25 = vmul.f32 %v6945_v61, %v6887_v0  ;;  %v6949_v38 = vmul.f32 %v6945_v61, %v6888_v2  ;;  %v9283_v2 = vld [vmem:[%s18242_s2] sm:$0xff] }
 0x832   :  { %v6950_v57 = vmul.f32 %v6945_v61, %v6889_v60  ;;  %v6951_v46 = vmul.f32 %v6945_v61, %v6890_v15  ;;  %v6952_v48 = vmul.f32 %v6945_v61, %v6891_v51  ;;  %v6953_v28 = vmul.f32 %v6945_v61, %v6892_v55  ;;  %v9284_v15 = vld [vmem:[%s18242_s2 + $0x8] sm:$0xff]  ;;  %v9285_v55 = vld [vmem:[%s18242_s2 + $0x10] sm:$0xff] }
 0x833   :  { %v6954_v40 = vmul.f32 %v6945_v61, %v6893_v56  ;;  %v6955_v49 = vmul.f32 %v6945_v61, %v6894_v43  ;;  %v6956_v17 = vmul.f32 %v6945_v61, %v6895_v34  ;;  %v6957_v53 = vmul.f32 %v6945_v61, %v6896_v59  ;;  %v9286_v34 = vld [vmem:[%s18242_s2 + $0x18] sm:$0xff] }
 0x834   :  { %v6958_v13 = vmul.f32 %v6945_v61, %v6897_v6  ;;  %v6959_v11 = vmul.f32 %v6945_v61, %v6898_v42  ;;  %v6960_v4 = vmul.f32 %v6945_v61, %v6899_v14  ;;  %v6961_v37 = vmul.f32 %v6945_v61, %v6900_v27  ;;  %v9287_v42 = vld [vmem:[%s18242_s2 + $0x20] sm:$0xff] }
 0x835   :  { %v6966_v7 = vadd.f32 %v6965_v33, %v6946_v26  ;;  %v6967_v30 = vadd.f32 %v6965_v33, %v6947_v44  ;;  %v6968_v22 = vadd.f32 %v6965_v33, %v6948_v25  ;;  %v6969_v20 = vadd.f32 %v6965_v33, %v6949_v38  ;;  %v9294_v44 = vld [vmem:[%s18242_s2 + $0x58] sm:$0xff] }
 0x836   :  { %v6970_v18 = vadd.f32 %v6965_v33, %v6950_v57  ;;  %v6971_v0 = vadd.f32 %v6965_v33, %v6951_v46  ;;  %v6972_v43 = vadd.f32 %v6965_v33, %v6952_v48  ;;  %v6973_v6 = vadd.f32 %v6965_v33, %v6953_v28  ;;  %v9295_v48 = vld [vmem:[%s18242_s2 + $0x60] sm:$0xff] }
 0x837   :  { %v17857_v60 = vadd.f32 %v9283_v2, %v6966_v7  ;;  %v17862_v51 = vadd.f32 %v9284_v15, %v6967_v30  ;;  %v17867_v56 = vadd.f32 %v9285_v55, %v6968_v22  ;;  %v17872_v59 = vadd.f32 %v9286_v34, %v6969_v20 }
 0x838   :  { %v17877_v14 = vadd.f32 %v9287_v42, %v6970_v18  ;;  %v6974_v27 = vadd.f32 %v6965_v33, %v6954_v40  ;;  %v17882_v8 = vadd.f32 %v9288_v45, %v6971_v0  ;;  %v6975_v16 = vadd.f32 %v6965_v33, %v6955_v49  ;;  %v9296_v49 = vld [vmem:[%s18242_s2 + $0x68] sm:$0xff]  ;;  %v9298_v18 = vld [vmem:[%s18242_s2 + $0x78] sm:$0xff] }
 0x839   :  { %v7014_v21 = vmin.f32 %v17857_v60, 20.0  ;;  %v7015_v24 = vmin.f32 %v17862_v51, 20.0  ;;  %v7016_v62 = vmin.f32 %v17867_v56, 20.0  ;;  %v6976_v41 = vadd.f32 %v6965_v33, %v6956_v17 }
 0x83a   :  { %v17890_v54 = vadd.f32 %v9289_v58, %v6972_v43  ;;  %v7017_v47 = vmin.f32 %v17872_v59, 20.0  ;;  %v6977_v12 = vadd.f32 %v6965_v33, %v6957_v53  ;;  %v17896_v19 = vadd.f32 %v9290_v36, %v6973_v6 }
 0x83b   :  { %v7018_v10 = vmin.f32 %v17877_v14, 20.0  ;;  %v6978_v9 = vadd.f32 %v6965_v33, %v6958_v13  ;;  %v6979_v52 = vadd.f32 %v6965_v33, %v6959_v11  ;;  %v17902_v29 = vadd.f32 %v9291_v5, %v6974_v27  ;;  %v9297_v11 = vld [vmem:[%s18242_s2 + $0x70] sm:$0xff]  ;;  %s9326_s2 = smov [#allocation2]  }
 0x83c   :  { %v7019_v32 = vmin.f32 %v17882_v8, 20.0  ;;  %v17908_v31 = vadd.f32 %v9292_v35, %v6975_v16  ;;  %v7030_v23 = vmul.f32 1.442695, %v7014_v21  ;;  %v7032_v3 = vmul.f32 1.442695, %v7015_v24  ;;  %s7243_s30 = sshll.u32 %s9326_s2, 4  ;;  %s7244_s30 = int_to_ptr.vmem [resolvable:$true] %s7243_s30 }
 0x83d   :  { %v7034_v50 = vmul.f32 1.442695, %v7016_v62  ;;  %v6980_v63 = vadd.f32 %v6965_v33, %v6960_v4  ;;  %v17913_v61 = vadd.f32 %v9293_v1, %v6976_v41  ;;  %v7020_v39 = vmin.f32 %v17890_v54, 20.0  ;;  %s9299_s8 = scalar_lea.vmem %s7244_s30, 2048  ;;  %p9304_p1 = scmp.lt.s32.totalorder %s7244_s30, %s7244_s30 }
 0x83e   :  { %v7036_v26 = vmul.f32 1.442695, %v7017_v47  ;;  %v17919_v25 = vadd.f32 %v9294_v44, %v6977_v12  ;;  %v7021_v38 = vmin.f32 %v17896_v19, 20.0  ;;  %9214 = vpow2.f32 %v7030_v23  ;;  %p9300_p0 = scmp.ne.s32.totalorder %s7244_s30, %s9299_s8  ;;  %p9305_p2 = scmp.lt.s32.totalorder %s9299_s8, %s9299_s8 }
 0x83f   :  { %v7038_v57 = vmul.f32 1.442695, %v7018_v10  ;;  %v6981_v46 = vadd.f32 %v6965_v33, %v6961_v37  ;;  %v17925_v28 = vadd.f32 %v9295_v48, %v6978_v9  ;;  %v7022_v40 = vmin.f32 %v17902_v29, 20.0 }
 0x840   :  { %9216 = vpow2.f32 %v7032_v3  ;;  %v17931_v17 = vadd.f32 %v9296_v49, %v6979_v52  ;;  %v7023_v53 = vmin.f32 %v17908_v31, 20.0  ;;  %v7040_v13 = vmul.f32 1.442695, %v7019_v32  ;;  %p9306_p3 = por %p9305_p2, %p9304_p1 }
 0x841   :  { %9218 = vpow2.f32 %v7034_v50  ;;  %v17937_v4 = vadd.f32 %v9297_v11, %v6980_v63  ;;  %v7024_v37 = vmin.f32 %v17913_v61, 20.0  ;;  %v7042_v33 = vmul.f32 1.442695, %v7020_v39 }
 0x842   :  { %9220 = vpow2.f32 %v7036_v26  ;;  %v7025_v7 = vmin.f32 %v17919_v25, 20.0  ;;  %v7044_v30 = vmul.f32 1.442695, %v7021_v38  ;;  %v7026_v22 = vmin.f32 %v17925_v28, 20.0  ;;  %p9307_p4 = pnand %p9306_p3, %p9300_p0 }
 0x843   :  { %9222 = vpow2.f32 %v7038_v57  ;;  %v7046_v20 = vmul.f32 1.442695, %v7022_v40  ;;  %v17945_v0 = vadd.f32 %v9298_v18, %v6981_v46  ;;  %v7027_v2 = vmin.f32 %v17931_v17, 20.0 }
 0x844   :  { %9224 = vpow2.f32 %v7040_v13  ;;  %v7048_v15 = vmul.f32 1.442695, %v7023_v53  ;;  %v7028_v55 = vmin.f32 %v17937_v4, 20.0  ;;  %v7050_v43 = vmul.f32 1.442695, %v7024_v37 }
 0x845   :  { %9226 = vpow2.f32 %v7042_v33  ;;  %v7052_v34 = vmul.f32 1.442695, %v7025_v7  ;;  %v7054_v6 = vmul.f32 1.442695, %v7026_v22  ;;  %v7029_v27 = vmin.f32 %v17945_v0, 20.0 }
 0x846   :  { %9228 = vpow2.f32 %v7044_v30  ;;  %v7056_v45 = vmul.f32 1.442695, %v7027_v2  ;;  %v7058_v21 = vmul.f32 1.442695, %v7028_v55  ;;  %vm6998_vm4 = vcmp.gt.f32.partialorder %v17857_v60, 20.0 }
 0x847   :  { %9230 = vpow2.f32 %v7046_v20  ;;  %v7060_v12 = vmul.f32 1.442695, %v7029_v27  ;;  %vm6999_vm12 = vcmp.gt.f32.partialorder %v17862_v51, 20.0  ;;  %vm7001_vm13 = vcmp.gt.f32.partialorder %v17872_v59, 20.0 }
 0x848   :  { %v17949_v42 = vpop.eup %9214  ;;  %9232 = vpow2.f32 %v7048_v15  ;;  %vm7006_vm9 = vcmp.gt.f32.partialorder %v17902_v29, 20.0  ;;  %vm7007_vm15 = vcmp.gt.f32.partialorder %v17908_v31, 20.0  ;;  %vm7008_vm11 = vcmp.gt.f32.partialorder %v17913_v61, 20.0 }
 0x849   :  { %9234 = vpow2.f32 %v7050_v43  ;;  %v7062_v62 = vadd.f32 1.0, %v17949_v42  ;;  %v7065_v5 = vmul.f32 -0.5, %v17949_v42  ;;  %v7068_v1 = vand.u32 2147483647, %v17949_v42 }
 0x84a   :  { %v9217_v16 = vpop.eup %9216  ;;  %9236 = vpow2.f32 %v7052_v34 }
 0x84b   :  { %v17952_v24 = vpop.eup %9218  ;;  %9238 = vpow2.f32 %v7054_v6  ;;  %v7071_v58 = vadd.f32 1.0, %v9217_v16  ;;  %v7074_v23 = vmul.f32 -0.5, %v9217_v16  ;;  %v7066_v38 = vadd.f32 1.0, %v7065_v5 }
 0x84c   :  { %v17955_v41 = vpop.eup %9220  ;;  %9240 = vpow2.f32 %v7056_v45  ;;  %v7080_v36 = vadd.f32 1.0, %v17952_v24  ;;  %v7083_v39 = vmul.f32 -0.5, %v17952_v24  ;;  %v7077_v57 = vand.u32 2147483647, %v9217_v16 }
 0x84d   :  { %v17957_v47 = vpop.eup %9222  ;;  %9242 = vpow2.f32 %v7058_v21  ;;  %v7089_v9 = vadd.f32 1.0, %v17955_v41  ;;  %v7092_v26 = vmul.f32 -0.5, %v17955_v41  ;;  %v7075_v40 = vadd.f32 1.0, %v7074_v23 }
 0x84e   :  { %v17960_v10 = vpop.eup %9224  ;;  %9244 = vlog2.f32 %v7062_v62  ;;  %v7098_v32 = vadd.f32 1.0, %v17957_v47  ;;  %v7086_v49 = vand.u32 2147483647, %v17952_v24  ;;  %v7101_v53 = vmul.f32 -0.5, %v17957_v47 }
 0x84f   :  { %v17963_v52 = vpop.eup %9226  ;;  %9246 = vlog2.f32 %v7071_v58  ;;  %v7107_v50 = vadd.f32 1.0, %v17960_v10  ;;  %v7110_v11 = vmul.f32 -0.5, %v17960_v10  ;;  %vm17991_vm0 = vcmp.lt.f32.partialorder %v7068_v1, 0.0004427343 }
 0x850   :  { %v17967_v35 = vpop.eup %9228  ;;  %9248 = vpow2.f32 %v7060_v12  ;;  %v7116_v46 = vadd.f32 1.0, %v17963_v52  ;;  %v7119_v37 = vmul.f32 -0.5, %v17963_v52  ;;  %v7084_v22 = vadd.f32 1.0, %v7083_v39 }
 0x851   :  { %v17969_v3 = vpop.eup %9230  ;;  %9250 = vlog2.f32 %v7080_v36  ;;  %v7125_v33 = vadd.f32 1.0, %v17967_v35  ;;  %v7093_v20 = vadd.f32 1.0, %v7092_v26  ;;  %v7095_v18 = vand.u32 2147483647, %v17955_v41 }
 0x852   :  { %v17972_v63 = vpop.eup %9232  ;;  %9252 = vlog2.f32 %v7089_v9  ;;  %v7104_v2 = vand.u32 2147483647, %v17957_v47  ;;  %vm17999_vm10 = vcmp.lt.f32.partialorder %v7077_v57, 0.0004427343  ;;  %v7128_v43 = vmul.f32 -0.5, %v17967_v35 }
 0x853   :  { %v17977_v44 = vpop.eup %9234  ;;  %9254 = vlog2.f32 %v7098_v32  ;;  %v7134_v34 = vadd.f32 1.0, %v17969_v3  ;;  %v7137_v6 = vmul.f32 -0.5, %v17969_v3  ;;  %v18007_v45 = vmul.f32 %v17949_v42, %v7066_v38 }
 0x854   :  { %v17980_v48 = vpop.eup %9236  ;;  %9256 = vlog2.f32 %v7107_v50  ;;  %v18009_v21 = vmul.f32 %v9217_v16, %v7075_v40  ;;  %v7102_v62 = vadd.f32 1.0, %v7101_v53  ;;  %v7143_v58 = vadd.f32 1.0, %v17972_v63 }
 0x855   :  { %v17984_v13 = vpop.eup %9238  ;;  %9258 = vlog2.f32 %v7116_v46  ;;  %vm18012_vm6 = vcmp.lt.f32.partialorder %v7086_v49, 0.0004427343  ;;  %v7111_v9 = vadd.f32 1.0, %v7110_v11  ;;  %v7113_v5 = vand.u32 2147483647, %v17960_v10 }
 0x856   :  { %v17989_v7 = vpop.eup %9240  ;;  %9260 = vlog2.f32 %v7125_v33  ;;  %v7120_v32 = vadd.f32 1.0, %v7119_v37  ;;  %v18020_v42 = vmul.f32 %v17952_v24, %v7084_v22  ;;  %v18023_v16 = vmul.f32 %v17955_v41, %v7093_v20 }
 0x857   :  { %v17997_v15 = vpop.eup %9242  ;;  %9262 = vlog2.f32 %v7134_v34  ;;  %v7122_v50 = vand.u32 2147483647, %v17963_v52  ;;  %vm18028_vm3 = vcmp.lt.f32.partialorder %v7095_v18, 0.0004427343  ;;  %vm18032_vm1 = vcmp.lt.f32.partialorder %v7104_v2, 0.0004427343 }
 0x858   :  { %v9245_v27 = vpop.eup %9244  ;;  %9264 = vlog2.f32 %v7143_v58  ;;  %v7129_v57 = vadd.f32 1.0, %v7128_v43  ;;  %v7131_v24 = vand.u32 2147483647, %v17967_v35  ;;  %v7138_v46 = vadd.f32 1.0, %v7137_v6 }
 0x859   :  { %v9247_v12 = vpop.eup %9246  ;;  %v18026_v39 = vmul.f32 0.6931472, %v9245_v27  ;;  %v7140_v49 = vand.u32 2147483647, %v17969_v3  ;;  %v7146_v53 = vmul.f32 -0.5, %v17972_v63  ;;  %v7152_v11 = vadd.f32 1.0, %v17977_v44 }
 0x85a   :  { %v18017_v23 = vpop.eup %9248  ;;  %v18037_v40 = vmul.f32 0.6931472, %v9247_v12  ;;  %v18043_v33 = vmul.f32 %v17957_v47, %v7102_v62  ;;  %v18046_v22 = vmul.f32 %v17960_v10, %v7111_v9  ;;  %vm18048_vm2 = vcmp.lt.f32.partialorder %v7113_v5, 0.0004427343 }
 0x85b   :  { %v9251_v1 = vpop.eup %9250  ;;  %v18053_v18 = vmul.f32 %v17963_v52, %v7120_v32  ;;  %vm18057_vm5 = vcmp.lt.f32.partialorder %v7122_v50, 0.0004427343  ;;  %v7149_v47 = vand.u32 2147483647, %v17972_v63  ;;  %9266 = vlog2.f32 %v7152_v11 }
 0x85c   :  { %v9253_v41 = vpop.eup %9252  ;;  %v18055_v43 = vmul.f32 0.6931472, %v9251_v1  ;;  %v7155_v10 = vmul.f32 -0.5, %v17977_v44  ;;  %v18068_v52 = vmul.f32 %v17967_v35, %v7129_v57  ;;  %vm18070_vm7 = vcmp.lt.f32.partialorder %v7131_v24, 0.0004427343 }
 0x85d   :  { %v9255_v37 = vpop.eup %9254  ;;  %v18075_v58 = vmul.f32 %v17969_v3, %v7138_v46  ;;  %v7161_v12 = vadd.f32 1.0, %v17980_v48  ;;  %v18082_v5 = vmul.f32 0.6931472, %v9253_v41  ;;  %vm18086_vm8 = vcmp.lt.f32.partialorder %v7140_v49, 0.0004427343 }
 0x85e   :  { %v9257_v2 = vpop.eup %9256  ;;  %v18084_v32 = vmul.f32 0.6931472, %v9255_v37  ;;  %v7147_v50 = vadd.f32 1.0, %v7146_v53  ;;  %v7164_v57 = vmul.f32 -0.5, %v17980_v48  ;;  %v7170_v24 = vadd.f32 1.0, %v17984_v13 }
 0x85f   :  { %v9259_v6 = vpop.eup %9258  ;;  %v18092_v3 = vmul.f32 0.6931472, %v9257_v2  ;;  %9268 = vlog2.f32 %v7161_v12  ;;  %v7088_v46 = vsel %vm18012_vm6, %v18020_v42, %v18055_v43  ;;  %vm18103_vm14 = vcmp.lt.f32.partialorder %v7149_v47, 0.0004427343 }
 0x860   :  { %v9261_v1 = vpop.eup %9260  ;;  %v18101_v41 = vmul.f32 0.6931472, %v9259_v6  ;;  %v7156_v53 = vadd.f32 1.0, %v7155_v10  ;;  %v7158_v11 = vand.u32 2147483647, %v17977_v44  ;;  %9270 = vlog2.f32 %v7170_v24 }
 0x861   :  { %v9263_v37 = vpop.eup %9262  ;;  %v7167_v2 = vand.u32 2147483647, %v17980_v48  ;;  %v7173_v36 = vmul.f32 -0.5, %v17984_v13  ;;  %v7179_v42 = vadd.f32 1.0, %v17989_v7  ;;  %vm7004_vm6 = vcmp.gt.f32.partialorder %v17890_v54, 20.0 }
 0x862   :  { %v9265_v43 = vpop.eup %9264  ;;  %v7097_v47 = vsel %vm18028_vm3, %v18023_v16, %v18082_v5  ;;  %v7106_v10 = vsel %vm18032_vm1, %v18043_v33, %v18084_v32  ;;  %v7127_v6 = vmul.f32 0.6931472, %v9261_v1  ;;  %v7148_v12 = vmul.f32 %v17972_v63, %v7147_v50 }
 0x863   :  { %v7136_v24 = vmul.f32 0.6931472, %v9263_v37  ;;  %v7165_v9 = vadd.f32 1.0, %v7164_v57  ;;  %9272 = vlog2.f32 %v7179_v42  ;;  %v7182_v27 = vmul.f32 -0.5, %v17989_v7 }
 0x864   :  { %v7115_v16 = vsel %vm18048_vm2, %v18046_v22, %v18092_v3  ;;  %v7157_v63 = vmul.f32 %v17977_v44, %v7156_v53  ;;  %vm18135_vm1 = vcmp.lt.f32.partialorder %v7158_v11, 0.0004427343  ;;  %v7188_v38 = vadd.f32 1.0, %v17997_v15 }
 0x865   :  { %v7124_v33 = vsel %vm18057_vm5, %v18053_v18, %v18101_v41  ;;  %v7145_v5 = vmul.f32 0.6931472, %v9265_v43  ;;  %vm18144_vm3 = vcmp.lt.f32.partialorder %v7167_v2, 0.0004427343  ;;  %v7174_v20 = vadd.f32 1.0, %v7173_v36  ;;  %v9267_v22 = vpop.eup %9266 }
 0x866   :  { %vm7010_vm2 = vcmp.gt.f32.partialorder %v17925_v28, 20.0  ;;  %v7133_v44 = vsel %vm18070_vm7, %v18068_v52, %v7127_v6  ;;  %v7176_v50 = vand.u32 2147483647, %v17984_v13  ;;  %9274 = vlog2.f32 %v7188_v38 }
 0x867   :  { %v7197_v1 = vadd.f32 1.0, %v18017_v23  ;;  %v7142_v18 = vsel %vm18086_vm8, %v18075_v58, %v7136_v24  ;;  %v7154_v34 = vmul.f32 0.6931472, %v9267_v22  ;;  %v7166_v3 = vmul.f32 %v17980_v48, %v7165_v9 }
 0x868   :  { %v7183_v57 = vadd.f32 1.0, %v7182_v27  ;;  %v7185_v41 = vand.u32 2147483647, %v17989_v7  ;;  %v20696_v52 = vsel %vm17991_vm0, %v18007_v45, %v18026_v39  ;;  %v20697_v58 = vsel %vm17999_vm10, %v18009_v21, %v18037_v40 }
 0x869   :  { %9276 = vlog2.f32 %v7197_v1  ;;  %v7206_v62 = vsel %vm6998_vm4, %v17857_v60, %v20696_v52  ;;  %v7207_v48 = vsel %vm6999_vm12, %v17862_v51, %v20697_v58  ;;  %v9269_v27 = vpop.eup %9268  ;;  %v7151_v30 = vsel %vm18103_vm14, %v7148_v12, %v7145_v5 }
 0x86a   :  { %v7175_v9 = vmul.f32 %v17984_v13, %v7174_v20  ;;  %v7191_v45 = vmul.f32 -0.5, %v17997_v15  ;;  %vm20698_vm0 = vcmp.gt.f32.partialorder %v17867_v56, 20.0  ;;  %7222 = vst [vmem:[#allocation2] sm:$0xff] %v7206_v62  ;;  %7223 = vst [vmem:[#allocation2 + $0x8] sm:$0xff] %v7207_v48  ;;  %v7160_v55 = vsel %vm18135_vm1, %v7157_v63, %v7154_v34  ;;  %v9271_v39 = vpop.eup %9270 }
 0x86b   :  { %v7208_v60 = vsel %vm20698_vm0, %v17867_v56, %v7088_v46  ;;  %v7163_v21 = vmul.f32 0.6931472, %v9269_v27  ;;  %v7209_v51 = vsel %vm7001_vm13, %v17872_v59, %v7097_v47  ;;  %vm20699_vm10 = vcmp.gt.f32.partialorder %v17877_v14, 20.0 }
 0x86c   :  { %v7210_v13 = vsel %vm20699_vm10, %v17877_v14, %v7106_v10  ;;  %7224 = vst [vmem:[#allocation2 + $0x10] sm:$0xff] %v7208_v60  ;;  %v7200_v40 = vmul.f32 -0.5, %v18017_v23  ;;  %vm20700_vm5 = vcmp.gt.f32.partialorder %v17882_v8, 20.0  ;;  %v7212_v35 = vsel %vm7004_vm6, %v17890_v54, %v7124_v33  ;;  %7225 = vst [vmem:[#allocation2 + $0x18] sm:$0xff] %v7209_v51 }
 0x86d   :  { %v7211_v56 = vsel %vm20700_vm5, %v17882_v8, %v7115_v16  ;;  %vm20701_vm7 = vcmp.gt.f32.partialorder %v17896_v19, 20.0  ;;  %7226 = vst [vmem:[#allocation2 + $0x20] sm:$0xff] %v7210_v13  ;;  %v7169_v14 = vsel %vm18144_vm3, %v7166_v3, %v7163_v21  ;;  %v7172_v46 = vmul.f32 0.6931472, %v9271_v39  ;;  %7228 = vst [vmem:[#allocation2 + $0x30] sm:$0xff] %v7212_v35  ;;  %v9273_v54 = vpop.eup %9272 }
 0x86e   :  { %v7213_v59 = vsel %vm20701_vm7, %v17896_v19, %v7133_v44  ;;  %v7214_v49 = vsel %vm7006_vm9, %v17902_v29, %v7142_v18  ;;  %v7215_v8 = vsel %vm7007_vm15, %v17908_v31, %v7151_v30  ;;  %7227 = vst [vmem:[#allocation2 + $0x28] sm:$0xff] %v7211_v56  ;;  %vm7177_vm8 = vcmp.lt.f32.partialorder %v7176_v50, 0.0004427343 }
 0x86f   :  { %7229 = vst [vmem:[#allocation2 + $0x38] sm:$0xff] %v7213_v59  ;;  %v7192_v19 = vadd.f32 1.0, %v7191_v45  ;;  %v7216_v53 = vsel %vm7008_vm11, %v17913_v61, %v7160_v55  ;;  %vm20702_vm4 = vcmp.gt.f32.partialorder %v17919_v25, 20.0  ;;  %7230 = vst [vmem:[#allocation2 + $0x40] sm:$0xff] %v7214_v49  ;;  %v7178_v29 = vsel %vm7177_vm8, %v7175_v9, %v7172_v46 }
 0x870   :  { %v7217_v11 = vsel %vm20702_vm4, %v17919_v25, %v7169_v14  ;;  %7231 = vst [vmem:[#allocation2 + $0x48] sm:$0xff] %v7215_v8  ;;  %v7181_v37 = vmul.f32 0.6931472, %v9273_v54  ;;  %v7184_v31 = vmul.f32 %v17989_v7, %v7183_v57  ;;  %v7194_v2 = vand.u32 2147483647, %v17997_v15  ;;  %7232 = vst [vmem:[#allocation2 + $0x50] sm:$0xff] %v7216_v53  ;;  %v9275_v42 = vpop.eup %9274 }
 0x871   :  { %7233 = vst [vmem:[#allocation2 + $0x58] sm:$0xff] %v7217_v11  ;;  %vm7186_vm12 = vcmp.lt.f32.partialorder %v7185_v41, 0.0004427343  ;;  %v7201_v36 = vadd.f32 1.0, %v7200_v40  ;;  %v7218_v61 = vsel %vm7010_vm2, %v17925_v28, %v7178_v29  ;;  %vm7011_vm11 = vcmp.gt.f32.partialorder %v17931_v17, 20.0 }
 0x872   :  { %v7187_v25 = vsel %vm7186_vm12, %v7184_v31, %v7181_v37  ;;  %v7203_v43 = vand.u32 2147483647, %v18017_v23  ;;  %7234 = vst [vmem:[#allocation2 + $0x60] sm:$0xff] %v7218_v61  ;;  %v7190_v47 = vmul.f32 0.6931472, %v9275_v42  ;;  %v7193_v7 = vmul.f32 %v17997_v15, %v7192_v19 }
 0x873   :  { %v7219_v10 = vsel %vm7011_vm11, %v17931_v17, %v7187_v25  ;;  %v9277_v6 = vpop.eup %9276  ;;  %vm7195_vm14 = vcmp.lt.f32.partialorder %v7194_v2, 0.0004427343  ;;  %vm7012_vm13 = vcmp.gt.f32.partialorder %v17937_v4, 20.0  ;;  %v7202_v24 = vmul.f32 %v18017_v23, %v7201_v36 }
 0x874   :  { %7235 = vst [vmem:[#allocation2 + $0x68] sm:$0xff] %v7219_v10  ;;  %v7196_v28 = vsel %vm7195_vm14, %v7193_v7, %v7190_v47  ;;  %v7199_v12 = vmul.f32 0.6931472, %v9277_v6  ;;  %vm7204_vm9 = vcmp.lt.f32.partialorder %v7203_v43, 0.0004427343  ;;  %vm7013_vm15 = vcmp.gt.f32.partialorder %v17945_v0, 20.0 }
 0x875   :  { %v7220_v16 = vsel %vm7012_vm13, %v17937_v4, %v7196_v28 }
 0x876   :  { %v7205_v63 = vsel %vm7204_vm9, %v7202_v24, %v7199_v12  ;;  %7236 = vst [vmem:[#allocation2 + $0x70] sm:$0xff] %v7220_v16 }
 0x877   :  { %v7221_v17 = vsel %vm7013_vm15, %v17945_v0, %v7205_v63 }
 0x878   :  { %7237 = vst [vmem:[#allocation2 + $0x78] sm:$0xff] %v7221_v17 }
 0x879   :  { %9310 = shalt.err (!%p9307_p4)
}
 0x87a   :  { %s9311_s1 = scalar_lea.hbm %s18247_s7, 2048 }
 0x87b   :  { %p9312_p5 = scmp.ne.s32.totalorder %s18247_s7, %s9311_s1  ;;  %p9315_p6 = scmp.lt.u32.totalorder %s9311_s1, %s18247_s7 }
 0x87d   :  { %p9317_p7 = pnand %p9315_p6, %p9312_p5 }
 0x87f   :  { %9320 = shalt.err (!%p9317_p7)
}
 0x880   :  { %s9327_s14 = smov 128   ;;  %s9328_s15 = smov 8  }
 0x881   :  { %7249 = dma.vmem_to_hbm [thread:$0]  %s7244_s30, 2048, %s18247_s7, [#allocation3], %s9327_s14, %s9327_s14, %s9328_s15  }
 0x882   :  { %9321 = dma.done.wait [#allocation3], 2048  }
 0x883   :  { %9322 = vsyncadd [#allocation3], 4294965248 }
 0x884   :  { %7253 = vsyncpa [#allocation3], 1 }

</bundles_post_ra>
